<compile_context>
chip_gen: v6e
topology: v6e:2x2x1
jax: 0.10.0
libtpu: 0.0.40
codegen_flags: <defaults>
</compile_context>

<pallas_src>
import math

import numpy as np
import jax
import jax.numpy as jnp
from jax.experimental import pallas as pl
from jax.experimental.pallas import tpu as pltpu

# ---- scaled-down model dims (PyTorch original: D=768, H=12, FF=2048, V_IN=512) ----
D = 128          # d_model
H = 4            # attention heads
DH = D // H
FF = 256         # transformer feed-forward width
V_IN = 64        # visual input feature size
VOCAB = 32       # mini-BERT vocab
S = 8            # text sequence length
T_IMG = 1        # image "sequence" length (module .squeeze(1)'s it)
B = 2            # batch
DROPOUT_RATE = 0.1
L_DEC = 3        # decoder layers

_ATTN_SCALE = 1.0 / math.sqrt(DH)

# ----------------------- packed parameter-slab layout -------------------------
# bias slab: one f32 row per dense bias, zero-padded to WB lanes
WB = L_DEC * 2 * D                               # 768 = widest row (hoisted KV bias)
(BB_BERT_QKV, BB_BERT_O, BB_BERT_FF1, BB_BERT_FF2, BB_BERT_POOL,
 BB_VIS, BB_CA_KV, BB_FC1, BB_FC2, BB_CLS) = range(10)


def BB_DEC(l, j):   # j: 0=self-attn fused, 1=cross-attn q, 2=cross-attn out, 3=ff1, 4=ff2
    return 10 + l * 5 + j


N_BIAS_ROWS = 10 + L_DEC * 5                     # 25

# layernorm slab: gamma at row 2*i, beta at row 2*i+1
LN_BERT_EMB, LN_BERT_1, LN_BERT_2 = 0, 1, 2


def LN_DEC(l, j):   # j: 0=after self-attn, 1=after cross-attn, 2=after FF
    return 3 + l * 3 + j


N_LN_PAIRS = 3 + L_DEC * 3                       # 12 pairs -> 24 rows


# ------------------------------ fused kernel ----------------------------------
def _fused_kernel(
        # per-example data
        x_ref, sa_bias_ref, ca_bias_ref, img_ref, keep_ref, noise_ref,
        # packed weights
        bert_wqkv_ref, bert_wo_ref, bert_ff1_ref, bert_ff2_ref, bert_pool_ref,
        vis_w_ref,
        dec_dd_ref,        # [L, 3, D, D]: 0=fused Wv@Wo (self-attn), 1=cross Wq, 2=cross Wo
        dec_ca_wkv_ref,    # [D, L*2D] per-layer [K|V] stacked on the output axis
        dec_ff1_ref,       # [L, D, FF]
        dec_ff2_ref,       # [L, FF, D]
        fc1_ref, fc2_ref, cls_ref,
        ln_ref,            # [2*N_LN_PAIRS, D]
        b_ref,             # [N_BIAS_ROWS, WB]
        out_ref):

    def brow(i, width):                       # [1, width] f32 bias row
        return b_ref[i:i + 1, :width]

    def lnorm(x, i):
        g = ln_ref[2 * i:2 * i + 1, :]
        bb = ln_ref[2 * i + 1:2 * i + 2, :]
        mu = jnp.mean(x, axis=-1, keepdims=True)
        var = jnp.mean(jnp.square(x - mu), axis=-1, keepdims=True)
        return (x - mu) * jax.lax.rsqrt(var + 1e-5) * g + bb

    def dense(x, w, bias, act=None):
        y = jnp.dot(x.astype(w.dtype), w, preferred_element_type=jnp.float32) + bias
        if act == "relu":
            y = jnp.maximum(y, 0.0)
        elif act == "tanh":
            y = jnp.tanh(y)
        return y

    def mha(q2, k2, v2, wo, bo, bias2):
        # Per-head attention with the output projection folded into the head
        # loop: out = sum_h softmax(q_h k_h^T / sqrt(dh)) v_h @ Wo[h*DH:(h+1)*DH]
        # -> no 32-lane concatenation of per-head outputs.
        out = None
        for h in range(H):
            sl = slice(h * DH, (h + 1) * DH)
            s = jnp.einsum("qd,kd->qk", q2[:, sl], k2[:, sl],
                           preferred_element_type=jnp.float32) * _ATTN_SCALE + bias2
            s = s - jnp.max(s, axis=-1, keepdims=True)
            p = jnp.exp(s)
            p = p * pl.reciprocal(jnp.sum(p, axis=-1, keepdims=True), approx=True)
            pv = jnp.dot(p, v2[:, sl], preferred_element_type=jnp.float32)
            c = jnp.dot(pv.astype(wo.dtype), wo[sl, :], preferred_element_type=jnp.float32)
            out = c if out is None else out + c
        return out + bo

    # -------- text branch: mini-BERT stand-in, batch folded to [B*S, D] --------
    # TODO(synk): pretrained BertModel has no in-script equivalent; replaced by a
    # synthetic 1-layer post-norm encoder with deterministic random weights.
    sa_bias = sa_bias_ref[...]
    x2 = lnorm(x_ref[...], LN_BERT_EMB)
    qkv = dense(x2, bert_wqkv_ref[...], brow(BB_BERT_QKV, 3 * D))              # [BS, 3D]
    sa = mha(qkv[:, :D], qkv[:, D:2 * D], qkv[:, 2 * D:], bert_wo_ref[...],
             brow(BB_BERT_O, D), sa_bias)
    x2 = lnorm(x2 + sa, LN_BERT_1)
    hh = dense(x2, bert_ff1_ref[...], brow(BB_BERT_FF1, FF), act="relu")
    hh = dense(hh, bert_ff2_ref[...], brow(BB_BERT_FF2, D))
    mem2 = lnorm(x2 + hh, LN_BERT_2)                                           # [B*S, D]
    # BERT pooler: tanh(W . hidden[:, 0]); CLS rows sit at sublane offsets b*S (mult. of 8)
    cls_rows = jnp.concatenate([mem2[b * S:b * S + 1, :] for b in range(B)], axis=0)
    eeg_txt_feature = dense(cls_rows, bert_pool_ref[...], brow(BB_BERT_POOL, D), act="tanh")

    # -------- visual encoder (Linear V_IN -> D) --------
    y2 = dense(img_ref[...], vis_w_ref[...], brow(BB_VIS, D))                  # [B*T_IMG, D]
    act_img_feature = y2                                                       # .squeeze(1) since T_IMG == 1

    # -------- 3-layer TransformerDecoder (post-norm), key-padding via biases --------
    # TODO(synk): sub-layer dropout inside the Transformer layers uses eval-mode
    # (identity) semantics; only the explicit feature-level dropout is applied.
    # Cross-attn K/V of the loop-invariant memory: ONE matmul feeds all layers.
    kv_all = dense(mem2, dec_ca_wkv_ref[...], brow(BB_CA_KV, L_DEC * 2 * D))   # [B*S, L*2D]
    ca_bias = ca_bias_ref[...]
    for l in range(L_DEC):
        # self-attention over a single target token: softmax over one key == 1,
        # so the sub-layer collapses to y @ (Wv@Wo) + (bv@Wo + bo), pre-fused host-side.
        # TODO(synk): a fully key-padded single token (NaN in PyTorch) is not reproduced.
        sa = dense(y2, dec_dd_ref[l, 0, :, :], brow(BB_DEC(l, 0), D))
        y2 = lnorm(y2 + sa, LN_DEC(l, 0))
        q2 = dense(y2, dec_dd_ref[l, 1, :, :], brow(BB_DEC(l, 1), D))
        k2 = kv_all[:, l * 2 * D:l * 2 * D + D]
        v2 = kv_all[:, l * 2 * D + D:(l + 1) * 2 * D]
        ca = mha(q2, k2, v2, dec_dd_ref[l, 2, :, :], brow(BB_DEC(l, 2), D), ca_bias)
        y2 = lnorm(y2 + ca, LN_DEC(l, 1))
        hh = dense(y2, dec_ff1_ref[l, :, :], brow(BB_DEC(l, 3), FF), act="relu")
        hh = dense(hh, dec_ff2_ref[l, :, :], brow(BB_DEC(l, 4), D))
        y2 = lnorm(y2 + hh, LN_DEC(l, 2))
    cross_attn_result = y2                         # T_IMG == 1 -> mean over tokens is identity

    # -------- min-max normalize + dropout + Laplace noise + MLP head --------
    feat = jnp.concatenate([eeg_txt_feature, act_img_feature, cross_attn_result],
                           axis=-1)                                            # [B, 3D], 128-lane aligned
    fmin = jnp.min(feat, axis=-1, keepdims=True)
    fmax = jnp.max(feat, axis=-1, keepdims=True)
    rng_ = fmax - fmin
    # TODO(synk): PyTorch divides by (max-min) unguarded; guard avoids NaN on constant rows.
    inv = pl.reciprocal(jnp.where(rng_ > 0.0, rng_, 1.0), approx=True)
    feat = (feat - fmin) * inv
    feat = feat * keep_ref[...]                    # nn.Dropout (inverted scaling, host-sampled)
    feat = feat + noise_ref[...]                   # equally-weighted per-row Laplace noise
    hh = dense(feat, fc1_ref[...], brow(BB_FC1, 3 * D), act="relu")
    hh = dense(hh, fc2_ref[...], brow(BB_FC2, D), act="tanh")
    out_ref[...] = dense(hh, cls_ref[...], brow(BB_CLS, 2))                    # [B, 2]


# ------------------------------ parameters ------------------------------------
class _KeyGen:
    def __init__(self, key):
        self.key = key

    def __call__(self):
        self.key, k = jax.random.split(self.key)
        return k


def init_params(key):
    kg = _KeyGen(key)

    def wmat(n_in, n_out):
        # MXU matmul operands stored bf16; biases / LN params stay f32
        return (0.02 * jax.random.normal(kg(), (n_in, n_out), jnp.float32)).astype(jnp.bfloat16)

    def bvec(n):
        return 0.02 * jax.random.normal(kg(), (n,), jnp.float32)

    bias_rows, ln_rows = {}, {}

    def set_b(idx, v):
        bias_rows[idx] = jnp.pad(v, (0, WB - v.shape[0]))

    def set_ln(idx):
        ln_rows[2 * idx] = jnp.ones((D,), jnp.float32)
        ln_rows[2 * idx + 1] = jnp.zeros((D,), jnp.float32)

    # ----- mini-BERT text encoder -----
    wq, wk, wv = wmat(D, D), wmat(D, D), wmat(D, D)
    bert_wqkv = jnp.concatenate([wq, wk, wv], axis=1)
    set_b(BB_BERT_QKV, jnp.concatenate([bvec(D), bvec(D), bvec(D)]))
    bert_wo = wmat(D, D); set_b(BB_BERT_O, bvec(D))
    bert_ff1 = wmat(D, FF); set_b(BB_BERT_FF1, bvec(FF))
    bert_ff2 = wmat(FF, D); set_b(BB_BERT_FF2, bvec(D))
    bert_pool = wmat(D, D); set_b(BB_BERT_POOL, bvec(D))
    set_ln(LN_BERT_EMB); set_ln(LN_BERT_1); set_ln(LN_BERT_2)

    # ----- visual encoder -----
    vis_w = wmat(V_IN, D); set_b(BB_VIS, bvec(D))

    # ----- 3-layer transformer decoder, weights stacked per kind -----
    dec_dd, dec_ff1, dec_ff2, ca_wkv_cols, ca_bkv = [], [], [], [], []
    for l in range(L_DEC):
        # self-attention (T_IMG == 1 specialization): only V/O projections matter;
        # prefuse Wv@Wo and bv@Wo + bo into a single [D, D] dense.
        wv_sa, bv_sa = wmat(D, D), bvec(D)
        wo_sa, bo_sa = wmat(D, D), bvec(D)
        sa_w = (wv_sa.astype(jnp.float32) @ wo_sa.astype(jnp.float32)).astype(jnp.bfloat16)
        set_b(BB_DEC(l, 0), bv_sa @ wo_sa.astype(jnp.float32) + bo_sa)
        # cross-attention
        ca_wq, ca_wk, ca_wv, ca_wo = wmat(D, D), wmat(D, D), wmat(D, D), wmat(D, D)
        set_b(BB_DEC(l, 1), bvec(D))                      # q bias
        set_b(BB_DEC(l, 2), bvec(D))                      # out-proj bias
        ca_bkv.append(jnp.concatenate([bvec(D), bvec(D)]))
        ca_wkv_cols.append(jnp.concatenate([ca_wk, ca_wv], axis=1))
        dec_dd.append(jnp.stack([sa_w, ca_wq, ca_wo]))
        # feed-forward
        dec_ff1.append(wmat(D, FF)); set_b(BB_DEC(l, 3), bvec(FF))
        dec_ff2.append(wmat(FF, D)); set_b(BB_DEC(l, 4), bvec(D))
        set_ln(LN_DEC(l, 0)); set_ln(LN_DEC(l, 1)); set_ln(LN_DEC(l, 2))
    set_b(BB_CA_KV, jnp.concatenate(ca_bkv))

    # ----- head -----
    fc1 = wmat(3 * D, 3 * D); set_b(BB_FC1, bvec(3 * D))
    fc2 = wmat(3 * D, D); set_b(BB_FC2, bvec(D))
    cls = wmat(D, 2); set_b(BB_CLS, bvec(2))

    kernel = dict(
        bert_wqkv=bert_wqkv, bert_wo=bert_wo, bert_ff1=bert_ff1,
        bert_ff2=bert_ff2, bert_pool=bert_pool, vis_w=vis_w,
        dec_dd=jnp.stack(dec_dd),                          # [L, 3, D, D]
        dec_ca_wkv=jnp.concatenate(ca_wkv_cols, axis=1),   # [D, L*2D]
        dec_ff1=jnp.stack(dec_ff1),                        # [L, D, FF]
        dec_ff2=jnp.stack(dec_ff2),                        # [L, FF, D]
        fc1=fc1, fc2=fc2, cls=cls,
        ln_slab=jnp.stack([ln_rows[i] for i in range(2 * N_LN_PAIRS)]),   # [24, D]
        b_slab=jnp.stack([bias_rows[i] for i in range(N_BIAS_ROWS)]),     # [25, WB]
    )
    emb = dict(
        tok_emb=0.02 * jax.random.normal(kg(), (VOCAB, D), jnp.float32),
        pos_emb=0.02 * jax.random.normal(kg(), (S, D), jnp.float32),
    )
    return dict(emb=emb, kernel=kernel)


# -------------------------------- forward --------------------------------------
def forward(params, eeg_txt_input, eeg_txt_mask, act_img_input, act_img_mask,
            epsilon, dropout_rate, rng):
    kw = params["kernel"]
    BS, BT = B * S, B * T_IMG

    # additive attention biases for the batch-folded layout:
    # block-diagonal (no cross-batch attention) + text key-padding mask
    key_valid = eeg_txt_mask.astype(jnp.float32).reshape(BS) > 0               # [BS]
    txt_bid = jnp.repeat(jnp.arange(B), S)                                     # [BS]
    img_bid = jnp.repeat(jnp.arange(B), T_IMG)                                 # [BT]
    sa_bias = jnp.where((txt_bid[:, None] == txt_bid[None, :]) & key_valid[None, :],
                        0.0, -1e9).astype(jnp.float32)                         # [BS, BS]
    ca_bias = jnp.where((img_bid[:, None] == txt_bid[None, :]) & key_valid[None, :],
                        0.0, -1e9).astype(jnp.float32)                         # [BT, BS]
    # TODO(synk): act_img_mask only feeds the (eliminated) single-token decoder
    # self-attention, where softmax over one key == 1, so it does not enter the kernel.
    del act_img_mask

    # embedding gather + positional add stays in glue (host-side)
    x_emb = (params["emb"]["tok_emb"][eeg_txt_input]
             + params["emb"]["pos_emb"][None, :, :]).reshape(BS, D)

    # RNG sampling in plain JAX (torch RNG streams not reproducible); applied in-kernel.
    eps_hat = 1.0 / np.log((np.exp(epsilon) - dropout_rate) / (1.0 - dropout_rate))
    lap_sigma = 1.0 / eps_hat                      # matches the PyTorch module verbatim
    k1, k2 = jax.random.split(rng)
    keep_mask = (jax.random.bernoulli(k1, 1.0 - dropout_rate, (B, 3 * D))
                 .astype(jnp.float32) / (1.0 - dropout_rate))                  # inverted dropout
    noise = lap_sigma * jax.random.laplace(k2, (B, 1), jnp.float32)

    img2 = act_img_input.reshape(BT, V_IN)

    args = (x_emb, sa_bias, ca_bias, img2, keep_mask, noise,
            kw["bert_wqkv"], kw["bert_wo"], kw["bert_ff1"], kw["bert_ff2"], kw["bert_pool"],
            kw["vis_w"], kw["dec_dd"], kw["dec_ca_wkv"], kw["dec_ff1"], kw["dec_ff2"],
            kw["fc1"], kw["fc2"], kw["cls"], kw["ln_slab"], kw["b_slab"])

    # Single invocation (no grid): the whole packed weight set (~2.3 MB bf16/f32)
    # plus tiny activations is VMEM-resident; batch is folded into the row dim.
    # TODO(synk): at production dims (D=768) weights exceed v7x VMEM; per-layer
    # weight streaming (emit_pipeline over the [L, ...] stacks) would be required.
    return pl.pallas_call(
        _fused_kernel,
        out_shape=jax.ShapeDtypeStruct((B, 2), jnp.float32),
        compiler_params=pltpu.CompilerParams(vmem_limit_bytes=32 * 1024 * 1024),
    )(*args)


# --------------------------------- main -----------------------------------------
if __name__ == "__main__":
    root = jax.random.PRNGKey(0)
    kparam, kdata, kdrop = jax.random.split(root, 3)
    params = init_params(kparam)

    k_ids, k_img = jax.random.split(kdata)
    eeg_txt_input = jax.random.randint(k_ids, (B, S), 0, VOCAB, dtype=jnp.int32)
    eeg_txt_mask = jnp.array([[1] * S, [1] * (S - 2) + [0, 0]], dtype=jnp.int32)   # [B, S]
    act_img_input = jax.random.normal(k_img, (B, T_IMG, V_IN), jnp.float32)        # [B, 1, V_IN]
    act_img_mask = jnp.ones((B, T_IMG), dtype=jnp.int32)                            # [B, 1]
    epsilon = 1.0

    pred = forward(params, eeg_txt_input, eeg_txt_mask, act_img_input, act_img_mask,
                   epsilon, DROPOUT_RATE, kdrop)
    jax.block_until_ready(pred)
    assert pred.shape == (B, 2) and pred.dtype == jnp.float32
    assert bool(jnp.all(jnp.isfinite(pred)))
    print("KERNEL_OK")
</pallas_src>

<mosaic_0001>
module attributes {stable_mosaic.version = 11 : i64} {
  func.func @_fused_kernel(%arg0: memref<16x128xf32, #tpu.memory_space<vmem>>, %arg1: memref<16x16xf32, #tpu.memory_space<vmem>>, %arg2: memref<2x16xf32, #tpu.memory_space<vmem>>, %arg3: memref<2x64xf32, #tpu.memory_space<vmem>>, %arg4: memref<2x384xf32, #tpu.memory_space<vmem>>, %arg5: memref<2x1xf32, #tpu.memory_space<vmem>>, %arg6: memref<128x384xbf16, #tpu.memory_space<vmem>>, %arg7: memref<128x128xbf16, #tpu.memory_space<vmem>>, %arg8: memref<128x256xbf16, #tpu.memory_space<vmem>>, %arg9: memref<256x128xbf16, #tpu.memory_space<vmem>>, %arg10: memref<128x128xbf16, #tpu.memory_space<vmem>>, %arg11: memref<64x128xbf16, #tpu.memory_space<vmem>>, %arg12: memref<3x3x128x128xbf16, #tpu.memory_space<vmem>>, %arg13: memref<128x768xbf16, #tpu.memory_space<vmem>>, %arg14: memref<3x128x256xbf16, #tpu.memory_space<vmem>>, %arg15: memref<3x256x128xbf16, #tpu.memory_space<vmem>>, %arg16: memref<384x384xbf16, #tpu.memory_space<vmem>>, %arg17: memref<384x128xbf16, #tpu.memory_space<vmem>>, %arg18: memref<128x2xbf16, #tpu.memory_space<vmem>>, %arg19: memref<24x128xf32, #tpu.memory_space<vmem>>, %arg20: memref<25x768xf32, #tpu.memory_space<vmem>>, %arg21: memref<2x2xf32, #tpu.memory_space<vmem>>) attributes {dimension_semantics = [], scalar_prefetch = 0 : i64, scratch_operands = 0 : i64, tpu.core_type = #tpu.core_type<tc>} {
    %c0 = arith.constant 0 : index
    %c0_0 = arith.constant 0 : index
    %0 = vector.load %arg1[%c0, %c0_0] : memref<16x16xf32, #tpu.memory_space<vmem>>, vector<16x16xf32>
    %c0_1 = arith.constant 0 : index
    %c0_2 = arith.constant 0 : index
    %1 = vector.load %arg0[%c0_1, %c0_2] : memref<16x128xf32, #tpu.memory_space<vmem>>, vector<16x128xf32>
    %c0_3 = arith.constant 0 : index
    %c0_4 = arith.constant 0 : index
    %2 = vector.load %arg19[%c0_3, %c0_4] : memref<24x128xf32, #tpu.memory_space<vmem>>, vector<1x128xf32>
    %c1 = arith.constant 1 : index
    %c0_5 = arith.constant 0 : index
    %3 = vector.load %arg19[%c1, %c0_5] : memref<24x128xf32, #tpu.memory_space<vmem>>, vector<1x128xf32>
    %cst = arith.constant dense<0.000000e+00> : vector<16xf32>
    %4 = vector.multi_reduction <add>, %1, %cst [1] : vector<16x128xf32> to vector<16xf32>
    %5 = vector.shape_cast %4 : vector<16xf32> to vector<16x1xf32>
    %cst_6 = arith.constant 1.280000e+02 : f32
    %6 = vector.broadcast %cst_6 : f32 to vector<16x1xf32>
    %7 = arith.divf %5, %6 : vector<16x1xf32>
    %8 = vector.broadcast %7 : vector<16x1xf32> to vector<16x128xf32>
    %9 = arith.subf %1, %8 : vector<16x128xf32>
    %10 = arith.mulf %9, %9 : vector<16x128xf32>
    %cst_7 = arith.constant dense<0.000000e+00> : vector<16xf32>
    %11 = vector.multi_reduction <add>, %10, %cst_7 [1] : vector<16x128xf32> to vector<16xf32>
    %12 = vector.shape_cast %11 : vector<16xf32> to vector<16x1xf32>
    %cst_8 = arith.constant 1.280000e+02 : f32
    %13 = vector.broadcast %cst_8 : f32 to vector<16x1xf32>
    %14 = arith.divf %12, %13 : vector<16x1xf32>
    %15 = vector.broadcast %7 : vector<16x1xf32> to vector<16x128xf32>
    %16 = arith.subf %1, %15 : vector<16x128xf32>
    %cst_9 = arith.constant 9.99999974E-6 : f32
    %17 = vector.broadcast %cst_9 : f32 to vector<16x1xf32>
    %18 = arith.addf %14, %17 : vector<16x1xf32>
    %19 = math.rsqrt %18 : vector<16x1xf32>
    %20 = vector.broadcast %19 : vector<16x1xf32> to vector<16x128xf32>
    %21 = arith.mulf %16, %20 : vector<16x128xf32>
    %22 = vector.broadcast %2 : vector<1x128xf32> to vector<16x128xf32>
    %23 = arith.mulf %21, %22 : vector<16x128xf32>
    %24 = vector.broadcast %3 : vector<1x128xf32> to vector<16x128xf32>
    %25 = arith.addf %23, %24 : vector<16x128xf32>
    %c0_10 = arith.constant 0 : index
    %c0_11 = arith.constant 0 : index
    %26 = vector.load %arg6[%c0_10, %c0_11] : memref<128x384xbf16, #tpu.memory_space<vmem>>, vector<128x384xbf16>
    %c0_12 = arith.constant 0 : index
    %c0_13 = arith.constant 0 : index
    %27 = vector.load %arg20[%c0_12, %c0_13] : memref<25x768xf32, #tpu.memory_space<vmem>>, vector<1x384xf32>
    %28 = arith.truncf %25 : vector<16x128xf32> to vector<16x128xbf16>
    %cst_14 = arith.constant dense<0.000000e+00> : vector<16x384xf32>
    %29 = tpu.matmul %28, %26, %cst_14 {dimension_numbers = #tpu.dot_dimension_numbers<[1], [0], [0], [1], [0, 0, 1, 1], [], []>} : vector<16x128xbf16>, vector<128x384xbf16>, vector<16x384xf32> -> vector<16x384xf32>
    %30 = vector.broadcast %27 : vector<1x384xf32> to vector<16x384xf32>
    %31 = arith.addf %29, %30 : vector<16x384xf32>
    %32 = vector.extract_strided_slice %31 {offsets = [0, 0], sizes = [16, 128], strides = [1, 1]} : vector<16x384xf32> to vector<16x128xf32>
    %33 = vector.extract_strided_slice %31 {offsets = [0, 128], sizes = [16, 128], strides = [1, 1]} : vector<16x384xf32> to vector<16x128xf32>
    %34 = vector.extract_strided_slice %31 {offsets = [0, 256], sizes = [16, 128], strides = [1, 1]} : vector<16x384xf32> to vector<16x128xf32>
    %c0_15 = arith.constant 0 : index
    %c0_16 = arith.constant 0 : index
    %35 = vector.load %arg7[%c0_15, %c0_16] : memref<128x128xbf16, #tpu.memory_space<vmem>>, vector<128x128xbf16>
    %c1_17 = arith.constant 1 : index
    %c0_18 = arith.constant 0 : index
    %36 = vector.load %arg20[%c1_17, %c0_18] : memref<25x768xf32, #tpu.memory_space<vmem>>, vector<1x128xf32>
    %37 = vector.extract_strided_slice %32 {offsets = [0, 0], sizes = [16, 32], strides = [1, 1]} : vector<16x128xf32> to vector<16x32xf32>
    %38 = vector.extract_strided_slice %33 {offsets = [0, 0], sizes = [16, 32], strides = [1, 1]} : vector<16x128xf32> to vector<16x32xf32>
    "tpu.trace_start"() <{level = 10 : i32, message = "qd,kd->qk"}> : () -> ()
    %cst_19 = arith.constant dense<0.000000e+00> : vector<16x16xf32>
    %39 = tpu.matmul %37, %38, %cst_19 {dimension_numbers = #tpu.dot_dimension_numbers<[1], [1], [0], [0], [0, 0, 1, 0], [], []>} : vector<16x32xf32>, vector<16x32xf32>, vector<16x16xf32> -> vector<16x16xf32>
    "tpu.trace_stop"() : () -> ()
    %cst_20 = arith.constant 0.176776692 : f32
    %40 = vector.broadcast %cst_20 : f32 to vector<16x16xf32>
    %41 = arith.mulf %39, %40 : vector<16x16xf32>
    %42 = arith.addf %41, %0 : vector<16x16xf32>
    %cst_21 = arith.constant dense<0xFF800000> : vector<16xf32>
    %43 = vector.multi_reduction <maximumf>, %42, %cst_21 [1] : vector<16x16xf32> to vector<16xf32>
    %44 = vector.shape_cast %43 : vector<16xf32> to vector<16x1xf32>
    %45 = vector.broadcast %44 : vector<16x1xf32> to vector<16x16xf32>
    %46 = arith.subf %42, %45 : vector<16x16xf32>
    %47 = math.exp %46 : vector<16x16xf32>
    %cst_22 = arith.constant dense<0.000000e+00> : vector<16xf32>
    %48 = vector.multi_reduction <add>, %47, %cst_22 [1] : vector<16x16xf32> to vector<16xf32>
    %49 = vector.shape_cast %48 : vector<16xf32> to vector<16x1xf32>
    %50 = tpu.reciprocal %49 {approx = true} : vector<16x1xf32> -> vector<16x1xf32>
    %51 = vector.broadcast %50 : vector<16x1xf32> to vector<16x16xf32>
    %52 = arith.mulf %47, %51 : vector<16x16xf32>
    %53 = vector.extract_strided_slice %34 {offsets = [0, 0], sizes = [16, 32], strides = [1, 1]} : vector<16x128xf32> to vector<16x32xf32>
    %cst_23 = arith.constant dense<0.000000e+00> : vector<16x32xf32>
    %54 = tpu.matmul %52, %53, %cst_23 {dimension_numbers = #tpu.dot_dimension_numbers<[1], [0], [0], [1], [0, 0, 1, 1], [], []>} : vector<16x16xf32>, vector<16x32xf32>, vector<16x32xf32> -> vector<16x32xf32>
    %55 = arith.truncf %54 : vector<16x32xf32> to vector<16x32xbf16>
    %56 = vector.extract_strided_slice %35 {offsets = [0, 0], sizes = [32, 128], strides = [1, 1]} : vector<128x128xbf16> to vector<32x128xbf16>
    %cst_24 = arith.constant dense<0.000000e+00> : vector<16x128xf32>
    %57 = tpu.matmul %55, %56, %cst_24 {dimension_numbers = #tpu.dot_dimension_numbers<[1], [0], [0], [1], [0, 0, 1, 1], [], []>} : vector<16x32xbf16>, vector<32x128xbf16>, vector<16x128xf32> -> vector<16x128xf32>
    %58 = vector.extract_strided_slice %32 {offsets = [0, 32], sizes = [16, 32], strides = [1, 1]} : vector<16x128xf32> to vector<16x32xf32>
    %59 = vector.extract_strided_slice %33 {offsets = [0, 32], sizes = [16, 32], strides = [1, 1]} : vector<16x128xf32> to vector<16x32xf32>
    "tpu.trace_start"() <{level = 10 : i32, message = "qd,kd->qk"}> : () -> ()
    %cst_25 = arith.constant dense<0.000000e+00> : vector<16x16xf32>
    %60 = tpu.matmul %58, %59, %cst_25 {dimension_numbers = #tpu.dot_dimension_numbers<[1], [1], [0], [0], [0, 0, 1, 0], [], []>} : vector<16x32xf32>, vector<16x32xf32>, vector<16x16xf32> -> vector<16x16xf32>
    "tpu.trace_stop"() : () -> ()
    %cst_26 = arith.constant 0.176776692 : f32
    %61 = vector.broadcast %cst_26 : f32 to vector<16x16xf32>
    %62 = arith.mulf %60, %61 : vector<16x16xf32>
    %63 = arith.addf %62, %0 : vector<16x16xf32>
    %cst_27 = arith.constant dense<0xFF800000> : vector<16xf32>
    %64 = vector.multi_reduction <maximumf>, %63, %cst_27 [1] : vector<16x16xf32> to vector<16xf32>
    %65 = vector.shape_cast %64 : vector<16xf32> to vector<16x1xf32>
    %66 = vector.broadcast %65 : vector<16x1xf32> to vector<16x16xf32>
    %67 = arith.subf %63, %66 : vector<16x16xf32>
    %68 = math.exp %67 : vector<16x16xf32>
    %cst_28 = arith.constant dense<0.000000e+00> : vector<16xf32>
    %69 = vector.multi_reduction <add>, %68, %cst_28 [1] : vector<16x16xf32> to vector<16xf32>
    %70 = vector.shape_cast %69 : vector<16xf32> to vector<16x1xf32>
    %71 = tpu.reciprocal %70 {approx = true} : vector<16x1xf32> -> vector<16x1xf32>
    %72 = vector.broadcast %71 : vector<16x1xf32> to vector<16x16xf32>
    %73 = arith.mulf %68, %72 : vector<16x16xf32>
    %74 = vector.extract_strided_slice %34 {offsets = [0, 32], sizes = [16, 32], strides = [1, 1]} : vector<16x128xf32> to vector<16x32xf32>
    %cst_29 = arith.constant dense<0.000000e+00> : vector<16x32xf32>
    %75 = tpu.matmul %73, %74, %cst_29 {dimension_numbers = #tpu.dot_dimension_numbers<[1], [0], [0], [1], [0, 0, 1, 1], [], []>} : vector<16x16xf32>, vector<16x32xf32>, vector<16x32xf32> -> vector<16x32xf32>
    %76 = arith.truncf %75 : vector<16x32xf32> to vector<16x32xbf16>
    %77 = vector.extract_strided_slice %35 {offsets = [32, 0], sizes = [32, 128], strides = [1, 1]} : vector<128x128xbf16> to vector<32x128xbf16>
    %cst_30 = arith.constant dense<0.000000e+00> : vector<16x128xf32>
    %78 = tpu.matmul %76, %77, %cst_30 {dimension_numbers = #tpu.dot_dimension_numbers<[1], [0], [0], [1], [0, 0, 1, 1], [], []>} : vector<16x32xbf16>, vector<32x128xbf16>, vector<16x128xf32> -> vector<16x128xf32>
    %79 = arith.addf %57, %78 : vector<16x128xf32>
    %80 = vector.extract_strided_slice %32 {offsets = [0, 64], sizes = [16, 32], strides = [1, 1]} : vector<16x128xf32> to vector<16x32xf32>
    %81 = vector.extract_strided_slice %33 {offsets = [0, 64], sizes = [16, 32], strides = [1, 1]} : vector<16x128xf32> to vector<16x32xf32>
    "tpu.trace_start"() <{level = 10 : i32, message = "qd,kd->qk"}> : () -> ()
    %cst_31 = arith.constant dense<0.000000e+00> : vector<16x16xf32>
    %82 = tpu.matmul %80, %81, %cst_31 {dimension_numbers = #tpu.dot_dimension_numbers<[1], [1], [0], [0], [0, 0, 1, 0], [], []>} : vector<16x32xf32>, vector<16x32xf32>, vector<16x16xf32> -> vector<16x16xf32>
    "tpu.trace_stop"() : () -> ()
    %cst_32 = arith.constant 0.176776692 : f32
    %83 = vector.broadcast %cst_32 : f32 to vector<16x16xf32>
    %84 = arith.mulf %82, %83 : vector<16x16xf32>
    %85 = arith.addf %84, %0 : vector<16x16xf32>
    %cst_33 = arith.constant dense<0xFF800000> : vector<16xf32>
    %86 = vector.multi_reduction <maximumf>, %85, %cst_33 [1] : vector<16x16xf32> to vector<16xf32>
    %87 = vector.shape_cast %86 : vector<16xf32> to vector<16x1xf32>
    %88 = vector.broadcast %87 : vector<16x1xf32> to vector<16x16xf32>
    %89 = arith.subf %85, %88 : vector<16x16xf32>
    %90 = math.exp %89 : vector<16x16xf32>
    %cst_34 = arith.constant dense<0.000000e+00> : vector<16xf32>
    %91 = vector.multi_reduction <add>, %90, %cst_34 [1] : vector<16x16xf32> to vector<16xf32>
    %92 = vector.shape_cast %91 : vector<16xf32> to vector<16x1xf32>
    %93 = tpu.reciprocal %92 {approx = true} : vector<16x1xf32> -> vector<16x1xf32>
    %94 = vector.broadcast %93 : vector<16x1xf32> to vector<16x16xf32>
    %95 = arith.mulf %90, %94 : vector<16x16xf32>
    %96 = vector.extract_strided_slice %34 {offsets = [0, 64], sizes = [16, 32], strides = [1, 1]} : vector<16x128xf32> to vector<16x32xf32>
    %cst_35 = arith.constant dense<0.000000e+00> : vector<16x32xf32>
    %97 = tpu.matmul %95, %96, %cst_35 {dimension_numbers = #tpu.dot_dimension_numbers<[1], [0], [0], [1], [0, 0, 1, 1], [], []>} : vector<16x16xf32>, vector<16x32xf32>, vector<16x32xf32> -> vector<16x32xf32>
    %98 = arith.truncf %97 : vector<16x32xf32> to vector<16x32xbf16>
    %99 = vector.extract_strided_slice %35 {offsets = [64, 0], sizes = [32, 128], strides = [1, 1]} : vector<128x128xbf16> to vector<32x128xbf16>
    %cst_36 = arith.constant dense<0.000000e+00> : vector<16x128xf32>
    %100 = tpu.matmul %98, %99, %cst_36 {dimension_numbers = #tpu.dot_dimension_numbers<[1], [0], [0], [1], [0, 0, 1, 1], [], []>} : vector<16x32xbf16>, vector<32x128xbf16>, vector<16x128xf32> -> vector<16x128xf32>
    %101 = arith.addf %79, %100 : vector<16x128xf32>
    %102 = vector.extract_strided_slice %32 {offsets = [0, 96], sizes = [16, 32], strides = [1, 1]} : vector<16x128xf32> to vector<16x32xf32>
    %103 = vector.extract_strided_slice %33 {offsets = [0, 96], sizes = [16, 32], strides = [1, 1]} : vector<16x128xf32> to vector<16x32xf32>
    "tpu.trace_start"() <{level = 10 : i32, message = "qd,kd->qk"}> : () -> ()
    %cst_37 = arith.constant dense<0.000000e+00> : vector<16x16xf32>
    %104 = tpu.matmul %102, %103, %cst_37 {dimension_numbers = #tpu.dot_dimension_numbers<[1], [1], [0], [0], [0, 0, 1, 0], [], []>} : vector<16x32xf32>, vector<16x32xf32>, vector<16x16xf32> -> vector<16x16xf32>
    "tpu.trace_stop"() : () -> ()
    %cst_38 = arith.constant 0.176776692 : f32
    %105 = vector.broadcast %cst_38 : f32 to vector<16x16xf32>
    %106 = arith.mulf %104, %105 : vector<16x16xf32>
    %107 = arith.addf %106, %0 : vector<16x16xf32>
    %cst_39 = arith.constant dense<0xFF800000> : vector<16xf32>
    %108 = vector.multi_reduction <maximumf>, %107, %cst_39 [1] : vector<16x16xf32> to vector<16xf32>
    %109 = vector.shape_cast %108 : vector<16xf32> to vector<16x1xf32>
    %110 = vector.broadcast %109 : vector<16x1xf32> to vector<16x16xf32>
    %111 = arith.subf %107, %110 : vector<16x16xf32>
    %112 = math.exp %111 : vector<16x16xf32>
    %cst_40 = arith.constant dense<0.000000e+00> : vector<16xf32>
    %113 = vector.multi_reduction <add>, %112, %cst_40 [1] : vector<16x16xf32> to vector<16xf32>
    %114 = vector.shape_cast %113 : vector<16xf32> to vector<16x1xf32>
    %115 = tpu.reciprocal %114 {approx = true} : vector<16x1xf32> -> vector<16x1xf32>
    %116 = vector.broadcast %115 : vector<16x1xf32> to vector<16x16xf32>
    %117 = arith.mulf %112, %116 : vector<16x16xf32>
    %118 = vector.extract_strided_slice %34 {offsets = [0, 96], sizes = [16, 32], strides = [1, 1]} : vector<16x128xf32> to vector<16x32xf32>
    %cst_41 = arith.constant dense<0.000000e+00> : vector<16x32xf32>
    %119 = tpu.matmul %117, %118, %cst_41 {dimension_numbers = #tpu.dot_dimension_numbers<[1], [0], [0], [1], [0, 0, 1, 1], [], []>} : vector<16x16xf32>, vector<16x32xf32>, vector<16x32xf32> -> vector<16x32xf32>
    %120 = arith.truncf %119 : vector<16x32xf32> to vector<16x32xbf16>
    %121 = vector.extract_strided_slice %35 {offsets = [96, 0], sizes = [32, 128], strides = [1, 1]} : vector<128x128xbf16> to vector<32x128xbf16>
    %cst_42 = arith.constant dense<0.000000e+00> : vector<16x128xf32>
    %122 = tpu.matmul %120, %121, %cst_42 {dimension_numbers = #tpu.dot_dimension_numbers<[1], [0], [0], [1], [0, 0, 1, 1], [], []>} : vector<16x32xbf16>, vector<32x128xbf16>, vector<16x128xf32> -> vector<16x128xf32>
    %123 = arith.addf %101, %122 : vector<16x128xf32>
    %124 = vector.broadcast %36 : vector<1x128xf32> to vector<16x128xf32>
    %125 = arith.addf %123, %124 : vector<16x128xf32>
    %126 = arith.addf %25, %125 : vector<16x128xf32>
    %c2 = arith.constant 2 : index
    %c0_43 = arith.constant 0 : index
    %127 = vector.load %arg19[%c2, %c0_43] : memref<24x128xf32, #tpu.memory_space<vmem>>, vector<1x128xf32>
    %c3 = arith.constant 3 : index
    %c0_44 = arith.constant 0 : index
    %128 = vector.load %arg19[%c3, %c0_44] : memref<24x128xf32, #tpu.memory_space<vmem>>, vector<1x128xf32>
    %cst_45 = arith.constant dense<0.000000e+00> : vector<16xf32>
    %129 = vector.multi_reduction <add>, %126, %cst_45 [1] : vector<16x128xf32> to vector<16xf32>
    %130 = vector.shape_cast %129 : vector<16xf32> to vector<16x1xf32>
    %cst_46 = arith.constant 1.280000e+02 : f32
    %131 = vector.broadcast %cst_46 : f32 to vector<16x1xf32>
    %132 = arith.divf %130, %131 : vector<16x1xf32>
    %133 = vector.broadcast %132 : vector<16x1xf32> to vector<16x128xf32>
    %134 = arith.subf %126, %133 : vector<16x128xf32>
    %135 = arith.mulf %134, %134 : vector<16x128xf32>
    %cst_47 = arith.constant dense<0.000000e+00> : vector<16xf32>
    %136 = vector.multi_reduction <add>, %135, %cst_47 [1] : vector<16x128xf32> to vector<16xf32>
    %137 = vector.shape_cast %136 : vector<16xf32> to vector<16x1xf32>
    %cst_48 = arith.constant 1.280000e+02 : f32
    %138 = vector.broadcast %cst_48 : f32 to vector<16x1xf32>
    %139 = arith.divf %137, %138 : vector<16x1xf32>
    %140 = vector.broadcast %132 : vector<16x1xf32> to vector<16x128xf32>
    %141 = arith.subf %126, %140 : vector<16x128xf32>
    %cst_49 = arith.constant 9.99999974E-6 : f32
    %142 = vector.broadcast %cst_49 : f32 to vector<16x1xf32>
    %143 = arith.addf %139, %142 : vector<16x1xf32>
    %144 = math.rsqrt %143 : vector<16x1xf32>
    %145 = vector.broadcast %144 : vector<16x1xf32> to vector<16x128xf32>
    %146 = arith.mulf %141, %145 : vector<16x128xf32>
    %147 = vector.broadcast %127 : vector<1x128xf32> to vector<16x128xf32>
    %148 = arith.mulf %146, %147 : vector<16x128xf32>
    %149 = vector.broadcast %128 : vector<1x128xf32> to vector<16x128xf32>
    %150 = arith.addf %148, %149 : vector<16x128xf32>
    %c0_50 = arith.constant 0 : index
    %c0_51 = arith.constant 0 : index
    %151 = vector.load %arg8[%c0_50, %c0_51] : memref<128x256xbf16, #tpu.memory_space<vmem>>, vector<128x256xbf16>
    %c2_52 = arith.constant 2 : index
    %c0_53 = arith.constant 0 : index
    %152 = vector.load %arg20[%c2_52, %c0_53] : memref<25x768xf32, #tpu.memory_space<vmem>>, vector<1x256xf32>
    %153 = arith.truncf %150 : vector<16x128xf32> to vector<16x128xbf16>
    %cst_54 = arith.constant dense<0.000000e+00> : vector<16x256xf32>
    %154 = tpu.matmul %153, %151, %cst_54 {dimension_numbers = #tpu.dot_dimension_numbers<[1], [0], [0], [1], [0, 0, 1, 1], [], []>} : vector<16x128xbf16>, vector<128x256xbf16>, vector<16x256xf32> -> vector<16x256xf32>
    %155 = vector.broadcast %152 : vector<1x256xf32> to vector<16x256xf32>
    %156 = arith.addf %154, %155 : vector<16x256xf32>
    %cst_55 = arith.constant 0.000000e+00 : f32
    %157 = vector.broadcast %cst_55 : f32 to vector<16x256xf32>
    %158 = arith.maximumf %156, %157 : vector<16x256xf32>
    %c0_56 = arith.constant 0 : index
    %c0_57 = arith.constant 0 : index
    %159 = vector.load %arg9[%c0_56, %c0_57] : memref<256x128xbf16, #tpu.memory_space<vmem>>, vector<256x128xbf16>
    %c3_58 = arith.constant 3 : index
    %c0_59 = arith.constant 0 : index
    %160 = vector.load %arg20[%c3_58, %c0_59] : memref<25x768xf32, #tpu.memory_space<vmem>>, vector<1x128xf32>
    %161 = arith.truncf %158 : vector<16x256xf32> to vector<16x256xbf16>
    %cst_60 = arith.constant dense<0.000000e+00> : vector<16x128xf32>
    %162 = tpu.matmul %161, %159, %cst_60 {dimension_numbers = #tpu.dot_dimension_numbers<[1], [0], [0], [1], [0, 0, 1, 1], [], []>} : vector<16x256xbf16>, vector<256x128xbf16>, vector<16x128xf32> -> vector<16x128xf32>
    %163 = vector.broadcast %160 : vector<1x128xf32> to vector<16x128xf32>
    %164 = arith.addf %162, %163 : vector<16x128xf32>
    %165 = arith.addf %150, %164 : vector<16x128xf32>
    %c4 = arith.constant 4 : index
    %c0_61 = arith.constant 0 : index
    %166 = vector.load %arg19[%c4, %c0_61] : memref<24x128xf32, #tpu.memory_space<vmem>>, vector<1x128xf32>
    %c5 = arith.constant 5 : index
    %c0_62 = arith.constant 0 : index
    %167 = vector.load %arg19[%c5, %c0_62] : memref<24x128xf32, #tpu.memory_space<vmem>>, vector<1x128xf32>
    %cst_63 = arith.constant dense<0.000000e+00> : vector<16xf32>
    %168 = vector.multi_reduction <add>, %165, %cst_63 [1] : vector<16x128xf32> to vector<16xf32>
    %169 = vector.shape_cast %168 : vector<16xf32> to vector<16x1xf32>
    %cst_64 = arith.constant 1.280000e+02 : f32
    %170 = vector.broadcast %cst_64 : f32 to vector<16x1xf32>
    %171 = arith.divf %169, %170 : vector<16x1xf32>
    %172 = vector.broadcast %171 : vector<16x1xf32> to vector<16x128xf32>
    %173 = arith.subf %165, %172 : vector<16x128xf32>
    %174 = arith.mulf %173, %173 : vector<16x128xf32>
    %cst_65 = arith.constant dense<0.000000e+00> : vector<16xf32>
    %175 = vector.multi_reduction <add>, %174, %cst_65 [1] : vector<16x128xf32> to vector<16xf32>
    %176 = vector.shape_cast %175 : vector<16xf32> to vector<16x1xf32>
    %cst_66 = arith.constant 1.280000e+02 : f32
    %177 = vector.broadcast %cst_66 : f32 to vector<16x1xf32>
    %178 = arith.divf %176, %177 : vector<16x1xf32>
    %179 = vector.broadcast %171 : vector<16x1xf32> to vector<16x128xf32>
    %180 = arith.subf %165, %179 : vector<16x128xf32>
    %cst_67 = arith.constant 9.99999974E-6 : f32
    %181 = vector.broadcast %cst_67 : f32 to vector<16x1xf32>
    %182 = arith.addf %178, %181 : vector<16x1xf32>
    %183 = math.rsqrt %182 : vector<16x1xf32>
    %184 = vector.broadcast %183 : vector<16x1xf32> to vector<16x128xf32>
    %185 = arith.mulf %180, %184 : vector<16x128xf32>
    %186 = vector.broadcast %166 : vector<1x128xf32> to vector<16x128xf32>
    %187 = arith.mulf %185, %186 : vector<16x128xf32>
    %188 = vector.broadcast %167 : vector<1x128xf32> to vector<16x128xf32>
    %189 = arith.addf %187, %188 : vector<16x128xf32>
    %190 = vector.extract_strided_slice %189 {offsets = [0, 0], sizes = [1, 128], strides = [1, 1]} : vector<16x128xf32> to vector<1x128xf32>
    %191 = vector.extract_strided_slice %189 {offsets = [8, 0], sizes = [1, 128], strides = [1, 1]} : vector<16x128xf32> to vector<1x128xf32>
    %192 = tpu.concatenate %190, %191 in 0 : vector<1x128xf32>, vector<1x128xf32> -> vector<2x128xf32>
    %c0_68 = arith.constant 0 : index
    %c0_69 = arith.constant 0 : index
    %193 = vector.load %arg10[%c0_68, %c0_69] : memref<128x128xbf16, #tpu.memory_space<vmem>>, vector<128x128xbf16>
    %c4_70 = arith.constant 4 : index
    %c0_71 = arith.constant 0 : index
    %194 = vector.load %arg20[%c4_70, %c0_71] : memref<25x768xf32, #tpu.memory_space<vmem>>, vector<1x128xf32>
    %195 = arith.truncf %192 : vector<2x128xf32> to vector<2x128xbf16>
    %cst_72 = arith.constant dense<0.000000e+00> : vector<2x128xf32>
    %196 = tpu.matmul %195, %193, %cst_72 {dimension_numbers = #tpu.dot_dimension_numbers<[1], [0], [0], [1], [0, 0, 1, 1], [], []>} : vector<2x128xbf16>, vector<128x128xbf16>, vector<2x128xf32> -> vector<2x128xf32>
    %197 = vector.broadcast %194 : vector<1x128xf32> to vector<2x128xf32>
    %198 = arith.addf %196, %197 : vector<2x128xf32>
    %199 = math.tanh %198 : vector<2x128xf32>
    %c0_73 = arith.constant 0 : index
    %c0_74 = arith.constant 0 : index
    %200 = vector.load %arg3[%c0_73, %c0_74] : memref<2x64xf32, #tpu.memory_space<vmem>>, vector<2x64xf32>
    %c0_75 = arith.constant 0 : index
    %c0_76 = arith.constant 0 : index
    %201 = vector.load %arg11[%c0_75, %c0_76] : memref<64x128xbf16, #tpu.memory_space<vmem>>, vector<64x128xbf16>
    %c5_77 = arith.constant 5 : index
    %c0_78 = arith.constant 0 : index
    %202 = vector.load %arg20[%c5_77, %c0_78] : memref<25x768xf32, #tpu.memory_space<vmem>>, vector<1x128xf32>
    %203 = arith.truncf %200 : vector<2x64xf32> to vector<2x64xbf16>
    %cst_79 = arith.constant dense<0.000000e+00> : vector<2x128xf32>
    %204 = tpu.matmul %203, %201, %cst_79 {dimension_numbers = #tpu.dot_dimension_numbers<[1], [0], [0], [1], [0, 0, 1, 1], [], []>} : vector<2x64xbf16>, vector<64x128xbf16>, vector<2x128xf32> -> vector<2x128xf32>
    %205 = vector.broadcast %202 : vector<1x128xf32> to vector<2x128xf32>
    %206 = arith.addf %204, %205 : vector<2x128xf32>
    %c0_80 = arith.constant 0 : index
    %c0_81 = arith.constant 0 : index
    %207 = vector.load %arg13[%c0_80, %c0_81] : memref<128x768xbf16, #tpu.memory_space<vmem>>, vector<128x768xbf16>
    %c6 = arith.constant 6 : index
    %c0_82 = arith.constant 0 : index
    %208 = vector.load %arg20[%c6, %c0_82] : memref<25x768xf32, #tpu.memory_space<vmem>>, vector<1x768xf32>
    %209 = arith.truncf %189 : vector<16x128xf32> to vector<16x128xbf16>
    %cst_83 = arith.constant dense<0.000000e+00> : vector<16x768xf32>
    %210 = tpu.matmul %209, %207, %cst_83 {dimension_numbers = #tpu.dot_dimension_numbers<[1], [0], [0], [1], [0, 0, 1, 1], [], []>} : vector<16x128xbf16>, vector<128x768xbf16>, vector<16x768xf32> -> vector<16x768xf32>
    %211 = vector.broadcast %208 : vector<1x768xf32> to vector<16x768xf32>
    %212 = arith.addf %210, %211 : vector<16x768xf32>
    %c0_84 = arith.constant 0 : index
    %c0_85 = arith.constant 0 : index
    %213 = vector.load %arg2[%c0_84, %c0_85] : memref<2x16xf32, #tpu.memory_space<vmem>>, vector<2x16xf32>
    %c0_86 = arith.constant 0 : index
    %c0_87 = arith.constant 0 : index
    %c0_88 = arith.constant 0 : index
    %c0_89 = arith.constant 0 : index
    %214 = vector.load %arg12[%c0_86, %c0_87, %c0_88, %c0_89] : memref<3x3x128x128xbf16, #tpu.memory_space<vmem>>, vector<1x1x128x128xbf16>
    %215 = vector.shape_cast %214 : vector<1x1x128x128xbf16> to vector<128x128xbf16>
    %c10 = arith.constant 10 : index
    %c0_90 = arith.constant 0 : index
    %216 = vector.load %arg20[%c10, %c0_90] : memref<25x768xf32, #tpu.memory_space<vmem>>, vector<1x128xf32>
    %217 = arith.truncf %206 : vector<2x128xf32> to vector<2x128xbf16>
    %cst_91 = arith.constant dense<0.000000e+00> : vector<2x128xf32>
    %218 = tpu.matmul %217, %215, %cst_91 {dimension_numbers = #tpu.dot_dimension_numbers<[1], [0], [0], [1], [0, 0, 1, 1], [], []>} : vector<2x128xbf16>, vector<128x128xbf16>, vector<2x128xf32> -> vector<2x128xf32>
    %219 = vector.broadcast %216 : vector<1x128xf32> to vector<2x128xf32>
    %220 = arith.addf %218, %219 : vector<2x128xf32>
    %221 = arith.addf %206, %220 : vector<2x128xf32>
    %c6_92 = arith.constant 6 : index
    %c0_93 = arith.constant 0 : index
    %222 = vector.load %arg19[%c6_92, %c0_93] : memref<24x128xf32, #tpu.memory_space<vmem>>, vector<1x128xf32>
    %c7 = arith.constant 7 : index
    %c0_94 = arith.constant 0 : index
    %223 = vector.load %arg19[%c7, %c0_94] : memref<24x128xf32, #tpu.memory_space<vmem>>, vector<1x128xf32>
    %cst_95 = arith.constant dense<0.000000e+00> : vector<2xf32>
    %224 = vector.multi_reduction <add>, %221, %cst_95 [1] : vector<2x128xf32> to vector<2xf32>
    %225 = vector.shape_cast %224 : vector<2xf32> to vector<2x1xf32>
    %cst_96 = arith.constant 1.280000e+02 : f32
    %226 = vector.broadcast %cst_96 : f32 to vector<2x1xf32>
    %227 = arith.divf %225, %226 : vector<2x1xf32>
    %228 = vector.broadcast %227 : vector<2x1xf32> to vector<2x128xf32>
    %229 = arith.subf %221, %228 : vector<2x128xf32>
    %230 = arith.mulf %229, %229 : vector<2x128xf32>
    %cst_97 = arith.constant dense<0.000000e+00> : vector<2xf32>
    %231 = vector.multi_reduction <add>, %230, %cst_97 [1] : vector<2x128xf32> to vector<2xf32>
    %232 = vector.shape_cast %231 : vector<2xf32> to vector<2x1xf32>
    %cst_98 = arith.constant 1.280000e+02 : f32
    %233 = vector.broadcast %cst_98 : f32 to vector<2x1xf32>
    %234 = arith.divf %232, %233 : vector<2x1xf32>
    %235 = vector.broadcast %227 : vector<2x1xf32> to vector<2x128xf32>
    %236 = arith.subf %221, %235 : vector<2x128xf32>
    %cst_99 = arith.constant 9.99999974E-6 : f32
    %237 = vector.broadcast %cst_99 : f32 to vector<2x1xf32>
    %238 = arith.addf %234, %237 : vector<2x1xf32>
    %239 = math.rsqrt %238 : vector<2x1xf32>
    %240 = vector.broadcast %239 : vector<2x1xf32> to vector<2x128xf32>
    %241 = arith.mulf %236, %240 : vector<2x128xf32>
    %242 = vector.broadcast %222 : vector<1x128xf32> to vector<2x128xf32>
    %243 = arith.mulf %241, %242 : vector<2x128xf32>
    %244 = vector.broadcast %223 : vector<1x128xf32> to vector<2x128xf32>
    %245 = arith.addf %243, %244 : vector<2x128xf32>
    %c0_100 = arith.constant 0 : index
    %c1_101 = arith.constant 1 : index
    %c0_102 = arith.constant 0 : index
    %c0_103 = arith.constant 0 : index
    %246 = vector.load %arg12[%c0_100, %c1_101, %c0_102, %c0_103] : memref<3x3x128x128xbf16, #tpu.memory_space<vmem>>, vector<1x1x128x128xbf16>
    %247 = vector.shape_cast %246 : vector<1x1x128x128xbf16> to vector<128x128xbf16>
    %c11 = arith.constant 11 : index
    %c0_104 = arith.constant 0 : index
    %248 = vector.load %arg20[%c11, %c0_104] : memref<25x768xf32, #tpu.memory_space<vmem>>, vector<1x128xf32>
    %249 = arith.truncf %245 : vector<2x128xf32> to vector<2x128xbf16>
    %cst_105 = arith.constant dense<0.000000e+00> : vector<2x128xf32>
    %250 = tpu.matmul %249, %247, %cst_105 {dimension_numbers = #tpu.dot_dimension_numbers<[1], [0], [0], [1], [0, 0, 1, 1], [], []>} : vector<2x128xbf16>, vector<128x128xbf16>, vector<2x128xf32> -> vector<2x128xf32>
    %251 = vector.broadcast %248 : vector<1x128xf32> to vector<2x128xf32>
    %252 = arith.addf %250, %251 : vector<2x128xf32>
    %253 = vector.extract_strided_slice %212 {offsets = [0, 0], sizes = [16, 128], strides = [1, 1]} : vector<16x768xf32> to vector<16x128xf32>
    %254 = vector.extract_strided_slice %212 {offsets = [0, 128], sizes = [16, 128], strides = [1, 1]} : vector<16x768xf32> to vector<16x128xf32>
    %c0_106 = arith.constant 0 : index
    %c2_107 = arith.constant 2 : index
    %c0_108 = arith.constant 0 : index
    %c0_109 = arith.constant 0 : index
    %255 = vector.load %arg12[%c0_106, %c2_107, %c0_108, %c0_109] : memref<3x3x128x128xbf16, #tpu.memory_space<vmem>>, vector<1x1x128x128xbf16>
    %256 = vector.shape_cast %255 : vector<1x1x128x128xbf16> to vector<128x128xbf16>
    %c12 = arith.constant 12 : index
    %c0_110 = arith.constant 0 : index
    %257 = vector.load %arg20[%c12, %c0_110] : memref<25x768xf32, #tpu.memory_space<vmem>>, vector<1x128xf32>
    %258 = vector.extract_strided_slice %252 {offsets = [0, 0], sizes = [2, 32], strides = [1, 1]} : vector<2x128xf32> to vector<2x32xf32>
    %259 = vector.extract_strided_slice %253 {offsets = [0, 0], sizes = [16, 32], strides = [1, 1]} : vector<16x128xf32> to vector<16x32xf32>
    "tpu.trace_start"() <{level = 10 : i32, message = "qd,kd->qk"}> : () -> ()
    %cst_111 = arith.constant dense<0.000000e+00> : vector<2x16xf32>
    %260 = tpu.matmul %258, %259, %cst_111 {dimension_numbers = #tpu.dot_dimension_numbers<[1], [1], [0], [0], [0, 0, 1, 0], [], []>} : vector<2x32xf32>, vector<16x32xf32>, vector<2x16xf32> -> vector<2x16xf32>
    "tpu.trace_stop"() : () -> ()
    %cst_112 = arith.constant 0.176776692 : f32
    %261 = vector.broadcast %cst_112 : f32 to vector<2x16xf32>
    %262 = arith.mulf %260, %261 : vector<2x16xf32>
    %263 = arith.addf %262, %213 : vector<2x16xf32>
    %cst_113 = arith.constant dense<0xFF800000> : vector<2xf32>
    %264 = vector.multi_reduction <maximumf>, %263, %cst_113 [1] : vector<2x16xf32> to vector<2xf32>
    %265 = vector.shape_cast %264 : vector<2xf32> to vector<2x1xf32>
    %266 = vector.broadcast %265 : vector<2x1xf32> to vector<2x16xf32>
    %267 = arith.subf %263, %266 : vector<2x16xf32>
    %268 = math.exp %267 : vector<2x16xf32>
    %cst_114 = arith.constant dense<0.000000e+00> : vector<2xf32>
    %269 = vector.multi_reduction <add>, %268, %cst_114 [1] : vector<2x16xf32> to vector<2xf32>
    %270 = vector.shape_cast %269 : vector<2xf32> to vector<2x1xf32>
    %271 = tpu.reciprocal %270 {approx = true} : vector<2x1xf32> -> vector<2x1xf32>
    %272 = vector.broadcast %271 : vector<2x1xf32> to vector<2x16xf32>
    %273 = arith.mulf %268, %272 : vector<2x16xf32>
    %274 = vector.extract_strided_slice %254 {offsets = [0, 0], sizes = [16, 32], strides = [1, 1]} : vector<16x128xf32> to vector<16x32xf32>
    %cst_115 = arith.constant dense<0.000000e+00> : vector<2x32xf32>
    %275 = tpu.matmul %273, %274, %cst_115 {dimension_numbers = #tpu.dot_dimension_numbers<[1], [0], [0], [1], [0, 0, 1, 1], [], []>} : vector<2x16xf32>, vector<16x32xf32>, vector<2x32xf32> -> vector<2x32xf32>
    %276 = arith.truncf %275 : vector<2x32xf32> to vector<2x32xbf16>
    %277 = vector.extract_strided_slice %256 {offsets = [0, 0], sizes = [32, 128], strides = [1, 1]} : vector<128x128xbf16> to vector<32x128xbf16>
    %cst_116 = arith.constant dense<0.000000e+00> : vector<2x128xf32>
    %278 = tpu.matmul %276, %277, %cst_116 {dimension_numbers = #tpu.dot_dimension_numbers<[1], [0], [0], [1], [0, 0, 1, 1], [], []>} : vector<2x32xbf16>, vector<32x128xbf16>, vector<2x128xf32> -> vector<2x128xf32>
    %279 = vector.extract_strided_slice %252 {offsets = [0, 32], sizes = [2, 32], strides = [1, 1]} : vector<2x128xf32> to vector<2x32xf32>
    %280 = vector.extract_strided_slice %253 {offsets = [0, 32], sizes = [16, 32], strides = [1, 1]} : vector<16x128xf32> to vector<16x32xf32>
    "tpu.trace_start"() <{level = 10 : i32, message = "qd,kd->qk"}> : () -> ()
    %cst_117 = arith.constant dense<0.000000e+00> : vector<2x16xf32>
    %281 = tpu.matmul %279, %280, %cst_117 {dimension_numbers = #tpu.dot_dimension_numbers<[1], [1], [0], [0], [0, 0, 1, 0], [], []>} : vector<2x32xf32>, vector<16x32xf32>, vector<2x16xf32> -> vector<2x16xf32>
    "tpu.trace_stop"() : () -> ()
    %cst_118 = arith.constant 0.176776692 : f32
    %282 = vector.broadcast %cst_118 : f32 to vector<2x16xf32>
    %283 = arith.mulf %281, %282 : vector<2x16xf32>
    %284 = arith.addf %283, %213 : vector<2x16xf32>
    %cst_119 = arith.constant dense<0xFF800000> : vector<2xf32>
    %285 = vector.multi_reduction <maximumf>, %284, %cst_119 [1] : vector<2x16xf32> to vector<2xf32>
    %286 = vector.shape_cast %285 : vector<2xf32> to vector<2x1xf32>
    %287 = vector.broadcast %286 : vector<2x1xf32> to vector<2x16xf32>
    %288 = arith.subf %284, %287 : vector<2x16xf32>
    %289 = math.exp %288 : vector<2x16xf32>
    %cst_120 = arith.constant dense<0.000000e+00> : vector<2xf32>
    %290 = vector.multi_reduction <add>, %289, %cst_120 [1] : vector<2x16xf32> to vector<2xf32>
    %291 = vector.shape_cast %290 : vector<2xf32> to vector<2x1xf32>
    %292 = tpu.reciprocal %291 {approx = true} : vector<2x1xf32> -> vector<2x1xf32>
    %293 = vector.broadcast %292 : vector<2x1xf32> to vector<2x16xf32>
    %294 = arith.mulf %289, %293 : vector<2x16xf32>
    %295 = vector.extract_strided_slice %254 {offsets = [0, 32], sizes = [16, 32], strides = [1, 1]} : vector<16x128xf32> to vector<16x32xf32>
    %cst_121 = arith.constant dense<0.000000e+00> : vector<2x32xf32>
    %296 = tpu.matmul %294, %295, %cst_121 {dimension_numbers = #tpu.dot_dimension_numbers<[1], [0], [0], [1], [0, 0, 1, 1], [], []>} : vector<2x16xf32>, vector<16x32xf32>, vector<2x32xf32> -> vector<2x32xf32>
    %297 = arith.truncf %296 : vector<2x32xf32> to vector<2x32xbf16>
    %298 = vector.extract_strided_slice %256 {offsets = [32, 0], sizes = [32, 128], strides = [1, 1]} : vector<128x128xbf16> to vector<32x128xbf16>
    %cst_122 = arith.constant dense<0.000000e+00> : vector<2x128xf32>
    %299 = tpu.matmul %297, %298, %cst_122 {dimension_numbers = #tpu.dot_dimension_numbers<[1], [0], [0], [1], [0, 0, 1, 1], [], []>} : vector<2x32xbf16>, vector<32x128xbf16>, vector<2x128xf32> -> vector<2x128xf32>
    %300 = arith.addf %278, %299 : vector<2x128xf32>
    %301 = vector.extract_strided_slice %252 {offsets = [0, 64], sizes = [2, 32], strides = [1, 1]} : vector<2x128xf32> to vector<2x32xf32>
    %302 = vector.extract_strided_slice %253 {offsets = [0, 64], sizes = [16, 32], strides = [1, 1]} : vector<16x128xf32> to vector<16x32xf32>
    "tpu.trace_start"() <{level = 10 : i32, message = "qd,kd->qk"}> : () -> ()
    %cst_123 = arith.constant dense<0.000000e+00> : vector<2x16xf32>
    %303 = tpu.matmul %301, %302, %cst_123 {dimension_numbers = #tpu.dot_dimension_numbers<[1], [1], [0], [0], [0, 0, 1, 0], [], []>} : vector<2x32xf32>, vector<16x32xf32>, vector<2x16xf32> -> vector<2x16xf32>
    "tpu.trace_stop"() : () -> ()
    %cst_124 = arith.constant 0.176776692 : f32
    %304 = vector.broadcast %cst_124 : f32 to vector<2x16xf32>
    %305 = arith.mulf %303, %304 : vector<2x16xf32>
    %306 = arith.addf %305, %213 : vector<2x16xf32>
    %cst_125 = arith.constant dense<0xFF800000> : vector<2xf32>
    %307 = vector.multi_reduction <maximumf>, %306, %cst_125 [1] : vector<2x16xf32> to vector<2xf32>
    %308 = vector.shape_cast %307 : vector<2xf32> to vector<2x1xf32>
    %309 = vector.broadcast %308 : vector<2x1xf32> to vector<2x16xf32>
    %310 = arith.subf %306, %309 : vector<2x16xf32>
    %311 = math.exp %310 : vector<2x16xf32>
    %cst_126 = arith.constant dense<0.000000e+00> : vector<2xf32>
    %312 = vector.multi_reduction <add>, %311, %cst_126 [1] : vector<2x16xf32> to vector<2xf32>
    %313 = vector.shape_cast %312 : vector<2xf32> to vector<2x1xf32>
    %314 = tpu.reciprocal %313 {approx = true} : vector<2x1xf32> -> vector<2x1xf32>
    %315 = vector.broadcast %314 : vector<2x1xf32> to vector<2x16xf32>
    %316 = arith.mulf %311, %315 : vector<2x16xf32>
    %317 = vector.extract_strided_slice %254 {offsets = [0, 64], sizes = [16, 32], strides = [1, 1]} : vector<16x128xf32> to vector<16x32xf32>
    %cst_127 = arith.constant dense<0.000000e+00> : vector<2x32xf32>
    %318 = tpu.matmul %316, %317, %cst_127 {dimension_numbers = #tpu.dot_dimension_numbers<[1], [0], [0], [1], [0, 0, 1, 1], [], []>} : vector<2x16xf32>, vector<16x32xf32>, vector<2x32xf32> -> vector<2x32xf32>
    %319 = arith.truncf %318 : vector<2x32xf32> to vector<2x32xbf16>
    %320 = vector.extract_strided_slice %256 {offsets = [64, 0], sizes = [32, 128], strides = [1, 1]} : vector<128x128xbf16> to vector<32x128xbf16>
    %cst_128 = arith.constant dense<0.000000e+00> : vector<2x128xf32>
    %321 = tpu.matmul %319, %320, %cst_128 {dimension_numbers = #tpu.dot_dimension_numbers<[1], [0], [0], [1], [0, 0, 1, 1], [], []>} : vector<2x32xbf16>, vector<32x128xbf16>, vector<2x128xf32> -> vector<2x128xf32>
    %322 = arith.addf %300, %321 : vector<2x128xf32>
    %323 = vector.extract_strided_slice %252 {offsets = [0, 96], sizes = [2, 32], strides = [1, 1]} : vector<2x128xf32> to vector<2x32xf32>
    %324 = vector.extract_strided_slice %253 {offsets = [0, 96], sizes = [16, 32], strides = [1, 1]} : vector<16x128xf32> to vector<16x32xf32>
    "tpu.trace_start"() <{level = 10 : i32, message = "qd,kd->qk"}> : () -> ()
    %cst_129 = arith.constant dense<0.000000e+00> : vector<2x16xf32>
    %325 = tpu.matmul %323, %324, %cst_129 {dimension_numbers = #tpu.dot_dimension_numbers<[1], [1], [0], [0], [0, 0, 1, 0], [], []>} : vector<2x32xf32>, vector<16x32xf32>, vector<2x16xf32> -> vector<2x16xf32>
    "tpu.trace_stop"() : () -> ()
    %cst_130 = arith.constant 0.176776692 : f32
    %326 = vector.broadcast %cst_130 : f32 to vector<2x16xf32>
    %327 = arith.mulf %325, %326 : vector<2x16xf32>
    %328 = arith.addf %327, %213 : vector<2x16xf32>
    %cst_131 = arith.constant dense<0xFF800000> : vector<2xf32>
    %329 = vector.multi_reduction <maximumf>, %328, %cst_131 [1] : vector<2x16xf32> to vector<2xf32>
    %330 = vector.shape_cast %329 : vector<2xf32> to vector<2x1xf32>
    %331 = vector.broadcast %330 : vector<2x1xf32> to vector<2x16xf32>
    %332 = arith.subf %328, %331 : vector<2x16xf32>
    %333 = math.exp %332 : vector<2x16xf32>
    %cst_132 = arith.constant dense<0.000000e+00> : vector<2xf32>
    %334 = vector.multi_reduction <add>, %333, %cst_132 [1] : vector<2x16xf32> to vector<2xf32>
    %335 = vector.shape_cast %334 : vector<2xf32> to vector<2x1xf32>
    %336 = tpu.reciprocal %335 {approx = true} : vector<2x1xf32> -> vector<2x1xf32>
    %337 = vector.broadcast %336 : vector<2x1xf32> to vector<2x16xf32>
    %338 = arith.mulf %333, %337 : vector<2x16xf32>
    %339 = vector.extract_strided_slice %254 {offsets = [0, 96], sizes = [16, 32], strides = [1, 1]} : vector<16x128xf32> to vector<16x32xf32>
    %cst_133 = arith.constant dense<0.000000e+00> : vector<2x32xf32>
    %340 = tpu.matmul %338, %339, %cst_133 {dimension_numbers = #tpu.dot_dimension_numbers<[1], [0], [0], [1], [0, 0, 1, 1], [], []>} : vector<2x16xf32>, vector<16x32xf32>, vector<2x32xf32> -> vector<2x32xf32>
    %341 = arith.truncf %340 : vector<2x32xf32> to vector<2x32xbf16>
    %342 = vector.extract_strided_slice %256 {offsets = [96, 0], sizes = [32, 128], strides = [1, 1]} : vector<128x128xbf16> to vector<32x128xbf16>
    %cst_134 = arith.constant dense<0.000000e+00> : vector<2x128xf32>
    %343 = tpu.matmul %341, %342, %cst_134 {dimension_numbers = #tpu.dot_dimension_numbers<[1], [0], [0], [1], [0, 0, 1, 1], [], []>} : vector<2x32xbf16>, vector<32x128xbf16>, vector<2x128xf32> -> vector<2x128xf32>
    %344 = arith.addf %322, %343 : vector<2x128xf32>
    %345 = vector.broadcast %257 : vector<1x128xf32> to vector<2x128xf32>
    %346 = arith.addf %344, %345 : vector<2x128xf32>
    %347 = arith.addf %245, %346 : vector<2x128xf32>
    %c8 = arith.constant 8 : index
    %c0_135 = arith.constant 0 : index
    %348 = vector.load %arg19[%c8, %c0_135] : memref<24x128xf32, #tpu.memory_space<vmem>>, vector<1x128xf32>
    %c9 = arith.constant 9 : index
    %c0_136 = arith.constant 0 : index
    %349 = vector.load %arg19[%c9, %c0_136] : memref<24x128xf32, #tpu.memory_space<vmem>>, vector<1x128xf32>
    %cst_137 = arith.constant dense<0.000000e+00> : vector<2xf32>
    %350 = vector.multi_reduction <add>, %347, %cst_137 [1] : vector<2x128xf32> to vector<2xf32>
    %351 = vector.shape_cast %350 : vector<2xf32> to vector<2x1xf32>
    %cst_138 = arith.constant 1.280000e+02 : f32
    %352 = vector.broadcast %cst_138 : f32 to vector<2x1xf32>
    %353 = arith.divf %351, %352 : vector<2x1xf32>
    %354 = vector.broadcast %353 : vector<2x1xf32> to vector<2x128xf32>
    %355 = arith.subf %347, %354 : vector<2x128xf32>
    %356 = arith.mulf %355, %355 : vector<2x128xf32>
    %cst_139 = arith.constant dense<0.000000e+00> : vector<2xf32>
    %357 = vector.multi_reduction <add>, %356, %cst_139 [1] : vector<2x128xf32> to vector<2xf32>
    %358 = vector.shape_cast %357 : vector<2xf32> to vector<2x1xf32>
    %cst_140 = arith.constant 1.280000e+02 : f32
    %359 = vector.broadcast %cst_140 : f32 to vector<2x1xf32>
    %360 = arith.divf %358, %359 : vector<2x1xf32>
    %361 = vector.broadcast %353 : vector<2x1xf32> to vector<2x128xf32>
    %362 = arith.subf %347, %361 : vector<2x128xf32>
    %cst_141 = arith.constant 9.99999974E-6 : f32
    %363 = vector.broadcast %cst_141 : f32 to vector<2x1xf32>
    %364 = arith.addf %360, %363 : vector<2x1xf32>
    %365 = math.rsqrt %364 : vector<2x1xf32>
    %366 = vector.broadcast %365 : vector<2x1xf32> to vector<2x128xf32>
    %367 = arith.mulf %362, %366 : vector<2x128xf32>
    %368 = vector.broadcast %348 : vector<1x128xf32> to vector<2x128xf32>
    %369 = arith.mulf %367, %368 : vector<2x128xf32>
    %370 = vector.broadcast %349 : vector<1x128xf32> to vector<2x128xf32>
    %371 = arith.addf %369, %370 : vector<2x128xf32>
    %c0_142 = arith.constant 0 : index
    %c0_143 = arith.constant 0 : index
    %c0_144 = arith.constant 0 : index
    %372 = vector.load %arg14[%c0_142, %c0_143, %c0_144] : memref<3x128x256xbf16, #tpu.memory_space<vmem>>, vector<1x128x256xbf16>
    %373 = vector.shape_cast %372 : vector<1x128x256xbf16> to vector<128x256xbf16>
    %c13 = arith.constant 13 : index
    %c0_145 = arith.constant 0 : index
    %374 = vector.load %arg20[%c13, %c0_145] : memref<25x768xf32, #tpu.memory_space<vmem>>, vector<1x256xf32>
    %375 = arith.truncf %371 : vector<2x128xf32> to vector<2x128xbf16>
    %cst_146 = arith.constant dense<0.000000e+00> : vector<2x256xf32>
    %376 = tpu.matmul %375, %373, %cst_146 {dimension_numbers = #tpu.dot_dimension_numbers<[1], [0], [0], [1], [0, 0, 1, 1], [], []>} : vector<2x128xbf16>, vector<128x256xbf16>, vector<2x256xf32> -> vector<2x256xf32>
    %377 = vector.broadcast %374 : vector<1x256xf32> to vector<2x256xf32>
    %378 = arith.addf %376, %377 : vector<2x256xf32>
    %cst_147 = arith.constant 0.000000e+00 : f32
    %379 = vector.broadcast %cst_147 : f32 to vector<2x256xf32>
    %380 = arith.maximumf %378, %379 : vector<2x256xf32>
    %c0_148 = arith.constant 0 : index
    %c0_149 = arith.constant 0 : index
    %c0_150 = arith.constant 0 : index
    %381 = vector.load %arg15[%c0_148, %c0_149, %c0_150] : memref<3x256x128xbf16, #tpu.memory_space<vmem>>, vector<1x256x128xbf16>
    %382 = vector.shape_cast %381 : vector<1x256x128xbf16> to vector<256x128xbf16>
    %c14 = arith.constant 14 : index
    %c0_151 = arith.constant 0 : index
    %383 = vector.load %arg20[%c14, %c0_151] : memref<25x768xf32, #tpu.memory_space<vmem>>, vector<1x128xf32>
    %384 = arith.truncf %380 : vector<2x256xf32> to vector<2x256xbf16>
    %cst_152 = arith.constant dense<0.000000e+00> : vector<2x128xf32>
    %385 = tpu.matmul %384, %382, %cst_152 {dimension_numbers = #tpu.dot_dimension_numbers<[1], [0], [0], [1], [0, 0, 1, 1], [], []>} : vector<2x256xbf16>, vector<256x128xbf16>, vector<2x128xf32> -> vector<2x128xf32>
    %386 = vector.broadcast %383 : vector<1x128xf32> to vector<2x128xf32>
    %387 = arith.addf %385, %386 : vector<2x128xf32>
    %388 = arith.addf %371, %387 : vector<2x128xf32>
    %c10_153 = arith.constant 10 : index
    %c0_154 = arith.constant 0 : index
    %389 = vector.load %arg19[%c10_153, %c0_154] : memref<24x128xf32, #tpu.memory_space<vmem>>, vector<1x128xf32>
    %c11_155 = arith.constant 11 : index
    %c0_156 = arith.constant 0 : index
    %390 = vector.load %arg19[%c11_155, %c0_156] : memref<24x128xf32, #tpu.memory_space<vmem>>, vector<1x128xf32>
    %cst_157 = arith.constant dense<0.000000e+00> : vector<2xf32>
    %391 = vector.multi_reduction <add>, %388, %cst_157 [1] : vector<2x128xf32> to vector<2xf32>
    %392 = vector.shape_cast %391 : vector<2xf32> to vector<2x1xf32>
    %cst_158 = arith.constant 1.280000e+02 : f32
    %393 = vector.broadcast %cst_158 : f32 to vector<2x1xf32>
    %394 = arith.divf %392, %393 : vector<2x1xf32>
    %395 = vector.broadcast %394 : vector<2x1xf32> to vector<2x128xf32>
    %396 = arith.subf %388, %395 : vector<2x128xf32>
    %397 = arith.mulf %396, %396 : vector<2x128xf32>
    %cst_159 = arith.constant dense<0.000000e+00> : vector<2xf32>
    %398 = vector.multi_reduction <add>, %397, %cst_159 [1] : vector<2x128xf32> to vector<2xf32>
    %399 = vector.shape_cast %398 : vector<2xf32> to vector<2x1xf32>
    %cst_160 = arith.constant 1.280000e+02 : f32
    %400 = vector.broadcast %cst_160 : f32 to vector<2x1xf32>
    %401 = arith.divf %399, %400 : vector<2x1xf32>
    %402 = vector.broadcast %394 : vector<2x1xf32> to vector<2x128xf32>
    %403 = arith.subf %388, %402 : vector<2x128xf32>
    %cst_161 = arith.constant 9.99999974E-6 : f32
    %404 = vector.broadcast %cst_161 : f32 to vector<2x1xf32>
    %405 = arith.addf %401, %404 : vector<2x1xf32>
    %406 = math.rsqrt %405 : vector<2x1xf32>
    %407 = vector.broadcast %406 : vector<2x1xf32> to vector<2x128xf32>
    %408 = arith.mulf %403, %407 : vector<2x128xf32>
    %409 = vector.broadcast %389 : vector<1x128xf32> to vector<2x128xf32>
    %410 = arith.mulf %408, %409 : vector<2x128xf32>
    %411 = vector.broadcast %390 : vector<1x128xf32> to vector<2x128xf32>
    %412 = arith.addf %410, %411 : vector<2x128xf32>
    %c1_162 = arith.constant 1 : index
    %c0_163 = arith.constant 0 : index
    %c0_164 = arith.constant 0 : index
    %c0_165 = arith.constant 0 : index
    %413 = vector.load %arg12[%c1_162, %c0_163, %c0_164, %c0_165] : memref<3x3x128x128xbf16, #tpu.memory_space<vmem>>, vector<1x1x128x128xbf16>
    %414 = vector.shape_cast %413 : vector<1x1x128x128xbf16> to vector<128x128xbf16>
    %c15 = arith.constant 15 : index
    %c0_166 = arith.constant 0 : index
    %415 = vector.load %arg20[%c15, %c0_166] : memref<25x768xf32, #tpu.memory_space<vmem>>, vector<1x128xf32>
    %416 = arith.truncf %412 : vector<2x128xf32> to vector<2x128xbf16>
    %cst_167 = arith.constant dense<0.000000e+00> : vector<2x128xf32>
    %417 = tpu.matmul %416, %414, %cst_167 {dimension_numbers = #tpu.dot_dimension_numbers<[1], [0], [0], [1], [0, 0, 1, 1], [], []>} : vector<2x128xbf16>, vector<128x128xbf16>, vector<2x128xf32> -> vector<2x128xf32>
    %418 = vector.broadcast %415 : vector<1x128xf32> to vector<2x128xf32>
    %419 = arith.addf %417, %418 : vector<2x128xf32>
    %420 = arith.addf %412, %419 : vector<2x128xf32>
    %c12_168 = arith.constant 12 : index
    %c0_169 = arith.constant 0 : index
    %421 = vector.load %arg19[%c12_168, %c0_169] : memref<24x128xf32, #tpu.memory_space<vmem>>, vector<1x128xf32>
    %c13_170 = arith.constant 13 : index
    %c0_171 = arith.constant 0 : index
    %422 = vector.load %arg19[%c13_170, %c0_171] : memref<24x128xf32, #tpu.memory_space<vmem>>, vector<1x128xf32>
    %cst_172 = arith.constant dense<0.000000e+00> : vector<2xf32>
    %423 = vector.multi_reduction <add>, %420, %cst_172 [1] : vector<2x128xf32> to vector<2xf32>
    %424 = vector.shape_cast %423 : vector<2xf32> to vector<2x1xf32>
    %cst_173 = arith.constant 1.280000e+02 : f32
    %425 = vector.broadcast %cst_173 : f32 to vector<2x1xf32>
    %426 = arith.divf %424, %425 : vector<2x1xf32>
    %427 = vector.broadcast %426 : vector<2x1xf32> to vector<2x128xf32>
    %428 = arith.subf %420, %427 : vector<2x128xf32>
    %429 = arith.mulf %428, %428 : vector<2x128xf32>
    %cst_174 = arith.constant dense<0.000000e+00> : vector<2xf32>
    %430 = vector.multi_reduction <add>, %429, %cst_174 [1] : vector<2x128xf32> to vector<2xf32>
    %431 = vector.shape_cast %430 : vector<2xf32> to vector<2x1xf32>
    %cst_175 = arith.constant 1.280000e+02 : f32
    %432 = vector.broadcast %cst_175 : f32 to vector<2x1xf32>
    %433 = arith.divf %431, %432 : vector<2x1xf32>
    %434 = vector.broadcast %426 : vector<2x1xf32> to vector<2x128xf32>
    %435 = arith.subf %420, %434 : vector<2x128xf32>
    %cst_176 = arith.constant 9.99999974E-6 : f32
    %436 = vector.broadcast %cst_176 : f32 to vector<2x1xf32>
    %437 = arith.addf %433, %436 : vector<2x1xf32>
    %438 = math.rsqrt %437 : vector<2x1xf32>
    %439 = vector.broadcast %438 : vector<2x1xf32> to vector<2x128xf32>
    %440 = arith.mulf %435, %439 : vector<2x128xf32>
    %441 = vector.broadcast %421 : vector<1x128xf32> to vector<2x128xf32>
    %442 = arith.mulf %440, %441 : vector<2x128xf32>
    %443 = vector.broadcast %422 : vector<1x128xf32> to vector<2x128xf32>
    %444 = arith.addf %442, %443 : vector<2x128xf32>
    %c1_177 = arith.constant 1 : index
    %c1_178 = arith.constant 1 : index
    %c0_179 = arith.constant 0 : index
    %c0_180 = arith.constant 0 : index
    %445 = vector.load %arg12[%c1_177, %c1_178, %c0_179, %c0_180] : memref<3x3x128x128xbf16, #tpu.memory_space<vmem>>, vector<1x1x128x128xbf16>
    %446 = vector.shape_cast %445 : vector<1x1x128x128xbf16> to vector<128x128xbf16>
    %c16 = arith.constant 16 : index
    %c0_181 = arith.constant 0 : index
    %447 = vector.load %arg20[%c16, %c0_181] : memref<25x768xf32, #tpu.memory_space<vmem>>, vector<1x128xf32>
    %448 = arith.truncf %444 : vector<2x128xf32> to vector<2x128xbf16>
    %cst_182 = arith.constant dense<0.000000e+00> : vector<2x128xf32>
    %449 = tpu.matmul %448, %446, %cst_182 {dimension_numbers = #tpu.dot_dimension_numbers<[1], [0], [0], [1], [0, 0, 1, 1], [], []>} : vector<2x128xbf16>, vector<128x128xbf16>, vector<2x128xf32> -> vector<2x128xf32>
    %450 = vector.broadcast %447 : vector<1x128xf32> to vector<2x128xf32>
    %451 = arith.addf %449, %450 : vector<2x128xf32>
    %452 = vector.extract_strided_slice %212 {offsets = [0, 256], sizes = [16, 128], strides = [1, 1]} : vector<16x768xf32> to vector<16x128xf32>
    %453 = vector.extract_strided_slice %212 {offsets = [0, 384], sizes = [16, 128], strides = [1, 1]} : vector<16x768xf32> to vector<16x128xf32>
    %c1_183 = arith.constant 1 : index
    %c2_184 = arith.constant 2 : index
    %c0_185 = arith.constant 0 : index
    %c0_186 = arith.constant 0 : index
    %454 = vector.load %arg12[%c1_183, %c2_184, %c0_185, %c0_186] : memref<3x3x128x128xbf16, #tpu.memory_space<vmem>>, vector<1x1x128x128xbf16>
    %455 = vector.shape_cast %454 : vector<1x1x128x128xbf16> to vector<128x128xbf16>
    %c17 = arith.constant 17 : index
    %c0_187 = arith.constant 0 : index
    %456 = vector.load %arg20[%c17, %c0_187] : memref<25x768xf32, #tpu.memory_space<vmem>>, vector<1x128xf32>
    %457 = vector.extract_strided_slice %451 {offsets = [0, 0], sizes = [2, 32], strides = [1, 1]} : vector<2x128xf32> to vector<2x32xf32>
    %458 = vector.extract_strided_slice %452 {offsets = [0, 0], sizes = [16, 32], strides = [1, 1]} : vector<16x128xf32> to vector<16x32xf32>
    "tpu.trace_start"() <{level = 10 : i32, message = "qd,kd->qk"}> : () -> ()
    %cst_188 = arith.constant dense<0.000000e+00> : vector<2x16xf32>
    %459 = tpu.matmul %457, %458, %cst_188 {dimension_numbers = #tpu.dot_dimension_numbers<[1], [1], [0], [0], [0, 0, 1, 0], [], []>} : vector<2x32xf32>, vector<16x32xf32>, vector<2x16xf32> -> vector<2x16xf32>
    "tpu.trace_stop"() : () -> ()
    %cst_189 = arith.constant 0.176776692 : f32
    %460 = vector.broadcast %cst_189 : f32 to vector<2x16xf32>
    %461 = arith.mulf %459, %460 : vector<2x16xf32>
    %462 = arith.addf %461, %213 : vector<2x16xf32>
    %cst_190 = arith.constant dense<0xFF800000> : vector<2xf32>
    %463 = vector.multi_reduction <maximumf>, %462, %cst_190 [1] : vector<2x16xf32> to vector<2xf32>
    %464 = vector.shape_cast %463 : vector<2xf32> to vector<2x1xf32>
    %465 = vector.broadcast %464 : vector<2x1xf32> to vector<2x16xf32>
    %466 = arith.subf %462, %465 : vector<2x16xf32>
    %467 = math.exp %466 : vector<2x16xf32>
    %cst_191 = arith.constant dense<0.000000e+00> : vector<2xf32>
    %468 = vector.multi_reduction <add>, %467, %cst_191 [1] : vector<2x16xf32> to vector<2xf32>
    %469 = vector.shape_cast %468 : vector<2xf32> to vector<2x1xf32>
    %470 = tpu.reciprocal %469 {approx = true} : vector<2x1xf32> -> vector<2x1xf32>
    %471 = vector.broadcast %470 : vector<2x1xf32> to vector<2x16xf32>
    %472 = arith.mulf %467, %471 : vector<2x16xf32>
    %473 = vector.extract_strided_slice %453 {offsets = [0, 0], sizes = [16, 32], strides = [1, 1]} : vector<16x128xf32> to vector<16x32xf32>
    %cst_192 = arith.constant dense<0.000000e+00> : vector<2x32xf32>
    %474 = tpu.matmul %472, %473, %cst_192 {dimension_numbers = #tpu.dot_dimension_numbers<[1], [0], [0], [1], [0, 0, 1, 1], [], []>} : vector<2x16xf32>, vector<16x32xf32>, vector<2x32xf32> -> vector<2x32xf32>
    %475 = arith.truncf %474 : vector<2x32xf32> to vector<2x32xbf16>
    %476 = vector.extract_strided_slice %455 {offsets = [0, 0], sizes = [32, 128], strides = [1, 1]} : vector<128x128xbf16> to vector<32x128xbf16>
    %cst_193 = arith.constant dense<0.000000e+00> : vector<2x128xf32>
    %477 = tpu.matmul %475, %476, %cst_193 {dimension_numbers = #tpu.dot_dimension_numbers<[1], [0], [0], [1], [0, 0, 1, 1], [], []>} : vector<2x32xbf16>, vector<32x128xbf16>, vector<2x128xf32> -> vector<2x128xf32>
    %478 = vector.extract_strided_slice %451 {offsets = [0, 32], sizes = [2, 32], strides = [1, 1]} : vector<2x128xf32> to vector<2x32xf32>
    %479 = vector.extract_strided_slice %452 {offsets = [0, 32], sizes = [16, 32], strides = [1, 1]} : vector<16x128xf32> to vector<16x32xf32>
    "tpu.trace_start"() <{level = 10 : i32, message = "qd,kd->qk"}> : () -> ()
    %cst_194 = arith.constant dense<0.000000e+00> : vector<2x16xf32>
    %480 = tpu.matmul %478, %479, %cst_194 {dimension_numbers = #tpu.dot_dimension_numbers<[1], [1], [0], [0], [0, 0, 1, 0], [], []>} : vector<2x32xf32>, vector<16x32xf32>, vector<2x16xf32> -> vector<2x16xf32>
    "tpu.trace_stop"() : () -> ()
    %cst_195 = arith.constant 0.176776692 : f32
    %481 = vector.broadcast %cst_195 : f32 to vector<2x16xf32>
    %482 = arith.mulf %480, %481 : vector<2x16xf32>
    %483 = arith.addf %482, %213 : vector<2x16xf32>
    %cst_196 = arith.constant dense<0xFF800000> : vector<2xf32>
    %484 = vector.multi_reduction <maximumf>, %483, %cst_196 [1] : vector<2x16xf32> to vector<2xf32>
    %485 = vector.shape_cast %484 : vector<2xf32> to vector<2x1xf32>
    %486 = vector.broadcast %485 : vector<2x1xf32> to vector<2x16xf32>
    %487 = arith.subf %483, %486 : vector<2x16xf32>
    %488 = math.exp %487 : vector<2x16xf32>
    %cst_197 = arith.constant dense<0.000000e+00> : vector<2xf32>
    %489 = vector.multi_reduction <add>, %488, %cst_197 [1] : vector<2x16xf32> to vector<2xf32>
    %490 = vector.shape_cast %489 : vector<2xf32> to vector<2x1xf32>
    %491 = tpu.reciprocal %490 {approx = true} : vector<2x1xf32> -> vector<2x1xf32>
    %492 = vector.broadcast %491 : vector<2x1xf32> to vector<2x16xf32>
    %493 = arith.mulf %488, %492 : vector<2x16xf32>
    %494 = vector.extract_strided_slice %453 {offsets = [0, 32], sizes = [16, 32], strides = [1, 1]} : vector<16x128xf32> to vector<16x32xf32>
    %cst_198 = arith.constant dense<0.000000e+00> : vector<2x32xf32>
    %495 = tpu.matmul %493, %494, %cst_198 {dimension_numbers = #tpu.dot_dimension_numbers<[1], [0], [0], [1], [0, 0, 1, 1], [], []>} : vector<2x16xf32>, vector<16x32xf32>, vector<2x32xf32> -> vector<2x32xf32>
    %496 = arith.truncf %495 : vector<2x32xf32> to vector<2x32xbf16>
    %497 = vector.extract_strided_slice %455 {offsets = [32, 0], sizes = [32, 128], strides = [1, 1]} : vector<128x128xbf16> to vector<32x128xbf16>
    %cst_199 = arith.constant dense<0.000000e+00> : vector<2x128xf32>
    %498 = tpu.matmul %496, %497, %cst_199 {dimension_numbers = #tpu.dot_dimension_numbers<[1], [0], [0], [1], [0, 0, 1, 1], [], []>} : vector<2x32xbf16>, vector<32x128xbf16>, vector<2x128xf32> -> vector<2x128xf32>
    %499 = arith.addf %477, %498 : vector<2x128xf32>
    %500 = vector.extract_strided_slice %451 {offsets = [0, 64], sizes = [2, 32], strides = [1, 1]} : vector<2x128xf32> to vector<2x32xf32>
    %501 = vector.extract_strided_slice %452 {offsets = [0, 64], sizes = [16, 32], strides = [1, 1]} : vector<16x128xf32> to vector<16x32xf32>
    "tpu.trace_start"() <{level = 10 : i32, message = "qd,kd->qk"}> : () -> ()
    %cst_200 = arith.constant dense<0.000000e+00> : vector<2x16xf32>
    %502 = tpu.matmul %500, %501, %cst_200 {dimension_numbers = #tpu.dot_dimension_numbers<[1], [1], [0], [0], [0, 0, 1, 0], [], []>} : vector<2x32xf32>, vector<16x32xf32>, vector<2x16xf32> -> vector<2x16xf32>
    "tpu.trace_stop"() : () -> ()
    %cst_201 = arith.constant 0.176776692 : f32
    %503 = vector.broadcast %cst_201 : f32 to vector<2x16xf32>
    %504 = arith.mulf %502, %503 : vector<2x16xf32>
    %505 = arith.addf %504, %213 : vector<2x16xf32>
    %cst_202 = arith.constant dense<0xFF800000> : vector<2xf32>
    %506 = vector.multi_reduction <maximumf>, %505, %cst_202 [1] : vector<2x16xf32> to vector<2xf32>
    %507 = vector.shape_cast %506 : vector<2xf32> to vector<2x1xf32>
    %508 = vector.broadcast %507 : vector<2x1xf32> to vector<2x16xf32>
    %509 = arith.subf %505, %508 : vector<2x16xf32>
    %510 = math.exp %509 : vector<2x16xf32>
    %cst_203 = arith.constant dense<0.000000e+00> : vector<2xf32>
    %511 = vector.multi_reduction <add>, %510, %cst_203 [1] : vector<2x16xf32> to vector<2xf32>
    %512 = vector.shape_cast %511 : vector<2xf32> to vector<2x1xf32>
    %513 = tpu.reciprocal %512 {approx = true} : vector<2x1xf32> -> vector<2x1xf32>
    %514 = vector.broadcast %513 : vector<2x1xf32> to vector<2x16xf32>
    %515 = arith.mulf %510, %514 : vector<2x16xf32>
    %516 = vector.extract_strided_slice %453 {offsets = [0, 64], sizes = [16, 32], strides = [1, 1]} : vector<16x128xf32> to vector<16x32xf32>
    %cst_204 = arith.constant dense<0.000000e+00> : vector<2x32xf32>
    %517 = tpu.matmul %515, %516, %cst_204 {dimension_numbers = #tpu.dot_dimension_numbers<[1], [0], [0], [1], [0, 0, 1, 1], [], []>} : vector<2x16xf32>, vector<16x32xf32>, vector<2x32xf32> -> vector<2x32xf32>
    %518 = arith.truncf %517 : vector<2x32xf32> to vector<2x32xbf16>
    %519 = vector.extract_strided_slice %455 {offsets = [64, 0], sizes = [32, 128], strides = [1, 1]} : vector<128x128xbf16> to vector<32x128xbf16>
    %cst_205 = arith.constant dense<0.000000e+00> : vector<2x128xf32>
    %520 = tpu.matmul %518, %519, %cst_205 {dimension_numbers = #tpu.dot_dimension_numbers<[1], [0], [0], [1], [0, 0, 1, 1], [], []>} : vector<2x32xbf16>, vector<32x128xbf16>, vector<2x128xf32> -> vector<2x128xf32>
    %521 = arith.addf %499, %520 : vector<2x128xf32>
    %522 = vector.extract_strided_slice %451 {offsets = [0, 96], sizes = [2, 32], strides = [1, 1]} : vector<2x128xf32> to vector<2x32xf32>
    %523 = vector.extract_strided_slice %452 {offsets = [0, 96], sizes = [16, 32], strides = [1, 1]} : vector<16x128xf32> to vector<16x32xf32>
    "tpu.trace_start"() <{level = 10 : i32, message = "qd,kd->qk"}> : () -> ()
    %cst_206 = arith.constant dense<0.000000e+00> : vector<2x16xf32>
    %524 = tpu.matmul %522, %523, %cst_206 {dimension_numbers = #tpu.dot_dimension_numbers<[1], [1], [0], [0], [0, 0, 1, 0], [], []>} : vector<2x32xf32>, vector<16x32xf32>, vector<2x16xf32> -> vector<2x16xf32>
    "tpu.trace_stop"() : () -> ()
    %cst_207 = arith.constant 0.176776692 : f32
    %525 = vector.broadcast %cst_207 : f32 to vector<2x16xf32>
    %526 = arith.mulf %524, %525 : vector<2x16xf32>
    %527 = arith.addf %526, %213 : vector<2x16xf32>
    %cst_208 = arith.constant dense<0xFF800000> : vector<2xf32>
    %528 = vector.multi_reduction <maximumf>, %527, %cst_208 [1] : vector<2x16xf32> to vector<2xf32>
    %529 = vector.shape_cast %528 : vector<2xf32> to vector<2x1xf32>
    %530 = vector.broadcast %529 : vector<2x1xf32> to vector<2x16xf32>
    %531 = arith.subf %527, %530 : vector<2x16xf32>
    %532 = math.exp %531 : vector<2x16xf32>
    %cst_209 = arith.constant dense<0.000000e+00> : vector<2xf32>
    %533 = vector.multi_reduction <add>, %532, %cst_209 [1] : vector<2x16xf32> to vector<2xf32>
    %534 = vector.shape_cast %533 : vector<2xf32> to vector<2x1xf32>
    %535 = tpu.reciprocal %534 {approx = true} : vector<2x1xf32> -> vector<2x1xf32>
    %536 = vector.broadcast %535 : vector<2x1xf32> to vector<2x16xf32>
    %537 = arith.mulf %532, %536 : vector<2x16xf32>
    %538 = vector.extract_strided_slice %453 {offsets = [0, 96], sizes = [16, 32], strides = [1, 1]} : vector<16x128xf32> to vector<16x32xf32>
    %cst_210 = arith.constant dense<0.000000e+00> : vector<2x32xf32>
    %539 = tpu.matmul %537, %538, %cst_210 {dimension_numbers = #tpu.dot_dimension_numbers<[1], [0], [0], [1], [0, 0, 1, 1], [], []>} : vector<2x16xf32>, vector<16x32xf32>, vector<2x32xf32> -> vector<2x32xf32>
    %540 = arith.truncf %539 : vector<2x32xf32> to vector<2x32xbf16>
    %541 = vector.extract_strided_slice %455 {offsets = [96, 0], sizes = [32, 128], strides = [1, 1]} : vector<128x128xbf16> to vector<32x128xbf16>
    %cst_211 = arith.constant dense<0.000000e+00> : vector<2x128xf32>
    %542 = tpu.matmul %540, %541, %cst_211 {dimension_numbers = #tpu.dot_dimension_numbers<[1], [0], [0], [1], [0, 0, 1, 1], [], []>} : vector<2x32xbf16>, vector<32x128xbf16>, vector<2x128xf32> -> vector<2x128xf32>
    %543 = arith.addf %521, %542 : vector<2x128xf32>
    %544 = vector.broadcast %456 : vector<1x128xf32> to vector<2x128xf32>
    %545 = arith.addf %543, %544 : vector<2x128xf32>
    %546 = arith.addf %444, %545 : vector<2x128xf32>
    %c14_212 = arith.constant 14 : index
    %c0_213 = arith.constant 0 : index
    %547 = vector.load %arg19[%c14_212, %c0_213] : memref<24x128xf32, #tpu.memory_space<vmem>>, vector<1x128xf32>
    %c15_214 = arith.constant 15 : index
    %c0_215 = arith.constant 0 : index
    %548 = vector.load %arg19[%c15_214, %c0_215] : memref<24x128xf32, #tpu.memory_space<vmem>>, vector<1x128xf32>
    %cst_216 = arith.constant dense<0.000000e+00> : vector<2xf32>
    %549 = vector.multi_reduction <add>, %546, %cst_216 [1] : vector<2x128xf32> to vector<2xf32>
    %550 = vector.shape_cast %549 : vector<2xf32> to vector<2x1xf32>
    %cst_217 = arith.constant 1.280000e+02 : f32
    %551 = vector.broadcast %cst_217 : f32 to vector<2x1xf32>
    %552 = arith.divf %550, %551 : vector<2x1xf32>
    %553 = vector.broadcast %552 : vector<2x1xf32> to vector<2x128xf32>
    %554 = arith.subf %546, %553 : vector<2x128xf32>
    %555 = arith.mulf %554, %554 : vector<2x128xf32>
    %cst_218 = arith.constant dense<0.000000e+00> : vector<2xf32>
    %556 = vector.multi_reduction <add>, %555, %cst_218 [1] : vector<2x128xf32> to vector<2xf32>
    %557 = vector.shape_cast %556 : vector<2xf32> to vector<2x1xf32>
    %cst_219 = arith.constant 1.280000e+02 : f32
    %558 = vector.broadcast %cst_219 : f32 to vector<2x1xf32>
    %559 = arith.divf %557, %558 : vector<2x1xf32>
    %560 = vector.broadcast %552 : vector<2x1xf32> to vector<2x128xf32>
    %561 = arith.subf %546, %560 : vector<2x128xf32>
    %cst_220 = arith.constant 9.99999974E-6 : f32
    %562 = vector.broadcast %cst_220 : f32 to vector<2x1xf32>
    %563 = arith.addf %559, %562 : vector<2x1xf32>
    %564 = math.rsqrt %563 : vector<2x1xf32>
    %565 = vector.broadcast %564 : vector<2x1xf32> to vector<2x128xf32>
    %566 = arith.mulf %561, %565 : vector<2x128xf32>
    %567 = vector.broadcast %547 : vector<1x128xf32> to vector<2x128xf32>
    %568 = arith.mulf %566, %567 : vector<2x128xf32>
    %569 = vector.broadcast %548 : vector<1x128xf32> to vector<2x128xf32>
    %570 = arith.addf %568, %569 : vector<2x128xf32>
    %c1_221 = arith.constant 1 : index
    %c0_222 = arith.constant 0 : index
    %c0_223 = arith.constant 0 : index
    %571 = vector.load %arg14[%c1_221, %c0_222, %c0_223] : memref<3x128x256xbf16, #tpu.memory_space<vmem>>, vector<1x128x256xbf16>
    %572 = vector.shape_cast %571 : vector<1x128x256xbf16> to vector<128x256xbf16>
    %c18 = arith.constant 18 : index
    %c0_224 = arith.constant 0 : index
    %573 = vector.load %arg20[%c18, %c0_224] : memref<25x768xf32, #tpu.memory_space<vmem>>, vector<1x256xf32>
    %574 = arith.truncf %570 : vector<2x128xf32> to vector<2x128xbf16>
    %cst_225 = arith.constant dense<0.000000e+00> : vector<2x256xf32>
    %575 = tpu.matmul %574, %572, %cst_225 {dimension_numbers = #tpu.dot_dimension_numbers<[1], [0], [0], [1], [0, 0, 1, 1], [], []>} : vector<2x128xbf16>, vector<128x256xbf16>, vector<2x256xf32> -> vector<2x256xf32>
    %576 = vector.broadcast %573 : vector<1x256xf32> to vector<2x256xf32>
    %577 = arith.addf %575, %576 : vector<2x256xf32>
    %cst_226 = arith.constant 0.000000e+00 : f32
    %578 = vector.broadcast %cst_226 : f32 to vector<2x256xf32>
    %579 = arith.maximumf %577, %578 : vector<2x256xf32>
    %c1_227 = arith.constant 1 : index
    %c0_228 = arith.constant 0 : index
    %c0_229 = arith.constant 0 : index
    %580 = vector.load %arg15[%c1_227, %c0_228, %c0_229] : memref<3x256x128xbf16, #tpu.memory_space<vmem>>, vector<1x256x128xbf16>
    %581 = vector.shape_cast %580 : vector<1x256x128xbf16> to vector<256x128xbf16>
    %c19 = arith.constant 19 : index
    %c0_230 = arith.constant 0 : index
    %582 = vector.load %arg20[%c19, %c0_230] : memref<25x768xf32, #tpu.memory_space<vmem>>, vector<1x128xf32>
    %583 = arith.truncf %579 : vector<2x256xf32> to vector<2x256xbf16>
    %cst_231 = arith.constant dense<0.000000e+00> : vector<2x128xf32>
    %584 = tpu.matmul %583, %581, %cst_231 {dimension_numbers = #tpu.dot_dimension_numbers<[1], [0], [0], [1], [0, 0, 1, 1], [], []>} : vector<2x256xbf16>, vector<256x128xbf16>, vector<2x128xf32> -> vector<2x128xf32>
    %585 = vector.broadcast %582 : vector<1x128xf32> to vector<2x128xf32>
    %586 = arith.addf %584, %585 : vector<2x128xf32>
    %587 = arith.addf %570, %586 : vector<2x128xf32>
    %c16_232 = arith.constant 16 : index
    %c0_233 = arith.constant 0 : index
    %588 = vector.load %arg19[%c16_232, %c0_233] : memref<24x128xf32, #tpu.memory_space<vmem>>, vector<1x128xf32>
    %c17_234 = arith.constant 17 : index
    %c0_235 = arith.constant 0 : index
    %589 = vector.load %arg19[%c17_234, %c0_235] : memref<24x128xf32, #tpu.memory_space<vmem>>, vector<1x128xf32>
    %cst_236 = arith.constant dense<0.000000e+00> : vector<2xf32>
    %590 = vector.multi_reduction <add>, %587, %cst_236 [1] : vector<2x128xf32> to vector<2xf32>
    %591 = vector.shape_cast %590 : vector<2xf32> to vector<2x1xf32>
    %cst_237 = arith.constant 1.280000e+02 : f32
    %592 = vector.broadcast %cst_237 : f32 to vector<2x1xf32>
    %593 = arith.divf %591, %592 : vector<2x1xf32>
    %594 = vector.broadcast %593 : vector<2x1xf32> to vector<2x128xf32>
    %595 = arith.subf %587, %594 : vector<2x128xf32>
    %596 = arith.mulf %595, %595 : vector<2x128xf32>
    %cst_238 = arith.constant dense<0.000000e+00> : vector<2xf32>
    %597 = vector.multi_reduction <add>, %596, %cst_238 [1] : vector<2x128xf32> to vector<2xf32>
    %598 = vector.shape_cast %597 : vector<2xf32> to vector<2x1xf32>
    %cst_239 = arith.constant 1.280000e+02 : f32
    %599 = vector.broadcast %cst_239 : f32 to vector<2x1xf32>
    %600 = arith.divf %598, %599 : vector<2x1xf32>
    %601 = vector.broadcast %593 : vector<2x1xf32> to vector<2x128xf32>
    %602 = arith.subf %587, %601 : vector<2x128xf32>
    %cst_240 = arith.constant 9.99999974E-6 : f32
    %603 = vector.broadcast %cst_240 : f32 to vector<2x1xf32>
    %604 = arith.addf %600, %603 : vector<2x1xf32>
    %605 = math.rsqrt %604 : vector<2x1xf32>
    %606 = vector.broadcast %605 : vector<2x1xf32> to vector<2x128xf32>
    %607 = arith.mulf %602, %606 : vector<2x128xf32>
    %608 = vector.broadcast %588 : vector<1x128xf32> to vector<2x128xf32>
    %609 = arith.mulf %607, %608 : vector<2x128xf32>
    %610 = vector.broadcast %589 : vector<1x128xf32> to vector<2x128xf32>
    %611 = arith.addf %609, %610 : vector<2x128xf32>
    %c2_241 = arith.constant 2 : index
    %c0_242 = arith.constant 0 : index
    %c0_243 = arith.constant 0 : index
    %c0_244 = arith.constant 0 : index
    %612 = vector.load %arg12[%c2_241, %c0_242, %c0_243, %c0_244] : memref<3x3x128x128xbf16, #tpu.memory_space<vmem>>, vector<1x1x128x128xbf16>
    %613 = vector.shape_cast %612 : vector<1x1x128x128xbf16> to vector<128x128xbf16>
    %c20 = arith.constant 20 : index
    %c0_245 = arith.constant 0 : index
    %614 = vector.load %arg20[%c20, %c0_245] : memref<25x768xf32, #tpu.memory_space<vmem>>, vector<1x128xf32>
    %615 = arith.truncf %611 : vector<2x128xf32> to vector<2x128xbf16>
    %cst_246 = arith.constant dense<0.000000e+00> : vector<2x128xf32>
    %616 = tpu.matmul %615, %613, %cst_246 {dimension_numbers = #tpu.dot_dimension_numbers<[1], [0], [0], [1], [0, 0, 1, 1], [], []>} : vector<2x128xbf16>, vector<128x128xbf16>, vector<2x128xf32> -> vector<2x128xf32>
    %617 = vector.broadcast %614 : vector<1x128xf32> to vector<2x128xf32>
    %618 = arith.addf %616, %617 : vector<2x128xf32>
    %619 = arith.addf %611, %618 : vector<2x128xf32>
    %c18_247 = arith.constant 18 : index
    %c0_248 = arith.constant 0 : index
    %620 = vector.load %arg19[%c18_247, %c0_248] : memref<24x128xf32, #tpu.memory_space<vmem>>, vector<1x128xf32>
    %c19_249 = arith.constant 19 : index
    %c0_250 = arith.constant 0 : index
    %621 = vector.load %arg19[%c19_249, %c0_250] : memref<24x128xf32, #tpu.memory_space<vmem>>, vector<1x128xf32>
    %cst_251 = arith.constant dense<0.000000e+00> : vector<2xf32>
    %622 = vector.multi_reduction <add>, %619, %cst_251 [1] : vector<2x128xf32> to vector<2xf32>
    %623 = vector.shape_cast %622 : vector<2xf32> to vector<2x1xf32>
    %cst_252 = arith.constant 1.280000e+02 : f32
    %624 = vector.broadcast %cst_252 : f32 to vector<2x1xf32>
    %625 = arith.divf %623, %624 : vector<2x1xf32>
    %626 = vector.broadcast %625 : vector<2x1xf32> to vector<2x128xf32>
    %627 = arith.subf %619, %626 : vector<2x128xf32>
    %628 = arith.mulf %627, %627 : vector<2x128xf32>
    %cst_253 = arith.constant dense<0.000000e+00> : vector<2xf32>
    %629 = vector.multi_reduction <add>, %628, %cst_253 [1] : vector<2x128xf32> to vector<2xf32>
    %630 = vector.shape_cast %629 : vector<2xf32> to vector<2x1xf32>
    %cst_254 = arith.constant 1.280000e+02 : f32
    %631 = vector.broadcast %cst_254 : f32 to vector<2x1xf32>
    %632 = arith.divf %630, %631 : vector<2x1xf32>
    %633 = vector.broadcast %625 : vector<2x1xf32> to vector<2x128xf32>
    %634 = arith.subf %619, %633 : vector<2x128xf32>
    %cst_255 = arith.constant 9.99999974E-6 : f32
    %635 = vector.broadcast %cst_255 : f32 to vector<2x1xf32>
    %636 = arith.addf %632, %635 : vector<2x1xf32>
    %637 = math.rsqrt %636 : vector<2x1xf32>
    %638 = vector.broadcast %637 : vector<2x1xf32> to vector<2x128xf32>
    %639 = arith.mulf %634, %638 : vector<2x128xf32>
    %640 = vector.broadcast %620 : vector<1x128xf32> to vector<2x128xf32>
    %641 = arith.mulf %639, %640 : vector<2x128xf32>
    %642 = vector.broadcast %621 : vector<1x128xf32> to vector<2x128xf32>
    %643 = arith.addf %641, %642 : vector<2x128xf32>
    %c2_256 = arith.constant 2 : index
    %c1_257 = arith.constant 1 : index
    %c0_258 = arith.constant 0 : index
    %c0_259 = arith.constant 0 : index
    %644 = vector.load %arg12[%c2_256, %c1_257, %c0_258, %c0_259] : memref<3x3x128x128xbf16, #tpu.memory_space<vmem>>, vector<1x1x128x128xbf16>
    %645 = vector.shape_cast %644 : vector<1x1x128x128xbf16> to vector<128x128xbf16>
    %c21 = arith.constant 21 : index
    %c0_260 = arith.constant 0 : index
    %646 = vector.load %arg20[%c21, %c0_260] : memref<25x768xf32, #tpu.memory_space<vmem>>, vector<1x128xf32>
    %647 = arith.truncf %643 : vector<2x128xf32> to vector<2x128xbf16>
    %cst_261 = arith.constant dense<0.000000e+00> : vector<2x128xf32>
    %648 = tpu.matmul %647, %645, %cst_261 {dimension_numbers = #tpu.dot_dimension_numbers<[1], [0], [0], [1], [0, 0, 1, 1], [], []>} : vector<2x128xbf16>, vector<128x128xbf16>, vector<2x128xf32> -> vector<2x128xf32>
    %649 = vector.broadcast %646 : vector<1x128xf32> to vector<2x128xf32>
    %650 = arith.addf %648, %649 : vector<2x128xf32>
    %651 = vector.extract_strided_slice %212 {offsets = [0, 512], sizes = [16, 128], strides = [1, 1]} : vector<16x768xf32> to vector<16x128xf32>
    %652 = vector.extract_strided_slice %212 {offsets = [0, 640], sizes = [16, 128], strides = [1, 1]} : vector<16x768xf32> to vector<16x128xf32>
    %c2_262 = arith.constant 2 : index
    %c2_263 = arith.constant 2 : index
    %c0_264 = arith.constant 0 : index
    %c0_265 = arith.constant 0 : index
    %653 = vector.load %arg12[%c2_262, %c2_263, %c0_264, %c0_265] : memref<3x3x128x128xbf16, #tpu.memory_space<vmem>>, vector<1x1x128x128xbf16>
    %654 = vector.shape_cast %653 : vector<1x1x128x128xbf16> to vector<128x128xbf16>
    %c22 = arith.constant 22 : index
    %c0_266 = arith.constant 0 : index
    %655 = vector.load %arg20[%c22, %c0_266] : memref<25x768xf32, #tpu.memory_space<vmem>>, vector<1x128xf32>
    %656 = vector.extract_strided_slice %650 {offsets = [0, 0], sizes = [2, 32], strides = [1, 1]} : vector<2x128xf32> to vector<2x32xf32>
    %657 = vector.extract_strided_slice %651 {offsets = [0, 0], sizes = [16, 32], strides = [1, 1]} : vector<16x128xf32> to vector<16x32xf32>
    "tpu.trace_start"() <{level = 10 : i32, message = "qd,kd->qk"}> : () -> ()
    %cst_267 = arith.constant dense<0.000000e+00> : vector<2x16xf32>
    %658 = tpu.matmul %656, %657, %cst_267 {dimension_numbers = #tpu.dot_dimension_numbers<[1], [1], [0], [0], [0, 0, 1, 0], [], []>} : vector<2x32xf32>, vector<16x32xf32>, vector<2x16xf32> -> vector<2x16xf32>
    "tpu.trace_stop"() : () -> ()
    %cst_268 = arith.constant 0.176776692 : f32
    %659 = vector.broadcast %cst_268 : f32 to vector<2x16xf32>
    %660 = arith.mulf %658, %659 : vector<2x16xf32>
    %661 = arith.addf %660, %213 : vector<2x16xf32>
    %cst_269 = arith.constant dense<0xFF800000> : vector<2xf32>
    %662 = vector.multi_reduction <maximumf>, %661, %cst_269 [1] : vector<2x16xf32> to vector<2xf32>
    %663 = vector.shape_cast %662 : vector<2xf32> to vector<2x1xf32>
    %664 = vector.broadcast %663 : vector<2x1xf32> to vector<2x16xf32>
    %665 = arith.subf %661, %664 : vector<2x16xf32>
    %666 = math.exp %665 : vector<2x16xf32>
    %cst_270 = arith.constant dense<0.000000e+00> : vector<2xf32>
    %667 = vector.multi_reduction <add>, %666, %cst_270 [1] : vector<2x16xf32> to vector<2xf32>
    %668 = vector.shape_cast %667 : vector<2xf32> to vector<2x1xf32>
    %669 = tpu.reciprocal %668 {approx = true} : vector<2x1xf32> -> vector<2x1xf32>
    %670 = vector.broadcast %669 : vector<2x1xf32> to vector<2x16xf32>
    %671 = arith.mulf %666, %670 : vector<2x16xf32>
    %672 = vector.extract_strided_slice %652 {offsets = [0, 0], sizes = [16, 32], strides = [1, 1]} : vector<16x128xf32> to vector<16x32xf32>
    %cst_271 = arith.constant dense<0.000000e+00> : vector<2x32xf32>
    %673 = tpu.matmul %671, %672, %cst_271 {dimension_numbers = #tpu.dot_dimension_numbers<[1], [0], [0], [1], [0, 0, 1, 1], [], []>} : vector<2x16xf32>, vector<16x32xf32>, vector<2x32xf32> -> vector<2x32xf32>
    %674 = arith.truncf %673 : vector<2x32xf32> to vector<2x32xbf16>
    %675 = vector.extract_strided_slice %654 {offsets = [0, 0], sizes = [32, 128], strides = [1, 1]} : vector<128x128xbf16> to vector<32x128xbf16>
    %cst_272 = arith.constant dense<0.000000e+00> : vector<2x128xf32>
    %676 = tpu.matmul %674, %675, %cst_272 {dimension_numbers = #tpu.dot_dimension_numbers<[1], [0], [0], [1], [0, 0, 1, 1], [], []>} : vector<2x32xbf16>, vector<32x128xbf16>, vector<2x128xf32> -> vector<2x128xf32>
    %677 = vector.extract_strided_slice %650 {offsets = [0, 32], sizes = [2, 32], strides = [1, 1]} : vector<2x128xf32> to vector<2x32xf32>
    %678 = vector.extract_strided_slice %651 {offsets = [0, 32], sizes = [16, 32], strides = [1, 1]} : vector<16x128xf32> to vector<16x32xf32>
    "tpu.trace_start"() <{level = 10 : i32, message = "qd,kd->qk"}> : () -> ()
    %cst_273 = arith.constant dense<0.000000e+00> : vector<2x16xf32>
    %679 = tpu.matmul %677, %678, %cst_273 {dimension_numbers = #tpu.dot_dimension_numbers<[1], [1], [0], [0], [0, 0, 1, 0], [], []>} : vector<2x32xf32>, vector<16x32xf32>, vector<2x16xf32> -> vector<2x16xf32>
    "tpu.trace_stop"() : () -> ()
    %cst_274 = arith.constant 0.176776692 : f32
    %680 = vector.broadcast %cst_274 : f32 to vector<2x16xf32>
    %681 = arith.mulf %679, %680 : vector<2x16xf32>
    %682 = arith.addf %681, %213 : vector<2x16xf32>
    %cst_275 = arith.constant dense<0xFF800000> : vector<2xf32>
    %683 = vector.multi_reduction <maximumf>, %682, %cst_275 [1] : vector<2x16xf32> to vector<2xf32>
    %684 = vector.shape_cast %683 : vector<2xf32> to vector<2x1xf32>
    %685 = vector.broadcast %684 : vector<2x1xf32> to vector<2x16xf32>
    %686 = arith.subf %682, %685 : vector<2x16xf32>
    %687 = math.exp %686 : vector<2x16xf32>
    %cst_276 = arith.constant dense<0.000000e+00> : vector<2xf32>
    %688 = vector.multi_reduction <add>, %687, %cst_276 [1] : vector<2x16xf32> to vector<2xf32>
    %689 = vector.shape_cast %688 : vector<2xf32> to vector<2x1xf32>
    %690 = tpu.reciprocal %689 {approx = true} : vector<2x1xf32> -> vector<2x1xf32>
    %691 = vector.broadcast %690 : vector<2x1xf32> to vector<2x16xf32>
    %692 = arith.mulf %687, %691 : vector<2x16xf32>
    %693 = vector.extract_strided_slice %652 {offsets = [0, 32], sizes = [16, 32], strides = [1, 1]} : vector<16x128xf32> to vector<16x32xf32>
    %cst_277 = arith.constant dense<0.000000e+00> : vector<2x32xf32>
    %694 = tpu.matmul %692, %693, %cst_277 {dimension_numbers = #tpu.dot_dimension_numbers<[1], [0], [0], [1], [0, 0, 1, 1], [], []>} : vector<2x16xf32>, vector<16x32xf32>, vector<2x32xf32> -> vector<2x32xf32>
    %695 = arith.truncf %694 : vector<2x32xf32> to vector<2x32xbf16>
    %696 = vector.extract_strided_slice %654 {offsets = [32, 0], sizes = [32, 128], strides = [1, 1]} : vector<128x128xbf16> to vector<32x128xbf16>
    %cst_278 = arith.constant dense<0.000000e+00> : vector<2x128xf32>
    %697 = tpu.matmul %695, %696, %cst_278 {dimension_numbers = #tpu.dot_dimension_numbers<[1], [0], [0], [1], [0, 0, 1, 1], [], []>} : vector<2x32xbf16>, vector<32x128xbf16>, vector<2x128xf32> -> vector<2x128xf32>
    %698 = arith.addf %676, %697 : vector<2x128xf32>
    %699 = vector.extract_strided_slice %650 {offsets = [0, 64], sizes = [2, 32], strides = [1, 1]} : vector<2x128xf32> to vector<2x32xf32>
    %700 = vector.extract_strided_slice %651 {offsets = [0, 64], sizes = [16, 32], strides = [1, 1]} : vector<16x128xf32> to vector<16x32xf32>
    "tpu.trace_start"() <{level = 10 : i32, message = "qd,kd->qk"}> : () -> ()
    %cst_279 = arith.constant dense<0.000000e+00> : vector<2x16xf32>
    %701 = tpu.matmul %699, %700, %cst_279 {dimension_numbers = #tpu.dot_dimension_numbers<[1], [1], [0], [0], [0, 0, 1, 0], [], []>} : vector<2x32xf32>, vector<16x32xf32>, vector<2x16xf32> -> vector<2x16xf32>
    "tpu.trace_stop"() : () -> ()
    %cst_280 = arith.constant 0.176776692 : f32
    %702 = vector.broadcast %cst_280 : f32 to vector<2x16xf32>
    %703 = arith.mulf %701, %702 : vector<2x16xf32>
    %704 = arith.addf %703, %213 : vector<2x16xf32>
    %cst_281 = arith.constant dense<0xFF800000> : vector<2xf32>
    %705 = vector.multi_reduction <maximumf>, %704, %cst_281 [1] : vector<2x16xf32> to vector<2xf32>
    %706 = vector.shape_cast %705 : vector<2xf32> to vector<2x1xf32>
    %707 = vector.broadcast %706 : vector<2x1xf32> to vector<2x16xf32>
    %708 = arith.subf %704, %707 : vector<2x16xf32>
    %709 = math.exp %708 : vector<2x16xf32>
    %cst_282 = arith.constant dense<0.000000e+00> : vector<2xf32>
    %710 = vector.multi_reduction <add>, %709, %cst_282 [1] : vector<2x16xf32> to vector<2xf32>
    %711 = vector.shape_cast %710 : vector<2xf32> to vector<2x1xf32>
    %712 = tpu.reciprocal %711 {approx = true} : vector<2x1xf32> -> vector<2x1xf32>
    %713 = vector.broadcast %712 : vector<2x1xf32> to vector<2x16xf32>
    %714 = arith.mulf %709, %713 : vector<2x16xf32>
    %715 = vector.extract_strided_slice %652 {offsets = [0, 64], sizes = [16, 32], strides = [1, 1]} : vector<16x128xf32> to vector<16x32xf32>
    %cst_283 = arith.constant dense<0.000000e+00> : vector<2x32xf32>
    %716 = tpu.matmul %714, %715, %cst_283 {dimension_numbers = #tpu.dot_dimension_numbers<[1], [0], [0], [1], [0, 0, 1, 1], [], []>} : vector<2x16xf32>, vector<16x32xf32>, vector<2x32xf32> -> vector<2x32xf32>
    %717 = arith.truncf %716 : vector<2x32xf32> to vector<2x32xbf16>
    %718 = vector.extract_strided_slice %654 {offsets = [64, 0], sizes = [32, 128], strides = [1, 1]} : vector<128x128xbf16> to vector<32x128xbf16>
    %cst_284 = arith.constant dense<0.000000e+00> : vector<2x128xf32>
    %719 = tpu.matmul %717, %718, %cst_284 {dimension_numbers = #tpu.dot_dimension_numbers<[1], [0], [0], [1], [0, 0, 1, 1], [], []>} : vector<2x32xbf16>, vector<32x128xbf16>, vector<2x128xf32> -> vector<2x128xf32>
    %720 = arith.addf %698, %719 : vector<2x128xf32>
    %721 = vector.extract_strided_slice %650 {offsets = [0, 96], sizes = [2, 32], strides = [1, 1]} : vector<2x128xf32> to vector<2x32xf32>
    %722 = vector.extract_strided_slice %651 {offsets = [0, 96], sizes = [16, 32], strides = [1, 1]} : vector<16x128xf32> to vector<16x32xf32>
    "tpu.trace_start"() <{level = 10 : i32, message = "qd,kd->qk"}> : () -> ()
    %cst_285 = arith.constant dense<0.000000e+00> : vector<2x16xf32>
    %723 = tpu.matmul %721, %722, %cst_285 {dimension_numbers = #tpu.dot_dimension_numbers<[1], [1], [0], [0], [0, 0, 1, 0], [], []>} : vector<2x32xf32>, vector<16x32xf32>, vector<2x16xf32> -> vector<2x16xf32>
    "tpu.trace_stop"() : () -> ()
    %cst_286 = arith.constant 0.176776692 : f32
    %724 = vector.broadcast %cst_286 : f32 to vector<2x16xf32>
    %725 = arith.mulf %723, %724 : vector<2x16xf32>
    %726 = arith.addf %725, %213 : vector<2x16xf32>
    %cst_287 = arith.constant dense<0xFF800000> : vector<2xf32>
    %727 = vector.multi_reduction <maximumf>, %726, %cst_287 [1] : vector<2x16xf32> to vector<2xf32>
    %728 = vector.shape_cast %727 : vector<2xf32> to vector<2x1xf32>
    %729 = vector.broadcast %728 : vector<2x1xf32> to vector<2x16xf32>
    %730 = arith.subf %726, %729 : vector<2x16xf32>
    %731 = math.exp %730 : vector<2x16xf32>
    %cst_288 = arith.constant dense<0.000000e+00> : vector<2xf32>
    %732 = vector.multi_reduction <add>, %731, %cst_288 [1] : vector<2x16xf32> to vector<2xf32>
    %733 = vector.shape_cast %732 : vector<2xf32> to vector<2x1xf32>
    %734 = tpu.reciprocal %733 {approx = true} : vector<2x1xf32> -> vector<2x1xf32>
    %735 = vector.broadcast %734 : vector<2x1xf32> to vector<2x16xf32>
    %736 = arith.mulf %731, %735 : vector<2x16xf32>
    %737 = vector.extract_strided_slice %652 {offsets = [0, 96], sizes = [16, 32], strides = [1, 1]} : vector<16x128xf32> to vector<16x32xf32>
    %cst_289 = arith.constant dense<0.000000e+00> : vector<2x32xf32>
    %738 = tpu.matmul %736, %737, %cst_289 {dimension_numbers = #tpu.dot_dimension_numbers<[1], [0], [0], [1], [0, 0, 1, 1], [], []>} : vector<2x16xf32>, vector<16x32xf32>, vector<2x32xf32> -> vector<2x32xf32>
    %739 = arith.truncf %738 : vector<2x32xf32> to vector<2x32xbf16>
    %740 = vector.extract_strided_slice %654 {offsets = [96, 0], sizes = [32, 128], strides = [1, 1]} : vector<128x128xbf16> to vector<32x128xbf16>
    %cst_290 = arith.constant dense<0.000000e+00> : vector<2x128xf32>
    %741 = tpu.matmul %739, %740, %cst_290 {dimension_numbers = #tpu.dot_dimension_numbers<[1], [0], [0], [1], [0, 0, 1, 1], [], []>} : vector<2x32xbf16>, vector<32x128xbf16>, vector<2x128xf32> -> vector<2x128xf32>
    %742 = arith.addf %720, %741 : vector<2x128xf32>
    %743 = vector.broadcast %655 : vector<1x128xf32> to vector<2x128xf32>
    %744 = arith.addf %742, %743 : vector<2x128xf32>
    %745 = arith.addf %643, %744 : vector<2x128xf32>
    %c20_291 = arith.constant 20 : index
    %c0_292 = arith.constant 0 : index
    %746 = vector.load %arg19[%c20_291, %c0_292] : memref<24x128xf32, #tpu.memory_space<vmem>>, vector<1x128xf32>
    %c21_293 = arith.constant 21 : index
    %c0_294 = arith.constant 0 : index
    %747 = vector.load %arg19[%c21_293, %c0_294] : memref<24x128xf32, #tpu.memory_space<vmem>>, vector<1x128xf32>
    %cst_295 = arith.constant dense<0.000000e+00> : vector<2xf32>
    %748 = vector.multi_reduction <add>, %745, %cst_295 [1] : vector<2x128xf32> to vector<2xf32>
    %749 = vector.shape_cast %748 : vector<2xf32> to vector<2x1xf32>
    %cst_296 = arith.constant 1.280000e+02 : f32
    %750 = vector.broadcast %cst_296 : f32 to vector<2x1xf32>
    %751 = arith.divf %749, %750 : vector<2x1xf32>
    %752 = vector.broadcast %751 : vector<2x1xf32> to vector<2x128xf32>
    %753 = arith.subf %745, %752 : vector<2x128xf32>
    %754 = arith.mulf %753, %753 : vector<2x128xf32>
    %cst_297 = arith.constant dense<0.000000e+00> : vector<2xf32>
    %755 = vector.multi_reduction <add>, %754, %cst_297 [1] : vector<2x128xf32> to vector<2xf32>
    %756 = vector.shape_cast %755 : vector<2xf32> to vector<2x1xf32>
    %cst_298 = arith.constant 1.280000e+02 : f32
    %757 = vector.broadcast %cst_298 : f32 to vector<2x1xf32>
    %758 = arith.divf %756, %757 : vector<2x1xf32>
    %759 = vector.broadcast %751 : vector<2x1xf32> to vector<2x128xf32>
    %760 = arith.subf %745, %759 : vector<2x128xf32>
    %cst_299 = arith.constant 9.99999974E-6 : f32
    %761 = vector.broadcast %cst_299 : f32 to vector<2x1xf32>
    %762 = arith.addf %758, %761 : vector<2x1xf32>
    %763 = math.rsqrt %762 : vector<2x1xf32>
    %764 = vector.broadcast %763 : vector<2x1xf32> to vector<2x128xf32>
    %765 = arith.mulf %760, %764 : vector<2x128xf32>
    %766 = vector.broadcast %746 : vector<1x128xf32> to vector<2x128xf32>
    %767 = arith.mulf %765, %766 : vector<2x128xf32>
    %768 = vector.broadcast %747 : vector<1x128xf32> to vector<2x128xf32>
    %769 = arith.addf %767, %768 : vector<2x128xf32>
    %c2_300 = arith.constant 2 : index
    %c0_301 = arith.constant 0 : index
    %c0_302 = arith.constant 0 : index
    %770 = vector.load %arg14[%c2_300, %c0_301, %c0_302] : memref<3x128x256xbf16, #tpu.memory_space<vmem>>, vector<1x128x256xbf16>
    %771 = vector.shape_cast %770 : vector<1x128x256xbf16> to vector<128x256xbf16>
    %c23 = arith.constant 23 : index
    %c0_303 = arith.constant 0 : index
    %772 = vector.load %arg20[%c23, %c0_303] : memref<25x768xf32, #tpu.memory_space<vmem>>, vector<1x256xf32>
    %773 = arith.truncf %769 : vector<2x128xf32> to vector<2x128xbf16>
    %cst_304 = arith.constant dense<0.000000e+00> : vector<2x256xf32>
    %774 = tpu.matmul %773, %771, %cst_304 {dimension_numbers = #tpu.dot_dimension_numbers<[1], [0], [0], [1], [0, 0, 1, 1], [], []>} : vector<2x128xbf16>, vector<128x256xbf16>, vector<2x256xf32> -> vector<2x256xf32>
    %775 = vector.broadcast %772 : vector<1x256xf32> to vector<2x256xf32>
    %776 = arith.addf %774, %775 : vector<2x256xf32>
    %cst_305 = arith.constant 0.000000e+00 : f32
    %777 = vector.broadcast %cst_305 : f32 to vector<2x256xf32>
    %778 = arith.maximumf %776, %777 : vector<2x256xf32>
    %c2_306 = arith.constant 2 : index
    %c0_307 = arith.constant 0 : index
    %c0_308 = arith.constant 0 : index
    %779 = vector.load %arg15[%c2_306, %c0_307, %c0_308] : memref<3x256x128xbf16, #tpu.memory_space<vmem>>, vector<1x256x128xbf16>
    %780 = vector.shape_cast %779 : vector<1x256x128xbf16> to vector<256x128xbf16>
    %c24 = arith.constant 24 : index
    %c0_309 = arith.constant 0 : index
    %781 = vector.load %arg20[%c24, %c0_309] : memref<25x768xf32, #tpu.memory_space<vmem>>, vector<1x128xf32>
    %782 = arith.truncf %778 : vector<2x256xf32> to vector<2x256xbf16>
    %cst_310 = arith.constant dense<0.000000e+00> : vector<2x128xf32>
    %783 = tpu.matmul %782, %780, %cst_310 {dimension_numbers = #tpu.dot_dimension_numbers<[1], [0], [0], [1], [0, 0, 1, 1], [], []>} : vector<2x256xbf16>, vector<256x128xbf16>, vector<2x128xf32> -> vector<2x128xf32>
    %784 = vector.broadcast %781 : vector<1x128xf32> to vector<2x128xf32>
    %785 = arith.addf %783, %784 : vector<2x128xf32>
    %786 = arith.addf %769, %785 : vector<2x128xf32>
    %c22_311 = arith.constant 22 : index
    %c0_312 = arith.constant 0 : index
    %787 = vector.load %arg19[%c22_311, %c0_312] : memref<24x128xf32, #tpu.memory_space<vmem>>, vector<1x128xf32>
    %c23_313 = arith.constant 23 : index
    %c0_314 = arith.constant 0 : index
    %788 = vector.load %arg19[%c23_313, %c0_314] : memref<24x128xf32, #tpu.memory_space<vmem>>, vector<1x128xf32>
    %cst_315 = arith.constant dense<0.000000e+00> : vector<2xf32>
    %789 = vector.multi_reduction <add>, %786, %cst_315 [1] : vector<2x128xf32> to vector<2xf32>
    %790 = vector.shape_cast %789 : vector<2xf32> to vector<2x1xf32>
    %cst_316 = arith.constant 1.280000e+02 : f32
    %791 = vector.broadcast %cst_316 : f32 to vector<2x1xf32>
    %792 = arith.divf %790, %791 : vector<2x1xf32>
    %793 = vector.broadcast %792 : vector<2x1xf32> to vector<2x128xf32>
    %794 = arith.subf %786, %793 : vector<2x128xf32>
    %795 = arith.mulf %794, %794 : vector<2x128xf32>
    %cst_317 = arith.constant dense<0.000000e+00> : vector<2xf32>
    %796 = vector.multi_reduction <add>, %795, %cst_317 [1] : vector<2x128xf32> to vector<2xf32>
    %797 = vector.shape_cast %796 : vector<2xf32> to vector<2x1xf32>
    %cst_318 = arith.constant 1.280000e+02 : f32
    %798 = vector.broadcast %cst_318 : f32 to vector<2x1xf32>
    %799 = arith.divf %797, %798 : vector<2x1xf32>
    %800 = vector.broadcast %792 : vector<2x1xf32> to vector<2x128xf32>
    %801 = arith.subf %786, %800 : vector<2x128xf32>
    %cst_319 = arith.constant 9.99999974E-6 : f32
    %802 = vector.broadcast %cst_319 : f32 to vector<2x1xf32>
    %803 = arith.addf %799, %802 : vector<2x1xf32>
    %804 = math.rsqrt %803 : vector<2x1xf32>
    %805 = vector.broadcast %804 : vector<2x1xf32> to vector<2x128xf32>
    %806 = arith.mulf %801, %805 : vector<2x128xf32>
    %807 = vector.broadcast %787 : vector<1x128xf32> to vector<2x128xf32>
    %808 = arith.mulf %806, %807 : vector<2x128xf32>
    %809 = vector.broadcast %788 : vector<1x128xf32> to vector<2x128xf32>
    %810 = arith.addf %808, %809 : vector<2x128xf32>
    %811 = tpu.concatenate %199, %206, %810 in 1 : vector<2x128xf32>, vector<2x128xf32>, vector<2x128xf32> -> vector<2x384xf32>
    %cst_320 = arith.constant dense<0x7F800000> : vector<2xf32>
    %812 = vector.multi_reduction <minimumf>, %811, %cst_320 [1] : vector<2x384xf32> to vector<2xf32>
    %813 = vector.shape_cast %812 : vector<2xf32> to vector<2x1xf32>
    %cst_321 = arith.constant dense<0xFF800000> : vector<2xf32>
    %814 = vector.multi_reduction <maximumf>, %811, %cst_321 [1] : vector<2x384xf32> to vector<2xf32>
    %815 = vector.shape_cast %814 : vector<2xf32> to vector<2x1xf32>
    %816 = arith.subf %815, %813 : vector<2x1xf32>
    %cst_322 = arith.constant 0.000000e+00 : f32
    %817 = vector.broadcast %cst_322 : f32 to vector<2x1xf32>
    %818 = arith.cmpf ogt, %816, %817 : vector<2x1xf32>
    %cst_323 = arith.constant 1.000000e+00 : f32
    %819 = vector.broadcast %cst_323 : f32 to vector<2x1xf32>
    %820 = arith.select %818, %816, %819 : vector<2x1xi1>, vector<2x1xf32>
    %821 = tpu.reciprocal %820 {approx = true} : vector<2x1xf32> -> vector<2x1xf32>
    %822 = vector.broadcast %813 : vector<2x1xf32> to vector<2x384xf32>
    %823 = arith.subf %811, %822 : vector<2x384xf32>
    %824 = vector.broadcast %821 : vector<2x1xf32> to vector<2x384xf32>
    %825 = arith.mulf %823, %824 : vector<2x384xf32>
    %c0_324 = arith.constant 0 : index
    %c0_325 = arith.constant 0 : index
    %826 = vector.load %arg4[%c0_324, %c0_325] : memref<2x384xf32, #tpu.memory_space<vmem>>, vector<2x384xf32>
    %827 = arith.mulf %825, %826 : vector<2x384xf32>
    %c0_326 = arith.constant 0 : index
    %c0_327 = arith.constant 0 : index
    %828 = vector.load %arg5[%c0_326, %c0_327] : memref<2x1xf32, #tpu.memory_space<vmem>>, vector<2x1xf32>
    %829 = vector.broadcast %828 : vector<2x1xf32> to vector<2x384xf32>
    %830 = arith.addf %827, %829 : vector<2x384xf32>
    %c0_328 = arith.constant 0 : index
    %c0_329 = arith.constant 0 : index
    %831 = vector.load %arg16[%c0_328, %c0_329] : memref<384x384xbf16, #tpu.memory_space<vmem>>, vector<384x384xbf16>
    %c7_330 = arith.constant 7 : index
    %c0_331 = arith.constant 0 : index
    %832 = vector.load %arg20[%c7_330, %c0_331] : memref<25x768xf32, #tpu.memory_space<vmem>>, vector<1x384xf32>
    %833 = arith.truncf %830 : vector<2x384xf32> to vector<2x384xbf16>
    %cst_332 = arith.constant dense<0.000000e+00> : vector<2x384xf32>
    %834 = tpu.matmul %833, %831, %cst_332 {dimension_numbers = #tpu.dot_dimension_numbers<[1], [0], [0], [1], [0, 0, 1, 1], [], []>} : vector<2x384xbf16>, vector<384x384xbf16>, vector<2x384xf32> -> vector<2x384xf32>
    %835 = vector.broadcast %832 : vector<1x384xf32> to vector<2x384xf32>
    %836 = arith.addf %834, %835 : vector<2x384xf32>
    %cst_333 = arith.constant 0.000000e+00 : f32
    %837 = vector.broadcast %cst_333 : f32 to vector<2x384xf32>
    %838 = arith.maximumf %836, %837 : vector<2x384xf32>
    %c0_334 = arith.constant 0 : index
    %c0_335 = arith.constant 0 : index
    %839 = vector.load %arg17[%c0_334, %c0_335] : memref<384x128xbf16, #tpu.memory_space<vmem>>, vector<384x128xbf16>
    %c8_336 = arith.constant 8 : index
    %c0_337 = arith.constant 0 : index
    %840 = vector.load %arg20[%c8_336, %c0_337] : memref<25x768xf32, #tpu.memory_space<vmem>>, vector<1x128xf32>
    %841 = arith.truncf %838 : vector<2x384xf32> to vector<2x384xbf16>
    %cst_338 = arith.constant dense<0.000000e+00> : vector<2x128xf32>
    %842 = tpu.matmul %841, %839, %cst_338 {dimension_numbers = #tpu.dot_dimension_numbers<[1], [0], [0], [1], [0, 0, 1, 1], [], []>} : vector<2x384xbf16>, vector<384x128xbf16>, vector<2x128xf32> -> vector<2x128xf32>
    %843 = vector.broadcast %840 : vector<1x128xf32> to vector<2x128xf32>
    %844 = arith.addf %842, %843 : vector<2x128xf32>
    %845 = math.tanh %844 : vector<2x128xf32>
    %c0_339 = arith.constant 0 : index
    %c0_340 = arith.constant 0 : index
    %846 = vector.load %arg18[%c0_339, %c0_340] : memref<128x2xbf16, #tpu.memory_space<vmem>>, vector<128x2xbf16>
    %c9_341 = arith.constant 9 : index
    %c0_342 = arith.constant 0 : index
    %847 = vector.load %arg20[%c9_341, %c0_342] : memref<25x768xf32, #tpu.memory_space<vmem>>, vector<1x2xf32>
    %848 = arith.truncf %845 : vector<2x128xf32> to vector<2x128xbf16>
    %cst_343 = arith.constant dense<0.000000e+00> : vector<2x2xf32>
    %849 = tpu.matmul %848, %846, %cst_343 {dimension_numbers = #tpu.dot_dimension_numbers<[1], [0], [0], [1], [0, 0, 1, 1], [], []>} : vector<2x128xbf16>, vector<128x2xbf16>, vector<2x2xf32> -> vector<2x2xf32>
    %850 = vector.broadcast %847 : vector<1x2xf32> to vector<2x2xf32>
    %851 = arith.addf %849, %850 : vector<2x2xf32>
    %c0_344 = arith.constant 0 : index
    %c0_345 = arith.constant 0 : index
    %852 = vector.load %arg21[%c0_344, %c0_345] : memref<2x2xf32, #tpu.memory_space<vmem>>, vector<2x2xf32>
    tpu.vector_store %arg21[%c0_344, %c0_345], %851 {strides = array<i32>} : memref<2x2xf32, #tpu.memory_space<vmem>>, vector<2x2xf32>,
    return
  }
}

</mosaic_0001>

<bundles_post_ra>
// kernel: tpu_custom_call.1
= control target key start
LH: loop header
LB: loop body
LE: loop exit
PB: predicated region body
PF: predicated region fallthrough
CT: control target
= control target key end

     0   :  { %s12205_s0 = inlined_call_operand.hbm [shape: f32[16,128], index: 0, kind: input, shape index: {}]   ;;  %s12206_s1 = inlined_call_operand.hbm [shape: f32[16,16], index: 1, kind: input, shape index: {}]   ;;  %s12207_s2 = inlined_call_operand.hbm [shape: f32[2,16], index: 2, kind: input, shape index: {}]   ;;  %s12208_s3 = inlined_call_operand.hbm [shape: f32[2,64], index: 3, kind: input, shape index: {}]   ;;  %s12209_s4 = inlined_call_operand.hbm [shape: f32[2,384], index: 4, kind: input, shape index: {}]   ;;  %s12210_s5 = inlined_call_operand.vmem [shape: f32[2,1], index: 5, kind: input, shape index: {}]   ;;  %s12211_s6 = inlined_call_operand.hbm [shape: bf16[128,384], index: 6, kind: input, shape index: {}]   ;;  %s12212_s7 = inlined_call_operand.vmem [shape: bf16[128,128], index: 7, kind: input, shape index: {}]   ;;  %s12213_s8 = inlined_call_operand.hbm [shape: bf16[128,256], index: 8, kind: input, shape index: {}]   ;;  %s12214_s9 = inlined_call_operand.hbm [shape: bf16[256,128], index: 9, kind: input, shape index: {}]   ;;  %s12215_s10 = inlined_call_operand.hbm [shape: bf16[128,128], index: 10, kind: input, shape index: {}]   ;;  %s12216_s11 = inlined_call_operand.hbm [shape: bf16[64,128], index: 11, kind: input, shape index: {}]   ;;  %s12217_s12 = inlined_call_operand.hbm [shape: bf16[3,3,128,128], index: 12, kind: input, shape index: {}]   ;;  %s12218_s13 = inlined_call_operand.hbm [shape: bf16[128,768], index: 13, kind: input, shape index: {}]   ;;  %s12219_s14 = inlined_call_operand.hbm [shape: bf16[3,128,256], index: 14, kind: input, shape index: {}]   ;;  %s12220_s15 = inlined_call_operand.hbm [shape: bf16[3,256,128], index: 15, kind: input, shape index: {}]   ;;  %s12221_s16 = inlined_call_operand.hbm [shape: bf16[384,384], index: 16, kind: input, shape index: {}]   ;;  %s12222_s17 = inlined_call_operand.hbm [shape: bf16[384,128], index: 17, kind: input, shape index: {}]   ;;  %s12223_s18 = inlined_call_operand.vmem [shape: bf16[128,2], index: 18, kind: input, shape index: {}]   ;;  %s12224_s19 = inlined_call_operand.vmem [shape: f32[24,128], index: 19, kind: input, shape index: {}]   ;;  %s12225_s20 = inlined_call_operand.hbm [shape: f32[25,768], index: 20, kind: input, shape index: {}]   ;;  %s12226_s21 = inlined_call_operand.hbm [shape: f32[2,2], index: 21, kind: output, shape index: {}]  }
   0x1   :  { %12229 = sst [smem:[#allocation40_spill]] %s12205_s0 }
   0x2   :  { %12230 = sst [smem:[#allocation41_spill]] %s12206_s1 }
   0x3   :  { %12231 = sst [smem:[#allocation42_spill]] %s12207_s2 }
   0x4   :  { %12232 = sst [smem:[#allocation43_spill]] %s12208_s3 }
   0x5   :  { %12233 = sst [smem:[#allocation44_spill]] %s12209_s4 }
   0x6   :  { %12234 = sst [smem:[#allocation45_spill]] %s12210_s5 }
   0x7   :  { %26 = vsyncpa [#allocation3], 0 }
   0x8   :  { %27 = vsyncpa [#allocation6], 0 }
   0x9   :  { %28 = vsyncpa [#allocation9], 0 }
   0xa   :  { %29 = vsyncpa [#allocation12], 0 }
   0xb   :  { %30 = vsyncpa [#allocation15], 0 }
   0xc   :  { %31 = vsyncpa [#allocation18], 0 }
   0xd   :  { %32 = vsyncpa [#allocation21], 0 }
   0xe   :  { %33 = vsyncpa [#allocation24], 0 }
   0xf   :  { %34 = vsyncpa [#allocation27], 0 }
  0x10   :  { %35 = vsyncpa [#allocation4], 0  ;;  %s10993_s2 = smov [#allocation5]   ;;  %s10994_s26 = smov [#allocation8]  }
  0x11   :  { %s53_s25 = sshll.u32 %s10993_s2, 4  ;;  %s76_s27 = sshll.u32 %s10994_s26, 4  ;;  %s54_s25 = int_to_ptr.vmem [resolvable:$true] %s53_s25  ;;  %s77_s27 = int_to_ptr.vmem [resolvable:$true] %s76_s27 }
  0x12   :  { %s10621_s3 = scalar_lea.vmem %s54_s25, 256  ;;  %p10626_p1 = scmp.lt.s32.totalorder %s54_s25, %s54_s25 }
  0x13   :  { %p10622_p0 = scmp.ne.s32.totalorder %s54_s25, %s10621_s3  ;;  %p10627_p2 = scmp.lt.s32.totalorder %s10621_s3, %s10621_s3 }
  0x15   :  { %p10628_p3 = por %p10627_p2, %p10626_p1 }
  0x17   :  { %p10629_p4 = pnand %p10628_p3, %p10622_p0 }
  0x19   :  { %10632 = shalt.err (!%p10629_p4)
}
  0x1a   :  { %s10995_s28 = smov 128   ;;  %s10996_s29 = smov 8  }
  0x1b   :  { %s12235_s30 = sld [smem:[#allocation41_spill]]  ;;  %s10641_s5 = scalar_lea.vmem %s77_s27, 32 }
  0x1c   :  { %p10642_p5 = scmp.ne.s32.totalorder %s77_s27, %s10641_s5  ;;  %p10646_p6 = scmp.lt.s32.totalorder %s77_s27, %s77_s27 }
  0x1d   :  { %p10647_p7 = scmp.lt.s32.totalorder %s10641_s5, %s10641_s5 }
  0x1f   :  { %p10648_p8 = por %p10647_p7, %p10646_p6 }
  0x21   :  { %59 = dma.hbm_to_vmem [thread:$0]  %s12235_s30, 256, %s54_s25, [#allocation6], %s10995_s28, %s10995_s28, %s10996_s29  }
  0x22   :  { %p10649_p9 = pnand %p10648_p8, %p10642_p5 }
  0x24   :  { %10652 = shalt.err (!%p10649_p9)
}
  0x25   :  { %s12236_s1 = sld [smem:[#allocation43_spill]]  ;;  %s10997_s24 = smov [#allocation11]  }
  0x26   :  { %s97_s2 = sshll.u32 %s10997_s24, 4  ;;  %s98_s2 = int_to_ptr.vmem [resolvable:$true] %s97_s2 }
  0x27   :  { %s10661_s26 = scalar_lea.vmem %s98_s2, 3072  ;;  %p10666_p11 = scmp.lt.s32.totalorder %s98_s2, %s98_s2 }
  0x28   :  { %p10662_p10 = scmp.ne.s32.totalorder %s98_s2, %s10661_s26  ;;  %p10667_p12 = scmp.lt.s32.totalorder %s10661_s26, %s10661_s26 }
  0x2a   :  { %p10668_p13 = por %p10667_p12, %p10666_p11 }
  0x2b   :  { %79 = dma.hbm_to_vmem [thread:$0]  %s12236_s1, 32, %s77_s27, [#allocation9]  }
  0x2c   :  { %p10669_p0 = pnand %p10668_p13, %p10662_p10 }
  0x2e   :  { %10672 = shalt.err (!%p10669_p0)
}
  0x2f   :  { %s12227_s25 = smov 192   ;;  %s12228_s3 = smov 12  }
  0x30   :  { %103 = dma.hbm_to_vmem [thread:$0]  %s12211_s6, 3072, %s98_s2, [#allocation12], %s12227_s25, %s12227_s25, %s12228_s3  }
  0x31   :  { %s11000_s27 = smov [#allocation14]  }
  0x32   :  { %s123_s30 = sshll.u32 %s11000_s27, 4  ;;  %s124_s30 = int_to_ptr.vmem [resolvable:$true] %s123_s30 }
  0x33   :  { %s10681_s5 = scalar_lea.vmem %s124_s30, 2048  ;;  %p10686_p2 = scmp.lt.s32.totalorder %s124_s30, %s124_s30 }
  0x34   :  { %p10682_p1 = scmp.ne.s32.totalorder %s124_s30, %s10681_s5  ;;  %p10687_p3 = scmp.lt.s32.totalorder %s10681_s5, %s10681_s5 }
  0x36   :  { %p10688_p4 = por %p10687_p3, %p10686_p2 }
  0x38   :  { %p10689_p5 = pnand %p10688_p4, %p10682_p1 }
  0x3a   :  { %10692 = shalt.err (!%p10689_p5)
}
  0x3b   :  { %s11001_s22 = smov 64   ;;  %s11002_s23 = smov 4  }
  0x3c   :  { %129 = dma.hbm_to_vmem [thread:$0]  %s12214_s9, 2048, %s124_s30, [#allocation15], %s11001_s22, %s11001_s22, %s11002_s23  }
  0x3d   :  { %s11003_s6 = smov [#allocation17]   ;;  %s11004_s26 = smov [#allocation20]  }
  0x3e   :  { %s147_s2 = sshll.u32 %s11003_s6, 4  ;;  %s171_s0 = sshll.u32 %s11004_s26, 4  ;;  %s148_s2 = int_to_ptr.vmem [resolvable:$true] %s147_s2  ;;  %s172_s0 = int_to_ptr.vmem [resolvable:$true] %s171_s0 }
  0x3f   :  { %s10701_s4 = scalar_lea.vmem %s148_s2, 512  ;;  %p10706_p7 = scmp.lt.s32.totalorder %s148_s2, %s148_s2 }
  0x40   :  { %p10702_p6 = scmp.ne.s32.totalorder %s148_s2, %s10701_s4  ;;  %p10707_p8 = scmp.lt.s32.totalorder %s10701_s4, %s10701_s4 }
  0x42   :  { %p10708_p9 = por %p10707_p8, %p10706_p7 }
  0x44   :  { %p10709_p10 = pnand %p10708_p9, %p10702_p6 }
  0x46   :  { %10712 = shalt.err (!%p10709_p10)
}
  0x47   :  { %153 = dma.hbm_to_vmem [thread:$0]  %s12216_s11, 512, %s148_s2, [#allocation18], %s11001_s22, %s11001_s22, %s11002_s23  }
  0x48   :  { %s10721_s9 = scalar_lea.vmem %s172_s0, 6144  ;;  %p10726_p12 = scmp.lt.s32.totalorder %s172_s0, %s172_s0 }
  0x49   :  { %p10722_p11 = scmp.ne.s32.totalorder %s172_s0, %s10721_s9  ;;  %p10727_p13 = scmp.lt.s32.totalorder %s10721_s9, %s10721_s9 }
  0x4b   :  { %p10728_p0 = por %p10727_p13, %p10726_p12 }
  0x4d   :  { %p10729_p1 = pnand %p10728_p0, %p10722_p11 }
  0x4f   :  { %10732 = shalt.err (!%p10729_p1)
}
  0x50   :  { %s11005_s30 = smov 384   ;;  %s11006_s1 = smov 24  }
  0x51   :  { %177 = dma.hbm_to_vmem [thread:$0]  %s12218_s13, 6144, %s172_s0, [#allocation21], %s11005_s30, %s11005_s30, %s11006_s1  }
  0x52   :  { %s11007_s26 = smov [#allocation23]   ;;  %s11008_s25 = smov [#allocation26]  }
  0x53   :  { %s195_s4 = sshll.u32 %s11007_s26, 4  ;;  %s219_s3 = sshll.u32 %s11008_s25, 4  ;;  %s196_s4 = int_to_ptr.vmem [resolvable:$true] %s195_s4  ;;  %s220_s3 = int_to_ptr.vmem [resolvable:$true] %s219_s3 }
  0x54   :  { %s10741_s11 = scalar_lea.vmem %s196_s4, 6144  ;;  %p10746_p3 = scmp.lt.s32.totalorder %s196_s4, %s196_s4 }
  0x55   :  { %p10742_p2 = scmp.ne.s32.totalorder %s196_s4, %s10741_s11  ;;  %p10747_p4 = scmp.lt.s32.totalorder %s10741_s11, %s10741_s11 }
  0x57   :  { %p10748_p5 = por %p10747_p4, %p10746_p3 }
  0x59   :  { %p10749_p6 = pnand %p10748_p5, %p10742_p2 }
  0x5b   :  { %10752 = shalt.err (!%p10749_p6)
}
  0x5c   :  { %201 = dma.hbm_to_vmem [thread:$0]  %s12220_s15, 6144, %s196_s4, [#allocation24], %s11001_s22, %s11001_s22, %s11002_s23  }
  0x5d   :  { %s10761_s13 = scalar_lea.vmem %s220_s3, 3072  ;;  %p10766_p8 = scmp.lt.s32.totalorder %s220_s3, %s220_s3 }
  0x5e   :  { %p10762_p7 = scmp.ne.s32.totalorder %s220_s3, %s10761_s13  ;;  %p10767_p9 = scmp.lt.s32.totalorder %s10761_s13, %s10761_s13 }
  0x60   :  { %p10768_p10 = por %p10767_p9, %p10766_p8 }
  0x62   :  { %p10769_p11 = pnand %p10768_p10, %p10762_p7 }
  0x64   :  { %10772 = shalt.err (!%p10769_p11)
}
  0x65   :  { %225 = dma.hbm_to_vmem [thread:$0]  %s12222_s17, 3072, %s220_s3, [#allocation27], %s11001_s22, %s11001_s22, %s11002_s23  }
  0x66   :  { %s11009_s5 = smov [#allocation2]   ;;  %s11010_s30 = smov [#allocation7]  }
  0x67   :  { %s41_s9 = sshll.u32 %s11009_s5, 4  ;;  %s66_s1 = sshll.u32 %s11010_s30, 4  ;;  %s42_s9 = int_to_ptr.vmem [resolvable:$true] %s41_s9  ;;  %s67_s1 = int_to_ptr.vmem [resolvable:$true] %s66_s1 }
  0x68   :  { %s10781_s15 = scalar_lea.vmem %s42_s9, 256  ;;  %p10786_p13 = scmp.lt.s32.totalorder %s42_s9, %s42_s9 }
  0x69   :  { %p10782_p12 = scmp.ne.s32.totalorder %s42_s9, %s10781_s15  ;;  %p10787_p0 = scmp.lt.s32.totalorder %s10781_s15, %s10781_s15 }
  0x6b   :  { %p10788_p1 = por %p10787_p0, %p10786_p13 }
  0x6d   :  { %p10789_p2 = pnand %p10788_p1, %p10782_p12 }
  0x6f   :  { %10792 = shalt.err (!%p10789_p2)
}
  0x70   :  { %s12237_s26 = sld [smem:[#allocation40_spill]]  ;;  %s10801_s17 = scalar_lea.vmem %s67_s1, 32 }
  0x71   :  { %p10802_p3 = scmp.ne.s32.totalorder %s67_s1, %s10801_s17  ;;  %p10806_p4 = scmp.lt.s32.totalorder %s67_s1, %s67_s1 }
  0x72   :  { %p10807_p5 = scmp.lt.s32.totalorder %s10801_s17, %s10801_s17 }
  0x74   :  { %p10808_p6 = por %p10807_p5, %p10806_p4 }
  0x76   :  { %47 = dma.hbm_to_vmem [thread:$0]  %s12237_s26, 256, %s42_s9, [#allocation3], %s10995_s28, %s10995_s28, %s10996_s29  }
  0x77   :  { %p10809_p7 = pnand %p10808_p6, %p10802_p3 }
  0x79   :  { %10812 = shalt.err (!%p10809_p7)
}
  0x7a   :  { %s12238_s11 = sld [smem:[#allocation42_spill]]  ;;  %s11011_s2 = smov [#allocation10]  }
  0x7b   :  { %s86_s27 = sshll.u32 %s11011_s2, 4  ;;  %s11012_s13 = smov [#allocation13]   ;;  %s87_s27 = int_to_ptr.vmem [resolvable:$true] %s86_s27 }
  0x7c   :  { %s111_s25 = sshll.u32 %s11012_s13, 4  ;;  %s10821_s0 = scalar_lea.vmem %s87_s27, 96  ;;  %s112_s25 = int_to_ptr.vmem [resolvable:$true] %s111_s25 }
  0x7d   :  { %p10822_p8 = scmp.ne.s32.totalorder %s87_s27, %s10821_s0  ;;  %p10826_p9 = scmp.lt.s32.totalorder %s87_s27, %s87_s27 }
  0x7e   :  { %p10827_p10 = scmp.lt.s32.totalorder %s10821_s0, %s10821_s0 }
  0x80   :  { %69 = dma.hbm_to_vmem [thread:$0]  %s12238_s11, 32, %s67_s1, [#allocation6]  }
  0x81   :  { %p10828_p11 = por %p10827_p10, %p10826_p9 }
  0x83   :  { %p10829_p12 = pnand %p10828_p11, %p10822_p8 }
  0x85   :  { %10832 = shalt.err (!%p10829_p12)
}
  0x86   :  { %s12239_s30 = sld [smem:[#allocation44_spill]]  ;;  %s10841_s15 = scalar_lea.vmem %s112_s25, 2048 }
  0x87   :  { %p10842_p13 = scmp.ne.s32.totalorder %s112_s25, %s10841_s15  ;;  %p10846_p0 = scmp.lt.s32.totalorder %s112_s25, %s112_s25 }
  0x88   :  { %p10847_p1 = scmp.lt.s32.totalorder %s10841_s15, %s10841_s15 }
  0x8a   :  { %p10848_p2 = por %p10847_p1, %p10846_p0 }
  0x8c   :  { %89 = dma.hbm_to_vmem [thread:$0]  %s12239_s30, 96, %s87_s27, [#allocation9]  }
  0x8d   :  { %p10849_p3 = pnand %p10848_p2, %p10842_p13 }
  0x8f   :  { %10852 = shalt.err (!%p10849_p3)
}
  0x90   :  { %117 = dma.hbm_to_vmem [thread:$0]  %s12213_s8, 2048, %s112_s25, [#allocation12], %s10995_s28, %s10995_s28, %s10996_s29  }
  0x91   :  { %s11013_s6 = smov [#allocation16]   ;;  %s11014_s17 = smov [#allocation19]  }
  0x92   :  { %s135_s26 = sshll.u32 %s11013_s6, 4  ;;  %s159_s3 = sshll.u32 %s11014_s17, 4  ;;  %s136_s26 = int_to_ptr.vmem [resolvable:$true] %s135_s26  ;;  %s160_s3 = int_to_ptr.vmem [resolvable:$true] %s159_s3 }
  0x93   :  { %s10861_s4 = scalar_lea.vmem %s136_s26, 1024  ;;  %p10866_p5 = scmp.lt.s32.totalorder %s136_s26, %s136_s26 }
  0x94   :  { %p10862_p4 = scmp.ne.s32.totalorder %s136_s26, %s10861_s4  ;;  %p10867_p6 = scmp.lt.s32.totalorder %s10861_s4, %s10861_s4 }
  0x96   :  { %p10868_p7 = por %p10867_p6, %p10866_p5 }
  0x98   :  { %p10869_p8 = pnand %p10868_p7, %p10862_p4 }
  0x9a   :  { %10872 = shalt.err (!%p10869_p8)
}
  0x9b   :  { %141 = dma.hbm_to_vmem [thread:$0]  %s12215_s10, 1024, %s136_s26, [#allocation15], %s11001_s22, %s11001_s22, %s11002_s23  }
  0x9c   :  { %s10881_s8 = scalar_lea.vmem %s160_s3, 9216  ;;  %p10886_p10 = scmp.lt.s32.totalorder %s160_s3, %s160_s3 }
  0x9d   :  { %p10882_p9 = scmp.ne.s32.totalorder %s160_s3, %s10881_s8  ;;  %p10887_p11 = scmp.lt.s32.totalorder %s10881_s8, %s10881_s8 }
  0x9f   :  { %p10888_p12 = por %p10887_p11, %p10886_p10 }
  0xa1   :  { %p10889_p13 = pnand %p10888_p12, %p10882_p9 }
  0xa3   :  { %10892 = shalt.err (!%p10889_p13)
}
  0xa4   :  { %165 = dma.hbm_to_vmem [thread:$0]  %s12217_s12, 9216, %s160_s3, [#allocation18], %s11001_s22, %s11001_s22, %s11002_s23  }
  0xa5   :  { %s11015_s25 = smov [#allocation22]   ;;  %s11016_s5 = smov [#allocation25]  }
  0xa6   :  { %s183_s0 = sshll.u32 %s11015_s25, 4  ;;  %s207_s9 = sshll.u32 %s11016_s5, 4  ;;  %s184_s0 = int_to_ptr.vmem [resolvable:$true] %s183_s0  ;;  %s208_s9 = int_to_ptr.vmem [resolvable:$true] %s207_s9 }
  0xa7   :  { %s10901_s10 = scalar_lea.vmem %s184_s0, 6144  ;;  %p10906_p1 = scmp.lt.s32.totalorder %s184_s0, %s184_s0 }
  0xa8   :  { %p10902_p0 = scmp.ne.s32.totalorder %s184_s0, %s10901_s10  ;;  %p10907_p2 = scmp.lt.s32.totalorder %s10901_s10, %s10901_s10 }
  0xaa   :  { %p10908_p3 = por %p10907_p2, %p10906_p1 }
  0xac   :  { %p10909_p4 = pnand %p10908_p3, %p10902_p0 }
  0xae   :  { %10912 = shalt.err (!%p10909_p4)
}
  0xaf   :  { %189 = dma.hbm_to_vmem [thread:$0]  %s12219_s14, 6144, %s184_s0, [#allocation21], %s10995_s28, %s10995_s28, %s10996_s29  }
  0xb0   :  { %s10921_s12 = scalar_lea.vmem %s208_s9, 9216  ;;  %p10926_p6 = scmp.lt.s32.totalorder %s208_s9, %s208_s9 }
  0xb1   :  { %p10922_p5 = scmp.ne.s32.totalorder %s208_s9, %s10921_s12  ;;  %p10927_p7 = scmp.lt.s32.totalorder %s10921_s12, %s10921_s12 }
  0xb3   :  { %p10928_p8 = por %p10927_p7, %p10926_p6 }
  0xb5   :  { %p10929_p9 = pnand %p10928_p8, %p10922_p5 }
  0xb7   :  { %10932 = shalt.err (!%p10929_p9)
}
  0xb8   :  { %s12240_s23 = smov 12   ;;  %s12241_s1 = smov 192  }
  0xb9   :  { %213 = dma.hbm_to_vmem [thread:$0]  %s12221_s16, 9216, %s208_s9, [#allocation24], %s12241_s1, %s12241_s1, %s12240_s23  }
  0xba   :  { %s11017_s26 = smov [#allocation28]  }
  0xbb   :  { %s235_s17 = sshll.u32 %s11017_s26, 4  ;;  %s236_s17 = int_to_ptr.vmem [resolvable:$true] %s235_s17 }
  0xbc   :  { %s10941_s3 = scalar_lea.vmem %s236_s17, 3072  ;;  %p10946_p11 = scmp.lt.s32.totalorder %s236_s17, %s236_s17 }
  0xbd   :  { %p10942_p10 = scmp.ne.s32.totalorder %s236_s17, %s10941_s3  ;;  %p10947_p12 = scmp.lt.s32.totalorder %s10941_s3, %s10941_s3 }
  0xbf   :  { %p10948_p13 = por %p10947_p12, %p10946_p11 }
  0xc1   :  { %p10949_p0 = pnand %p10948_p13, %p10942_p10 }
  0xc3   :  { %10952 = shalt.err (!%p10949_p0)
}
  0xc4   :  { %s11018_s14 = smov 768   ;;  %s11019_s28 = smov 48  }
  0xc5   :  { %241 = dma.hbm_to_vmem [thread:$0]  %s12225_s20, 3072, %s236_s17, [#allocation27], %s11018_s14, %s11018_s14, %s11019_s28  }
  0xc6   :  { %10973 = dma.done.wait [#allocation3], 256  }
  0xc7   :  { %10974 = vsyncadd [#allocation3], 4294967040 }
  0xc8   :  { %10975 = dma.done.wait [#allocation6], 288  }
  0xc9   :  { %10976 = vsyncadd [#allocation6], 4294967008 }
  0xca   :  { %10977 = dma.done.wait [#allocation9], 128  }
  0xcb   :  { %10978 = vsyncadd [#allocation9], 4294967168 }
  0xcc   :  { %10979 = dma.done.wait [#allocation12], 5120  }
  0xcd   :  { %10980 = vsyncadd [#allocation12], 4294962176 }
  0xce   :  { %10981 = dma.done.wait [#allocation15], 3072  }
  0xcf   :  { %10982 = vsyncadd [#allocation15], 4294964224 }
  0xd0   :  { %10983 = dma.done.wait [#allocation18], 9728  }
  0xd1   :  { %10984 = vsyncadd [#allocation18], 4294957568 }
  0xd2   :  { %10985 = dma.done.wait [#allocation21], 12288  }
  0xd3   :  { %10986 = vsyncadd [#allocation21], 4294955008 }
  0xd4   :  { %10987 = dma.done.wait [#allocation24], 15360  }
  0xd5   :  { %10988 = vsyncadd [#allocation24], 4294951936 }
  0xd6   :  { %10989 = dma.done.wait [#allocation27], 6144  }
  0xd7   :  { %10990 = vsyncadd [#allocation27], 4294961152  ;;  %v296_v0 = vld [vmem:[#allocation2] sm:$0xff]  ;;  %v297_v1 = vld [vmem:[#allocation2 + $0x8] sm:$0xff]  ;;  %v11020_v4 = vmov 0.0   ;;  %v11021_v30 = vmov 0   ;;  %v370_v53 = vlaneseq }
  0xd8   :  { %300 = vadd.xlane.f32.xlu0 %v296_v0  ;;  %v10011_v2 = vld [vmem:[#allocation11 + $0xac] ss:$12 sps:$4 sm:$0xff]   ;;  %v10013_v3 = vld [vmem:[#allocation11 + $0xa8] ss:$12 sps:$4 sm:$0xff]   ;;  %9391 = vmatprep.subr.bf16.mxu1 %v11020_v4  ;;  %v10014_v5 = vld [vmem:[#allocation11 + $0xb0] ss:$12 sps:$4 sm:$0xff]  }
  0xd9   :  { %513 = vmatprep.subr.bf16.mxu0 %v10011_v2  ;;  %9392 = vmatpush3.bf16.msra.mxu1 %v10014_v5  ;;  %v10015_v14 = vld [vmem:[#allocation11 + $0x94] ss:$12 sps:$4 sm:$0xff]   ;;  %v10017_v15 = vld [vmem:[#allocation11 + $0x90] ss:$12 sps:$4 sm:$0xff]   ;;  %v10018_v16 = vld [vmem:[#allocation11 + $0x98] ss:$12 sps:$4 sm:$0xff]  }
  0xda   :  { %514 = vmatpush1.bf16.msra.mxu0 %v10013_v3  ;;  %9393 = vmatprep.subr.bf16.mxu1 %v11020_v4  ;;  %v10019_v17 = vld [vmem:[#allocation11 + $0x7c] ss:$12 sps:$4 sm:$0xff]   ;;  %v10021_v18 = vld [vmem:[#allocation11 + $0x78] ss:$12 sps:$4 sm:$0xff]   ;;  %v10022_v19 = vld [vmem:[#allocation11 + $0x80] ss:$12 sps:$4 sm:$0xff]  }
  0xdb   :  { %515 = vmatprep.subr.bf16.mxu0 %v10015_v14  ;;  %v10023_v20 = vld [vmem:[#allocation11 + $0x64] ss:$12 sps:$4 sm:$0xff]   ;;  %v10025_v21 = vld [vmem:[#allocation11 + $0x60] ss:$12 sps:$4 sm:$0xff]   ;;  %v10026_v22 = vld [vmem:[#allocation11 + $0x68] ss:$12 sps:$4 sm:$0xff]   ;;  %545 = vmatprep.mubr.bf16.mxu0 %v11021_v30 }
  0xdc   :  { %302 = vadd.xlane.f32.xlu0 %v297_v1  ;;  %v10027_v23 = vld [vmem:[#allocation11 + $0x4c] ss:$12 sps:$4 sm:$0xff]   ;;  %v10029_v24 = vld [vmem:[#allocation11 + $0x48] ss:$12 sps:$4 sm:$0xff]   ;;  %v10030_v25 = vld [vmem:[#allocation11 + $0x50] ss:$12 sps:$4 sm:$0xff]   ;;  %10009 = vset.pattern.permute.xlu1 %v11021_v30 }
  0xdd   :  { %9394 = vmatpush3.bf16.msra.mxu1 %v10018_v16  ;;  %v10031_v26 = vld [vmem:[#allocation11 + $0x34] ss:$12 sps:$4 sm:$0xff]   ;;  %v10033_v27 = vld [vmem:[#allocation11 + $0x30] ss:$12 sps:$4 sm:$0xff]   ;;  %v10034_v28 = vld [vmem:[#allocation11 + $0x38] ss:$12 sps:$4 sm:$0xff]   ;;  %10010 = vset.pattern.permute.xlu0 %v11021_v30 }
  0xde   :  { %516 = vmatpush1.bf16.msra.mxu0 %v10017_v15  ;;  %9395 = vmatprep.subr.bf16.mxu1 %v11020_v4  ;;  %v10035_v29 = vld [vmem:[#allocation11 + $0x1c] ss:$12 sps:$4 sm:$0xff]   ;;  %vm11022_vm0 = vmmov 0   ;;  %v10037_v31 = vld [vmem:[#allocation11 + $0x18] ss:$12 sps:$4 sm:$0xff]   ;;  %v11259_v54 = vshrl.u32 %v370_v53, 7 }
  0xdf   :  { %517 = vmatprep.subr.bf16.mxu0 %v10019_v17  ;;  %9407 = vmatprep.mubr.msk.bf16.mxu1 %vm11022_vm0, %v11020_v4  ;;  %v10038_v32 = vld [vmem:[#allocation11 + $0x20] ss:$12 sps:$4 sm:$0xff]   ;;  %v10039_v33 = vld [vmem:[#allocation11 + $0x4] ss:$12 sps:$4 sm:$0xff]   ;;  %v10042_v35 = vld [vmem:[#allocation11 + $0x8] ss:$12 sps:$4 sm:$0xff]  }
  0xe0   :  { %v10041_v34 = vld [vmem:[#allocation11] ss:$12 sps:$4 sm:$0xff]   ;;  %v8494_v44 = vld [vmem:[%s12224_s19] ss:$0 sm:$0xff]  ;;  %v8495_v48 = vld [vmem:[%s12224_s19 + $0x1] ss:$0 sm:$0xff] }
  0xe1   :  { %9396 = vmatpush3.bf16.msra.mxu1 %v10022_v19  ;;  %v11262_v55 = vsub.s32 0, %v11259_v54  ;;  %v367_v56 = vld [vmem:[#allocation28] ss:$8 sm:$0x7]  ;;  %v11265_v57 = vsub.s32 1, %v11259_v54  ;;  %v11269_v59 = vsub.s32 2, %v11259_v54 }
  0xe2   :  { %518 = vmatpush1.bf16.msra.mxu0 %v10021_v18  ;;  %9397 = vmatprep.subr.bf16.mxu1 %v11020_v4  ;;  %vm614_vm1 = vcmask 261120   ;;  %s11023_s8 = smov 96   ;;  %v11318_v18 = vld [vmem:[#allocation5 + $0x8] sm:$0xff]  ;;  %vm706_vm2 = vcmask 130048   ;;  %s11024_s15 = smov 32   ;;  %vm2210_vm3 = vcmask 523264  }
  0xe3   :  { %519 = vmatprep.subr.bf16.mxu0 %v10023_v20  ;;  %v373_v58 = vrot.slane %v367_v56, %v11262_v55  ;;  %v377_v60 = vrot.slane %v367_v56, %v11265_v57  ;;  %v381_v2 = vrot.slane %v367_v56, %v11269_v59  ;;  %vm2066_vm4 = vcmask 1040384   ;;  %s12242_s12 = sld [smem:[#allocation45_spill]]  ;;  %s11026_s27 = smov [#allocation29]  }
  0xe4   :  { %vm2817_vm5 = vcmask 1041408   ;;  %vm3047_vm6 = vcmask 123904   ;;  %vm8469_vm8 = vcmask 9216  }
  0xe5   :  { %9398 = vmatpush3.bf16.msra.mxu1 %v10026_v22 }
  0xe6   :  { %520 = vmatpush1.bf16.msra.mxu0 %v10025_v21  ;;  %9399 = vmatprep.subr.bf16.mxu1 %v11020_v4  ;;  %v11320_v21 = vld [vmem:[#allocation5] sm:$0xff] }
  0xe7   :  { %521 = vmatprep.subr.bf16.mxu0 %v10027_v23 }
  0xe9   :  { %9400 = vmatpush3.bf16.msra.mxu1 %v10030_v25 }
  0xea   :  { %522 = vmatpush1.bf16.msra.mxu0 %v10029_v24  ;;  %9401 = vmatprep.subr.bf16.mxu1 %v11020_v4 }
  0xeb   :  { %523 = vmatprep.subr.bf16.mxu0 %v10031_v26 }
  0xed   :  { %9402 = vmatpush3.bf16.msra.mxu1 %v10034_v28 }
  0xee   :  { %524 = vmatpush1.bf16.msra.mxu0 %v10033_v27  ;;  %9403 = vmatprep.subr.bf16.mxu1 %v11020_v4 }
  0xef   :  { %525 = vmatprep.subr.bf16.mxu0 %v10035_v29 }
  0xf1   :  { %9404 = vmatpush3.bf16.msra.mxu1 %v10038_v32 }
  0xf2   :  { %526 = vmatpush1.bf16.msra.mxu0 %v10037_v31  ;;  %9405 = vmatprep.subr.bf16.mxu1 %v11020_v4 }
  0xf3   :  { %527 = vmatprep.subr.bf16.mxu0 %v10039_v33 }
  0xf5   :  { %9406 = vmatpush3.bf16.msra.mxu1 %v10042_v35 }
  0xf6   :  { %528 = vmatpush1.bf16.msra.mxu0 %v10041_v34 }
 0x161   :  { %v301_v6 = vpop.xlane.xlu0 %300 }
 0x162   :  { %v305_v7 = vmul.f32 0.0078125, %v301_v6 }
 0x164   :  { %v11226_v8 = vsub.f32 %v296_v0, %v305_v7 }
 0x165   :  { %v303_v9 = vpop.xlane.xlu0 %302 }
 0x166   :  { %v306_v10 = vmul.f32 0.0078125, %v303_v9  ;;  %v309_v11 = vmul.f32 %v11226_v8, %v11226_v8 }
 0x168   :  { %311 = vadd.xlane.f32.xlu1 %v309_v11  ;;  %v11230_v12 = vsub.f32 %v297_v1, %v306_v10 }
 0x16a   :  { %v310_v13 = vmul.f32 %v11230_v12, %v11230_v12 }
 0x16c   :  { %313 = vadd.xlane.f32.xlu1 %v310_v13 }
 0x1f1   :  { %v312_v36 = vpop.xlane.xlu1 %311 }
 0x1f2   :  { %v315_v37 = vmul.f32 0.0078125, %v312_v36 }
 0x1f4   :  { %v317_v38 = vadd.f32 1e-05, %v315_v37 }
 0x1f5   :  { %v314_v39 = vpop.xlane.xlu1 %313 }
 0x1f6   :  { %10496 = vrsqrt.f32 %v317_v38  ;;  %v316_v40 = vmul.f32 0.0078125, %v314_v39 }
 0x1f8   :  { %v318_v41 = vadd.f32 1e-05, %v316_v40 }
 0x1fa   :  { %10498 = vrsqrt.f32 %v318_v41 }
 0x203   :  { %v10497_v42 = vpop.eup %10496 }
 0x204   :  { %v321_v43 = vmul.f32 %v10497_v42, %v11226_v8 }
 0x206   :  { %v327_v47 = vmul.f32 %v8494_v44, %v321_v43 }
 0x207   :  { %v10499_v45 = vpop.eup %10498 }
 0x208   :  { %v322_v46 = vmul.f32 %v10499_v45, %v11230_v12  ;;  %v11253_v50 = vadd.f32 %v8495_v48, %v327_v47 }
 0x20a   :  { %v328_v49 = vmul.f32 %v8494_v44, %v322_v46 }
 0x20c   :  { %v11255_v51 = vadd.f32 %v8495_v48, %v328_v49 }
 0x20e   :  { %v368_v52 = vpack.c.bf16 %v11255_v51, %v11253_v50 }
 0x210   :  { %546 = vmatmul.mubr.bf16.vlgmr.msra.gmra.mxu0 %v368_v52  ;;  %9408 = vmatmul.mubr.bf16.vlgmr.msra.gmra.mxu1 %v368_v52 }
 0x2d0   :  { %v547_v61 = vpop.f32.mrf.mxu0  ;;  %v590_v62 = vpop.f32.mrf.mxu1 }
 0x2d1   :  { %v11272_v63 = vadd.f32 %v547_v61, %v373_v58  ;;  %v11283_v10 = vadd.f32 %v590_v62, %v381_v2 }
 0x2d2   :  { %v549_v0 = vpop.f32.mrf.mxu0  ;;  %v9409_v1 = vpop.f32.mrf.mxu1 }
 0x2d3   :  { %v11275_v3 = vadd.f32 %v549_v0, %v377_v60  ;;  %9415 = vmatprep.mubr.msk.f32.mxu0 %vm614_vm1, %v11272_v63 }
 0x2d4   :  { %v551_v5 = vpop.f32.mrf.mxu0  ;;  %v593_v6 = vpop.f32.mrf.mxu1 }
 0x2d5   :  { %v11279_v7 = vadd.f32 %v593_v6, %v381_v2  ;;  %815 = vrot.lane.b32.xlu1 %v11275_v3, %s11023_s8  ;;  %v11299_v12 = vadd.f32 %v551_v5, %v373_v58  ;;  %v10045_v2 = vld [vmem:[%s12212_s7 + $0x8] sm:$0xff]  }
 0x2d6   :  { %v553_v8 = vpop.f32.mrf.mxu0  ;;  %v9410_v9 = vpop.f32.mrf.mxu1 }
 0x2d7   :  { %v11285_v11 = vadd.f32 %v553_v8, %v377_v60  ;;  %9418 = vmatprep.subr.mxu1 %v11279_v7  ;;  %v10046_v9 = vld [vmem:[%s12212_s7] sm:$0xff]  }
 0x2d8   :  { %9419 = vmatpush3.msra.mxu1 %v11279_v7 }
 0x2d9   :  { %9420 = vmatprep.subr.mxu1 %v11283_v10  ;;  %817 = vrot.lane.b32.xlu0 %v11285_v11, %s11023_s8 }
 0x2da   :  { %9411 = vmatprep.subr.msk.mxu0 %vm614_vm1, %v11285_v11  ;;  %811 = vrot.lane.b32.xlu1 %v11272_v63, %s11023_s8 }
 0x2db   :  { %9412 = vmatpush3.xpose.msk.msra.mxu0 %vm614_vm1, %v11285_v11  ;;  %9421 = vmatpush3.msra.mxu1 %v11283_v10 }
 0x2dc   :  { %9413 = vmatprep.subr.msk.mxu0 %vm614_vm1, %v11275_v3 }
 0x2de   :  { %813 = vrot.lane.b32.xlu1 %v11299_v12, %s11023_s8 }
 0x2df   :  { %9414 = vmatpush3.xpose.msk.msra.mxu0 %vm614_vm1, %v11275_v3 }
 0x2e2   :  { %9416 = vmatmul.mubr.msk.f32.vlgmr.msra.gmra.mxu0 %vm614_vm1, %v11299_v12 }
 0x347   :  { %v816_v13 = vpop.permute.xlu1 %815 }
 0x34b   :  { %v818_v14 = vpop.permute.xlu0 %817 }
 0x34c   :  { %v812_v15 = vpop.permute.xlu1 %811  ;;  %9425 = vmatprep.subr.msk.mxu0 %vm614_vm1, %v818_v14 }
 0x34d   :  { %9429 = vmatprep.mubr.msk.f32.mxu0 %vm614_vm1, %v812_v15  ;;  %9426 = vmatpush3.xpose.msk.msra.mxu0 %vm614_vm1, %v818_v14 }
 0x34e   :  { %9427 = vmatprep.subr.msk.mxu0 %vm614_vm1, %v816_v13 }
 0x350   :  { %v814_v16 = vpop.permute.xlu1 %813 }
 0x351   :  { %9428 = vmatpush3.xpose.msk.msra.mxu0 %vm614_vm1, %v816_v13 }
 0x352   :  { %9447 = vmatprep.subr.bf16.mxu0 %v11020_v4 }
 0x354   :  { %9430 = vmatmul.mubr.msk.f32.vlgmr.msra.gmra.mxu0 %vm614_vm1, %v814_v16 }
 0x355   :  { %9451 = vmatprep.mubr.msk.bf16.mxu0 %vm11022_vm0, %v11020_v4  ;;  %9448 = vmatpush3.bf16.msra.mxu0 %v10045_v2 }
 0x356   :  { %9449 = vmatprep.subr.bf16.mxu0 %v11020_v4 }
 0x359   :  { %9450 = vmatpush3.bf16.msra.mxu0 %v10046_v9 }
 0x3a2   :  { %v9417_v17 = vpop.f32.mrf.mxu0 }
 0x3a3   :  { %v703_v19 = vmul.f32 0.17677669, %v9417_v17 }
 0x3a4   :  { %v693_v20 = vpop.f32.mrf.mxu0 }
 0x3a5   :  { %v702_v22 = vmul.f32 0.17677669, %v693_v20  ;;  %v705_v23 = vadd.f32 %v703_v19, %v11318_v18 }
 0x3a7   :  { %v710_v24 = vsel %vm706_vm2, %v705_v23, -inf  ;;  %v704_v25 = vadd.f32 %v702_v22, %v11320_v21  ;;  %v10043_v22 = vld [vmem:[%s12212_s7 + $0x18] sm:$0xff]  }
 0x3a8   :  { %711 = vmax.xlane.f32.xlu1 %v710_v24  ;;  %v10044_v24 = vld [vmem:[%s12212_s7 + $0x10] sm:$0xff]  }
 0x3a9   :  { %v707_v26 = vsel %vm706_vm2, %v704_v25, -inf }
 0x3aa   :  { %708 = vmax.xlane.f32.xlu0 %v707_v26 }
 0x414   :  { %v9431_v27 = vpop.f32.mrf.mxu0 }
 0x415   :  { %v903_v29 = vmul.f32 0.17677669, %v9431_v27 }
 0x416   :  { %v893_v28 = vpop.f32.mrf.mxu0 }
 0x417   :  { %v902_v31 = vmul.f32 0.17677669, %v893_v28  ;;  %v905_v34 = vadd.f32 %v903_v29, %v11318_v18 }
 0x419   :  { %v904_v32 = vadd.f32 %v902_v31, %v11320_v21  ;;  %v909_v35 = vsel %vm706_vm2, %v905_v34, -inf }
 0x41b   :  { %v906_v33 = vsel %vm706_vm2, %v904_v32, -inf }
 0x41c   :  { %907 = vmax.xlane.f32.xlu0 %v906_v33 }
 0x420   :  { %910 = vmax.xlane.f32.xlu0 %v909_v35 }
 0x431   :  { %v712_v36 = vpop.xlane.xlu1 %711 }
 0x432   :  { %v714_v37 = vsub.f32 %v705_v23, %v712_v36 }
 0x433   :  { %v709_v38 = vpop.xlane.xlu0 %708 }
 0x434   :  { %v717_v39 = vmul.f32 1.442695, %v714_v37  ;;  %v713_v40 = vsub.f32 %v704_v25, %v709_v38 }
 0x436   :  { %10500 = vpow2.f32 %v717_v39  ;;  %v715_v41 = vmul.f32 1.442695, %v713_v40 }
 0x438   :  { %10502 = vpow2.f32 %v715_v41 }
 0x443   :  { %v10501_v42 = vpop.eup %10500 }
 0x444   :  { %v722_v43 = vsel %vm706_vm2, %v10501_v42, 0.0 }
 0x445   :  { %v10503_v44 = vpop.eup %10502  ;;  %723 = vadd.xlane.f32.xlu1 %v722_v43 }
 0x446   :  { %v719_v45 = vsel %vm706_vm2, %v10503_v44, 0.0 }
 0x447   :  { %720 = vadd.xlane.f32.xlu0 %v719_v45 }
 0x4a5   :  { %v908_v46 = vpop.xlane.xlu0 %907 }
 0x4a6   :  { %v912_v47 = vsub.f32 %v904_v32, %v908_v46 }
 0x4a8   :  { %v914_v48 = vmul.f32 1.442695, %v912_v47 }
 0x4a9   :  { %v911_v49 = vpop.xlane.xlu0 %910 }
 0x4aa   :  { %10504 = vpow2.f32 %v914_v48  ;;  %v913_v52 = vsub.f32 %v905_v34, %v911_v49 }
 0x4ac   :  { %v916_v53 = vmul.f32 1.442695, %v913_v52 }
 0x4ae   :  { %10506 = vpow2.f32 %v916_v53 }
 0x4b7   :  { %v10505_v56 = vpop.eup %10504 }
 0x4b8   :  { %v918_v58 = vsel %vm706_vm2, %v10505_v56, 0.0 }
 0x4b9   :  { %919 = vadd.xlane.f32.xlu0 %v918_v58 }
 0x4bb   :  { %v10507_v60 = vpop.eup %10506 }
 0x4bc   :  { %v921_v61 = vsel %vm706_vm2, %v10507_v60, 0.0 }
 0x4bd   :  { %922 = vadd.xlane.f32.xlu1 %v921_v61 }
 0x4ce   :  { %v724_v62 = vpop.xlane.xlu1 %723  ;;  %930 = vrot.lane.b32.xlu1 %v11283_v10, %s11023_s8 }
 0x4cf   :  { %932 = vrot.lane.b32.xlu0 %v11279_v7, %s11023_s8  ;;  %10508 = vrcp.f32 %v724_v62 }
 0x4d0   :  { %v721_v0 = vpop.xlane.xlu0 %720 }
 0x4d1   :  { %10510 = vrcp.f32 %v721_v0 }
 0x4d2   :  { %1136 = vrot.lane.b32.xlu1 %v11285_v11, %s11001_s22 }
 0x4d3   :  { %1130 = vrot.lane.b32.xlu0 %v11272_v63, %s11001_s22 }
 0x4d6   :  { %1134 = vrot.lane.b32.xlu1 %v11275_v3, %s11001_s22 }
 0x4da   :  { %1132 = vrot.lane.b32.xlu1 %v11299_v12, %s11001_s22 }
 0x4dc   :  { %v10509_v1 = vpop.eup %10508 }
 0x4dd   :  { %v728_v8 = vmul.f32 %v10509_v1, %v10501_v42 }
 0x4de   :  { %v10511_v5 = vpop.eup %10510 }
 0x4df   :  { %v727_v6 = vmul.f32 %v10511_v5, %v10503_v44 }
 0x4e1   :  { %9422 = vmatprep.mubr.msk.f32.mxu1 %vm706_vm2, %v727_v6 }
 0x4e2   :  { %9423 = vmatmul.mubr.msk.f32.vlgmr.msra.gmra.mxu1 %vm706_vm2, %v728_v8 }
 0x542   :  { %v920_v13 = vpop.xlane.xlu0 %919 }
 0x543   :  { %10512 = vrcp.f32 %v920_v13 }
 0x546   :  { %v923_v14 = vpop.xlane.xlu1 %922  ;;  %v933_v15 = vpop.permute.xlu0 %932 }
 0x547   :  { %10514 = vrcp.f32 %v923_v14  ;;  %9432 = vmatprep.subr.mxu1 %v933_v15 }
 0x548   :  { %9433 = vmatpush3.msra.mxu1 %v933_v15 }
 0x54a   :  { %v931_v16 = vpop.permute.xlu1 %930  ;;  %v1131_v33 = vpop.permute.xlu0 %1130 }
 0x54b   :  { %9434 = vmatprep.subr.mxu1 %v931_v16 }
 0x54c   :  { %9435 = vmatpush3.msra.mxu1 %v931_v16 }
 0x54d   :  { %9439 = vmatprep.subr.bf16.mxu1 %v11020_v4 }
 0x54e   :  { %v1137_v25 = vpop.permute.xlu1 %1136 }
 0x550   :  { %v10513_v17 = vpop.eup %10512 }
 0x551   :  { %v926_v19 = vmul.f32 %v10513_v17, %v10505_v56 }
 0x552   :  { %v1135_v34 = vpop.permute.xlu1 %1134 }
 0x553   :  { %9436 = vmatprep.mubr.msk.f32.mxu1 %vm706_vm2, %v926_v19 }
 0x554   :  { %v10515_v20 = vpop.eup %10514 }
 0x555   :  { %v927_v23 = vmul.f32 %v10515_v20, %v10507_v60 }
 0x556   :  { %v1133_v35 = vpop.permute.xlu1 %1132 }
 0x557   :  { %9437 = vmatmul.mubr.msk.f32.vlgmr.msra.gmra.mxu1 %vm706_vm2, %v927_v23 }
 0x558   :  { %9440 = vmatpush3.bf16.msra.mxu1 %v10043_v22  ;;  %9443 = vmatprep.mubr.msk.bf16.mxu1 %vm11022_vm0, %v11020_v4  ;;  %v10048_v22 = vld [vmem:[%s12212_s7 + $0x20] sm:$0xff]  }
 0x559   :  { %9441 = vmatprep.subr.bf16.mxu1 %v11020_v4 }
 0x55c   :  { %9442 = vmatpush3.bf16.msra.mxu1 %v10044_v24 }
 0x55d   :  { %9455 = vmatprep.subr.msk.mxu1 %vm614_vm1, %v1137_v25 }
 0x5a2   :  { %v9424_v26 = vpop.f32.mrf.mxu1 }
 0x5a4   :  { %v801_v27 = vpop.f32.mrf.mxu1 }
 0x5a5   :  { %v810_v28 = vpack.c.bf16 %v9424_v26, %v801_v27 }
 0x5a7   :  { %9452 = vmatmul.mubr.msk.bf16.vlgmr.msra.gmra.mxu0 %vm614_vm1, %v810_v28 }
 0x617   :  { %v9438_v29 = vpop.f32.mrf.mxu1 }
 0x619   :  { %v1008_v31 = vpop.f32.mrf.mxu1 }
 0x61a   :  { %v1017_v32 = vpack.c.bf16 %v9438_v29, %v1008_v31 }
 0x61c   :  { %9444 = vmatmul.mubr.msk.bf16.vlgmr.msra.gmra.mxu1 %vm614_vm1, %v1017_v32 }
 0x61d   :  { %9456 = vmatpush3.xpose.msk.msra.mxu1 %vm614_vm1, %v1137_v25  ;;  %9459 = vmatprep.mubr.msk.f32.mxu1 %vm614_vm1, %v1131_v33 }
 0x61e   :  { %9457 = vmatprep.subr.msk.mxu1 %vm614_vm1, %v1135_v34 }
 0x621   :  { %9458 = vmatpush3.xpose.msk.msra.mxu1 %vm614_vm1, %v1135_v34 }
 0x622   :  { %9469 = vmatprep.subr.bf16.mxu1 %v11020_v4 }
 0x624   :  { %9460 = vmatmul.mubr.msk.f32.vlgmr.msra.gmra.mxu1 %vm614_vm1, %v1133_v35 }
 0x625   :  { %9473 = vmatprep.mubr.msk.bf16.mxu1 %vm11022_vm0, %v11020_v4 }
 0x667   :  { %v11378_v36 = vpop.f32.mrf.mxu0 }
 0x669   :  { %v9453_v37 = vpop.f32.mrf.mxu0 }
 0x66b   :  { %v11380_v38 = vpop.f32.mrf.mxu0 }
 0x66d   :  { %v9454_v39 = vpop.f32.mrf.mxu0 }
 0x6dc   :  { %v11382_v40 = vpop.f32.mrf.mxu1 }
 0x6de   :  { %v9445_v41 = vpop.f32.mrf.mxu1 }
 0x6e0   :  { %v11384_v42 = vpop.f32.mrf.mxu1 }
 0x6e2   :  { %v9446_v43 = vpop.f32.mrf.mxu1 }
 0x6e4   :  { %v9461_v44 = vpop.f32.mrf.mxu1 }
 0x6e5   :  { %v1222_v45 = vmul.f32 0.17677669, %v9461_v44 }
 0x6e6   :  { %v1212_v46 = vpop.f32.mrf.mxu1 }
 0x6e7   :  { %v1221_v47 = vmul.f32 0.17677669, %v1212_v46  ;;  %v1224_v48 = vadd.f32 %v1222_v45, %v11318_v18 }
 0x6e9   :  { %v1228_v49 = vsel %vm706_vm2, %v1224_v48, -inf  ;;  %v1223_v52 = vadd.f32 %v1221_v47, %v11320_v21  ;;  %v1124_v47 = vadd.f32 %v11378_v36, %v11382_v40 }
 0x6ea   :  { %1229 = vmax.xlane.f32.xlu1 %v1228_v49 }
 0x6eb   :  { %v1225_v53 = vsel %vm706_vm2, %v1223_v52, -inf }
 0x6ec   :  { %1226 = vmax.xlane.f32.xlu0 %v1225_v53 }
 0x6fb   :  { %1247 = vrot.lane.b32.xlu1 %v11283_v10, %s11001_s22 }
 0x6ff   :  { %1399 = vrot.lane.b32.xlu1 %v11285_v11, %s11024_s15 }
 0x703   :  { %1397 = vrot.lane.b32.xlu1 %v11275_v3, %s11024_s15  ;;  %v10047_v3 = vld [vmem:[%s12212_s7 + $0x28] sm:$0xff]  }
 0x704   :  { %9470 = vmatpush3.bf16.msra.mxu1 %v10047_v3  ;;  %v613_v3 = vld [vmem:[#allocation28 + $0x1] ss:$0 sm:$0xff] }
 0x705   :  { %9471 = vmatprep.subr.bf16.mxu1 %v11020_v4 }
 0x707   :  { %1395 = vrot.lane.b32.xlu1 %v11299_v12, %s11024_s15 }
 0x708   :  { %9472 = vmatpush3.bf16.msra.mxu1 %v10048_v22 }
 0x709   :  { %9491 = vmatprep.subr.bf16.mxu1 %v11020_v4 }
 0x773   :  { %v1230_v56 = vpop.xlane.xlu1 %1229 }
 0x774   :  { %v1232_v58 = vsub.f32 %v1224_v48, %v1230_v56 }
 0x775   :  { %v1227_v60 = vpop.xlane.xlu0 %1226 }
 0x776   :  { %v1235_v61 = vmul.f32 1.442695, %v1232_v58  ;;  %v1231_v62 = vsub.f32 %v1223_v52, %v1227_v60  ;;  %v1127_v52 = vadd.f32 %v11380_v38, %v11384_v42  ;;  %v10049_v58 = vld [vmem:[%s12212_s7 + $0x38] sm:$0xff]  }
 0x777   :  { %v1248_v8 = vpop.permute.xlu1 %1247 }
 0x778   :  { %10516 = vpow2.f32 %v1235_v61  ;;  %v1233_v0 = vmul.f32 1.442695, %v1231_v62 }
 0x77a   :  { %10518 = vpow2.f32 %v1233_v0 }
 0x77b   :  { %v1400_v13 = vpop.permute.xlu1 %1399 }
 0x77f   :  { %v1398_v19 = vpop.permute.xlu1 %1397 }
 0x783   :  { %v1396_v20 = vpop.permute.xlu1 %1395 }
 0x785   :  { %v10517_v1 = vpop.eup %10516 }
 0x786   :  { %v1240_v2 = vsel %vm706_vm2, %v10517_v1, 0.0 }
 0x787   :  { %v10519_v5 = vpop.eup %10518  ;;  %1241 = vadd.xlane.f32.xlu0 %v1240_v2 }
 0x788   :  { %v1237_v11 = vsel %vm706_vm2, %v10519_v5, 0.0 }
 0x78b   :  { %1238 = vadd.xlane.f32.xlu0 %v1237_v11 }
 0x7a1   :  { %1249 = vrot.lane.b32.xlu0 %v11279_v7, %s11001_s22 }
 0x7a5   :  { %1393 = vrot.lane.b32.xlu0 %v11272_v63, %s11024_s15 }
 0x810   :  { %v1242_v12 = vpop.xlane.xlu0 %1241 }
 0x811   :  { %10520 = vrcp.f32 %v1242_v12 }
 0x814   :  { %v1239_v6 = vpop.xlane.xlu0 %1238 }
 0x815   :  { %10522 = vrcp.f32 %v1239_v6 }
 0x818   :  { %v1250_v9 = vpop.permute.xlu0 %1249 }
 0x819   :  { %9462 = vmatprep.subr.mxu0 %v1250_v9 }
 0x81a   :  { %9463 = vmatpush3.msra.mxu0 %v1250_v9 }
 0x81b   :  { %9464 = vmatprep.subr.mxu0 %v1248_v8 }
 0x81c   :  { %9465 = vmatpush3.msra.mxu0 %v1248_v8  ;;  %v1394_v17 = vpop.permute.xlu0 %1393 }
 0x81d   :  { %9477 = vmatprep.subr.msk.mxu0 %vm614_vm1, %v1400_v13 }
 0x81e   :  { %v10521_v63 = vpop.eup %10520 }
 0x81f   :  { %v1246_v16 = vmul.f32 %v10521_v63, %v10517_v1  ;;  %v10050_v1 = vld [vmem:[%s12212_s7 + $0x30] sm:$0xff]  }
 0x822   :  { %v10523_v14 = vpop.eup %10522 }
 0x823   :  { %v1245_v15 = vmul.f32 %v10523_v14, %v10519_v5 }
 0x825   :  { %9466 = vmatprep.mubr.msk.f32.mxu0 %vm706_vm2, %v1245_v15 }
 0x826   :  { %9467 = vmatmul.mubr.msk.f32.vlgmr.msra.gmra.mxu0 %vm706_vm2, %v1246_v16 }
 0x827   :  { %9478 = vmatpush3.xpose.msk.msra.mxu0 %vm614_vm1, %v1400_v13  ;;  %9481 = vmatprep.mubr.msk.f32.mxu0 %vm614_vm1, %v1394_v17 }
 0x828   :  { %9479 = vmatprep.subr.msk.mxu0 %vm614_vm1, %v1398_v19 }
 0x82b   :  { %9480 = vmatpush3.xpose.msk.msra.mxu0 %vm614_vm1, %v1398_v19  ;;  %v10051_v19 = vld [vmem:[#allocation13 + $0x70] ss:$8 sps:$4 sm:$0xff]  }
 0x82e   :  { %9482 = vmatmul.mubr.msk.f32.vlgmr.msra.gmra.mxu0 %vm614_vm1, %v1396_v20  ;;  %v10053_v20 = vld [vmem:[#allocation13 + $0x74] ss:$8 sps:$4 sm:$0xff]  }
 0x8e6   :  { %v9468_v23 = vpop.f32.mrf.mxu0 }
 0x8e8   :  { %v1325_v24 = vpop.f32.mrf.mxu0 }
 0x8e9   :  { %v1334_v25 = vpack.c.bf16 %v9468_v23, %v1325_v24 }
 0x8eb   :  { %9474 = vmatmul.mubr.msk.bf16.vlgmr.msra.gmra.mxu1 %vm614_vm1, %v1334_v25 }
 0x8ec   :  { %9495 = vmatprep.mubr.msk.bf16.mxu1 %vm11022_vm0, %v11020_v4  ;;  %9492 = vmatpush3.bf16.msra.mxu1 %v10049_v58  ;;  %v10084_v58 = vld [vmem:[#allocation14 + $0x18] sm:$0xff]  }
 0x8ed   :  { %9493 = vmatprep.subr.bf16.mxu1 %v11020_v4 }
 0x8ee   :  { %v9483_v26 = vpop.f32.mrf.mxu0 }
 0x8ef   :  { %v1485_v27 = vmul.f32 0.17677669, %v9483_v26 }
 0x8f0   :  { %v1475_v28 = vpop.f32.mrf.mxu0  ;;  %9494 = vmatpush3.bf16.msra.mxu1 %v10050_v1 }
 0x8f1   :  { %v1484_v29 = vmul.f32 0.17677669, %v1475_v28  ;;  %v1487_v31 = vadd.f32 %v1485_v27, %v11318_v18  ;;  %v10056_v28 = vld [vmem:[#allocation13 + $0x64] ss:$8 sps:$4 sm:$0xff]  }
 0x8f3   :  { %v1491_v32 = vsel %vm706_vm2, %v1487_v31, -inf  ;;  %v1486_v33 = vadd.f32 %v1484_v29, %v11320_v21  ;;  %v10054_v29 = vld [vmem:[#allocation13 + $0x60] ss:$8 sps:$4 sm:$0xff]  }
 0x8f4   :  { %1492 = vmax.xlane.f32.xlu1 %v1491_v32  ;;  %v10057_v32 = vld [vmem:[#allocation13 + $0x50] ss:$8 sps:$4 sm:$0xff]  }
 0x8f5   :  { %v1488_v34 = vsel %vm706_vm2, %v1486_v33, -inf }
 0x8f6   :  { %1489 = vmax.xlane.f32.xlu0 %v1488_v34  ;;  %v10062_v34 = vld [vmem:[#allocation13 + $0x44] ss:$8 sps:$4 sm:$0xff]  }
 0x905   :  { %1510 = vrot.lane.b32.xlu1 %v11283_v10, %s11024_s15 }
 0x97d   :  { %v1493_v35 = vpop.xlane.xlu1 %1492 }
 0x97e   :  { %v1495_v37 = vsub.f32 %v1487_v31, %v1493_v35  ;;  %v10059_v31 = vld [vmem:[#allocation13 + $0x54] ss:$8 sps:$4 sm:$0xff]  }
 0x97f   :  { %v1490_v39 = vpop.xlane.xlu0 %1489  ;;  %v10065_v35 = vld [vmem:[#allocation13 + $0x34] ss:$8 sps:$4 sm:$0xff]  }
 0x980   :  { %v1498_v41 = vmul.f32 1.442695, %v1495_v37  ;;  %v1494_v43 = vsub.f32 %v1486_v33, %v1490_v39  ;;  %v10060_v33 = vld [vmem:[#allocation13 + $0x40] ss:$8 sps:$4 sm:$0xff]   ;;  %v10063_v37 = vld [vmem:[#allocation13 + $0x30] ss:$8 sps:$4 sm:$0xff]  }
 0x981   :  { %v1511_v61 = vpop.permute.xlu1 %1510  ;;  %v10068_v39 = vld [vmem:[#allocation13 + $0x24] ss:$8 sps:$4 sm:$0xff]  }
 0x982   :  { %10524 = vpow2.f32 %v1498_v41  ;;  %v1496_v44 = vmul.f32 1.442695, %v1494_v43  ;;  %v10066_v41 = vld [vmem:[#allocation13 + $0x20] ss:$8 sps:$4 sm:$0xff]   ;;  %v10071_v43 = vld [vmem:[#allocation13 + $0x14] ss:$8 sps:$4 sm:$0xff]  }
 0x984   :  { %10526 = vpow2.f32 %v1496_v44  ;;  %v10069_v44 = vld [vmem:[#allocation13 + $0x10] ss:$8 sps:$4 sm:$0xff]  }
 0x98f   :  { %v10525_v18 = vpop.eup %10524 }
 0x990   :  { %v1503_v45 = vsel %vm706_vm2, %v10525_v18, 0.0 }
 0x991   :  { %v10527_v46 = vpop.eup %10526  ;;  %1504 = vadd.xlane.f32.xlu0 %v1503_v45  ;;  %v10072_v45 = vld [vmem:[#allocation13] ss:$8 sps:$4 sm:$0xff]  }
 0x992   :  { %v1500_v21 = vsel %vm706_vm2, %v10527_v46, 0.0 }
 0x995   :  { %1501 = vadd.xlane.f32.xlu0 %v1500_v21  ;;  %v10076_v21 = vld [vmem:[#allocation14 + $0x38] sm:$0xff]  }
 0x9ab   :  { %1512 = vrot.lane.b32.xlu0 %v11279_v7, %s11024_s15  ;;  %v1384_v10 = vpop.f32.mrf.mxu1 }
 0x9ac   :  { %v1391_v48 = vadd.f32 %v1384_v10, %v1124_v47  ;;  %v10077_v47 = vld [vmem:[#allocation14 + $0x70] sm:$0xff]  }
 0x9ad   :  { %v9475_v49 = vpop.f32.mrf.mxu1  ;;  %v10078_v10 = vld [vmem:[#allocation14 + $0x30] sm:$0xff]  }
 0x9ae   :  { %v10080_v49 = vld [vmem:[#allocation14 + $0x28] sm:$0xff]  }
 0x9af   :  { %v1387_v53 = vpop.f32.mrf.mxu1 }
 0x9b0   :  { %v1392_v56 = vadd.f32 %v1387_v53, %v1127_v52  ;;  %v10081_v52 = vld [vmem:[#allocation14 + $0x60] sm:$0xff]  }
 0x9b1   :  { %v9476_v60 = vpop.f32.mrf.mxu1  ;;  %v10082_v53 = vld [vmem:[#allocation14 + $0x20] sm:$0xff]  }
 0xa1a   :  { %v1505_v36 = vpop.xlane.xlu0 %1504 }
 0xa1b   :  { %10528 = vrcp.f32 %v1505_v36 }
 0xa1e   :  { %v1502_v40 = vpop.xlane.xlu0 %1501 }
 0xa1f   :  { %10530 = vrcp.f32 %v1502_v40 }
 0xa22   :  { %v1513_v7 = vpop.permute.xlu0 %1512 }
 0xa23   :  { %9484 = vmatprep.subr.mxu0 %v1513_v7 }
 0xa24   :  { %9485 = vmatpush3.msra.mxu0 %v1513_v7 }
 0xa25   :  { %9486 = vmatprep.subr.mxu0 %v1511_v61 }
 0xa26   :  { %9487 = vmatpush3.msra.mxu0 %v1511_v61 }
 0xa27   :  { %1806 = vmatprep.subr.bf16.mxu0 %v10053_v20 }
 0xa28   :  { %v10529_v38 = vpop.eup %10528 }
 0xa29   :  { %v1509_v0 = vmul.f32 %v10529_v38, %v10525_v18  ;;  %v10074_v18 = vld [vmem:[#allocation13 + $0x4] ss:$8 sps:$4 sm:$0xff]  }
 0xa2c   :  { %v10531_v42 = vpop.eup %10530 }
 0xa2d   :  { %v1508_v62 = vmul.f32 %v10531_v42, %v10527_v46  ;;  %v10075_v46 = vld [vmem:[#allocation14 + $0x78] sm:$0xff]  }
 0xa2e   :  { %9056 = vmatprep.subr.bf16.mxu1 %v10075_v46 }
 0xa2f   :  { %9488 = vmatprep.mubr.msk.f32.mxu0 %vm706_vm2, %v1508_v62 }
 0xa30   :  { %9489 = vmatmul.mubr.msk.f32.vlgmr.msra.gmra.mxu0 %vm706_vm2, %v1509_v0  ;;  %v8556_v0 = vld [vmem:[%s12224_s19 + $0x2] ss:$0 sm:$0xff] }
 0xa31   :  { %1838 = vmatprep.mubr.bf16.mxu0 %v11021_v30  ;;  %1807 = vmatpush1.bf16.msra.mxu0 %v10051_v19 }
 0xa32   :  { %1808 = vmatprep.subr.bf16.mxu0 %v10056_v28 }
 0xa35   :  { %1809 = vmatpush1.bf16.msra.mxu0 %v10054_v29 }
 0xa36   :  { %1810 = vmatprep.subr.bf16.mxu0 %v10059_v31 }
 0xa39   :  { %1811 = vmatpush1.bf16.msra.mxu0 %v10057_v32 }
 0xa3a   :  { %1812 = vmatprep.subr.bf16.mxu0 %v10062_v34 }
 0xa3d   :  { %1813 = vmatpush1.bf16.msra.mxu0 %v10060_v33 }
 0xa3e   :  { %1814 = vmatprep.subr.bf16.mxu0 %v10065_v35 }
 0xa41   :  { %1815 = vmatpush1.bf16.msra.mxu0 %v10063_v37  ;;  %v1885_v37 = vld [vmem:[#allocation28 + $0x3] ss:$0 sm:$0xff] }
 0xa42   :  { %1816 = vmatprep.subr.bf16.mxu0 %v10068_v39 }
 0xa45   :  { %1817 = vmatpush1.bf16.msra.mxu0 %v10066_v41 }
 0xa46   :  { %1818 = vmatprep.subr.bf16.mxu0 %v10071_v43 }
 0xa49   :  { %1819 = vmatpush1.bf16.msra.mxu0 %v10069_v44 }
 0xa4a   :  { %1820 = vmatprep.subr.bf16.mxu0 %v10074_v18 }
 0xa4d   :  { %1821 = vmatpush1.bf16.msra.mxu0 %v10072_v45 }
 0xa4e   :  { %9499 = vmatprep.subr.bf16.mxu0 %v11020_v4 }
 0xaf0   :  { %v9490_v2 = vpop.f32.mrf.mxu0 }
 0xaf2   :  { %v1588_v5 = vpop.f32.mrf.mxu0 }
 0xaf3   :  { %v1597_v11 = vpack.c.bf16 %v9490_v2, %v1588_v5 }
 0xaf5   :  { %9496 = vmatmul.mubr.msk.bf16.vlgmr.msra.gmra.mxu1 %vm614_vm1, %v1597_v11  ;;  %v8557_v11 = vld [vmem:[%s12224_s19 + $0x3] ss:$0 sm:$0xff] }
 0xaf6   :  { %9057 = vmatpush3.bf16.msra.mxu1 %v10076_v21 }
 0xaf7   :  { %9058 = vmatprep.subr.bf16.mxu1 %v10077_v47 }
 0xafa   :  { %9059 = vmatpush3.bf16.msra.mxu1 %v10078_v10  ;;  %v10091_v10 = vld [vmem:[#allocation17 + $0x18] sm:$0xff]  }
 0xbb5   :  { %v1647_v12 = vpop.f32.mrf.mxu1 }
 0xbb6   :  { %v1654_v6 = vadd.f32 %v1647_v12, %v1391_v48  ;;  %v10079_v48 = vld [vmem:[#allocation14 + $0x68] sm:$0xff]  }
 0xbb7   :  { %v9497_v8 = vpop.f32.mrf.mxu1  ;;  %9060 = vmatprep.subr.bf16.mxu1 %v10079_v48  ;;  %v10092_v48 = vld [vmem:[#allocation17 + $0x10] sm:$0xff]  }
 0xbb8   :  { %v1656_v9 = vadd.f32 %v1654_v6, %v613_v3  ;;  %9061 = vmatpush3.bf16.msra.mxu1 %v10080_v49  ;;  %v10093_v49 = vld [vmem:[#allocation17 + $0x8] sm:$0xff]  }
 0xbb9   :  { %v1650_v13 = vpop.f32.mrf.mxu1  ;;  %9062 = vmatprep.subr.bf16.mxu1 %v10081_v52  ;;  %v10094_v52 = vld [vmem:[#allocation17] sm:$0xff]  }
 0xbba   :  { %v1655_v63 = vadd.f32 %v1650_v13, %v1392_v56  ;;  %v1658_v14 = vadd.f32 %v1656_v9, %v11253_v50  ;;  %v10083_v56 = vld [vmem:[#allocation14 + $0x58] sm:$0xff]   ;;  %v10085_v9 = vld [vmem:[#allocation14 + $0x50] sm:$0xff]  }
 0xbbb   :  { %v9498_v15 = vpop.f32.mrf.mxu1  ;;  %v10086_v13 = vld [vmem:[#allocation14 + $0x10] sm:$0xff]  }
 0xbbc   :  { %v1657_v16 = vadd.f32 %v1655_v63, %v613_v3  ;;  %1662 = vadd.xlane.f32.xlu1 %v1658_v14  ;;  %9063 = vmatpush3.bf16.msra.mxu1 %v10082_v53  ;;  %v10087_v63 = vld [vmem:[#allocation14 + $0x48] sm:$0xff]   ;;  %v10089_v15 = vld [vmem:[#allocation14 + $0x40] sm:$0xff]   ;;  %v2175_v53 = vld [vmem:[#allocation8] sm:$0x3] }
 0xbbd   :  { %9064 = vmatprep.subr.bf16.mxu1 %v10083_v56  ;;  %v10097_v56 = vld [vmem:[#allocation20 + $0x154] ss:$24 sps:$4 sm:$0xff]  }
 0xbbe   :  { %v1659_v17 = vadd.f32 %v1657_v16, %v11255_v51  ;;  %v10090_v16 = vld [vmem:[#allocation14] sm:$0xff]  }
 0xbc0   :  { %1664 = vadd.xlane.f32.xlu0 %v1659_v17  ;;  %9065 = vmatpush3.bf16.msra.mxu1 %v10084_v58  ;;  %v2185_v58 = vpack.c.bf16 %v2175_v53, %v2175_v53 }
 0xbc1   :  { %9066 = vmatprep.subr.bf16.mxu1 %v10085_v9  ;;  %v10107_v9 = vld [vmem:[#allocation20 + $0xc0] ss:$24 sps:$4 sm:$0xff]  }
 0xbc4   :  { %9067 = vmatpush3.bf16.msra.mxu1 %v10086_v13  ;;  %v10110_v13 = vld [vmem:[#allocation16 + $0x20] sm:$0xff]  }
 0xbc5   :  { %9068 = vmatprep.subr.bf16.mxu1 %v10087_v63  ;;  %v10113_v63 = vld [vmem:[#allocation20 + $0x94] ss:$24 sps:$4 sm:$0xff]  }
 0xc45   :  { %v1663_v22 = vpop.xlane.xlu1 %1662 }
 0xc46   :  { %v1666_v23 = vmul.f32 0.0078125, %v1663_v22 }
 0xc48   :  { %v11450_v24 = vsub.f32 %v1658_v14, %v1666_v23  ;;  %v10088_v14 = vld [vmem:[#allocation14 + $0x8] sm:$0xff]  }
 0xc49   :  { %v1665_v25 = vpop.xlane.xlu0 %1664  ;;  %9069 = vmatpush3.bf16.msra.mxu1 %v10088_v14  ;;  %v10111_v14 = vld [vmem:[#allocation20 + $0x90] ss:$24 sps:$4 sm:$0xff]  }
 0xc4a   :  { %v1667_v26 = vmul.f32 0.0078125, %v1665_v25  ;;  %v1670_v27 = vmul.f32 %v11450_v24, %v11450_v24  ;;  %9070 = vmatprep.subr.bf16.mxu1 %v10089_v15  ;;  %v10117_v15 = vld [vmem:[#allocation20 + $0x64] ss:$24 sps:$4 sm:$0xff]  }
 0xc4c   :  { %v11454_v50 = vsub.f32 %v1659_v17, %v1667_v26  ;;  %1672 = vadd.xlane.f32.xlu0 %v1670_v27  ;;  %v1713_v17 = vld [vmem:[#allocation28 + $0x2] ss:$8 sm:$0x3] }
 0xc4d   :  { %9071 = vmatpush3.bf16.msra.mxu1 %v10090_v16  ;;  %v1723_v20 = vrot.slane %v1713_v17, %v11265_v57  ;;  %v1719_v22 = vrot.slane %v1713_v17, %v11262_v55  ;;  %v10114_v16 = vld [vmem:[#allocation16 + $0x18] sm:$0xff]  }
 0xc4e   :  { %v1671_v51 = vmul.f32 %v11454_v50, %v11454_v50  ;;  %9519 = vmatprep.subr.bf16.mxu1 %v11020_v4  ;;  %v10115_v17 = vld [vmem:[#allocation20 + $0x60] ss:$24 sps:$4 sm:$0xff]  }
 0xc50   :  { %1674 = vadd.xlane.f32.xlu1 %v1671_v51 }
 0xcd5   :  { %v1673_v60 = vpop.xlane.xlu0 %1672 }
 0xcd6   :  { %v1676_v36 = vmul.f32 0.0078125, %v1673_v60  ;;  %v10095_v60 = vld [vmem:[#allocation20 + $0x150] ss:$24 sps:$4 sm:$0xff]  }
 0xcd8   :  { %v1678_v40 = vadd.f32 1e-05, %v1676_v36 }
 0xcd9   :  { %v1675_v7 = vpop.xlane.xlu1 %1674 }
 0xcda   :  { %10532 = vrsqrt.f32 %v1678_v40  ;;  %v1677_v61 = vmul.f32 0.0078125, %v1675_v7 }
 0xcdc   :  { %v1679_v38 = vadd.f32 1e-05, %v1677_v61 }
 0xcde   :  { %10534 = vrsqrt.f32 %v1679_v38 }
 0xce7   :  { %v10533_v42 = vpop.eup %10532 }
 0xce8   :  { %v1682_v62 = vmul.f32 %v10533_v42, %v11450_v24 }
 0xcea   :  { %v1688_v5 = vmul.f32 %v8556_v0, %v1682_v62 }
 0xceb   :  { %v10535_v1 = vpop.eup %10534 }
 0xcec   :  { %v1683_v2 = vmul.f32 %v10535_v1, %v11454_v50  ;;  %v1694_v12 = vadd.f32 %v8557_v11, %v1688_v5  ;;  %v10098_v1 = vld [vmem:[#allocation16 + $0x38] sm:$0xff]  }
 0xced   :  { %v10099_v5 = vld [vmem:[#allocation20 + $0x120] ss:$24 sps:$4 sm:$0xff]  }
 0xcee   :  { %v1689_v3 = vmul.f32 %v8556_v0, %v1683_v2  ;;  %v10101_v2 = vld [vmem:[#allocation20 + $0x124] ss:$24 sps:$4 sm:$0xff]  }
 0xcf0   :  { %v1695_v6 = vadd.f32 %v8557_v11, %v1689_v3  ;;  %v10102_v11 = vld [vmem:[#allocation16 + $0x30] sm:$0xff]  }
 0xcf1   :  { %v10105_v3 = vld [vmem:[#allocation20 + $0xf4] ss:$24 sps:$4 sm:$0xff]  }
 0xcf2   :  { %v1714_v8 = vpack.c.bf16 %v1695_v6, %v1694_v12 }
 0xcf4   :  { %1839 = vmatmul.mubr.bf16.vlgmr.msra.gmra.mxu0 %v1714_v8  ;;  %v10109_v8 = vld [vmem:[#allocation20 + $0xc4] ss:$24 sps:$4 sm:$0xff]  }
 0xcf5   :  { %9515 = vmatprep.mubr.msk.bf16.mxu0 %vm11022_vm0, %v11020_v4  ;;  %9500 = vmatpush3.bf16.msra.mxu0 %v10098_v1  ;;  %v10142_v1 = vld [vmem:[#allocation20 + $0xf8] ss:$24 sps:$4 sm:$0xff]  }
 0xcf6   :  { %9501 = vmatprep.subr.bf16.mxu0 %v11020_v4 }
 0xcf9   :  { %9502 = vmatpush3.bf16.msra.mxu0 %v10102_v11  ;;  %v10153_v11 = vld [vmem:[#allocation20 + $0xa4] ss:$24 sps:$4 sm:$0xff]  }
 0xcfa   :  { %9503 = vmatprep.subr.bf16.mxu0 %v11020_v4 }
 0xdb4   :  { %v1840_v19 = vpop.f32.mrf.mxu0 }
 0xdb5   :  { %v1841_v27 = vadd.f32 %v1840_v19, %v1719_v22  ;;  %v10121_v19 = vld [vmem:[#allocation20 + $0x34] ss:$24 sps:$4 sm:$0xff]  }
 0xdb6   :  { %v1842_v23 = vpop.f32.mrf.mxu0 }
 0xdb7   :  { %v1843_v25 = vadd.f32 %v1842_v23, %v1723_v20  ;;  %v1849_v32 = vmax.f32 %v1841_v27, 0.0  ;;  %v10125_v23 = vld [vmem:[#allocation20 + $0x4] ss:$24 sps:$4 sm:$0xff]  }
 0xdb8   :  { %v1844_v24 = vpop.f32.mrf.mxu0  ;;  %v10126_v27 = vld [vmem:[#allocation16] sm:$0xff]  }
 0xdb9   :  { %v1845_v26 = vadd.f32 %v1844_v24, %v1719_v22  ;;  %v1850_v29 = vmax.f32 %v1843_v25, 0.0  ;;  %v10119_v22 = vld [vmem:[#allocation20 + $0x30] ss:$24 sps:$4 sm:$0xff]   ;;  %v10123_v25 = vld [vmem:[#allocation20] ss:$24 sps:$4 sm:$0xff]  }
 0xdba   :  { %v1846_v50 = vpop.f32.mrf.mxu0  ;;  %v10122_v24 = vld [vmem:[#allocation16 + $0x8] sm:$0xff]  }
 0xdbb   :  { %v1847_v51 = vadd.f32 %v1846_v50, %v1723_v20  ;;  %v1851_v28 = vmax.f32 %v1845_v26, 0.0  ;;  %v10118_v20 = vld [vmem:[#allocation16 + $0x10] sm:$0xff]   ;;  %v10129_v26 = vld [vmem:[#allocation20 + $0x164] ss:$24 sps:$4 sm:$0xff]  }
 0xdbc   :  { %v10132_v50 = vld [vmem:[#allocation20 + $0x15c] ss:$24 sps:$4 sm:$0xff]  }
 0xdbd   :  { %v1852_v31 = vmax.f32 %v1847_v51, 0.0  ;;  %v1886_v34 = vpack.c.bf16 %v1851_v28, %v1849_v32 }
 0xdbf   :  { %v1887_v33 = vpack.c.bf16 %v1852_v31, %v1850_v29 }
 0xdc1   :  { %2016 = vmatprep.mubr.bf16.mxu1 %v1887_v33 }
 0xdc2   :  { %2017 = vmatmul.mubr.bf16.vlgmr.msra.gmra.mxu1 %v1886_v34 }
 0xdc3   :  { %9527 = vmatprep.mubr.msk.bf16.mxu1 %vm11022_vm0, %v11020_v4  ;;  %9520 = vmatpush3.bf16.msra.mxu1 %v10091_v10 }
 0xdc4   :  { %9521 = vmatprep.subr.bf16.mxu1 %v11020_v4 }
 0xdc7   :  { %9522 = vmatpush3.bf16.msra.mxu1 %v10092_v48 }
 0xdc8   :  { %9523 = vmatprep.subr.bf16.mxu1 %v11020_v4 }
 0xdcb   :  { %9524 = vmatpush3.bf16.msra.mxu1 %v10093_v49  ;;  %v10127_v49 = vld [vmem:[#allocation20 + $0x160] ss:$24 sps:$4 sm:$0xff]  }
 0xdcc   :  { %9525 = vmatprep.subr.bf16.mxu1 %v11020_v4 }
 0xdcf   :  { %9526 = vmatpush3.bf16.msra.mxu1 %v10094_v52 }
 0xdd0   :  { %2578 = vmatprep.subr.bf16.mxu1 %v10097_v56  ;;  %v10135_v56 = vld [vmem:[#allocation20 + $0x134] ss:$24 sps:$4 sm:$0xff]  }
 0xdd2   :  { %9528 = vmatmul.mubr.msk.bf16.vlgmr.msra.gmra.mxu1 %vm2210_vm3, %v2185_v58  ;;  %v10130_v58 = vld [vmem:[#allocation20 + $0x158] ss:$24 sps:$4 sm:$0xff]  }
 0xdd3   :  { %2579 = vmatpush1.bf16.msra.mxu1 %v10095_v60  ;;  %2610 = vmatprep.mubr.bf16.mxu1 %v11021_v30 }
 0xdd4   :  { %2580 = vmatprep.subr.bf16.mxu1 %v10101_v2  ;;  %v10145_v2 = vld [vmem:[#allocation20 + $0xd0] ss:$24 sps:$4 sm:$0xff]  }
 0xdd7   :  { %2581 = vmatpush1.bf16.msra.mxu1 %v10099_v5  ;;  %v10150_v5 = vld [vmem:[#allocation20 + $0xcc] ss:$24 sps:$4 sm:$0xff]  }
 0xdd8   :  { %2582 = vmatprep.subr.bf16.mxu1 %v10105_v3  ;;  %v10148_v3 = vld [vmem:[#allocation20 + $0xc8] ss:$24 sps:$4 sm:$0xff]  }
 0xe82   :  { %v9072_v35 = vpop.f32.mrf.mxu1 }
 0xe84   :  { %v9073_v39 = vpop.f32.mrf.mxu1 }
 0xe85   :  { %v9074_v41 = vadd.f32 %v9073_v39, %v9072_v35 }
 0xe86   :  { %v9075_v43 = vpop.f32.mrf.mxu1 }
 0xe87   :  { %v2019_v44 = vadd.f32 %v9074_v41, %v1885_v37 }
 0xe88   :  { %v9076_v18 = vpop.f32.mrf.mxu1 }
 0xe89   :  { %v9077_v45 = vadd.f32 %v9076_v18, %v9075_v43  ;;  %v2025_v46 = vadd.f32 %v2019_v44, %v1694_v12  ;;  %v10103_v12 = vld [vmem:[#allocation20 + $0xf0] ss:$24 sps:$4 sm:$0xff]   ;;  %v8590_v44 = vld [vmem:[%s12224_s19 + $0x4] ss:$0 sm:$0xff] }
 0xe8a   :  { %2583 = vmatpush1.bf16.msra.mxu1 %v10103_v12  ;;  %v10151_v12 = vld [vmem:[#allocation20 + $0xa0] ss:$24 sps:$4 sm:$0xff]  }
 0xe8b   :  { %v2022_v21 = vadd.f32 %v9077_v45, %v1885_v37  ;;  %2029 = vadd.xlane.f32.xlu1 %v2025_v46  ;;  %2584 = vmatprep.subr.bf16.mxu1 %v10109_v8  ;;  %v10159_v8 = vld [vmem:[#allocation20 + $0x74] ss:$24 sps:$4 sm:$0xff]  }
 0xe8d   :  { %v2026_v47 = vadd.f32 %v2022_v21, %v1695_v6  ;;  %v10106_v6 = vld [vmem:[#allocation16 + $0x28] sm:$0xff]   ;;  %v8591_v21 = vld [vmem:[%s12224_s19 + $0x5] ss:$0 sm:$0xff] }
 0xe8e   :  { %9504 = vmatpush3.bf16.msra.mxu0 %v10106_v6  ;;  %2585 = vmatpush1.bf16.msra.mxu1 %v10107_v9  ;;  %v10156_v6 = vld [vmem:[#allocation20 + $0x9c] ss:$24 sps:$4 sm:$0xff]   ;;  %v10154_v9 = vld [vmem:[#allocation20 + $0x98] ss:$24 sps:$4 sm:$0xff]  }
 0xe8f   :  { %2031 = vadd.xlane.f32.xlu0 %v2026_v47  ;;  %9505 = vmatprep.subr.bf16.mxu0 %v11020_v4 }
 0xe90   :  { %2586 = vmatprep.subr.bf16.mxu1 %v10113_v63  ;;  %v10162_v63 = vld [vmem:[#allocation20 + $0x6c] ss:$24 sps:$4 sm:$0xff]  }
 0xe92   :  { %9506 = vmatpush3.bf16.msra.mxu0 %v10110_v13  ;;  %2587 = vmatpush1.bf16.msra.mxu1 %v10111_v14  ;;  %v11493_v51 = vpop.f32.mrf.mxu1  ;;  %v10157_v13 = vld [vmem:[#allocation20 + $0x70] ss:$24 sps:$4 sm:$0xff]   ;;  %v10165_v14 = vld [vmem:[#allocation20 + $0x44] ss:$24 sps:$4 sm:$0xff]  }
 0xe93   :  { %9507 = vmatprep.subr.bf16.mxu0 %v11020_v4  ;;  %2588 = vmatprep.subr.bf16.mxu1 %v10117_v15  ;;  %v10160_v15 = vld [vmem:[#allocation20 + $0x68] ss:$24 sps:$4 sm:$0xff]  }
 0xe94   :  { %v9529_v28 = vpop.f32.mrf.mxu1 }
 0xe95   :  { %v10179_v28 = vld [vmem:[#allocation19 + $0x18] sm:$0xff]  }
 0xe96   :  { %9508 = vmatpush3.bf16.msra.mxu0 %v10114_v16  ;;  %2589 = vmatpush1.bf16.msra.mxu1 %v10115_v17  ;;  %v2251_v29 = vpop.f32.mrf.mxu1  ;;  %v10163_v16 = vld [vmem:[#allocation20 + $0x40] ss:$24 sps:$4 sm:$0xff]   ;;  %v10168_v17 = vld [vmem:[#allocation20 + $0x3c] ss:$24 sps:$4 sm:$0xff]  }
 0xe97   :  { %9509 = vmatprep.subr.bf16.mxu0 %v11020_v4  ;;  %2590 = vmatprep.subr.bf16.mxu1 %v10121_v19  ;;  %v10171_v19 = vld [vmem:[#allocation20 + $0x14] ss:$24 sps:$4 sm:$0xff]  }
 0xe98   :  { %v9530_v31 = vpop.f32.mrf.mxu1  ;;  %v10180_v29 = vld [vmem:[#allocation19 + $0x10] sm:$0xff]  }
 0xe99   :  { %v2184_v31 = vld [vmem:[#allocation28 + $0x5] ss:$0 sm:$0xff] }
 0xe9a   :  { %9510 = vmatpush3.bf16.msra.mxu0 %v10118_v20  ;;  %2591 = vmatpush1.bf16.msra.mxu1 %v10119_v22  ;;  %v10166_v20 = vld [vmem:[#allocation20 + $0x38] ss:$24 sps:$4 sm:$0xff]  }
 0xe9b   :  { %9511 = vmatprep.subr.bf16.mxu0 %v11020_v4  ;;  %2592 = vmatprep.subr.bf16.mxu1 %v10125_v23  ;;  %v10169_v22 = vld [vmem:[#allocation20 + $0x10] ss:$24 sps:$4 sm:$0xff]   ;;  %v10174_v23 = vld [vmem:[#allocation20 + $0xc] ss:$24 sps:$4 sm:$0xff]  }
 0xe9e   :  { %9512 = vmatpush3.bf16.msra.mxu0 %v10122_v24  ;;  %2593 = vmatpush1.bf16.msra.mxu1 %v10123_v25  ;;  %v10172_v24 = vld [vmem:[#allocation20 + $0x8] ss:$24 sps:$4 sm:$0xff]   ;;  %v10175_v25 = vld [vmem:[#allocation19 + $0x38] sm:$0xff]  }
 0xe9f   :  { %9513 = vmatprep.subr.bf16.mxu0 %v11020_v4  ;;  %2664 = vmatprep.subr.bf16.mxu1 %v10129_v26  ;;  %v10176_v26 = vld [vmem:[#allocation19 + $0x30] sm:$0xff]  }
 0xea2   :  { %9514 = vmatpush3.bf16.msra.mxu0 %v10126_v27  ;;  %v10177_v27 = vld [vmem:[#allocation19 + $0x28] sm:$0xff]  }
 0xea3   :  { %2621 = vmatprep.subr.bf16.mxu0 %v10132_v50  ;;  %v10178_v50 = vld [vmem:[#allocation19 + $0x20] sm:$0xff]  }
 0xf14   :  { %v2030_v36 = vpop.xlane.xlu1 %2029 }
 0xf15   :  { %v2033_v40 = vmul.f32 0.0078125, %v2030_v36 }
 0xf17   :  { %v11478_v7 = vsub.f32 %v2025_v46, %v2033_v40  ;;  %v10133_v40 = vld [vmem:[#allocation20 + $0x130] ss:$24 sps:$4 sm:$0xff]  }
 0xf18   :  { %v2032_v61 = vpop.xlane.xlu0 %2031 }
 0xf19   :  { %v2034_v38 = vmul.f32 0.0078125, %v2032_v61  ;;  %v2037_v42 = vmul.f32 %v11478_v7, %v11478_v7  ;;  %v10141_v61 = vld [vmem:[#allocation20 + $0x104] ss:$24 sps:$4 sm:$0xff]  }
 0xf1b   :  { %v11482_v62 = vsub.f32 %v2026_v47, %v2034_v38  ;;  %2039 = vadd.xlane.f32.xlu1 %v2037_v42  ;;  %v10136_v38 = vld [vmem:[#allocation20 + $0x128] ss:$24 sps:$4 sm:$0xff]  }
 0xf1c   :  { %v10139_v42 = vld [vmem:[#allocation20 + $0x100] ss:$24 sps:$4 sm:$0xff]  }
 0xf1d   :  { %v2038_v0 = vmul.f32 %v11482_v62, %v11482_v62 }
 0xf1f   :  { %2041 = vadd.xlane.f32.xlu0 %v2038_v0  ;;  %v10147_v0 = vld [vmem:[#allocation20 + $0xd4] ss:$24 sps:$4 sm:$0xff]  }
 0xfa4   :  { %v2040_v32 = vpop.xlane.xlu1 %2039 }
 0xfa5   :  { %v2043_v33 = vmul.f32 0.0078125, %v2040_v32  ;;  %v10181_v32 = vld [vmem:[#allocation19 + $0x8] sm:$0xff]  }
 0xfa7   :  { %v2045_v34 = vadd.f32 1e-05, %v2043_v33  ;;  %v11523_v33 = vadd.f32 %v11493_v51, %v2184_v31  ;;  %v2858_v31 = vld [vmem:[#allocation28 + $0x33] ss:$0 sm:$0xff] }
 0xfa8   :  { %v2042_v35 = vpop.xlane.xlu0 %2041 }
 0xfa9   :  { %10536 = vrsqrt.f32 %v2045_v34  ;;  %v2044_v37 = vmul.f32 0.0078125, %v2042_v35  ;;  %v10182_v34 = vld [vmem:[#allocation19] sm:$0xff]   ;;  %v2725_v35 = vpack.c.bf16 %v11523_v33, %v11523_v33 }
 0xfab   :  { %v2046_v39 = vadd.f32 1e-05, %v2044_v37  ;;  %v2303_v37 = vld [vmem:[#allocation28 + $0x6] ss:$8 sm:$0xf] }
 0xfad   :  { %10538 = vrsqrt.f32 %v2046_v39  ;;  %v2304_v39 = vld [vmem:[#allocation28 + $0x6] ss:$8 sm:$0x30] }
 0xfb6   :  { %v10537_v41 = vpop.eup %10536 }
 0xfb7   :  { %v2049_v43 = vmul.f32 %v10537_v41, %v11478_v7  ;;  %v10138_v7 = vld [vmem:[#allocation20 + $0x12c] ss:$24 sps:$4 sm:$0xff]   ;;  %v11531_v41 = vor.u32 %v2304_v39, %v2303_v37 }
 0xfb9   :  { %v2055_v46 = vmul.f32 %v8590_v44, %v2049_v43 }
 0xfba   :  { %v10539_v18 = vpop.eup %10538 }
 0xfbb   :  { %v2050_v45 = vmul.f32 %v10539_v18, %v11482_v62  ;;  %v2061_v10 = vadd.f32 %v8591_v21, %v2055_v46  ;;  %v10144_v62 = vld [vmem:[#allocation20 + $0xfc] ss:$24 sps:$4 sm:$0xff]  }
 0xfbd   :  { %v2056_v47 = vmul.f32 %v8590_v44, %v2050_v45  ;;  %v2311_v44 = vrot.slane %v11531_v41, %v11262_v55 }
 0xfbf   :  { %v2062_v48 = vadd.f32 %v8591_v21, %v2056_v47 }
 0xfc1   :  { %v2064_v52 = vrot.slane %v2062_v48, 7  ;;  %v11503_v53 = vpack.c.bf16 %v2062_v48, %v2061_v10 }
 0xfc3   :  { %2611 = vmatmul.mubr.bf16.vlgmr.msra.gmra.mxu1 %v11503_v53  ;;  %v2067_v60 = vsel %vm2066_vm4, %v2061_v10, %v2064_v52 }
 0xfc4   :  { %2665 = vmatpush1.bf16.msra.mxu1 %v10127_v49  ;;  %v2085_v36 = vpack.c.bf16 %v2067_v60, %v2067_v60  ;;  %2696 = vmatprep.mubr.bf16.mxu1 %v11021_v30 }
 0xfc5   :  { %2666 = vmatprep.subr.bf16.mxu1 %v10135_v56 }
 0xfc6   :  { %9516 = vmatmul.mubr.bf16.vlgmr.msra.gmra.mxu0 %v2085_v36 }
 0xfc7   :  { %2622 = vmatpush1.bf16.msra.mxu0 %v10130_v58  ;;  %2653 = vmatprep.mubr.bf16.mxu0 %v11021_v30  ;;  %v2724_v58 = vld [vmem:[#allocation28 + $0x32] ss:$0 sm:$0xff] }
 0xfc8   :  { %2667 = vmatpush1.bf16.msra.mxu1 %v10133_v40  ;;  %2623 = vmatprep.subr.bf16.mxu0 %v10138_v7 }
 0xfc9   :  { %2668 = vmatprep.subr.bf16.mxu1 %v10141_v61 }
 0xfcb   :  { %2624 = vmatpush1.bf16.msra.mxu0 %v10136_v38 }
 0xfcc   :  { %2669 = vmatpush1.bf16.msra.mxu1 %v10139_v42  ;;  %2625 = vmatprep.subr.bf16.mxu0 %v10144_v62  ;;  %v10183_v62 = vld [vmem:[#allocation19 + $0x78] sm:$0xff]  }
 0xfcd   :  { %2670 = vmatprep.subr.bf16.mxu1 %v10147_v0  ;;  %v10184_v0 = vld [vmem:[#allocation19 + $0x70] sm:$0xff]  }
 0xfcf   :  { %2626 = vmatpush1.bf16.msra.mxu0 %v10142_v1 }
 0xfd0   :  { %2671 = vmatpush1.bf16.msra.mxu1 %v10145_v2  ;;  %2627 = vmatprep.subr.bf16.mxu0 %v10150_v5 }
 0xfd1   :  { %2672 = vmatprep.subr.bf16.mxu1 %v10153_v11 }
 0xfd3   :  { %2628 = vmatpush1.bf16.msra.mxu0 %v10148_v3 }
 0xfd4   :  { %2673 = vmatpush1.bf16.msra.mxu1 %v10151_v12  ;;  %2629 = vmatprep.subr.bf16.mxu0 %v10156_v6  ;;  %v10185_v12 = vld [vmem:[#allocation19 + $0x68] sm:$0xff]   ;;  %v10186_v6 = vld [vmem:[#allocation19 + $0x60] sm:$0xff]  }
 0xfd5   :  { %2674 = vmatprep.subr.bf16.mxu1 %v10159_v8  ;;  %v10187_v8 = vld [vmem:[#allocation19 + $0x58] sm:$0xff]  }
 0xfd7   :  { %2630 = vmatpush1.bf16.msra.mxu0 %v10154_v9  ;;  %v10188_v9 = vld [vmem:[#allocation19 + $0x50] sm:$0xff]  }
 0xfd8   :  { %2675 = vmatpush1.bf16.msra.mxu1 %v10157_v13  ;;  %2631 = vmatprep.subr.bf16.mxu0 %v10162_v63  ;;  %v10189_v13 = vld [vmem:[#allocation19 + $0x48] sm:$0xff]   ;;  %v10190_v63 = vld [vmem:[#allocation19 + $0x40] sm:$0xff]  }
 0xfd9   :  { %2676 = vmatprep.subr.bf16.mxu1 %v10165_v14 }
 0xfdb   :  { %2632 = vmatpush1.bf16.msra.mxu0 %v10160_v15 }
 0xfdc   :  { %2677 = vmatpush1.bf16.msra.mxu1 %v10163_v16  ;;  %2633 = vmatprep.subr.bf16.mxu0 %v10168_v17 }
 0xfdd   :  { %2678 = vmatprep.subr.bf16.mxu1 %v10171_v19  ;;  %v8661_v19 = vld [vmem:[%s12224_s19 + $0x6] ss:$0 sm:$0xff] }
 0xfdf   :  { %2634 = vmatpush1.bf16.msra.mxu0 %v10166_v20 }
 0xfe0   :  { %2679 = vmatpush1.bf16.msra.mxu1 %v10169_v22  ;;  %2635 = vmatprep.subr.bf16.mxu0 %v10174_v23  ;;  %v8662_v22 = vld [vmem:[%s12224_s19 + $0x7] ss:$0 sm:$0xff] }
 0xfe1   :  { %9551 = vmatprep.subr.bf16.mxu1 %v11020_v4 }
 0xfe3   :  { %2636 = vmatpush1.bf16.msra.mxu0 %v10172_v24  ;;  %2697 = vmatmul.mubr.bf16.vlgmr.msra.gmra.mxu1 %v11503_v53 }
 0xfe4   :  { %9531 = vmatprep.subr.bf16.mxu0 %v11020_v4  ;;  %9567 = vmatprep.mubr.msk.bf16.mxu1 %vm11022_vm0, %v11020_v4 }
 0xfe5   :  { %9552 = vmatpush3.bf16.msra.mxu1 %v10183_v62 }
 0xfe6   :  { %2654 = vmatmul.mubr.bf16.vlgmr.msra.gmra.mxu0 %v11503_v53  ;;  %9553 = vmatprep.subr.bf16.mxu1 %v11020_v4 }
 0xfe7   :  { %9532 = vmatpush3.bf16.msra.mxu0 %v10175_v25  ;;  %9547 = vmatprep.mubr.msk.bf16.mxu0 %vm11022_vm0, %v11020_v4 }
 0xfe8   :  { %9533 = vmatprep.subr.bf16.mxu0 %v11020_v4 }
 0xfe9   :  { %9554 = vmatpush3.bf16.msra.mxu1 %v10184_v0 }
 0xfea   :  { %9555 = vmatprep.subr.bf16.mxu1 %v11020_v4 }
 0xfeb   :  { %9534 = vmatpush3.bf16.msra.mxu0 %v10176_v26 }
 0xfec   :  { %9535 = vmatprep.subr.bf16.mxu0 %v11020_v4 }
 0xfed   :  { %9556 = vmatpush3.bf16.msra.mxu1 %v10185_v12 }
 0xfee   :  { %9557 = vmatprep.subr.bf16.mxu1 %v11020_v4 }
 0xfef   :  { %9536 = vmatpush3.bf16.msra.mxu0 %v10177_v27 }
 0xff0   :  { %9537 = vmatprep.subr.bf16.mxu0 %v11020_v4 }
 0xff1   :  { %9558 = vmatpush3.bf16.msra.mxu1 %v10186_v6 }
 0xff2   :  { %9559 = vmatprep.subr.bf16.mxu1 %v11020_v4 }
 0xff3   :  { %9538 = vmatpush3.bf16.msra.mxu0 %v10178_v50 }
 0xff4   :  { %9539 = vmatprep.subr.bf16.mxu0 %v11020_v4 }
 0xff5   :  { %9560 = vmatpush3.bf16.msra.mxu1 %v10187_v8 }
 0xff6   :  { %9561 = vmatprep.subr.bf16.mxu1 %v11020_v4 }
 0xff7   :  { %9540 = vmatpush3.bf16.msra.mxu0 %v10179_v28 }
 0xff8   :  { %9541 = vmatprep.subr.bf16.mxu0 %v11020_v4 }
 0xff9   :  { %9562 = vmatpush3.bf16.msra.mxu1 %v10188_v9 }
 0xffa   :  { %9563 = vmatprep.subr.bf16.mxu1 %v11020_v4 }
 0xffb   :  { %9542 = vmatpush3.bf16.msra.mxu0 %v10180_v29 }
 0xffc   :  { %9543 = vmatprep.subr.bf16.mxu0 %v11020_v4 }
 0xffd   :  { %9564 = vmatpush3.bf16.msra.mxu1 %v10189_v13 }
 0xffe   :  { %9565 = vmatprep.subr.bf16.mxu1 %v11020_v4 }
 0xfff   :  { %9544 = vmatpush3.bf16.msra.mxu0 %v10181_v32  ;;  %v2315_v32 = vrot.slane %v11531_v41, %v11265_v57 }
0x1000   :  { %9545 = vmatprep.subr.bf16.mxu0 %v11020_v4 }
0x1001   :  { %9566 = vmatpush3.bf16.msra.mxu1 %v10190_v63 }
0x1002   :  { %9599 = vmatprep.subr.bf16.mxu1 %v11020_v4 }
0x1003   :  { %9546 = vmatpush3.bf16.msra.mxu0 %v10182_v34 }
0x1004   :  { %9571 = vmatprep.subr.mxu0 %v11020_v4 }
0x1006   :  { %9548 = vmatmul.mubr.bf16.vlgmr.msra.gmra.mxu0 %v2725_v35 }
0x1007   :  { %9575 = vmatprep.mubr.msk.f32.mxu0 %vm11022_vm0, %v11020_v4 }
0x1083   :  { %v2612_v51 = vpop.f32.mrf.mxu1 }
0x1084   :  { %v11544_v10 = vadd.f32 %v2612_v51, %v2311_v44 }
0x1085   :  { %v11533_v43 = vpop.f32.mrf.mxu1 }
0x1086   :  { %v11537_v18 = vpop.f32.mrf.mxu0  ;;  %v11599_v51 = vadd.f32 %v11533_v43, %v2315_v32 }
0x1087   :  { %v2616_v45 = vpop.f32.mrf.mxu1 }
0x1088   :  { %v11539_v46 = vadd.f32 %v2616_v45, %v2311_v44  ;;  %v9517_v21 = vpop.f32.mrf.mxu0 }
0x1089   :  { %v2618_v26 = vpop.f32.mrf.mxu1 }
0x108a   :  { %v2171_v47 = vpop.f32.mrf.mxu0  ;;  %9572 = vmatpush3.xpose.msk.msra.mxu0 %vm614_vm1, %v11539_v46  ;;  %v11594_v37 = vadd.f32 %v2618_v26, %v2315_v32 }
0x108b   :  { %9573 = vmatprep.subr.mxu0 %v11020_v4  ;;  %v11607_v47 = vld [vmem:[#allocation7] sm:$0x3] }
0x108c   :  { %v9518_v48 = vpop.f32.mrf.mxu0 }
0x108e   :  { %9574 = vmatpush3.xpose.msk.msra.mxu0 %vm614_vm1, %v11544_v10 }
0x108f   :  { %9578 = vmatprep.subr.mxu0 %v11020_v4 }
0x10a3   :  { %v11582_v27 = vpop.f32.mrf.mxu1 }
0x10a5   :  { %v11584_v50 = vpop.f32.mrf.mxu1 }
0x10a6   :  { %v11549_v49 = vpop.f32.mrf.mxu0 }
0x10a7   :  { %v11586_v28 = vpop.f32.mrf.mxu1 }
0x10a8   :  { %v11551_v52 = vpop.f32.mrf.mxu0 }
0x10a9   :  { %v11588_v29 = vpop.f32.mrf.mxu1 }
0x10aa   :  { %v11553_v53 = vpop.f32.mrf.mxu0 }
0x10ac   :  { %v11555_v56 = vpop.f32.mrf.mxu0 }
0x10c6   :  { %v2808_v60 = vpop.f32.mrf.mxu0 }
0x10c7   :  { %v2809_v36 = vadd.f32 %v2808_v60, %v2724_v58 }
0x10c8   :  { %v9549_v40 = vpop.f32.mrf.mxu0 }
0x10c9   :  { %v2814_v7 = vadd.f32 %v2809_v36, %v11523_v33 }
0x10ca   :  { %v2811_v61 = vpop.f32.mrf.mxu0 }
0x10cb   :  { %v2818_v38 = vsel %vm2817_vm5, %v2814_v7, 0.0 }
0x10cc   :  { %2819 = vadd.xlane.f32.xlu0 %v2818_v38  ;;  %v9550_v42 = vpop.f32.mrf.mxu0 }
0x1155   :  { %v2820_v1 = vpop.xlane.xlu0 %2819 }
0x1156   :  { %v2821_v2 = vmul.f32 0.0078125, %v2820_v1 }
0x1158   :  { %v2822_v5 = vsub.f32 %v2814_v7, %v2821_v2 }
0x115a   :  { %v2823_v11 = vmul.f32 %v2822_v5, %v2822_v5 }
0x115c   :  { %v2824_v3 = vsel %vm2817_vm5, %v2823_v11, 0.0 }
0x115d   :  { %2825 = vadd.xlane.f32.xlu1 %v2824_v3 }
0x116e   :  { %3135 = vrot.lane.b32.xlu1 %v11544_v10, %s11023_s8 }
0x11e6   :  { %v2826_v14 = vpop.xlane.xlu1 %2825 }
0x11e7   :  { %v2827_v15 = vmul.f32 0.0078125, %v2826_v14 }
0x11e9   :  { %v2828_v16 = vadd.f32 1e-05, %v2827_v15 }
0x11ea   :  { %v3136_v42 = vpop.permute.xlu1 %3135 }
0x11eb   :  { %10540 = vrsqrt.f32 %v2828_v16 }
0x11f8   :  { %v10541_v17 = vpop.eup %10540 }
0x11f9   :  { %v2830_v20 = vmul.f32 %v10541_v17, %v2822_v5 }
0x11fb   :  { %v2835_v23 = vmul.f32 %v8661_v19, %v2830_v20  ;;  %v10193_v19 = vld [vmem:[#allocation19 + $0x98] sm:$0xff]   ;;  %v10194_v20 = vld [vmem:[#allocation19 + $0x90] sm:$0xff]  }
0x11fd   :  { %v11576_v24 = vadd.f32 %v8662_v22, %v2835_v23 }
0x11ff   :  { %v2859_v25 = vpack.c.bf16 %v11576_v24, %v11576_v24 }
0x1201   :  { %9568 = vmatmul.mubr.bf16.vlgmr.msra.gmra.mxu1 %v2859_v25 }
0x1202   :  { %9603 = vmatprep.mubr.msk.bf16.mxu1 %vm11022_vm0, %v11020_v4  ;;  %9600 = vmatpush3.bf16.msra.mxu1 %v10193_v19  ;;  %v10196_v19 = vld [vmem:[#allocation19 + $0xa0] sm:$0xff]  }
0x1203   :  { %9601 = vmatprep.subr.bf16.mxu1 %v11020_v4 }
0x1206   :  { %9602 = vmatpush3.bf16.msra.mxu1 %v10194_v20 }
0x1207   :  { %9615 = vmatprep.subr.mxu1 %v11020_v4 }
0x12c1   :  { %v2942_v34 = vpop.f32.mrf.mxu1 }
0x12c2   :  { %v11592_v35 = vadd.f32 %v2942_v34, %v2858_v31  ;;  %v10191_v31 = vld [vmem:[#allocation19 + $0x88] sm:$0xff]   ;;  %v10192_v34 = vld [vmem:[#allocation19 + $0x80] sm:$0xff]  }
0x12c3   :  { %v9569_v39 = vpop.f32.mrf.mxu1 }
0x12c4   :  { %9576 = vmatmul.mubr.msk.f32.vlgmr.msra.gmra.mxu0 %vm614_vm1, %v11592_v35 }
0x12c5   :  { %9579 = vmatpush3.msra.mxu0 %v11594_v37  ;;  %v2945_v44 = vpop.f32.mrf.mxu1  ;;  %9582 = vmatprep.mubr.msk.f32.mxu0 %vm11022_vm0, %v11020_v4 }
0x12c6   :  { %9580 = vmatprep.subr.mxu0 %v11020_v4 }
0x12c7   :  { %9581 = vmatpush3.msra.mxu0 %v11599_v51  ;;  %v9570_v45 = vpop.f32.mrf.mxu1 }
0x12c8   :  { %9585 = vmatprep.subr.mxu0 %v11020_v4 }
0x1384   :  { %v3041_v21 = vpop.f32.mrf.mxu0 }
0x1385   :  { %v3045_v48 = vmul.f32 0.17677669, %v3041_v21 }
0x1386   :  { %v9577_v58 = vpop.f32.mrf.mxu0 }
0x1387   :  { %v3046_v43 = vadd.f32 %v3045_v48, %v11607_v47 }
0x1389   :  { %v3048_v60 = vsel %vm3047_vm6, %v3046_v43, -inf }
0x138a   :  { %3049 = vmax.xlane.f32.xlu0 %v3048_v60 }
0x13a0   :  { %3137 = vrot.lane.b32.xlu0 %v11539_v46, %s11023_s8 }
0x1413   :  { %v3050_v36 = vpop.xlane.xlu0 %3049 }
0x1414   :  { %v3051_v40 = vsub.f32 %v3046_v43, %v3050_v36 }
0x1416   :  { %v3052_v7 = vmul.f32 1.442695, %v3051_v40 }
0x1417   :  { %v3138_v2 = vpop.permute.xlu0 %3137 }
0x1418   :  { %10542 = vpow2.f32 %v3052_v7 }
0x1425   :  { %v10543_v61 = vpop.eup %10542 }
0x1426   :  { %v3054_v38 = vsel %vm3047_vm6, %v10543_v61, 0.0 }
0x1427   :  { %3055 = vadd.xlane.f32.xlu1 %v3054_v38 }
0x1438   :  { %3133 = vrot.lane.b32.xlu1 %v11592_v35, %s11023_s8 }
0x14b0   :  { %v3056_v62 = vpop.xlane.xlu1 %3055 }
0x14b1   :  { %10544 = vrcp.f32 %v3056_v62 }
0x14b4   :  { %v3134_v5 = vpop.permute.xlu1 %3133 }
0x14be   :  { %v10545_v0 = vpop.eup %10544 }
0x14bf   :  { %v3058_v1 = vmul.f32 %v10545_v0, %v10543_v61 }
0x14c1   :  { %9583 = vmatmul.mubr.msk.f32.vlgmr.msra.gmra.mxu0 %vm706_vm2, %v3058_v1 }
0x14c2   :  { %9586 = vmatpush3.xpose.msk.msra.mxu0 %vm614_vm1, %v3138_v2  ;;  %9589 = vmatprep.mubr.msk.f32.mxu0 %vm11022_vm0, %v11020_v4 }
0x14c3   :  { %9587 = vmatprep.subr.mxu0 %v11020_v4 }
0x14c6   :  { %9588 = vmatpush3.xpose.msk.msra.mxu0 %vm614_vm1, %v3136_v42 }
0x14c7   :  { %9592 = vmatprep.subr.mxu0 %v11020_v4 }
0x14c9   :  { %9590 = vmatmul.mubr.msk.f32.vlgmr.msra.gmra.mxu0 %vm614_vm1, %v3134_v5 }
0x14ca   :  { %9596 = vmatprep.mubr.msk.f32.mxu0 %vm11022_vm0, %v11020_v4 }
0x1581   :  { %v3128_v11 = vpop.f32.mrf.mxu0 }
0x1582   :  { %v3132_v39 = vpack.c.bf16 %v3128_v11, %v3128_v11 }
0x1583   :  { %v9584_v3 = vpop.f32.mrf.mxu0 }
0x1589   :  { %v3211_v12 = vpop.f32.mrf.mxu0 }
0x158a   :  { %v3215_v6 = vmul.f32 0.17677669, %v3211_v12 }
0x158b   :  { %v9591_v8 = vpop.f32.mrf.mxu0 }
0x158c   :  { %v3216_v9 = vadd.f32 %v3215_v6, %v11607_v47 }
0x158e   :  { %v3217_v13 = vsel %vm3047_vm6, %v3216_v9, -inf }
0x158f   :  { %3218 = vmax.xlane.f32.xlu1 %v3217_v13 }
0x15a0   :  { %3230 = vrot.lane.b32.xlu1 %v11599_v51, %s11023_s8 }
0x15a4   :  { %3424 = vrot.lane.b32.xlu1 %v11539_v46, %s11001_s22 }
0x15a8   :  { %3420 = vrot.lane.b32.xlu1 %v11592_v35, %s11001_s22 }
0x15ac   :  { %3515 = vrot.lane.b32.xlu1 %v11599_v51, %s11001_s22 }
0x1618   :  { %v3219_v63 = vpop.xlane.xlu1 %3218 }
0x1619   :  { %v3220_v14 = vsub.f32 %v3216_v9, %v3219_v63 }
0x161b   :  { %v3221_v15 = vmul.f32 1.442695, %v3220_v14 }
0x161c   :  { %v3231_v25 = vpop.permute.xlu1 %3230 }
0x161d   :  { %10546 = vpow2.f32 %v3221_v15 }
0x1620   :  { %v3425_v48 = vpop.permute.xlu1 %3424 }
0x1624   :  { %v3421_v60 = vpop.permute.xlu1 %3420 }
0x1628   :  { %v3516_v9 = vpop.permute.xlu1 %3515 }
0x162a   :  { %v10547_v16 = vpop.eup %10546 }
0x162b   :  { %v3223_v17 = vsel %vm3047_vm6, %v10547_v16, 0.0 }
0x162c   :  { %3224 = vadd.xlane.f32.xlu0 %v3223_v17 }
0x1642   :  { %3232 = vrot.lane.b32.xlu0 %v11594_v37, %s11023_s8 }
0x1646   :  { %3422 = vrot.lane.b32.xlu0 %v11544_v10, %s11001_s22 }
0x16b5   :  { %v3225_v22 = vpop.xlane.xlu0 %3224 }
0x16b6   :  { %10548 = vrcp.f32 %v3225_v22 }
0x16b9   :  { %v3233_v23 = vpop.permute.xlu0 %3232 }
0x16ba   :  { %9593 = vmatpush3.msra.mxu0 %v3233_v23 }
0x16bb   :  { %9594 = vmatprep.subr.mxu0 %v11020_v4 }
0x16bc   :  { %9595 = vmatpush3.msra.mxu0 %v3231_v25 }
0x16bd   :  { %9607 = vmatprep.subr.bf16.mxu0 %v11020_v4  ;;  %v3423_v58 = vpop.permute.xlu0 %3422 }
0x16c3   :  { %v10549_v26 = vpop.eup %10548 }
0x16c4   :  { %v3227_v32 = vmul.f32 %v10549_v26, %v10547_v16 }
0x16c6   :  { %9597 = vmatmul.mubr.msk.f32.vlgmr.msra.gmra.mxu0 %vm706_vm2, %v3227_v32 }
0x16c7   :  { %9608 = vmatpush3.bf16.msra.mxu0 %v10191_v31  ;;  %9611 = vmatprep.mubr.msk.bf16.mxu0 %vm11022_vm0, %v11020_v4 }
0x16c8   :  { %9609 = vmatprep.subr.bf16.mxu0 %v11020_v4 }
0x16cb   :  { %9610 = vmatpush3.bf16.msra.mxu0 %v10192_v34 }
0x16cc   :  { %9629 = vmatprep.subr.bf16.mxu0 %v11020_v4 }
0x16ce   :  { %9612 = vmatmul.mubr.msk.bf16.vlgmr.msra.gmra.mxu0 %vm614_vm1, %v3132_v39 }
0x16cf   :  { %9633 = vmatprep.mubr.msk.bf16.mxu0 %vm11022_vm0, %v11020_v4 }
0x1786   :  { %v3305_v44 = vpop.f32.mrf.mxu0 }
0x1787   :  { %v3309_v45 = vpack.c.bf16 %v3305_v44, %v3305_v44 }
0x1788   :  { %v9598_v21 = vpop.f32.mrf.mxu0 }
0x1789   :  { %9604 = vmatmul.mubr.msk.bf16.vlgmr.msra.gmra.mxu1 %vm614_vm1, %v3309_v45 }
0x178a   :  { %9616 = vmatpush3.xpose.msk.msra.mxu1 %vm614_vm1, %v3425_v48  ;;  %9619 = vmatprep.mubr.msk.f32.mxu1 %vm11022_vm0, %v11020_v4 }
0x178b   :  { %9617 = vmatprep.subr.mxu1 %v11020_v4 }
0x178e   :  { %v11658_v43 = vpop.f32.mrf.mxu0  ;;  %9618 = vmatpush3.xpose.msk.msra.mxu1 %vm614_vm1, %v3423_v58 }
0x178f   :  { %9622 = vmatprep.subr.mxu1 %v11020_v4 }
0x1790   :  { %v9613_v36 = vpop.f32.mrf.mxu0 }
0x1791   :  { %9620 = vmatmul.mubr.msk.f32.vlgmr.msra.gmra.mxu1 %vm614_vm1, %v3421_v60 }
0x1792   :  { %v3417_v40 = vpop.f32.mrf.mxu0  ;;  %9626 = vmatprep.mubr.msk.f32.mxu1 %vm11022_vm0, %v11020_v4 }
0x1794   :  { %v9614_v7 = vpop.f32.mrf.mxu0 }
0x1795   :  { %v10197_v7 = vld [vmem:[#allocation19 + $0xb8] sm:$0xff]  }
0x1849   :  { %v11665_v61 = vpop.f32.mrf.mxu1 }
0x184a   :  { %v3415_v58 = vadd.f32 %v11658_v43, %v11665_v61  ;;  %v10198_v43 = vld [vmem:[#allocation19 + $0xb0] sm:$0xff]  }
0x184b   :  { %v9605_v38 = vpop.f32.mrf.mxu1 }
0x184d   :  { %v3362_v42 = vpop.f32.mrf.mxu1 }
0x184f   :  { %v9606_v62 = vpop.f32.mrf.mxu1 }
0x1851   :  { %v3498_v0 = vpop.f32.mrf.mxu1 }
0x1852   :  { %v3502_v1 = vmul.f32 0.17677669, %v3498_v0 }
0x1853   :  { %v9621_v2 = vpop.f32.mrf.mxu1 }
0x1854   :  { %v3503_v5 = vadd.f32 %v3502_v1, %v11607_v47 }
0x1856   :  { %v3504_v11 = vsel %vm3047_vm6, %v3503_v5, -inf }
0x1857   :  { %3505 = vmax.xlane.f32.xlu0 %v3504_v11  ;;  %v2965_v11 = vld [vmem:[#allocation28 + $0x34] ss:$0 sm:$0xff] }
0x186d   :  { %3517 = vrot.lane.b32.xlu0 %v11594_v37, %s11001_s22 }
0x1871   :  { %3655 = vrot.lane.b32.xlu0 %v11539_v46, %s11024_s15  ;;  %v10195_v46 = vld [vmem:[#allocation19 + $0xa8] sm:$0xff]  }
0x1872   :  { %9630 = vmatpush3.bf16.msra.mxu0 %v10195_v46 }
0x1873   :  { %9631 = vmatprep.subr.bf16.mxu0 %v11020_v4 }
0x1875   :  { %3651 = vrot.lane.b32.xlu0 %v11592_v35, %s11024_s15 }
0x1876   :  { %9632 = vmatpush3.bf16.msra.mxu0 %v10196_v19 }
0x1877   :  { %9644 = vmatprep.subr.mxu0 %v11020_v4 }
0x18e0   :  { %v3506_v3 = vpop.xlane.xlu0 %3505 }
0x18e1   :  { %v3507_v12 = vsub.f32 %v3503_v5, %v3506_v3 }
0x18e3   :  { %v3508_v6 = vmul.f32 1.442695, %v3507_v12 }
0x18e4   :  { %v3518_v8 = vpop.permute.xlu0 %3517 }
0x18e5   :  { %10550 = vpow2.f32 %v3508_v6  ;;  %9623 = vmatpush3.msra.mxu1 %v3518_v8 }
0x18e6   :  { %9624 = vmatprep.subr.mxu1 %v11020_v4 }
0x18e7   :  { %9625 = vmatpush3.msra.mxu1 %v3516_v9 }
0x18e8   :  { %9637 = vmatprep.subr.mxu1 %v11020_v4  ;;  %v3656_v16 = vpop.permute.xlu0 %3655 }
0x18f2   :  { %v10551_v13 = vpop.eup %10550 }
0x18f3   :  { %v3510_v63 = vsel %vm3047_vm6, %v10551_v13, 0.0 }
0x18f4   :  { %3511 = vadd.xlane.f32.xlu1 %v3510_v63 }
0x1905   :  { %3653 = vrot.lane.b32.xlu1 %v11544_v10, %s11024_s15  ;;  %v3652_v10 = vpop.permute.xlu0 %3651 }
0x197d   :  { %v3512_v35 = vpop.xlane.xlu1 %3511 }
0x197e   :  { %10552 = vrcp.f32 %v3512_v35  ;;  %v10199_v35 = vld [vmem:[#allocation22 + $0x70] ss:$8 sps:$4 sm:$0xff]  }
0x1981   :  { %v3654_v17 = vpop.permute.xlu1 %3653 }
0x198b   :  { %v10553_v14 = vpop.eup %10552 }
0x198c   :  { %v3514_v15 = vmul.f32 %v10553_v14, %v10551_v13  ;;  %v10201_v14 = vld [vmem:[#allocation22 + $0x74] ss:$8 sps:$4 sm:$0xff]  }
0x198e   :  { %9627 = vmatmul.mubr.msk.f32.vlgmr.msra.gmra.mxu1 %vm706_vm2, %v3514_v15  ;;  %v10204_v15 = vld [vmem:[#allocation22 + $0x64] ss:$8 sps:$4 sm:$0xff]  }
0x198f   :  { %9638 = vmatpush3.xpose.msk.msra.mxu1 %vm614_vm1, %v3656_v16  ;;  %9641 = vmatprep.mubr.msk.f32.mxu1 %vm11022_vm0, %v11020_v4  ;;  %v10202_v16 = vld [vmem:[#allocation22 + $0x60] ss:$8 sps:$4 sm:$0xff]  }
0x1990   :  { %9639 = vmatprep.subr.mxu1 %v11020_v4 }
0x1993   :  { %9640 = vmatpush3.xpose.msk.msra.mxu1 %vm614_vm1, %v3654_v17 }
0x1994   :  { %9651 = vmatprep.subr.bf16.mxu1 %v11020_v4 }
0x1996   :  { %9642 = vmatmul.mubr.msk.f32.vlgmr.msra.gmra.mxu1 %vm614_vm1, %v3652_v10 }
0x1997   :  { %9655 = vmatprep.mubr.msk.bf16.mxu1 %vm11022_vm0, %v11020_v4  ;;  %9652 = vmatpush3.bf16.msra.mxu1 %v10197_v7  ;;  %v10227_v7 = vld [vmem:[#allocation23 + $0x68] sm:$0xff]  }
0x1998   :  { %9653 = vmatprep.subr.bf16.mxu1 %v11020_v4 }
0x199b   :  { %9654 = vmatpush3.bf16.msra.mxu1 %v10198_v43 }
0x1a4e   :  { %v3590_v20 = vpop.f32.mrf.mxu1 }
0x1a4f   :  { %v3594_v22 = vpack.c.bf16 %v3590_v20, %v3590_v20 }
0x1a50   :  { %v9628_v23 = vpop.f32.mrf.mxu1 }
0x1a51   :  { %9634 = vmatmul.mubr.msk.bf16.vlgmr.msra.gmra.mxu0 %vm614_vm1, %v3594_v22  ;;  %v10205_v23 = vld [vmem:[#allocation22 + $0x50] ss:$8 sps:$4 sm:$0xff]  }
0x1a52   :  { %9648 = vmatprep.mubr.msk.f32.mxu0 %vm11022_vm0, %v11020_v4 }
0x1a56   :  { %v3729_v25 = vpop.f32.mrf.mxu1 }
0x1a57   :  { %v3733_v26 = vmul.f32 0.17677669, %v3729_v25  ;;  %v10208_v25 = vld [vmem:[#allocation22 + $0x40] ss:$8 sps:$4 sm:$0xff]  }
0x1a58   :  { %v9643_v31 = vpop.f32.mrf.mxu1 }
0x1a59   :  { %v3734_v32 = vadd.f32 %v3733_v26, %v11607_v47  ;;  %v10210_v26 = vld [vmem:[#allocation22 + $0x44] ss:$8 sps:$4 sm:$0xff]   ;;  %v10213_v31 = vld [vmem:[#allocation22 + $0x34] ss:$8 sps:$4 sm:$0xff]  }
0x1a5b   :  { %v3735_v34 = vsel %vm3047_vm6, %v3734_v32, -inf }
0x1a5c   :  { %3736 = vmax.xlane.f32.xlu1 %v3735_v34  ;;  %v10216_v34 = vld [vmem:[#allocation22 + $0x24] ss:$8 sps:$4 sm:$0xff]  }
0x1a6d   :  { %3746 = vrot.lane.b32.xlu1 %v11599_v51, %s11024_s15 }
0x1ae5   :  { %v3737_v39 = vpop.xlane.xlu1 %3736 }
0x1ae6   :  { %v3738_v44 = vsub.f32 %v3734_v32, %v3737_v39  ;;  %v10211_v32 = vld [vmem:[#allocation22 + $0x30] ss:$8 sps:$4 sm:$0xff]   ;;  %v10214_v39 = vld [vmem:[#allocation22 + $0x20] ss:$8 sps:$4 sm:$0xff]  }
0x1ae8   :  { %v3739_v45 = vmul.f32 1.442695, %v3738_v44  ;;  %v10219_v44 = vld [vmem:[#allocation22 + $0x14] ss:$8 sps:$4 sm:$0xff]  }
0x1ae9   :  { %v3747_v0 = vpop.permute.xlu1 %3746 }
0x1aea   :  { %10554 = vpow2.f32 %v3739_v45  ;;  %v10217_v45 = vld [vmem:[#allocation22 + $0x10] ss:$8 sps:$4 sm:$0xff]  }
0x1af7   :  { %v10555_v21 = vpop.eup %10554 }
0x1af8   :  { %v3741_v48 = vsel %vm3047_vm6, %v10555_v21, 0.0 }
0x1af9   :  { %3742 = vadd.xlane.f32.xlu0 %v3741_v48  ;;  %v10220_v48 = vld [vmem:[#allocation22] ss:$8 sps:$4 sm:$0xff]  }
0x1b0f   :  { %3748 = vrot.lane.b32.xlu0 %v11594_v37, %s11024_s15 }
0x1b11   :  { %v3644_v60 = vpop.f32.mrf.mxu0 }
0x1b12   :  { %v3650_v36 = vadd.f32 %v3644_v60, %v3415_v58  ;;  %v10223_v58 = vld [vmem:[#allocation23 + $0x78] sm:$0xff]  }
0x1b13   :  { %v9635_v40 = vpop.f32.mrf.mxu0  ;;  %v10224_v60 = vld [vmem:[#allocation23 + $0x38] sm:$0xff]   ;;  %9146 = vmatprep.subr.bf16.mxu1 %v10223_v58 }
0x1b14   :  { %v10226_v40 = vld [vmem:[#allocation23 + $0x30] sm:$0xff]  }
0x1b15   :  { %v3647_v38 = vpop.f32.mrf.mxu0 }
0x1b16   :  { %v10228_v38 = vld [vmem:[#allocation23 + $0x28] sm:$0xff]  }
0x1b17   :  { %v9636_v51 = vpop.f32.mrf.mxu0 }
0x1b18   :  { %v10229_v51 = vld [vmem:[#allocation23 + $0x60] sm:$0xff]  }
0x1b82   :  { %v3743_v42 = vpop.xlane.xlu0 %3742 }
0x1b83   :  { %10556 = vrcp.f32 %v3743_v42  ;;  %v10230_v42 = vld [vmem:[#allocation23 + $0x20] sm:$0xff]  }
0x1b86   :  { %v3749_v62 = vpop.permute.xlu0 %3748 }
0x1b87   :  { %9645 = vmatpush3.msra.mxu0 %v3749_v62  ;;  %v10231_v62 = vld [vmem:[#allocation23 + $0x58] sm:$0xff]  }
0x1b88   :  { %9646 = vmatprep.subr.mxu0 %v11020_v4 }
0x1b89   :  { %9647 = vmatpush3.msra.mxu0 %v3747_v0  ;;  %v10232_v0 = vld [vmem:[#allocation23 + $0x18] sm:$0xff]  }
0x1b8a   :  { %4019 = vmatprep.subr.bf16.mxu0 %v10201_v14  ;;  %v3926_v14 = vld [vmem:[#allocation28 + $0x35] ss:$8 sm:$0x3] }
0x1b90   :  { %v10557_v37 = vpop.eup %10556 }
0x1b91   :  { %v3745_v1 = vmul.f32 %v10557_v37, %v10555_v21  ;;  %v10222_v21 = vld [vmem:[#allocation22 + $0x4] ss:$8 sps:$4 sm:$0xff]   ;;  %v10233_v37 = vld [vmem:[#allocation23 + $0x50] sm:$0xff]  }
0x1b93   :  { %9649 = vmatmul.mubr.msk.f32.vlgmr.msra.gmra.mxu0 %vm706_vm2, %v3745_v1  ;;  %v10234_v1 = vld [vmem:[#allocation23 + $0x10] sm:$0xff]  }
0x1b94   :  { %4051 = vmatprep.mubr.bf16.mxu0 %v11021_v30  ;;  %4020 = vmatpush1.bf16.msra.mxu0 %v10199_v35  ;;  %v10238_v35 = vld [vmem:[#allocation23] sm:$0xff]  }
0x1b95   :  { %4021 = vmatprep.subr.bf16.mxu0 %v10204_v15  ;;  %v3932_v15 = vrot.slane %v3926_v14, %v11262_v55 }
0x1b98   :  { %4022 = vmatpush1.bf16.msra.mxu0 %v10202_v16  ;;  %v3936_v16 = vrot.slane %v3926_v14, %v11265_v57 }
0x1c53   :  { %v3821_v61 = vpop.f32.mrf.mxu0 }
0x1c54   :  { %v3825_v2 = vpack.c.bf16 %v3821_v61, %v3821_v61 }
0x1c55   :  { %v9650_v5 = vpop.f32.mrf.mxu0 }
0x1c56   :  { %9656 = vmatmul.mubr.msk.bf16.vlgmr.msra.gmra.mxu1 %vm614_vm1, %v3825_v2 }
0x1c57   :  { %9147 = vmatpush3.bf16.msra.mxu1 %v10224_v60 }
0x1d16   :  { %v3875_v3 = vpop.f32.mrf.mxu1 }
0x1d17   :  { %v3881_v12 = vadd.f32 %v3875_v3, %v3650_v36  ;;  %v10225_v36 = vld [vmem:[#allocation23 + $0x70] sm:$0xff]  }
0x1d18   :  { %v9657_v6 = vpop.f32.mrf.mxu1  ;;  %9148 = vmatprep.subr.bf16.mxu1 %v10225_v36  ;;  %v10239_v36 = vld [vmem:[#allocation19 + $0xf8] sm:$0xff]  }
0x1d19   :  { %v3882_v8 = vadd.f32 %v3881_v12, %v2965_v11  ;;  %9149 = vmatpush3.bf16.msra.mxu1 %v10226_v40  ;;  %v8699_v11 = vld [vmem:[%s12224_s19 + $0x8] ss:$0 sm:$0xff]  ;;  %v8700_v12 = vld [vmem:[%s12224_s19 + $0x9] ss:$0 sm:$0xff]  ;;  %v10240_v40 = vld [vmem:[#allocation19 + $0xf0] sm:$0xff]  }
0x1d1a   :  { %v3878_v9 = vpop.f32.mrf.mxu1  ;;  %9150 = vmatprep.subr.bf16.mxu1 %v10227_v7 }
0x1d1b   :  { %v3883_v13 = vadd.f32 %v3882_v8, %v11576_v24  ;;  %v10207_v24 = vld [vmem:[#allocation22 + $0x54] ss:$8 sps:$4 sm:$0xff]  }
0x1d1c   :  { %v9658_v63 = vpop.f32.mrf.mxu1  ;;  %4023 = vmatprep.subr.bf16.mxu0 %v10207_v24 }
0x1d1d   :  { %v3886_v46 = vsel %vm2817_vm5, %v3883_v13, 0.0  ;;  %4024 = vmatpush1.bf16.msra.mxu0 %v10205_v23  ;;  %9151 = vmatpush3.bf16.msra.mxu1 %v10228_v38  ;;  %v10236_v63 = vld [vmem:[#allocation23 + $0x8] sm:$0xff]  }
0x1d1e   :  { %3887 = vadd.xlane.f32.xlu1 %v3886_v46  ;;  %4025 = vmatprep.subr.bf16.mxu0 %v10210_v26  ;;  %v10237_v46 = vld [vmem:[#allocation23 + $0x40] sm:$0xff]  }
0x1d1f   :  { %9152 = vmatprep.subr.bf16.mxu1 %v10229_v51 }
0x1d21   :  { %4026 = vmatpush1.bf16.msra.mxu0 %v10208_v25  ;;  %9153 = vmatpush3.bf16.msra.mxu1 %v10230_v42 }
0x1d22   :  { %4027 = vmatprep.subr.bf16.mxu0 %v10213_v31  ;;  %9154 = vmatprep.subr.bf16.mxu1 %v10231_v62 }
0x1d25   :  { %4028 = vmatpush1.bf16.msra.mxu0 %v10211_v32  ;;  %9155 = vmatpush3.bf16.msra.mxu1 %v10232_v0  ;;  %v10241_v0 = vld [vmem:[#allocation19 + $0xe8] sm:$0xff]  }
0x1d26   :  { %4029 = vmatprep.subr.bf16.mxu0 %v10216_v34  ;;  %9156 = vmatprep.subr.bf16.mxu1 %v10233_v37  ;;  %v4094_v34 = vld [vmem:[#allocation28 + $0x36] ss:$0 sm:$0xff]  ;;  %v10242_v37 = vld [vmem:[#allocation19 + $0xe0] sm:$0xff]  }
0x1d29   :  { %4030 = vmatpush1.bf16.msra.mxu0 %v10214_v39  ;;  %9157 = vmatpush3.bf16.msra.mxu1 %v10234_v1  ;;  %v10243_v1 = vld [vmem:[#allocation19 + $0xd8] sm:$0xff]  }
0x1d2a   :  { %4031 = vmatprep.subr.bf16.mxu0 %v10219_v44 }
0x1d2d   :  { %4032 = vmatpush1.bf16.msra.mxu0 %v10217_v45 }
0x1d2e   :  { %4033 = vmatprep.subr.bf16.mxu0 %v10222_v21 }
0x1d31   :  { %4034 = vmatpush1.bf16.msra.mxu0 %v10220_v48 }
0x1d32   :  { %9659 = vmatprep.subr.bf16.mxu0 %v11020_v4 }
0x1da7   :  { %v3888_v17 = vpop.xlane.xlu1 %3887 }
0x1da8   :  { %v3889_v10 = vmul.f32 0.0078125, %v3888_v17 }
0x1daa   :  { %v3890_v19 = vsub.f32 %v3883_v13, %v3889_v10  ;;  %v10235_v13 = vld [vmem:[#allocation23 + $0x48] sm:$0xff]  }
0x1dab   :  { %9158 = vmatprep.subr.bf16.mxu1 %v10235_v13 }
0x1dac   :  { %v3891_v20 = vmul.f32 %v3890_v19, %v3890_v19  ;;  %9159 = vmatpush3.bf16.msra.mxu1 %v10236_v63 }
0x1dad   :  { %9160 = vmatprep.subr.bf16.mxu1 %v10237_v46  ;;  %v2319_v46 = vrot.slane %v11531_v41, %v11269_v59 }
0x1dae   :  { %v3892_v22 = vsel %vm2817_vm5, %v3891_v20, 0.0 }
0x1daf   :  { %3893 = vadd.xlane.f32.xlu0 %v3892_v22  ;;  %v11745_v14 = vadd.f32 %v11553_v53, %v2319_v46 }
0x1db0   :  { %9161 = vmatpush3.bf16.msra.mxu1 %v10238_v35 }
0x1db1   :  { %9679 = vmatprep.subr.bf16.mxu1 %v11020_v4 }
0x1e38   :  { %v3894_v43 = vpop.xlane.xlu0 %3893 }
0x1e39   :  { %v3895_v61 = vmul.f32 0.0078125, %v3894_v43  ;;  %v10244_v43 = vld [vmem:[#allocation19 + $0xd0] sm:$0xff]  }
0x1e3b   :  { %v3896_v2 = vadd.f32 1e-05, %v3895_v61  ;;  %v10245_v61 = vld [vmem:[#allocation19 + $0xc8] sm:$0xff]  }
0x1e3d   :  { %10558 = vrsqrt.f32 %v3896_v2  ;;  %v10246_v2 = vld [vmem:[#allocation19 + $0xc0] sm:$0xff]  }
0x1e4a   :  { %v10559_v5 = vpop.eup %10558 }
0x1e4b   :  { %v3898_v3 = vmul.f32 %v10559_v5, %v3890_v19 }
0x1e4d   :  { %v3903_v6 = vmul.f32 %v8699_v11, %v3898_v3 }
0x1e4f   :  { %v3908_v8 = vadd.f32 %v8700_v12, %v3903_v6  ;;  %v8733_v6 = vld [vmem:[%s12224_s19 + $0xa] ss:$0 sm:$0xff] }
0x1e51   :  { %v3927_v9 = vpack.c.bf16 %v3908_v8, %v3908_v8 }
0x1e53   :  { %4052 = vmatmul.mubr.bf16.vlgmr.msra.gmra.mxu0 %v3927_v9  ;;  %v8734_v9 = vld [vmem:[%s12224_s19 + $0xb] ss:$0 sm:$0xff] }
0x1e54   :  { %9675 = vmatprep.mubr.msk.bf16.mxu0 %vm11022_vm0, %v11020_v4  ;;  %9660 = vmatpush3.bf16.msra.mxu0 %v10239_v36 }
0x1e55   :  { %9661 = vmatprep.subr.bf16.mxu0 %v11020_v4 }
0x1e58   :  { %9662 = vmatpush3.bf16.msra.mxu0 %v10240_v40 }
0x1e59   :  { %9663 = vmatprep.subr.bf16.mxu0 %v11020_v4 }
0x1e5c   :  { %9664 = vmatpush3.bf16.msra.mxu0 %v10241_v0 }
0x1e5d   :  { %9665 = vmatprep.subr.bf16.mxu0 %v11020_v4 }
0x1e60   :  { %9666 = vmatpush3.bf16.msra.mxu0 %v10242_v37 }
0x1e61   :  { %9667 = vmatprep.subr.bf16.mxu0 %v11020_v4 }
0x1e64   :  { %9668 = vmatpush3.bf16.msra.mxu0 %v10243_v1 }
0x1e65   :  { %9669 = vmatprep.subr.bf16.mxu0 %v11020_v4 }
0x1e68   :  { %9670 = vmatpush3.bf16.msra.mxu0 %v10244_v43 }
0x1e69   :  { %9671 = vmatprep.subr.bf16.mxu0 %v11020_v4 }
0x1e6c   :  { %9672 = vmatpush3.bf16.msra.mxu0 %v10245_v61  ;;  %v2322_v61 = vsub.s32 3, %v11259_v54 }
0x1e6d   :  { %9673 = vmatprep.subr.bf16.mxu0 %v11020_v4 }
0x1e70   :  { %9674 = vmatpush3.bf16.msra.mxu0 %v10246_v2  ;;  %v4409_v2 = vld [vmem:[#allocation28 + $0x60] ss:$0 sm:$0xff] }
0x1e71   :  { %9699 = vmatprep.subr.mxu0 %v11020_v4 }
0x1f13   :  { %v4053_v17 = vpop.f32.mrf.mxu0 }
0x1f14   :  { %v4054_v10 = vadd.f32 %v4053_v17, %v3932_v15  ;;  %v11753_v15 = vadd.f32 %v11549_v49, %v2319_v46  ;;  %v10247_v49 = vld [vmem:[#allocation19 + $0x138] sm:$0xff]  }
0x1f15   :  { %v4055_v19 = vpop.f32.mrf.mxu0 }
0x1f16   :  { %v4056_v20 = vadd.f32 %v4055_v19, %v3936_v16  ;;  %v4060_v22 = vmax.f32 %v4054_v10, 0.0  ;;  %v4276_v16 = vld [vmem:[#allocation28 + $0x37] ss:$0 sm:$0xff] }
0x1f17   :  { %v4057_v24 = vpop.f32.mrf.mxu0 }
0x1f18   :  { %v4061_v23 = vmax.f32 %v4056_v20, 0.0  ;;  %v4095_v31 = vpack.c.bf16 %v4060_v22, %v4060_v22 }
0x1f19   :  { %v4058_v25 = vpop.f32.mrf.mxu0 }
0x1f1a   :  { %v4096_v26 = vpack.c.bf16 %v4061_v23, %v4061_v23  ;;  %v10248_v23 = vld [vmem:[#allocation19 + $0x130] sm:$0xff]  }
0x1f1c   :  { %4225 = vmatprep.mubr.bf16.mxu1 %v4096_v26 }
0x1f1d   :  { %4226 = vmatmul.mubr.bf16.vlgmr.msra.gmra.mxu1 %v4095_v31 }
0x1f1e   :  { %9695 = vmatprep.mubr.msk.bf16.mxu1 %vm11022_vm0, %v11020_v4  ;;  %9680 = vmatpush3.bf16.msra.mxu1 %v10247_v49 }
0x1f1f   :  { %9681 = vmatprep.subr.bf16.mxu1 %v11020_v4 }
0x1f22   :  { %9682 = vmatpush3.bf16.msra.mxu1 %v10248_v23 }
0x1f23   :  { %9683 = vmatprep.subr.bf16.mxu1 %v11020_v4 }
0x1fdd   :  { %v9162_v32 = vpop.f32.mrf.mxu1 }
0x1fdf   :  { %v9163_v39 = vpop.f32.mrf.mxu1 }
0x1fe0   :  { %v9164_v44 = vadd.f32 %v9163_v39, %v9162_v32  ;;  %v10249_v39 = vld [vmem:[#allocation19 + $0x128] sm:$0xff]  }
0x1fe1   :  { %v9165_v45 = vpop.f32.mrf.mxu1  ;;  %9684 = vmatpush3.bf16.msra.mxu1 %v10249_v39 }
0x1fe2   :  { %v4228_v21 = vadd.f32 %v9164_v44, %v4094_v34  ;;  %9685 = vmatprep.subr.bf16.mxu1 %v11020_v4  ;;  %v10250_v44 = vld [vmem:[#allocation19 + $0x120] sm:$0xff]   ;;  %v10251_v45 = vld [vmem:[#allocation19 + $0x118] sm:$0xff]  }
0x1fe3   :  { %v9166_v48 = vpop.f32.mrf.mxu1 }
0x1fe4   :  { %v4233_v58 = vadd.f32 %v4228_v21, %v3908_v8  ;;  %v10252_v21 = vld [vmem:[#allocation19 + $0x110] sm:$0xff]   ;;  %v10253_v48 = vld [vmem:[#allocation19 + $0x108] sm:$0xff]  }
0x1fe5   :  { %9686 = vmatpush3.bf16.msra.mxu1 %v10250_v44 }
0x1fe6   :  { %v4236_v60 = vsel %vm2817_vm5, %v4233_v58, 0.0  ;;  %9687 = vmatprep.subr.bf16.mxu1 %v11020_v4 }
0x1fe7   :  { %4237 = vadd.xlane.f32.xlu0 %v4236_v60 }
0x1fe9   :  { %9688 = vmatpush3.bf16.msra.mxu1 %v10251_v45 }
0x1fea   :  { %9689 = vmatprep.subr.bf16.mxu1 %v11020_v4 }
0x1fed   :  { %9690 = vmatpush3.bf16.msra.mxu1 %v10252_v21 }
0x1fee   :  { %9691 = vmatprep.subr.bf16.mxu1 %v11020_v4 }
0x1ff1   :  { %9692 = vmatpush3.bf16.msra.mxu1 %v10253_v48  ;;  %v10257_v48 = vld [vmem:[#allocation19 + $0x158] sm:$0xff]  }
0x1ff2   :  { %9693 = vmatprep.subr.bf16.mxu1 %v11020_v4 }
0x2070   :  { %v4238_v7 = vpop.xlane.xlu0 %4237 }
0x2071   :  { %v4239_v38 = vmul.f32 0.0078125, %v4238_v7 }
0x2073   :  { %v4240_v51 = vsub.f32 %v4233_v58, %v4239_v38  ;;  %v10254_v58 = vld [vmem:[#allocation19 + $0x100] sm:$0xff]  }
0x2074   :  { %9694 = vmatpush3.bf16.msra.mxu1 %v10254_v58  ;;  %v8743_v38 = vld [vmem:[%s12224_s19 + $0xc] ss:$0 sm:$0xff]  ;;  %v10258_v58 = vld [vmem:[#allocation19 + $0x150] sm:$0xff]  }
0x2075   :  { %v4241_v42 = vmul.f32 %v4240_v51, %v4240_v51  ;;  %9713 = vmatprep.subr.mxu1 %v11020_v4 }
0x2077   :  { %v4242_v62 = vsel %vm2817_vm5, %v4241_v42, 0.0  ;;  %v8744_v42 = vld [vmem:[%s12224_s19 + $0xd] ss:$0 sm:$0xff] }
0x2078   :  { %4243 = vadd.xlane.f32.xlu0 %v4242_v62 }
0x2101   :  { %v4244_v5 = vpop.xlane.xlu0 %4243 }
0x2102   :  { %v4245_v11 = vmul.f32 0.0078125, %v4244_v5  ;;  %v2323_v5 = vrot.slane %v11531_v41, %v2322_v61 }
0x2104   :  { %v4246_v3 = vadd.f32 1e-05, %v4245_v11 }
0x2106   :  { %10560 = vrsqrt.f32 %v4246_v3 }
0x2113   :  { %v10561_v12 = vpop.eup %10560 }
0x2114   :  { %v4248_v8 = vmul.f32 %v10561_v12, %v4240_v51  ;;  %v11793_v12 = vadd.f32 %v11555_v56, %v2323_v5 }
0x2116   :  { %v4253_v13 = vmul.f32 %v8733_v6, %v4248_v8  ;;  %v11800_v8 = vadd.f32 %v11551_v52, %v2323_v5 }
0x2118   :  { %v4258_v63 = vadd.f32 %v8734_v9, %v4253_v13 }
0x211a   :  { %v4277_v35 = vpack.c.bf16 %v4258_v63, %v4258_v63 }
0x211c   :  { %9676 = vmatmul.mubr.bf16.vlgmr.msra.gmra.mxu0 %v4277_v35 }
0x211d   :  { %9700 = vmatpush3.xpose.msk.msra.mxu0 %vm614_vm1, %v11745_v14  ;;  %9703 = vmatprep.mubr.msk.f32.mxu0 %vm11022_vm0, %v11020_v4 }
0x211e   :  { %9701 = vmatprep.subr.mxu0 %v11020_v4 }
0x2121   :  { %9702 = vmatpush3.xpose.msk.msra.mxu0 %vm614_vm1, %v11753_v15 }
0x2122   :  { %9706 = vmatprep.subr.mxu0 %v11020_v4 }
0x21dc   :  { %v4360_v53 = vpop.f32.mrf.mxu0 }
0x21dd   :  { %v4361_v17 = vadd.f32 %v4360_v53, %v4276_v16 }
0x21de   :  { %v9677_v10 = vpop.f32.mrf.mxu0 }
0x21df   :  { %v4366_v19 = vadd.f32 %v4361_v17, %v4258_v63 }
0x21e0   :  { %v4363_v20 = vpop.f32.mrf.mxu0 }
0x21e1   :  { %v4369_v22 = vsel %vm2817_vm5, %v4366_v19, 0.0 }
0x21e2   :  { %4370 = vadd.xlane.f32.xlu1 %v4369_v22  ;;  %v9678_v24 = vpop.f32.mrf.mxu0 }
0x21f3   :  { %4687 = vrot.lane.b32.xlu1 %v11745_v14, %s11023_s8 }
0x226b   :  { %v4371_v25 = vpop.xlane.xlu1 %4370 }
0x226c   :  { %v4372_v26 = vmul.f32 0.0078125, %v4371_v25 }
0x226e   :  { %v4373_v31 = vsub.f32 %v4366_v19, %v4372_v26 }
0x226f   :  { %v4688_v1 = vpop.permute.xlu1 %4687 }
0x2270   :  { %v4374_v32 = vmul.f32 %v4373_v31, %v4373_v31 }
0x2272   :  { %v4375_v34 = vsel %vm2817_vm5, %v4374_v32, 0.0 }
0x2273   :  { %4376 = vadd.xlane.f32.xlu0 %v4375_v34 }
0x2289   :  { %4685 = vrot.lane.b32.xlu0 %v11753_v15, %s11023_s8 }
0x22fc   :  { %v4377_v60 = vpop.xlane.xlu0 %4376 }
0x22fd   :  { %v4378_v36 = vmul.f32 0.0078125, %v4377_v60 }
0x22ff   :  { %v4379_v40 = vadd.f32 1e-05, %v4378_v36 }
0x2300   :  { %v4686_v43 = vpop.permute.xlu0 %4685 }
0x2301   :  { %10562 = vrsqrt.f32 %v4379_v40 }
0x230e   :  { %v10563_v7 = vpop.eup %10562 }
0x230f   :  { %v4381_v51 = vmul.f32 %v10563_v7, %v4373_v31  ;;  %v10255_v7 = vld [vmem:[#allocation19 + $0x148] sm:$0xff]  }
0x2311   :  { %v4386_v62 = vmul.f32 %v8743_v38, %v4381_v51  ;;  %v10256_v51 = vld [vmem:[#allocation19 + $0x140] sm:$0xff]  }
0x2313   :  { %v11778_v0 = vadd.f32 %v8744_v42, %v4386_v62 }
0x2315   :  { %v4410_v37 = vpack.c.bf16 %v11778_v0, %v11778_v0 }
0x2317   :  { %9696 = vmatmul.mubr.bf16.vlgmr.msra.gmra.mxu1 %v4410_v37 }
0x2318   :  { %9714 = vmatpush3.xpose.msk.msra.mxu1 %vm614_vm1, %v4688_v1  ;;  %9717 = vmatprep.mubr.msk.f32.mxu1 %vm11022_vm0, %v11020_v4 }
0x2319   :  { %9715 = vmatprep.subr.mxu1 %v11020_v4 }
0x231c   :  { %9716 = vmatpush3.xpose.msk.msra.mxu1 %vm614_vm1, %v4686_v43 }
0x231d   :  { %9727 = vmatprep.subr.bf16.mxu1 %v11020_v4 }
0x23d7   :  { %v4493_v11 = vpop.f32.mrf.mxu1 }
0x23d8   :  { %v11790_v3 = vadd.f32 %v4493_v11, %v4409_v2 }
0x23d9   :  { %v9697_v6 = vpop.f32.mrf.mxu1 }
0x23da   :  { %4683 = vrot.lane.b32.xlu1 %v11790_v3, %s11023_s8  ;;  %9704 = vmatmul.mubr.msk.f32.vlgmr.msra.gmra.mxu0 %vm614_vm1, %v11790_v3 }
0x23db   :  { %9707 = vmatpush3.msra.mxu0 %v11793_v12  ;;  %v4496_v9 = vpop.f32.mrf.mxu1  ;;  %9710 = vmatprep.mubr.msk.f32.mxu0 %vm11022_vm0, %v11020_v4 }
0x23dc   :  { %9708 = vmatprep.subr.mxu0 %v11020_v4 }
0x23dd   :  { %9709 = vmatpush3.msra.mxu0 %v11800_v8  ;;  %v9698_v56 = vpop.f32.mrf.mxu1 }
0x23de   :  { %9720 = vmatprep.subr.mxu0 %v11020_v4 }
0x244c   :  { %v4684_v13 = vpop.permute.xlu1 %4683 }
0x244d   :  { %9718 = vmatmul.mubr.msk.f32.vlgmr.msra.gmra.mxu1 %vm614_vm1, %v4684_v13 }
0x244e   :  { %9731 = vmatprep.mubr.msk.bf16.mxu1 %vm11022_vm0, %v11020_v4  ;;  %9728 = vmatpush3.bf16.msra.mxu1 %v10257_v48 }
0x244f   :  { %9729 = vmatprep.subr.bf16.mxu1 %v11020_v4 }
0x2452   :  { %9730 = vmatpush3.bf16.msra.mxu1 %v10258_v58 }
0x2453   :  { %9743 = vmatprep.subr.mxu1 %v11020_v4 }
0x249a   :  { %v4592_v52 = vpop.f32.mrf.mxu0 }
0x249b   :  { %v4596_v63 = vmul.f32 0.17677669, %v4592_v52 }
0x249c   :  { %v9705_v46 = vpop.f32.mrf.mxu0 }
0x249d   :  { %v4597_v35 = vadd.f32 %v4596_v63, %v11607_v47 }
0x249f   :  { %v4598_v16 = vsel %vm3047_vm6, %v4597_v35, -inf }
0x24a0   :  { %4599 = vmax.xlane.f32.xlu1 %v4598_v16 }
0x250d   :  { %v4761_v53 = vpop.f32.mrf.mxu1 }
0x250e   :  { %v4765_v17 = vmul.f32 0.17677669, %v4761_v53 }
0x250f   :  { %v9719_v10 = vpop.f32.mrf.mxu1 }
0x2510   :  { %v4766_v19 = vadd.f32 %v4765_v17, %v11607_v47  ;;  %v11856_v10 = vld [vmem:[#allocation7] sm:$0x3] }
0x2512   :  { %v4767_v20 = vsel %vm3047_vm6, %v4766_v19, -inf }
0x2513   :  { %4768 = vmax.xlane.f32.xlu0 %v4767_v20 }
0x2529   :  { %v4600_v22 = vpop.xlane.xlu1 %4599 }
0x252a   :  { %v4601_v24 = vsub.f32 %v4597_v35, %v4600_v22 }
0x252c   :  { %v4602_v49 = vmul.f32 1.442695, %v4601_v24 }
0x252e   :  { %10564 = vpow2.f32 %v4602_v49 }
0x253b   :  { %v10565_v23 = vpop.eup %10564 }
0x253c   :  { %v4604_v25 = vsel %vm3047_vm6, %v10565_v23, 0.0 }
0x253d   :  { %4605 = vadd.xlane.f32.xlu0 %v4604_v25 }
0x2553   :  { %4782 = vrot.lane.b32.xlu0 %v11793_v12, %s11023_s8 }
0x2557   :  { %4970 = vrot.lane.b32.xlu0 %v11790_v3, %s11001_s22 }
0x259c   :  { %v4769_v26 = vpop.xlane.xlu0 %4768 }
0x259d   :  { %v4770_v31 = vsub.f32 %v4766_v19, %v4769_v26  ;;  %v10259_v26 = vld [vmem:[#allocation19 + $0x168] sm:$0xff]  }
0x259f   :  { %v4771_v47 = vmul.f32 1.442695, %v4770_v31 }
0x25a1   :  { %10566 = vpow2.f32 %v4771_v47 }
0x25ae   :  { %v10567_v32 = vpop.eup %10566 }
0x25af   :  { %v4773_v34 = vsel %vm3047_vm6, %v10567_v32, 0.0 }
0x25b0   :  { %4774 = vadd.xlane.f32.xlu1 %v4773_v34 }
0x25c1   :  { %4780 = vrot.lane.b32.xlu1 %v11800_v8, %s11023_s8 }
0x25c5   :  { %4974 = vrot.lane.b32.xlu1 %v11745_v14, %s11001_s22 }
0x25c6   :  { %v4606_v39 = vpop.xlane.xlu0 %4605 }
0x25c7   :  { %10568 = vrcp.f32 %v4606_v39 }
0x25c9   :  { %4972 = vrot.lane.b32.xlu1 %v11753_v15, %s11001_s22 }
0x25ca   :  { %v4783_v21 = vpop.permute.xlu0 %4782 }
0x25ce   :  { %v4971_v11 = vpop.permute.xlu0 %4970 }
0x25d4   :  { %v10569_v44 = vpop.eup %10568 }
0x25d5   :  { %v4608_v45 = vmul.f32 %v10569_v44, %v10565_v23  ;;  %v10260_v44 = vld [vmem:[#allocation19 + $0x160] sm:$0xff]  }
0x25d7   :  { %9711 = vmatmul.mubr.msk.f32.vlgmr.msra.gmra.mxu0 %vm706_vm2, %v4608_v45 }
0x25d8   :  { %9721 = vmatpush3.msra.mxu0 %v4783_v21  ;;  %9724 = vmatprep.mubr.msk.f32.mxu0 %vm11022_vm0, %v11020_v4 }
0x25d9   :  { %9722 = vmatprep.subr.mxu0 %v11020_v4 }
0x2639   :  { %v4775_v60 = vpop.xlane.xlu1 %4774 }
0x263a   :  { %10570 = vrcp.f32 %v4775_v60 }
0x263d   :  { %v4781_v36 = vpop.permute.xlu1 %4780 }
0x263e   :  { %9723 = vmatpush3.msra.mxu0 %v4781_v36 }
0x263f   :  { %9735 = vmatprep.subr.bf16.mxu0 %v11020_v4 }
0x2641   :  { %v4975_v43 = vpop.permute.xlu1 %4974 }
0x2645   :  { %v4973_v5 = vpop.permute.xlu1 %4972 }
0x2647   :  { %v10571_v40 = vpop.eup %10570 }
0x2648   :  { %v4777_v38 = vmul.f32 %v10571_v40, %v10567_v32 }
0x264a   :  { %9725 = vmatmul.mubr.msk.f32.vlgmr.msra.gmra.mxu0 %vm706_vm2, %v4777_v38 }
0x264b   :  { %9736 = vmatpush3.bf16.msra.mxu0 %v10255_v7  ;;  %9739 = vmatprep.mubr.msk.bf16.mxu0 %vm11022_vm0, %v11020_v4 }
0x264c   :  { %9737 = vmatprep.subr.bf16.mxu0 %v11020_v4 }
0x264f   :  { %9738 = vmatpush3.bf16.msra.mxu0 %v10256_v51 }
0x2650   :  { %9750 = vmatprep.subr.mxu0 %v11020_v4 }
0x2697   :  { %v4678_v42 = vpop.f32.mrf.mxu0 }
0x2698   :  { %v4682_v62 = vpack.c.bf16 %v4678_v42, %v4678_v42 }
0x2699   :  { %v9712_v37 = vpop.f32.mrf.mxu0 }
0x269a   :  { %9740 = vmatmul.mubr.msk.bf16.vlgmr.msra.gmra.mxu0 %vm614_vm1, %v4682_v62 }
0x269b   :  { %9754 = vmatprep.mubr.msk.f32.mxu0 %vm11022_vm0, %v11020_v4 }
0x270a   :  { %v4855_v1 = vpop.f32.mrf.mxu0 }
0x270b   :  { %v4859_v61 = vpack.c.bf16 %v4855_v1, %v4855_v1 }
0x270c   :  { %v9726_v2 = vpop.f32.mrf.mxu0 }
0x270d   :  { %9732 = vmatmul.mubr.msk.bf16.vlgmr.msra.gmra.mxu1 %vm614_vm1, %v4859_v61 }
0x270e   :  { %9744 = vmatpush3.xpose.msk.msra.mxu1 %vm614_vm1, %v4975_v43  ;;  %9747 = vmatprep.mubr.msk.f32.mxu1 %vm11022_vm0, %v11020_v4 }
0x270f   :  { %9745 = vmatprep.subr.mxu1 %v11020_v4 }
0x2712   :  { %9746 = vmatpush3.xpose.msk.msra.mxu1 %vm614_vm1, %v4973_v5  ;;  %v10261_v5 = vld [vmem:[#allocation19 + $0x178] sm:$0xff]  }
0x2713   :  { %9757 = vmatprep.subr.bf16.mxu1 %v11020_v4 }
0x2715   :  { %9748 = vmatmul.mubr.msk.f32.vlgmr.msra.gmra.mxu1 %vm614_vm1, %v4971_v11 }
0x2716   :  { %9761 = vmatprep.mubr.msk.bf16.mxu1 %vm11022_vm0, %v11020_v4  ;;  %9758 = vmatpush3.bf16.msra.mxu1 %v10259_v26  ;;  %v10265_v26 = vld [vmem:[#allocation22 + $0xf4] ss:$8 sps:$4 sm:$0xff]  }
0x2717   :  { %9759 = vmatprep.subr.bf16.mxu1 %v11020_v4 }
0x271a   :  { %9760 = vmatpush3.bf16.msra.mxu1 %v10260_v44  ;;  %v10272_v44 = vld [vmem:[#allocation22 + $0xc0] ss:$8 sps:$4 sm:$0xff]  }
0x271b   :  { %9779 = vmatprep.subr.bf16.mxu1 %v11020_v4 }
0x275a   :  { %v11852_v6 = vpop.f32.mrf.mxu0 }
0x275c   :  { %v9741_v9 = vpop.f32.mrf.mxu0 }
0x275d   :  { %v10262_v9 = vld [vmem:[#allocation19 + $0x170] sm:$0xff]  }
0x275e   :  { %v4967_v56 = vpop.f32.mrf.mxu0 }
0x2760   :  { %v9742_v13 = vpop.f32.mrf.mxu0 }
0x27cd   :  { %v11854_v52 = vpop.f32.mrf.mxu1 }
0x27ce   :  { %v4965_v43 = vadd.f32 %v11852_v6, %v11854_v52 }
0x27cf   :  { %v9733_v63 = vpop.f32.mrf.mxu1 }
0x27d1   :  { %v4912_v46 = vpop.f32.mrf.mxu1 }
0x27d3   :  { %v9734_v35 = vpop.f32.mrf.mxu1 }
0x27d5   :  { %v5048_v16 = vpop.f32.mrf.mxu1 }
0x27d6   :  { %v5052_v53 = vmul.f32 0.17677669, %v5048_v16  ;;  %v4516_v16 = vld [vmem:[#allocation28 + $0x61] ss:$0 sm:$0xff] }
0x27d7   :  { %v9749_v17 = vpop.f32.mrf.mxu1 }
0x27d8   :  { %v5053_v19 = vadd.f32 %v11856_v10, %v5052_v53 }
0x27da   :  { %v5054_v20 = vsel %vm3047_vm6, %v5053_v19, -inf }
0x27db   :  { %5055 = vmax.xlane.f32.xlu1 %v5054_v20 }
0x27ec   :  { %5065 = vrot.lane.b32.xlu1 %v11800_v8, %s11001_s22 }
0x27f0   :  { %5205 = vrot.lane.b32.xlu1 %v11745_v14, %s11024_s15 }
0x27f4   :  { %5201 = vrot.lane.b32.xlu1 %v11790_v3, %s11024_s15 }
0x2864   :  { %v5056_v22 = vpop.xlane.xlu1 %5055 }
0x2865   :  { %v5057_v24 = vsub.f32 %v5053_v19, %v5056_v22 }
0x2867   :  { %v5058_v49 = vmul.f32 1.442695, %v5057_v24 }
0x2868   :  { %v5066_v31 = vpop.permute.xlu1 %5065 }
0x2869   :  { %10572 = vpow2.f32 %v5058_v49 }
0x286c   :  { %v5206_v34 = vpop.permute.xlu1 %5205 }
0x2870   :  { %v5202_v39 = vpop.permute.xlu1 %5201 }
0x2876   :  { %v10573_v23 = vpop.eup %10572 }
0x2877   :  { %v5060_v25 = vsel %vm3047_vm6, %v10573_v23, 0.0 }
0x2878   :  { %5061 = vadd.xlane.f32.xlu0 %v5060_v25  ;;  %v10263_v25 = vld [vmem:[#allocation22 + $0xf0] ss:$8 sps:$4 sm:$0xff]  }
0x288e   :  { %5067 = vrot.lane.b32.xlu0 %v11793_v12, %s11001_s22 }
0x2892   :  { %5203 = vrot.lane.b32.xlu0 %v11753_v15, %s11024_s15 }
0x2901   :  { %v5062_v14 = vpop.xlane.xlu0 %5061 }
0x2902   :  { %10574 = vrcp.f32 %v5062_v14  ;;  %v10268_v14 = vld [vmem:[#allocation22 + $0xe4] ss:$8 sps:$4 sm:$0xff]  }
0x2905   :  { %v5068_v3 = vpop.permute.xlu0 %5067 }
0x2906   :  { %9751 = vmatpush3.msra.mxu0 %v5068_v3  ;;  %v10266_v3 = vld [vmem:[#allocation22 + $0xe0] ss:$8 sps:$4 sm:$0xff]  }
0x2907   :  { %9752 = vmatprep.subr.mxu0 %v11020_v4 }
0x2908   :  { %9753 = vmatpush3.msra.mxu0 %v5066_v31 }
0x2909   :  { %9765 = vmatprep.subr.mxu0 %v11020_v4  ;;  %v5204_v15 = vpop.permute.xlu0 %5203 }
0x290f   :  { %v10575_v47 = vpop.eup %10574 }
0x2910   :  { %v5064_v32 = vmul.f32 %v10575_v47, %v10573_v23 }
0x2912   :  { %9755 = vmatmul.mubr.msk.f32.vlgmr.msra.gmra.mxu0 %vm706_vm2, %v5064_v32 }
0x2913   :  { %9766 = vmatpush3.xpose.msk.msra.mxu0 %vm614_vm1, %v5206_v34  ;;  %9769 = vmatprep.mubr.msk.f32.mxu0 %vm11022_vm0, %v11020_v4 }
0x2914   :  { %9767 = vmatprep.subr.mxu0 %v11020_v4 }
0x2917   :  { %9768 = vmatpush3.xpose.msk.msra.mxu0 %vm614_vm1, %v5204_v15 }
0x2918   :  { %9772 = vmatprep.subr.mxu0 %v11020_v4 }
0x291a   :  { %9770 = vmatmul.mubr.msk.f32.vlgmr.msra.gmra.mxu0 %vm614_vm1, %v5202_v39  ;;  %v10269_v39 = vld [vmem:[#allocation22 + $0xd0] ss:$8 sps:$4 sm:$0xff]  }
0x291b   :  { %9776 = vmatprep.mubr.msk.f32.mxu0 %vm11022_vm0, %v11020_v4 }
0x29d2   :  { %v5140_v45 = vpop.f32.mrf.mxu0 }
0x29d3   :  { %v5144_v21 = vpack.c.bf16 %v5140_v45, %v5140_v45  ;;  %v10274_v45 = vld [vmem:[#allocation22 + $0xc4] ss:$8 sps:$4 sm:$0xff]  }
0x29d4   :  { %v9756_v48 = vpop.f32.mrf.mxu0 }
0x29d5   :  { %9762 = vmatmul.mubr.msk.bf16.vlgmr.msra.gmra.mxu1 %vm614_vm1, %v5144_v21  ;;  %v10277_v21 = vld [vmem:[#allocation22 + $0xb4] ss:$8 sps:$4 sm:$0xff]   ;;  %v10275_v48 = vld [vmem:[#allocation22 + $0xb0] ss:$8 sps:$4 sm:$0xff]  }
0x29d6   :  { %9783 = vmatprep.mubr.msk.bf16.mxu1 %vm11022_vm0, %v11020_v4  ;;  %9780 = vmatpush3.bf16.msra.mxu1 %v10261_v5  ;;  %v10296_v5 = vld [vmem:[#allocation23 + $0x98] sm:$0xff]  }
0x29d7   :  { %9781 = vmatprep.subr.bf16.mxu1 %v11020_v4 }
0x29da   :  { %v5279_v58 = vpop.f32.mrf.mxu0  ;;  %9782 = vmatpush3.bf16.msra.mxu1 %v10262_v9  ;;  %v10298_v9 = vld [vmem:[#allocation23 + $0x90] sm:$0xff]  }
0x29db   :  { %v5283_v60 = vmul.f32 0.17677669, %v5279_v58  ;;  %v10280_v58 = vld [vmem:[#allocation22 + $0xa4] ss:$8 sps:$4 sm:$0xff]  }
0x29dc   :  { %v9771_v36 = vpop.f32.mrf.mxu0 }
0x29dd   :  { %v5284_v40 = vadd.f32 %v11856_v10, %v5283_v60  ;;  %v10278_v60 = vld [vmem:[#allocation22 + $0xa0] ss:$8 sps:$4 sm:$0xff]   ;;  %v10283_v36 = vld [vmem:[#allocation22 + $0x94] ss:$8 sps:$4 sm:$0xff]  }
0x29df   :  { %v5285_v7 = vsel %vm3047_vm6, %v5284_v40, -inf }
0x29e0   :  { %5286 = vmax.xlane.f32.xlu0 %v5285_v7  ;;  %v10286_v7 = vld [vmem:[#allocation22 + $0x84] ss:$8 sps:$4 sm:$0xff]  }
0x29f6   :  { %5298 = vrot.lane.b32.xlu0 %v11793_v12, %s11024_s15 }
0x2a69   :  { %v5287_v38 = vpop.xlane.xlu0 %5286 }
0x2a6a   :  { %v5288_v51 = vsub.f32 %v5284_v40, %v5287_v38  ;;  %v10281_v40 = vld [vmem:[#allocation22 + $0x90] ss:$8 sps:$4 sm:$0xff]   ;;  %v10284_v38 = vld [vmem:[#allocation22 + $0x80] ss:$8 sps:$4 sm:$0xff]  }
0x2a6c   :  { %v5289_v42 = vmul.f32 1.442695, %v5288_v51  ;;  %v10287_v51 = vld [vmem:[#allocation23 + $0xf8] sm:$0xff]  }
0x2a6d   :  { %v5299_v62 = vpop.permute.xlu0 %5298  ;;  %9222 = vmatprep.subr.bf16.mxu1 %v10287_v51 }
0x2a6e   :  { %10576 = vpow2.f32 %v5289_v42  ;;  %9773 = vmatpush3.msra.mxu0 %v5299_v62  ;;  %v10288_v42 = vld [vmem:[#allocation23 + $0xb8] sm:$0xff]   ;;  %v10289_v62 = vld [vmem:[#allocation23 + $0xf0] sm:$0xff]  }
0x2a6f   :  { %9774 = vmatprep.subr.mxu0 %v11020_v4 }
0x2a7b   :  { %v10577_v37 = vpop.eup %10576 }
0x2a7c   :  { %v5291_v1 = vsel %vm3047_vm6, %v10577_v37, 0.0 }
0x2a7d   :  { %5292 = vadd.xlane.f32.xlu1 %v5291_v1  ;;  %v10291_v1 = vld [vmem:[#allocation23 + $0xe8] sm:$0xff]  }
0x2a8e   :  { %5296 = vrot.lane.b32.xlu1 %v11800_v8, %s11024_s15 }
0x2a95   :  { %v5194_v61 = vpop.f32.mrf.mxu1 }
0x2a96   :  { %v5200_v12 = vadd.f32 %v5194_v61, %v4965_v43  ;;  %v10292_v43 = vld [vmem:[#allocation23 + $0xa8] sm:$0xff]   ;;  %v10293_v61 = vld [vmem:[#allocation23 + $0xe0] sm:$0xff]  }
0x2a97   :  { %v9763_v2 = vpop.f32.mrf.mxu1 }
0x2a98   :  { %v10295_v2 = vld [vmem:[#allocation23 + $0xd8] sm:$0xff]  }
0x2a99   :  { %v5197_v11 = vpop.f32.mrf.mxu1 }
0x2a9a   :  { %v10297_v11 = vld [vmem:[#allocation23 + $0xd0] sm:$0xff]  }
0x2a9b   :  { %v9764_v56 = vpop.f32.mrf.mxu1 }
0x2b06   :  { %v5293_v13 = vpop.xlane.xlu1 %5292 }
0x2b07   :  { %10578 = vrcp.f32 %v5293_v13 }
0x2b0a   :  { %v5297_v63 = vpop.permute.xlu1 %5296 }
0x2b0b   :  { %9775 = vmatpush3.msra.mxu0 %v5297_v63 }
0x2b0c   :  { %5570 = vmatprep.subr.bf16.mxu0 %v10265_v26 }
0x2b14   :  { %v10579_v46 = vpop.eup %10578 }
0x2b15   :  { %v5295_v8 = vmul.f32 %v10579_v46, %v10577_v37  ;;  %v10290_v37 = vld [vmem:[#allocation23 + $0xb0] sm:$0xff]  }
0x2b17   :  { %9777 = vmatmul.mubr.msk.f32.vlgmr.msra.gmra.mxu0 %vm706_vm2, %v5295_v8  ;;  %v8781_v8 = vld [vmem:[%s12224_s19 + $0xe] ss:$0 sm:$0xff] }
0x2b18   :  { %5602 = vmatprep.mubr.bf16.mxu0 %v11021_v30  ;;  %5571 = vmatpush1.bf16.msra.mxu0 %v10263_v25 }
0x2b19   :  { %5572 = vmatprep.subr.bf16.mxu0 %v10268_v14 }
0x2b1c   :  { %5573 = vmatpush1.bf16.msra.mxu0 %v10266_v3 }
0x2bd7   :  { %v5371_v6 = vpop.f32.mrf.mxu0 }
0x2bd8   :  { %v5375_v52 = vpack.c.bf16 %v5371_v6, %v5371_v6 }
0x2bd9   :  { %v9778_v35 = vpop.f32.mrf.mxu0 }
0x2bda   :  { %9784 = vmatmul.mubr.msk.bf16.vlgmr.msra.gmra.mxu1 %vm614_vm1, %v5375_v52  ;;  %v8782_v52 = vld [vmem:[%s12224_s19 + $0xf] ss:$0 sm:$0xff] }
0x2bdb   :  { %9223 = vmatpush3.bf16.msra.mxu1 %v10288_v42 }
0x2bdc   :  { %9224 = vmatprep.subr.bf16.mxu1 %v10289_v62 }
0x2bdf   :  { %9225 = vmatpush3.bf16.msra.mxu1 %v10290_v37 }
0x2be0   :  { %9226 = vmatprep.subr.bf16.mxu1 %v10291_v1 }
0x2be3   :  { %9227 = vmatpush3.bf16.msra.mxu1 %v10292_v43  ;;  %v10305_v43 = vld [vmem:[#allocation19 + $0x1a8] sm:$0xff]  }
0x2be4   :  { %9228 = vmatprep.subr.bf16.mxu1 %v10293_v61  ;;  %v10306_v61 = vld [vmem:[#allocation19 + $0x1a0] sm:$0xff]  }
0x2c9a   :  { %v5425_v53 = vpop.f32.mrf.mxu1 }
0x2c9b   :  { %v5431_v17 = vadd.f32 %v5425_v53, %v5200_v12  ;;  %v10294_v12 = vld [vmem:[#allocation23 + $0xa0] sm:$0xff]  }
0x2c9c   :  { %v9785_v19 = vpop.f32.mrf.mxu1  ;;  %9229 = vmatpush3.bf16.msra.mxu1 %v10294_v12  ;;  %v10307_v12 = vld [vmem:[#allocation19 + $0x198] sm:$0xff]  }
0x2c9d   :  { %v5432_v20 = vadd.f32 %v5431_v17, %v4516_v16  ;;  %9230 = vmatprep.subr.bf16.mxu1 %v10295_v2  ;;  %v10299_v17 = vld [vmem:[#allocation23 + $0xc8] sm:$0xff]   ;;  %v10308_v2 = vld [vmem:[#allocation19 + $0x190] sm:$0xff]  }
0x2c9e   :  { %v5428_v22 = vpop.f32.mrf.mxu1  ;;  %v10300_v19 = vld [vmem:[#allocation23 + $0x88] sm:$0xff]  }
0x2c9f   :  { %v5433_v24 = vadd.f32 %v5432_v20, %v11778_v0  ;;  %v10271_v0 = vld [vmem:[#allocation22 + $0xd4] ss:$8 sps:$4 sm:$0xff]   ;;  %v10301_v20 = vld [vmem:[#allocation23 + $0xc0] sm:$0xff]  }
0x2ca0   :  { %v9786_v49 = vpop.f32.mrf.mxu1  ;;  %5574 = vmatprep.subr.bf16.mxu0 %v10271_v0  ;;  %9231 = vmatpush3.bf16.msra.mxu1 %v10296_v5  ;;  %v10302_v22 = vld [vmem:[#allocation23 + $0x80] sm:$0xff]   ;;  %v10309_v5 = vld [vmem:[#allocation19 + $0x188] sm:$0xff]  }
0x2ca1   :  { %v5436_v23 = vsel %vm2817_vm5, %v5433_v24, 0.0  ;;  %5575 = vmatpush1.bf16.msra.mxu0 %v10269_v39  ;;  %9232 = vmatprep.subr.bf16.mxu1 %v10297_v11  ;;  %v10310_v11 = vld [vmem:[#allocation19 + $0x180] sm:$0xff]  }
0x2ca2   :  { %5437 = vadd.xlane.f32.xlu0 %v5436_v23  ;;  %5576 = vmatprep.subr.bf16.mxu0 %v10274_v45 }
0x2ca4   :  { %9233 = vmatpush3.bf16.msra.mxu1 %v10298_v9 }
0x2ca5   :  { %5577 = vmatpush1.bf16.msra.mxu0 %v10272_v44  ;;  %9234 = vmatprep.subr.bf16.mxu1 %v10299_v17  ;;  %v5646_v44 = vld [vmem:[#allocation28 + $0x63] ss:$0 sm:$0xff] }
0x2ca6   :  { %5578 = vmatprep.subr.bf16.mxu0 %v10277_v21 }
0x2ca8   :  { %9235 = vmatpush3.bf16.msra.mxu1 %v10300_v19 }
0x2ca9   :  { %5579 = vmatpush1.bf16.msra.mxu0 %v10275_v48  ;;  %9236 = vmatprep.subr.bf16.mxu1 %v10301_v20 }
0x2caa   :  { %5580 = vmatprep.subr.bf16.mxu0 %v10280_v58 }
0x2cac   :  { %9237 = vmatpush3.bf16.msra.mxu1 %v10302_v22  ;;  %v5828_v22 = vld [vmem:[#allocation28 + $0x64] ss:$0 sm:$0xff] }
0x2cad   :  { %5581 = vmatpush1.bf16.msra.mxu0 %v10278_v60  ;;  %9807 = vmatprep.subr.bf16.mxu1 %v11020_v4 }
0x2cae   :  { %5582 = vmatprep.subr.bf16.mxu0 %v10283_v36 }
0x2cb1   :  { %5583 = vmatpush1.bf16.msra.mxu0 %v10281_v40 }
0x2cb2   :  { %5584 = vmatprep.subr.bf16.mxu0 %v10286_v7  ;;  %v10303_v7 = vld [vmem:[#allocation19 + $0x1b8] sm:$0xff]  }
0x2cb5   :  { %5585 = vmatpush1.bf16.msra.mxu0 %v10284_v38  ;;  %v10304_v38 = vld [vmem:[#allocation19 + $0x1b0] sm:$0xff]  }
0x2cb6   :  { %9787 = vmatprep.subr.bf16.mxu0 %v11020_v4 }
0x2d2b   :  { %v5438_v31 = vpop.xlane.xlu0 %5437 }
0x2d2c   :  { %v5439_v47 = vmul.f32 0.0078125, %v5438_v31 }
0x2d2e   :  { %v5440_v32 = vsub.f32 %v5433_v24, %v5439_v47  ;;  %v5477_v24 = vld [vmem:[#allocation28 + $0x62] ss:$8 sm:$0x3] }
0x2d2f   :  { %v5483_v49 = vrot.slane %v5477_v24, %v11262_v55  ;;  %v5487_v23 = vrot.slane %v5477_v24, %v11265_v57 }
0x2d30   :  { %v5441_v34 = vmul.f32 %v5440_v32, %v5440_v32 }
0x2d32   :  { %v5442_v15 = vsel %vm2817_vm5, %v5441_v34, 0.0 }
0x2d33   :  { %5443 = vadd.xlane.f32.xlu1 %v5442_v15 }
0x2dbc   :  { %v5444_v56 = vpop.xlane.xlu1 %5443 }
0x2dbd   :  { %v5445_v13 = vmul.f32 0.0078125, %v5444_v56 }
0x2dbf   :  { %v5446_v63 = vadd.f32 1e-05, %v5445_v13 }
0x2dc1   :  { %10580 = vrsqrt.f32 %v5446_v63 }
0x2dce   :  { %v10581_v46 = vpop.eup %10580 }
0x2dcf   :  { %v5448_v6 = vmul.f32 %v10581_v46, %v5440_v32  ;;  %v8815_v46 = vld [vmem:[%s12224_s19 + $0x10] ss:$0 sm:$0xff] }
0x2dd1   :  { %v5453_v35 = vmul.f32 %v8781_v8, %v5448_v6  ;;  %v2326_v6 = vsub.s32 4, %v11259_v54 }
0x2dd3   :  { %v5458_v16 = vadd.f32 %v8782_v52, %v5453_v35  ;;  %v8816_v52 = vld [vmem:[%s12224_s19 + $0x11] ss:$0 sm:$0xff] }
0x2dd5   :  { %v5478_v53 = vpack.c.bf16 %v5458_v16, %v5458_v16 }
0x2dd7   :  { %5603 = vmatmul.mubr.bf16.vlgmr.msra.gmra.mxu0 %v5478_v53  ;;  %v2327_v53 = vrot.slane %v11531_v41, %v2326_v6 }
0x2dd8   :  { %9803 = vmatprep.mubr.msk.bf16.mxu0 %vm11022_vm0, %v11020_v4  ;;  %9788 = vmatpush3.bf16.msra.mxu0 %v10303_v7  ;;  %v8825_v7 = vld [vmem:[%s12224_s19 + $0x12] ss:$0 sm:$0xff] }
0x2dd9   :  { %9789 = vmatprep.subr.bf16.mxu0 %v11020_v4  ;;  %v11938_v19 = vadd.f32 %v11586_v28, %v2327_v53  ;;  %v11946_v20 = vadd.f32 %v11582_v27, %v2327_v53  ;;  %v10311_v27 = vld [vmem:[#allocation19 + $0x1f8] sm:$0xff]  }
0x2ddc   :  { %9790 = vmatpush3.bf16.msra.mxu0 %v10304_v38 }
0x2ddd   :  { %9791 = vmatprep.subr.bf16.mxu0 %v11020_v4 }
0x2de0   :  { %9792 = vmatpush3.bf16.msra.mxu0 %v10305_v43 }
0x2de1   :  { %9793 = vmatprep.subr.bf16.mxu0 %v11020_v4 }
0x2de4   :  { %9794 = vmatpush3.bf16.msra.mxu0 %v10306_v61 }
0x2de5   :  { %9795 = vmatprep.subr.bf16.mxu0 %v11020_v4 }
0x2de8   :  { %9796 = vmatpush3.bf16.msra.mxu0 %v10307_v12 }
0x2de9   :  { %9797 = vmatprep.subr.bf16.mxu0 %v11020_v4 }
0x2dec   :  { %9798 = vmatpush3.bf16.msra.mxu0 %v10308_v2 }
0x2ded   :  { %9799 = vmatprep.subr.bf16.mxu0 %v11020_v4 }
0x2df0   :  { %9800 = vmatpush3.bf16.msra.mxu0 %v10309_v5 }
0x2df1   :  { %9801 = vmatprep.subr.bf16.mxu0 %v11020_v4 }
0x2df4   :  { %9802 = vmatpush3.bf16.msra.mxu0 %v10310_v11 }
0x2df5   :  { %9827 = vmatprep.subr.mxu0 %v11020_v4 }
0x2e97   :  { %v5604_v25 = vpop.f32.mrf.mxu0 }
0x2e98   :  { %v5605_v26 = vadd.f32 %v5604_v25, %v5483_v49 }
0x2e99   :  { %v5606_v14 = vpop.f32.mrf.mxu0 }
0x2e9a   :  { %v5607_v3 = vadd.f32 %v5606_v14, %v5487_v23  ;;  %v5611_v31 = vmax.f32 %v5605_v26, 0.0 }
0x2e9b   :  { %v5608_v47 = vpop.f32.mrf.mxu0 }
0x2e9c   :  { %v5612_v32 = vmax.f32 %v5607_v3, 0.0  ;;  %v5647_v0 = vpack.c.bf16 %v5611_v31, %v5611_v31  ;;  %v10312_v3 = vld [vmem:[#allocation19 + $0x1f0] sm:$0xff]  }
0x2e9d   :  { %v5609_v34 = vpop.f32.mrf.mxu0 }
0x2e9e   :  { %v5648_v15 = vpack.c.bf16 %v5612_v32, %v5612_v32 }
0x2ea0   :  { %5777 = vmatprep.mubr.bf16.mxu1 %v5648_v15 }
0x2ea1   :  { %5778 = vmatmul.mubr.bf16.vlgmr.msra.gmra.mxu1 %v5647_v0  ;;  %v10313_v0 = vld [vmem:[#allocation19 + $0x1e8] sm:$0xff]  }
0x2ea2   :  { %9823 = vmatprep.mubr.msk.bf16.mxu1 %vm11022_vm0, %v11020_v4  ;;  %9808 = vmatpush3.bf16.msra.mxu1 %v10311_v27 }
0x2ea3   :  { %9809 = vmatprep.subr.bf16.mxu1 %v11020_v4 }
0x2ea6   :  { %9810 = vmatpush3.bf16.msra.mxu1 %v10312_v3 }
0x2ea7   :  { %9811 = vmatprep.subr.bf16.mxu1 %v11020_v4 }
0x2eaa   :  { %9812 = vmatpush3.bf16.msra.mxu1 %v10313_v0 }
0x2eab   :  { %9813 = vmatprep.subr.bf16.mxu1 %v11020_v4 }
0x2f61   :  { %v9238_v39 = vpop.f32.mrf.mxu1 }
0x2f63   :  { %v9239_v45 = vpop.f32.mrf.mxu1 }
0x2f64   :  { %v9240_v21 = vadd.f32 %v9239_v45, %v9238_v39  ;;  %v10314_v39 = vld [vmem:[#allocation19 + $0x1e0] sm:$0xff]   ;;  %v10316_v45 = vld [vmem:[#allocation19 + $0x1d0] sm:$0xff]  }
0x2f65   :  { %v9241_v48 = vpop.f32.mrf.mxu1  ;;  %9814 = vmatpush3.bf16.msra.mxu1 %v10314_v39  ;;  %v10320_v39 = vld [vmem:[#allocation19 + $0x200] sm:$0xff]  }
0x2f66   :  { %v5780_v58 = vadd.f32 %v9240_v21, %v5646_v44  ;;  %v10315_v44 = vld [vmem:[#allocation19 + $0x1d8] sm:$0xff]   ;;  %9815 = vmatprep.subr.bf16.mxu1 %v11020_v4  ;;  %v10317_v21 = vld [vmem:[#allocation19 + $0x1c8] sm:$0xff]   ;;  %v10318_v48 = vld [vmem:[#allocation19 + $0x1c0] sm:$0xff]  }
0x2f67   :  { %v9242_v60 = vpop.f32.mrf.mxu1 }
0x2f68   :  { %v5785_v36 = vadd.f32 %v5780_v58, %v5458_v16 }
0x2f69   :  { %9816 = vmatpush3.bf16.msra.mxu1 %v10315_v44 }
0x2f6a   :  { %v5788_v40 = vsel %vm2817_vm5, %v5785_v36, 0.0  ;;  %9817 = vmatprep.subr.bf16.mxu1 %v11020_v4 }
0x2f6b   :  { %5789 = vadd.xlane.f32.xlu0 %v5788_v40 }
0x2f6d   :  { %9818 = vmatpush3.bf16.msra.mxu1 %v10316_v45 }
0x2f6e   :  { %9819 = vmatprep.subr.bf16.mxu1 %v11020_v4 }
0x2f71   :  { %9820 = vmatpush3.bf16.msra.mxu1 %v10317_v21 }
0x2f72   :  { %9821 = vmatprep.subr.bf16.mxu1 %v11020_v4 }
0x2f75   :  { %9822 = vmatpush3.bf16.msra.mxu1 %v10318_v48  ;;  %v10321_v48 = vld [vmem:[#allocation19 + $0x218] sm:$0xff]  }
0x2f76   :  { %9834 = vmatprep.subr.mxu1 %v11020_v4 }
0x2ff4   :  { %v5790_v51 = vpop.xlane.xlu0 %5789 }
0x2ff5   :  { %v5791_v42 = vmul.f32 0.0078125, %v5790_v51  ;;  %v2330_v51 = vsub.s32 5, %v11259_v54 }
0x2ff7   :  { %v5792_v62 = vsub.f32 %v5785_v36, %v5791_v42  ;;  %v8826_v42 = vld [vmem:[%s12224_s19 + $0x13] ss:$0 sm:$0xff] }
0x2ff9   :  { %v5793_v37 = vmul.f32 %v5792_v62, %v5792_v62 }
0x2ffb   :  { %v5794_v1 = vsel %vm2817_vm5, %v5793_v37, 0.0 }
0x2ffc   :  { %5795 = vadd.xlane.f32.xlu0 %v5794_v1  ;;  %v2331_v1 = vrot.slane %v11531_v41, %v2330_v51  ;;  %v5961_v41 = vld [vmem:[#allocation28 + $0x65] ss:$0 sm:$0xff] }
0x2ffe   :  { %v11978_v61 = vadd.f32 %v11588_v29, %v2331_v1  ;;  %v11981_v12 = vadd.f32 %v11584_v50, %v2331_v1 }
0x3085   :  { %v5796_v9 = vpop.xlane.xlu0 %5795 }
0x3086   :  { %v5797_v56 = vmul.f32 0.0078125, %v5796_v9 }
0x3088   :  { %v5798_v13 = vadd.f32 1e-05, %v5797_v56 }
0x308a   :  { %10582 = vrsqrt.f32 %v5798_v13 }
0x3097   :  { %v10583_v63 = vpop.eup %10582 }
0x3098   :  { %v5800_v8 = vmul.f32 %v10583_v63, %v5792_v62 }
0x309a   :  { %v5805_v35 = vmul.f32 %v8815_v46, %v5800_v8 }
0x309c   :  { %v5810_v16 = vadd.f32 %v8816_v52, %v5805_v35 }
0x309e   :  { %v5829_v17 = vpack.c.bf16 %v5810_v16, %v5810_v16 }
0x30a0   :  { %9804 = vmatmul.mubr.bf16.vlgmr.msra.gmra.mxu0 %v5829_v17 }
0x30a1   :  { %9828 = vmatpush3.xpose.msk.msra.mxu0 %vm614_vm1, %v11938_v19  ;;  %9831 = vmatprep.mubr.msk.f32.mxu0 %vm11022_vm0, %v11020_v4 }
0x30a2   :  { %9829 = vmatprep.subr.mxu0 %v11020_v4 }
0x30a5   :  { %9830 = vmatpush3.xpose.msk.msra.mxu0 %vm614_vm1, %v11946_v20 }
0x30a6   :  { %9841 = vmatprep.subr.mxu0 %v11020_v4 }
0x3160   :  { %v5912_v28 = vpop.f32.mrf.mxu0 }
0x3161   :  { %v5913_v24 = vadd.f32 %v5912_v28, %v5828_v22 }
0x3162   :  { %v9805_v49 = vpop.f32.mrf.mxu0 }
0x3163   :  { %v5918_v23 = vadd.f32 %v5913_v24, %v5810_v16 }
0x3164   :  { %v5915_v25 = vpop.f32.mrf.mxu0 }
0x3165   :  { %v5921_v26 = vsel %vm2817_vm5, %v5918_v23, 0.0 }
0x3166   :  { %5922 = vadd.xlane.f32.xlu0 %v5921_v26  ;;  %v9806_v14 = vpop.f32.mrf.mxu0 }
0x317c   :  { %6239 = vrot.lane.b32.xlu0 %v11938_v19, %s11023_s8 }
0x31ef   :  { %v5923_v31 = vpop.xlane.xlu0 %5922 }
0x31f0   :  { %v5924_v47 = vmul.f32 0.0078125, %v5923_v31 }
0x31f2   :  { %v5925_v32 = vsub.f32 %v5918_v23, %v5924_v47 }
0x31f3   :  { %v6240_v11 = vpop.permute.xlu0 %6239 }
0x31f4   :  { %v5926_v34 = vmul.f32 %v5925_v32, %v5925_v32 }
0x31f6   :  { %v5927_v15 = vsel %vm2817_vm5, %v5926_v34, 0.0 }
0x31f7   :  { %5928 = vadd.xlane.f32.xlu1 %v5927_v15 }
0x3208   :  { %6237 = vrot.lane.b32.xlu1 %v11946_v20, %s11023_s8 }
0x3280   :  { %v5929_v58 = vpop.xlane.xlu1 %5928 }
0x3281   :  { %v5930_v60 = vmul.f32 0.0078125, %v5929_v58 }
0x3283   :  { %v5931_v36 = vadd.f32 1e-05, %v5930_v60  ;;  %v10322_v60 = vld [vmem:[#allocation19 + $0x210] sm:$0xff]  }
0x3284   :  { %v6238_v56 = vpop.permute.xlu1 %6237 }
0x3285   :  { %10584 = vrsqrt.f32 %v5931_v36 }
0x3292   :  { %v10585_v40 = vpop.eup %10584 }
0x3293   :  { %v5933_v38 = vmul.f32 %v10585_v40, %v5925_v32  ;;  %v10319_v32 = vld [vmem:[#allocation19 + $0x208] sm:$0xff]  }
0x3295   :  { %v5938_v62 = vmul.f32 %v8825_v7, %v5933_v38 }
0x3297   :  { %v11972_v37 = vadd.f32 %v8826_v42, %v5938_v62 }
0x3299   :  { %v5962_v43 = vpack.c.bf16 %v11972_v37, %v11972_v37 }
0x329b   :  { %9824 = vmatmul.mubr.bf16.vlgmr.msra.gmra.mxu1 %v5962_v43 }
0x329c   :  { %9835 = vmatpush3.msra.mxu1 %v11978_v61  ;;  %9838 = vmatprep.mubr.msk.f32.mxu1 %vm11022_vm0, %v11020_v4 }
0x329d   :  { %9836 = vmatprep.subr.mxu1 %v11020_v4 }
0x329e   :  { %9837 = vmatpush3.msra.mxu1 %v11981_v12 }
0x329f   :  { %9848 = vmatprep.subr.mxu1 %v11020_v4 }
0x335b   :  { %v6045_v2 = vpop.f32.mrf.mxu1 }
0x335c   :  { %v11989_v5 = vadd.f32 %v6045_v2, %v5961_v41 }
0x335d   :  { %v9825_v29 = vpop.f32.mrf.mxu1 }
0x335e   :  { %6235 = vrot.lane.b32.xlu1 %v11989_v5, %s11023_s8  ;;  %9832 = vmatmul.mubr.msk.f32.vlgmr.msra.gmra.mxu0 %vm614_vm1, %v11989_v5 }
0x335f   :  { %9842 = vmatpush3.xpose.msk.msra.mxu0 %vm614_vm1, %v6240_v11  ;;  %v6048_v50 = vpop.f32.mrf.mxu1  ;;  %9845 = vmatprep.mubr.msk.f32.mxu0 %vm11022_vm0, %v11020_v4 }
0x3360   :  { %9843 = vmatprep.subr.mxu0 %v11020_v4 }
0x3361   :  { %v9826_v9 = vpop.f32.mrf.mxu1 }
0x3363   :  { %9844 = vmatpush3.xpose.msk.msra.mxu0 %vm614_vm1, %v6238_v56 }
0x3364   :  { %9863 = vmatprep.subr.bf16.mxu0 %v11020_v4 }
0x33d0   :  { %v6236_v13 = vpop.permute.xlu1 %6235 }
0x33d1   :  { %9846 = vmatmul.mubr.msk.f32.vlgmr.msra.gmra.mxu0 %vm614_vm1, %v6236_v13 }
0x33d2   :  { %9867 = vmatprep.mubr.msk.bf16.mxu0 %vm11022_vm0, %v11020_v4  ;;  %9864 = vmatpush3.bf16.msra.mxu0 %v10319_v32 }
0x33d3   :  { %9865 = vmatprep.subr.bf16.mxu0 %v11020_v4 }
0x33d6   :  { %9866 = vmatpush3.bf16.msra.mxu0 %v10320_v39 }
0x33d7   :  { %9878 = vmatprep.subr.mxu0 %v11020_v4 }
0x341e   :  { %v6144_v63 = vpop.f32.mrf.mxu0 }
0x341f   :  { %v6148_v46 = vmul.f32 0.17677669, %v6144_v63 }
0x3420   :  { %v9833_v8 = vpop.f32.mrf.mxu0 }
0x3421   :  { %v6149_v6 = vadd.f32 %v11856_v10, %v6148_v46 }
0x3423   :  { %v6150_v52 = vsel %vm3047_vm6, %v6149_v6, -inf }
0x3424   :  { %6151 = vmax.xlane.f32.xlu1 %v6150_v52 }
0x3435   :  { %6334 = vrot.lane.b32.xlu1 %v11978_v61, %s11023_s8 }
0x3439   :  { %6526 = vrot.lane.b32.xlu1 %v11938_v19, %s11001_s22 }
0x343d   :  { %6524 = vrot.lane.b32.xlu1 %v11946_v20, %s11001_s22 }
0x3441   :  { %6522 = vrot.lane.b32.xlu1 %v11989_v5, %s11001_s22 }
0x3445   :  { %6617 = vrot.lane.b32.xlu1 %v11981_v12, %s11001_s22 }
0x3491   :  { %v6313_v35 = vpop.f32.mrf.mxu0 }
0x3492   :  { %v6317_v16 = vmul.f32 0.17677669, %v6313_v35 }
0x3493   :  { %v9847_v53 = vpop.f32.mrf.mxu0 }
0x3494   :  { %v6318_v17 = vadd.f32 %v11856_v10, %v6317_v16 }
0x3496   :  { %v6319_v22 = vsel %vm3047_vm6, %v6318_v17, -inf }
0x3497   :  { %6320 = vmax.xlane.f32.xlu0 %v6319_v22 }
0x34ad   :  { %v6152_v28 = vpop.xlane.xlu1 %6151 }
0x34ae   :  { %v6153_v24 = vsub.f32 %v6149_v6, %v6152_v28 }
0x34b0   :  { %v6154_v49 = vmul.f32 1.442695, %v6153_v24 }
0x34b1   :  { %v6335_v0 = vpop.permute.xlu1 %6334 }
0x34b2   :  { %10586 = vpow2.f32 %v6154_v49 }
0x34b5   :  { %v6527_v38 = vpop.permute.xlu1 %6526 }
0x34b9   :  { %v6525_v1 = vpop.permute.xlu1 %6524 }
0x34bd   :  { %v6523_v43 = vpop.permute.xlu1 %6522 }
0x34bf   :  { %v10587_v23 = vpop.eup %10586 }
0x34c0   :  { %v6156_v25 = vsel %vm3047_vm6, %v10587_v23, 0.0 }
0x34c1   :  { %6157 = vadd.xlane.f32.xlu0 %v6156_v25  ;;  %v6618_v22 = vpop.permute.xlu1 %6617 }
0x3520   :  { %v6321_v26 = vpop.xlane.xlu0 %6320 }
0x3521   :  { %v6322_v14 = vsub.f32 %v6318_v17, %v6321_v26 }
0x3523   :  { %v6323_v27 = vmul.f32 1.442695, %v6322_v14  ;;  %v10324_v14 = vld [vmem:[#allocation19 + $0x220] sm:$0xff]  }
0x3525   :  { %10588 = vpow2.f32 %v6323_v27 }
0x3532   :  { %v10589_v3 = vpop.eup %10588 }
0x3533   :  { %v6325_v31 = vsel %vm3047_vm6, %v10589_v3, 0.0 }
0x3534   :  { %6326 = vadd.xlane.f32.xlu0 %v6325_v31 }
0x354a   :  { %6332 = vrot.lane.b32.xlu0 %v11981_v12, %s11023_s8  ;;  %v6158_v47 = vpop.xlane.xlu0 %6157 }
0x354b   :  { %10590 = vrcp.f32 %v6158_v47 }
0x3558   :  { %v10591_v34 = vpop.eup %10590 }
0x3559   :  { %v6160_v15 = vmul.f32 %v10591_v34, %v10587_v23 }
0x355b   :  { %9839 = vmatmul.mubr.msk.f32.vlgmr.msra.gmra.mxu1 %vm706_vm2, %v6160_v15 }
0x355c   :  { %9849 = vmatpush3.msra.mxu1 %v6335_v0  ;;  %9852 = vmatprep.mubr.msk.f32.mxu1 %vm11022_vm0, %v11020_v4 }
0x355d   :  { %9850 = vmatprep.subr.mxu1 %v11020_v4 }
0x35bd   :  { %v6327_v44 = vpop.xlane.xlu0 %6326 }
0x35be   :  { %10592 = vrcp.f32 %v6327_v44 }
0x35c1   :  { %v6333_v45 = vpop.permute.xlu0 %6332 }
0x35c2   :  { %9851 = vmatpush3.msra.mxu1 %v6333_v45 }
0x35c3   :  { %9855 = vmatprep.subr.bf16.mxu1 %v11020_v4 }
0x35cb   :  { %v10593_v21 = vpop.eup %10592 }
0x35cc   :  { %v6329_v58 = vmul.f32 %v10593_v21, %v10589_v3 }
0x35ce   :  { %9853 = vmatmul.mubr.msk.f32.vlgmr.msra.gmra.mxu1 %vm706_vm2, %v6329_v58 }
0x35cf   :  { %9856 = vmatpush3.bf16.msra.mxu1 %v10321_v48  ;;  %9859 = vmatprep.mubr.msk.bf16.mxu1 %vm11022_vm0, %v11020_v4 }
0x35d0   :  { %9857 = vmatprep.subr.bf16.mxu1 %v11020_v4 }
0x35d3   :  { %9858 = vmatpush3.bf16.msra.mxu1 %v10322_v60 }
0x35d4   :  { %9871 = vmatprep.subr.mxu1 %v11020_v4 }
0x361b   :  { %v6230_v36 = vpop.f32.mrf.mxu1 }
0x361c   :  { %v6234_v40 = vpack.c.bf16 %v6230_v36, %v6230_v36 }
0x361d   :  { %v9840_v7 = vpop.f32.mrf.mxu1 }
0x361e   :  { %9868 = vmatmul.mubr.msk.bf16.vlgmr.msra.gmra.mxu0 %vm614_vm1, %v6234_v40  ;;  %v10325_v40 = vld [vmem:[#allocation19 + $0x238] sm:$0xff]  }
0x361f   :  { %9882 = vmatprep.mubr.msk.f32.mxu0 %vm11022_vm0, %v11020_v4 }
0x368e   :  { %v6407_v51 = vpop.f32.mrf.mxu1 }
0x368f   :  { %v6411_v42 = vpack.c.bf16 %v6407_v51, %v6407_v51 }
0x3690   :  { %v9854_v62 = vpop.f32.mrf.mxu1 }
0x3691   :  { %9860 = vmatmul.mubr.msk.bf16.vlgmr.msra.gmra.mxu1 %vm614_vm1, %v6411_v42 }
0x3692   :  { %9872 = vmatpush3.xpose.msk.msra.mxu1 %vm614_vm1, %v6527_v38  ;;  %9875 = vmatprep.mubr.msk.f32.mxu1 %vm11022_vm0, %v11020_v4 }
0x3693   :  { %9873 = vmatprep.subr.mxu1 %v11020_v4 }
0x3696   :  { %9874 = vmatpush3.xpose.msk.msra.mxu1 %vm614_vm1, %v6525_v1 }
0x3697   :  { %9885 = vmatprep.subr.bf16.mxu1 %v11020_v4 }
0x3699   :  { %9876 = vmatmul.mubr.msk.f32.vlgmr.msra.gmra.mxu1 %vm614_vm1, %v6523_v43 }
0x369a   :  { %9889 = vmatprep.mubr.msk.bf16.mxu1 %vm11022_vm0, %v11020_v4 }
0x36de   :  { %v12047_v41 = vpop.f32.mrf.mxu0 }
0x36e0   :  { %v9869_v2 = vpop.f32.mrf.mxu0 }
0x36e2   :  { %v6519_v29 = vpop.f32.mrf.mxu0 }
0x36e3   :  { %v6068_v29 = vld [vmem:[#allocation28 + $0x66] ss:$0 sm:$0xff] }
0x36e4   :  { %v9870_v11 = vpop.f32.mrf.mxu0 }
0x3751   :  { %v12049_v50 = vpop.f32.mrf.mxu1 }
0x3753   :  { %v9861_v9 = vpop.f32.mrf.mxu1 }
0x3755   :  { %v6464_v56 = vpop.f32.mrf.mxu1 }
0x3757   :  { %v9862_v13 = vpop.f32.mrf.mxu1 }
0x3759   :  { %v6600_v63 = vpop.f32.mrf.mxu1 }
0x375a   :  { %v6604_v46 = vmul.f32 0.17677669, %v6600_v63 }
0x375b   :  { %v9877_v8 = vpop.f32.mrf.mxu1 }
0x375c   :  { %v6605_v6 = vadd.f32 %v11856_v10, %v6604_v46 }
0x375e   :  { %v6606_v52 = vsel %vm3047_vm6, %v6605_v6, -inf }
0x375f   :  { %6607 = vmax.xlane.f32.xlu0 %v6606_v52  ;;  %v10329_v52 = vld [vmem:[#allocation22 + $0x174] ss:$8 sps:$4 sm:$0xff]  }
0x3775   :  { %6619 = vrot.lane.b32.xlu0 %v11978_v61, %s11001_s22 }
0x3779   :  { %6757 = vrot.lane.b32.xlu0 %v11938_v19, %s11024_s15  ;;  %v10323_v19 = vld [vmem:[#allocation19 + $0x228] sm:$0xff]  }
0x377a   :  { %9886 = vmatpush3.bf16.msra.mxu1 %v10323_v19  ;;  %v10333_v19 = vld [vmem:[#allocation22 + $0x150] ss:$8 sps:$4 sm:$0xff]  }
0x377b   :  { %9887 = vmatprep.subr.bf16.mxu1 %v11020_v4 }
0x377d   :  { %6753 = vrot.lane.b32.xlu0 %v11989_v5, %s11024_s15 }
0x377e   :  { %9888 = vmatpush3.bf16.msra.mxu1 %v10324_v14  ;;  %v10347_v14 = vld [vmem:[#allocation22 + $0x114] ss:$8 sps:$4 sm:$0xff]  }
0x377f   :  { %9907 = vmatprep.subr.bf16.mxu1 %v11020_v4 }
0x37e8   :  { %v6608_v35 = vpop.xlane.xlu0 %6607 }
0x37e9   :  { %v6609_v16 = vsub.f32 %v6605_v6, %v6608_v35  ;;  %v10327_v6 = vld [vmem:[#allocation22 + $0x170] ss:$8 sps:$4 sm:$0xff]   ;;  %v10332_v35 = vld [vmem:[#allocation22 + $0x164] ss:$8 sps:$4 sm:$0xff]  }
0x37eb   :  { %v6610_v53 = vmul.f32 1.442695, %v6609_v16  ;;  %v10330_v16 = vld [vmem:[#allocation22 + $0x160] ss:$8 sps:$4 sm:$0xff]  }
0x37ec   :  { %v6620_v17 = vpop.permute.xlu0 %6619 }
0x37ed   :  { %10594 = vpow2.f32 %v6610_v53  ;;  %9879 = vmatpush3.msra.mxu0 %v6620_v17 }
0x37ee   :  { %9880 = vmatprep.subr.mxu0 %v11020_v4 }
0x37ef   :  { %9881 = vmatpush3.msra.mxu0 %v6618_v22 }
0x37f0   :  { %9893 = vmatprep.subr.mxu0 %v11020_v4  ;;  %v6758_v25 = vpop.permute.xlu0 %6757 }
0x37fa   :  { %v10595_v28 = vpop.eup %10594 }
0x37fb   :  { %v6612_v24 = vsel %vm3047_vm6, %v10595_v28, 0.0 }
0x37fc   :  { %6613 = vadd.xlane.f32.xlu1 %v6612_v24 }
0x380d   :  { %6755 = vrot.lane.b32.xlu1 %v11946_v20, %s11024_s15  ;;  %v6754_v20 = vpop.permute.xlu0 %6753 }
0x3885   :  { %v6614_v5 = vpop.xlane.xlu1 %6613 }
0x3886   :  { %10596 = vrcp.f32 %v6614_v5  ;;  %v10336_v5 = vld [vmem:[#allocation22 + $0x140] ss:$8 sps:$4 sm:$0xff]  }
0x3889   :  { %v6756_v26 = vpop.permute.xlu1 %6755 }
0x3893   :  { %v10597_v49 = vpop.eup %10596 }
0x3894   :  { %v6616_v23 = vmul.f32 %v10597_v49, %v10595_v28  ;;  %v10338_v49 = vld [vmem:[#allocation22 + $0x144] ss:$8 sps:$4 sm:$0xff]  }
0x3896   :  { %9883 = vmatmul.mubr.msk.f32.vlgmr.msra.gmra.mxu0 %vm706_vm2, %v6616_v23  ;;  %v10341_v23 = vld [vmem:[#allocation22 + $0x134] ss:$8 sps:$4 sm:$0xff]  }
0x3897   :  { %9894 = vmatpush3.xpose.msk.msra.mxu0 %vm614_vm1, %v6758_v25  ;;  %9897 = vmatprep.mubr.msk.f32.mxu0 %vm11022_vm0, %v11020_v4  ;;  %v10339_v25 = vld [vmem:[#allocation22 + $0x130] ss:$8 sps:$4 sm:$0xff]  }
0x3898   :  { %9895 = vmatprep.subr.mxu0 %v11020_v4 }
0x389b   :  { %9896 = vmatpush3.xpose.msk.msra.mxu0 %vm614_vm1, %v6756_v26  ;;  %v10344_v26 = vld [vmem:[#allocation22 + $0x124] ss:$8 sps:$4 sm:$0xff]  }
0x389c   :  { %9900 = vmatprep.subr.mxu0 %v11020_v4 }
0x389e   :  { %9898 = vmatmul.mubr.msk.f32.vlgmr.msra.gmra.mxu0 %vm614_vm1, %v6754_v20  ;;  %v10342_v20 = vld [vmem:[#allocation22 + $0x120] ss:$8 sps:$4 sm:$0xff]  }
0x389f   :  { %9904 = vmatprep.mubr.msk.f32.mxu0 %vm11022_vm0, %v11020_v4 }
0x3956   :  { %v6692_v27 = vpop.f32.mrf.mxu0 }
0x3957   :  { %v6696_v3 = vpack.c.bf16 %v6692_v27, %v6692_v27  ;;  %v10345_v27 = vld [vmem:[#allocation22 + $0x110] ss:$8 sps:$4 sm:$0xff]  }
0x3958   :  { %v9884_v31 = vpop.f32.mrf.mxu0 }
0x3959   :  { %9890 = vmatmul.mubr.msk.bf16.vlgmr.msra.gmra.mxu1 %vm614_vm1, %v6696_v3  ;;  %v10350_v3 = vld [vmem:[#allocation22 + $0x104] ss:$8 sps:$4 sm:$0xff]   ;;  %v10348_v31 = vld [vmem:[#allocation22 + $0x100] ss:$8 sps:$4 sm:$0xff]  }
0x395a   :  { %9911 = vmatprep.mubr.msk.bf16.mxu1 %vm11022_vm0, %v11020_v4  ;;  %9908 = vmatpush3.bf16.msra.mxu1 %v10325_v40 }
0x395b   :  { %9909 = vmatprep.subr.bf16.mxu1 %v11020_v4 }
0x395e   :  { %v6831_v47 = vpop.f32.mrf.mxu0 }
0x395f   :  { %v6835_v32 = vmul.f32 0.17677669, %v6831_v47  ;;  %v10351_v47 = vld [vmem:[#allocation23 + $0x178] sm:$0xff]  }
0x3960   :  { %v9899_v34 = vpop.f32.mrf.mxu0 }
0x3961   :  { %v6836_v15 = vadd.f32 %v11856_v10, %v6835_v32  ;;  %v6517_v10 = vadd.f32 %v12047_v41, %v12049_v50  ;;  %v10352_v32 = vld [vmem:[#allocation23 + $0x138] sm:$0xff]   ;;  %v10353_v34 = vld [vmem:[#allocation23 + $0x170] sm:$0xff]  }
0x3963   :  { %v6837_v0 = vsel %vm3047_vm6, %v6836_v15, -inf }
0x3964   :  { %6838 = vmax.xlane.f32.xlu1 %v6837_v0  ;;  %v10355_v0 = vld [vmem:[#allocation23 + $0x168] sm:$0xff]  }
0x3975   :  { %6848 = vrot.lane.b32.xlu1 %v11981_v12, %s11024_s15  ;;  %v10326_v12 = vld [vmem:[#allocation19 + $0x230] sm:$0xff]  }
0x3976   :  { %9910 = vmatpush3.bf16.msra.mxu1 %v10326_v12  ;;  %v8863_v12 = vld [vmem:[%s12224_s19 + $0x14] ss:$0 sm:$0xff] }
0x3977   :  { %9298 = vmatprep.subr.bf16.mxu1 %v10351_v47  ;;  %v10375_v47 = vld [vmem:[#allocation25 + $0x7c] ss:$12 sps:$4 sm:$0xff]  }
0x39ed   :  { %v6839_v39 = vpop.xlane.xlu1 %6838 }
0x39ee   :  { %v6840_v44 = vsub.f32 %v6836_v15, %v6839_v39  ;;  %v10354_v15 = vld [vmem:[#allocation23 + $0x130] sm:$0xff]   ;;  %v10356_v39 = vld [vmem:[#allocation23 + $0x128] sm:$0xff]  }
0x39f0   :  { %v6841_v45 = vmul.f32 1.442695, %v6840_v44  ;;  %v10357_v44 = vld [vmem:[#allocation23 + $0x160] sm:$0xff]  }
0x39f1   :  { %v6849_v62 = vpop.permute.xlu1 %6848 }
0x39f2   :  { %10598 = vpow2.f32 %v6841_v45  ;;  %v10358_v45 = vld [vmem:[#allocation23 + $0x120] sm:$0xff]  }
0x39ff   :  { %v10599_v21 = vpop.eup %10598 }
0x3a00   :  { %v6843_v48 = vsel %vm3047_vm6, %v10599_v21, 0.0 }
0x3a01   :  { %6844 = vadd.xlane.f32.xlu0 %v6843_v48  ;;  %v10360_v48 = vld [vmem:[#allocation23 + $0x118] sm:$0xff]  }
0x3a17   :  { %6850 = vrot.lane.b32.xlu0 %v11978_v61, %s11024_s15 }
0x3a19   :  { %v6746_v58 = vpop.f32.mrf.mxu1 }
0x3a1a   :  { %v6752_v60 = vadd.f32 %v6746_v58, %v6517_v10  ;;  %v10361_v10 = vld [vmem:[#allocation23 + $0x150] sm:$0xff]  }
0x3a1b   :  { %v9891_v36 = vpop.f32.mrf.mxu1  ;;  %v10362_v58 = vld [vmem:[#allocation23 + $0x110] sm:$0xff]  }
0x3a1d   :  { %v6749_v7 = vpop.f32.mrf.mxu1 }
0x3a1f   :  { %v9892_v38 = vpop.f32.mrf.mxu1 }
0x3a8a   :  { %v6845_v51 = vpop.xlane.xlu0 %6844 }
0x3a8b   :  { %10600 = vrcp.f32 %v6845_v51  ;;  %v8864_v51 = vld [vmem:[%s12224_s19 + $0x15] ss:$0 sm:$0xff] }
0x3a8e   :  { %v6851_v42 = vpop.permute.xlu0 %6850 }
0x3a8f   :  { %9901 = vmatpush3.msra.mxu0 %v6851_v42 }
0x3a90   :  { %9902 = vmatprep.subr.mxu0 %v11020_v4 }
0x3a91   :  { %9903 = vmatpush3.msra.mxu0 %v6849_v62 }
0x3a92   :  { %7122 = vmatprep.subr.bf16.mxu0 %v10329_v52 }
0x3a98   :  { %v10601_v61 = vpop.eup %10600 }
0x3a99   :  { %v6847_v1 = vmul.f32 %v10601_v61, %v10599_v21  ;;  %v10359_v21 = vld [vmem:[#allocation23 + $0x158] sm:$0xff]  }
0x3a9b   :  { %9905 = vmatmul.mubr.msk.f32.vlgmr.msra.gmra.mxu0 %vm706_vm2, %v6847_v1  ;;  %v10363_v1 = vld [vmem:[#allocation23 + $0x148] sm:$0xff]  }
0x3a9c   :  { %7154 = vmatprep.mubr.bf16.mxu0 %v11021_v30  ;;  %7123 = vmatpush1.bf16.msra.mxu0 %v10327_v6 }
0x3a9d   :  { %7124 = vmatprep.subr.bf16.mxu0 %v10332_v35 }
0x3aa0   :  { %7125 = vmatpush1.bf16.msra.mxu0 %v10330_v16 }
0x3b5b   :  { %v6923_v43 = vpop.f32.mrf.mxu0 }
0x3b5c   :  { %v6927_v41 = vpack.c.bf16 %v6923_v43, %v6923_v43  ;;  %v10364_v43 = vld [vmem:[#allocation23 + $0x108] sm:$0xff]  }
0x3b5d   :  { %v9906_v2 = vpop.f32.mrf.mxu0 }
0x3b5e   :  { %9912 = vmatmul.mubr.msk.bf16.vlgmr.msra.gmra.mxu1 %vm614_vm1, %v6927_v41  ;;  %v10365_v41 = vld [vmem:[#allocation23 + $0x140] sm:$0xff]  }
0x3b5f   :  { %9299 = vmatpush3.bf16.msra.mxu1 %v10352_v32  ;;  %v10366_v2 = vld [vmem:[#allocation23 + $0x100] sm:$0xff]   ;;  %v10391_v32 = vld [vmem:[#allocation25 + $0x228] ss:$12 sps:$4 sm:$0xff]  }
0x3b60   :  { %9300 = vmatprep.subr.bf16.mxu1 %v10353_v34  ;;  %v10393_v34 = vld [vmem:[#allocation25 + $0x22c] ss:$12 sps:$4 sm:$0xff]  }
0x3b63   :  { %9301 = vmatpush3.bf16.msra.mxu1 %v10354_v15  ;;  %v10373_v15 = vld [vmem:[#allocation25 + $0x78] ss:$12 sps:$4 sm:$0xff]  }
0x3b64   :  { %9302 = vmatprep.subr.bf16.mxu1 %v10355_v0  ;;  %v10399_v0 = vld [vmem:[#allocation25 + $0x214] ss:$12 sps:$4 sm:$0xff]  }
0x3b67   :  { %9303 = vmatpush3.bf16.msra.mxu1 %v10356_v39  ;;  %v10378_v39 = vld [vmem:[#allocation25 + $0x64] ss:$12 sps:$4 sm:$0xff]  }
0x3b68   :  { %9304 = vmatprep.subr.bf16.mxu1 %v10357_v44  ;;  %v10397_v44 = vld [vmem:[#allocation25 + $0x210] ss:$12 sps:$4 sm:$0xff]  }
0x3b6b   :  { %9305 = vmatpush3.bf16.msra.mxu1 %v10358_v45  ;;  %v10376_v45 = vld [vmem:[#allocation25 + $0x60] ss:$12 sps:$4 sm:$0xff]  }
0x3b6c   :  { %9306 = vmatprep.subr.bf16.mxu1 %v10359_v21  ;;  %v10381_v21 = vld [vmem:[#allocation25 + $0x4c] ss:$12 sps:$4 sm:$0xff]  }
0x3b6f   :  { %9307 = vmatpush3.bf16.msra.mxu1 %v10360_v48  ;;  %v10379_v48 = vld [vmem:[#allocation25 + $0x48] ss:$12 sps:$4 sm:$0xff]  }
0x3b70   :  { %9308 = vmatprep.subr.bf16.mxu1 %v10361_v10  ;;  %v10384_v10 = vld [vmem:[#allocation25 + $0x34] ss:$12 sps:$4 sm:$0xff]  }
0x3b73   :  { %9309 = vmatpush3.bf16.msra.mxu1 %v10362_v58  ;;  %v10382_v58 = vld [vmem:[#allocation25 + $0x30] ss:$12 sps:$4 sm:$0xff]  }
0x3b74   :  { %9310 = vmatprep.subr.bf16.mxu1 %v10363_v1 }
0x3b77   :  { %9311 = vmatpush3.bf16.msra.mxu1 %v10364_v43 }
0x3b78   :  { %9312 = vmatprep.subr.bf16.mxu1 %v10365_v41 }
0x3b7b   :  { %9313 = vmatpush3.bf16.msra.mxu1 %v10366_v2 }
0x3b7c   :  { %7962 = vmatprep.subr.bf16.mxu1 %v10393_v34  ;;  %v10432_v34 = vld [vmem:[#allocation25 + $0xdc] ss:$12 sps:$4 sm:$0xff]  }
0x3c1e   :  { %v6977_v11 = vpop.f32.mrf.mxu1 }
0x3c1f   :  { %v6983_v50 = vadd.f32 %v6977_v11, %v6752_v60 }
0x3c20   :  { %v9913_v9 = vpop.f32.mrf.mxu1 }
0x3c21   :  { %v6984_v56 = vadd.f32 %v6983_v50, %v6068_v29  ;;  %v7029_v29 = vld [vmem:[#allocation28 + $0x67] ss:$8 sm:$0x3] }
0x3c22   :  { %v6980_v13 = vpop.f32.mrf.mxu1  ;;  %v7035_v11 = vrot.slane %v7029_v29, %v11262_v55  ;;  %v7039_v50 = vrot.slane %v7029_v29, %v11265_v57 }
0x3c23   :  { %v6985_v63 = vadd.f32 %v6984_v56, %v11972_v37  ;;  %v10335_v37 = vld [vmem:[#allocation22 + $0x154] ss:$8 sps:$4 sm:$0xff]  }
0x3c24   :  { %v9914_v46 = vpop.f32.mrf.mxu1  ;;  %7126 = vmatprep.subr.bf16.mxu0 %v10335_v37 }
0x3c25   :  { %v6988_v8 = vsel %vm2817_vm5, %v6985_v63, 0.0  ;;  %7127 = vmatpush1.bf16.msra.mxu0 %v10333_v19 }
0x3c26   :  { %6989 = vadd.xlane.f32.xlu1 %v6988_v8  ;;  %7128 = vmatprep.subr.bf16.mxu0 %v10338_v49 }
0x3c29   :  { %7129 = vmatpush1.bf16.msra.mxu0 %v10336_v5 }
0x3c2a   :  { %7130 = vmatprep.subr.bf16.mxu0 %v10341_v23 }
0x3c2d   :  { %7131 = vmatpush1.bf16.msra.mxu0 %v10339_v25 }
0x3c2e   :  { %7132 = vmatprep.subr.bf16.mxu0 %v10344_v26 }
0x3c31   :  { %7133 = vmatpush1.bf16.msra.mxu0 %v10342_v20 }
0x3c32   :  { %7134 = vmatprep.subr.bf16.mxu0 %v10347_v14 }
0x3c35   :  { %7135 = vmatpush1.bf16.msra.mxu0 %v10345_v27  ;;  %v10367_v27 = vld [vmem:[#allocation25 + $0xa8] ss:$12 sps:$4 sm:$0xff]  }
0x3c36   :  { %7136 = vmatprep.subr.bf16.mxu0 %v10350_v3  ;;  %v10372_v3 = vld [vmem:[#allocation25 + $0x94] ss:$12 sps:$4 sm:$0xff]  }
0x3c39   :  { %7137 = vmatpush1.bf16.msra.mxu0 %v10348_v31  ;;  %v10370_v31 = vld [vmem:[#allocation25 + $0x90] ss:$12 sps:$4 sm:$0xff]  }
0x3caf   :  { %v6990_v53 = vpop.xlane.xlu1 %6989 }
0x3cb0   :  { %v6991_v17 = vmul.f32 0.0078125, %v6990_v53 }
0x3cb2   :  { %v6992_v22 = vsub.f32 %v6985_v63, %v6991_v17  ;;  %v7198_v17 = vld [vmem:[#allocation28 + $0x90] ss:$0 sm:$0xff] }
0x3cb4   :  { %v6993_v28 = vmul.f32 %v6992_v22, %v6992_v22 }
0x3cb6   :  { %v6994_v24 = vsel %vm2817_vm5, %v6993_v28, 0.0 }
0x3cb7   :  { %6995 = vadd.xlane.f32.xlu0 %v6994_v24 }
0x3d40   :  { %v6996_v60 = vpop.xlane.xlu0 %6995 }
0x3d41   :  { %v6997_v36 = vmul.f32 0.0078125, %v6996_v60  ;;  %v10387_v60 = vld [vmem:[#allocation25 + $0x1c] ss:$12 sps:$4 sm:$0xff]  }
0x3d43   :  { %v6998_v40 = vadd.f32 1e-05, %v6997_v36  ;;  %v10385_v36 = vld [vmem:[#allocation25 + $0x18] ss:$12 sps:$4 sm:$0xff]  }
0x3d45   :  { %10602 = vrsqrt.f32 %v6998_v40  ;;  %v10390_v40 = vld [vmem:[#allocation25 + $0x4] ss:$12 sps:$4 sm:$0xff]  }
0x3d52   :  { %v10603_v7 = vpop.eup %10602 }
0x3d53   :  { %v7000_v38 = vmul.f32 %v10603_v7, %v6992_v22  ;;  %v10388_v7 = vld [vmem:[#allocation25] ss:$12 sps:$4 sm:$0xff]  }
0x3d55   :  { %v7005_v42 = vmul.f32 %v8863_v12, %v7000_v38  ;;  %v10396_v12 = vld [vmem:[#allocation25 + $0x16c] ss:$12 sps:$4 sm:$0xff]   ;;  %v10394_v38 = vld [vmem:[#allocation25 + $0x168] ss:$12 sps:$4 sm:$0xff]  }
0x3d57   :  { %v7010_v62 = vadd.f32 %v8864_v51, %v7005_v42  ;;  %v10402_v51 = vld [vmem:[#allocation25 + $0x154] ss:$12 sps:$4 sm:$0xff]   ;;  %v10400_v42 = vld [vmem:[#allocation25 + $0x150] ss:$12 sps:$4 sm:$0xff]  }
0x3d59   :  { %v7030_v61 = vpack.c.bf16 %v7010_v62, %v7010_v62 }
0x3d5b   :  { %7155 = vmatmul.mubr.bf16.vlgmr.msra.gmra.mxu0 %v7030_v61 }
0x3e1b   :  { %v7156_v9 = vpop.f32.mrf.mxu0 }
0x3e1c   :  { %v7157_v56 = vadd.f32 %v7156_v9, %v7035_v11  ;;  %v8897_v11 = vld [vmem:[%s12224_s19 + $0x16] ss:$0 sm:$0xff]  ;;  %v8898_v9 = vld [vmem:[%s12224_s19 + $0x17] ss:$0 sm:$0xff] }
0x3e1d   :  { %v7158_v13 = vpop.f32.mrf.mxu0 }
0x3e1e   :  { %v7159_v63 = vadd.f32 %v7158_v13, %v7039_v50  ;;  %v7163_v46 = vmax.f32 %v7157_v56, 0.0 }
0x3e1f   :  { %v7160_v8 = vpop.f32.mrf.mxu0 }
0x3e20   :  { %v7164_v6 = vmax.f32 %v7159_v63, 0.0  ;;  %v7199_v16 = vpack.c.bf16 %v7163_v46, %v7163_v46  ;;  %v7371_v46 = vsel %vm2817_vm5, %v11523_v33, -inf  ;;  %v7364_v8 = vsel %vm2817_vm5, %v11523_v33, inf }
0x3e21   :  { %v7161_v52 = vpop.f32.mrf.mxu0 }
0x3e22   :  { %v7200_v35 = vpack.c.bf16 %v7164_v6, %v7164_v6 }
0x3e24   :  { %7329 = vmatprep.mubr.bf16.mxu1 %v7200_v35 }
0x3e25   :  { %7330 = vmatmul.mubr.bf16.vlgmr.msra.gmra.mxu1 %v7199_v16 }
0x3e26   :  { %7994 = vmatprep.mubr.bf16.mxu1 %v11021_v30  ;;  %v10369_v30 = vld [vmem:[#allocation25 + $0xac] ss:$12 sps:$4 sm:$0xff]   ;;  %7963 = vmatpush1.bf16.msra.mxu1 %v10391_v32  ;;  %v10429_v32 = vld [vmem:[#allocation25 + $0x19c] ss:$12 sps:$4 sm:$0xff]  }
0x3e27   :  { %7921 = vmatprep.subr.bf16.mxu0 %v10369_v30  ;;  %7964 = vmatprep.subr.bf16.mxu1 %v10399_v0  ;;  %v10423_v30 = vld [vmem:[#allocation25 + $0x1b4] ss:$12 sps:$4 sm:$0xff]   ;;  %v10430_v0 = vld [vmem:[#allocation25 + $0xd8] ss:$12 sps:$4 sm:$0xff]  }
0x3e28   :  { %7922 = vmatpush1.bf16.msra.mxu0 %v10367_v27  ;;  %v10418_v27 = vld [vmem:[#allocation25 + $0x108] ss:$12 sps:$4 sm:$0xff]  }
0x3e29   :  { %7923 = vmatprep.subr.bf16.mxu0 %v10372_v3  ;;  %v10426_v3 = vld [vmem:[#allocation25 + $0xf4] ss:$12 sps:$4 sm:$0xff]  }
0x3e2a   :  { %7965 = vmatpush1.bf16.msra.mxu1 %v10397_v44  ;;  %v10433_v44 = vld [vmem:[#allocation25 + $0x180] ss:$12 sps:$4 sm:$0xff]  }
0x3e2c   :  { %7924 = vmatpush1.bf16.msra.mxu0 %v10370_v31  ;;  %v10421_v31 = vld [vmem:[#allocation25 + $0x1b0] ss:$12 sps:$4 sm:$0xff]  }
0x3e2d   :  { %7925 = vmatprep.subr.bf16.mxu0 %v10375_v47  ;;  %v10424_v47 = vld [vmem:[#allocation25 + $0xf0] ss:$12 sps:$4 sm:$0xff]  }
0x3e30   :  { %7926 = vmatpush1.bf16.msra.mxu0 %v10373_v15  ;;  %v10427_v15 = vld [vmem:[#allocation25 + $0x198] ss:$12 sps:$4 sm:$0xff]  }
0x3e31   :  { %7927 = vmatprep.subr.bf16.mxu0 %v10378_v39  ;;  %v10435_v39 = vld [vmem:[#allocation25 + $0x184] ss:$12 sps:$4 sm:$0xff]  }
0x3e34   :  { %7928 = vmatpush1.bf16.msra.mxu0 %v10376_v45  ;;  %v10439_v45 = vld [vmem:[#allocation25 + $0xc4] ss:$12 sps:$4 sm:$0xff]  }
0x3e35   :  { %7929 = vmatprep.subr.bf16.mxu0 %v10381_v21  ;;  %v10437_v21 = vld [vmem:[#allocation25 + $0xc0] ss:$12 sps:$4 sm:$0xff]  }
0x3e38   :  { %7930 = vmatpush1.bf16.msra.mxu0 %v10379_v48  ;;  %v10440_v48 = vld [vmem:[#allocation25 + $0x170] ss:$12 sps:$4 sm:$0xff]  }
0x3e39   :  { %7931 = vmatprep.subr.bf16.mxu0 %v10384_v10 }
0x3e3c   :  { %7932 = vmatpush1.bf16.msra.mxu0 %v10382_v58 }
0x3e3d   :  { %7933 = vmatprep.subr.bf16.mxu0 %v10387_v60 }
0x3e40   :  { %7934 = vmatpush1.bf16.msra.mxu0 %v10385_v36  ;;  %v11025_v36 = vmov 1983009808  }
0x3e41   :  { %7935 = vmatprep.subr.bf16.mxu0 %v10390_v40  ;;  %v7391_v40 = vunpack.c.l.s4 %v11025_v36  ;;  %v10474_v36 = vld [vmem:[#allocation26 + $0x50] sm:$0xff]  }
0x3e44   :  { %7936 = vmatpush1.bf16.msra.mxu0 %v10388_v7 }
0x3e45   :  { %7937 = vmatprep.subr.bf16.mxu0 %v10396_v12  ;;  %v7392_v12 = vunpack.c.0.s8 %v7391_v40  ;;  %v10475_v40 = vld [vmem:[#allocation26 + $0x10] sm:$0xff]  }
0x3e48   :  { %7938 = vmatpush2.bf16.msra.mxu0 %v10394_v38  ;;  %v7387_v38 = vld [vmem:[#allocation10] sm:$0x3f] }
0x3e49   :  { %7939 = vmatprep.subr.bf16.mxu0 %v10402_v51  ;;  %v7395_v51 = vsub.s32 %v7392_v12, %v11259_v54  ;;  %v10477_v12 = vld [vmem:[#allocation26 + $0x8] sm:$0xff]  }
0x3e4c   :  { %7940 = vmatpush2.bf16.msra.mxu0 %v10400_v42  ;;  %v7389_v42 = vcombine.high %v7387_v38, %v7387_v38 }
0x3ee5   :  { %v9314_v53 = vpop.f32.mrf.mxu1 }
0x3ee7   :  { %v9315_v22 = vpop.f32.mrf.mxu1 }
0x3ee8   :  { %v9316_v28 = vadd.f32 %v9315_v22, %v9314_v53  ;;  %v10405_v22 = vld [vmem:[#allocation25 + $0x1fc] ss:$12 sps:$4 sm:$0xff]  }
0x3ee9   :  { %v9317_v24 = vpop.f32.mrf.mxu1  ;;  %7966 = vmatprep.subr.bf16.mxu1 %v10405_v22  ;;  %v10445_v22 = vld [vmem:[#allocation25 + $0x218] ss:$12 sps:$4 sm:$0xff]  }
0x3eea   :  { %v7332_v37 = vadd.f32 %v9316_v28, %v7198_v17  ;;  %v10403_v28 = vld [vmem:[#allocation25 + $0x1f8] ss:$12 sps:$4 sm:$0xff]   ;;  %v10408_v24 = vld [vmem:[#allocation25 + $0x13c] ss:$12 sps:$4 sm:$0xff]  }
0x3eeb   :  { %v9318_v19 = vpop.f32.mrf.mxu1  ;;  %7941 = vmatprep.subr.bf16.mxu0 %v10408_v24  ;;  %7967 = vmatpush1.bf16.msra.mxu1 %v10403_v28  ;;  %v10446_v28 = vld [vmem:[#allocation25 + $0x140] ss:$12 sps:$4 sm:$0xff]  }
0x3eec   :  { %v7337_v5 = vadd.f32 %v7332_v37, %v7010_v62  ;;  %v2084_v62 = vld [vmem:[#allocation28 + $0x4] ss:$0 sm:$0xff]  ;;  %v7411_v19 = vld [vmem:[%s12242_s12] sm:$0x3]  ;;  %v10447_v24 = vld [vmem:[#allocation25 + $0x80] ss:$12 sps:$4 sm:$0xff]  }
0x3eed   :  { %v2169_v61 = vadd.f32 %v11537_v18, %v2084_v62  ;;  %v10406_v37 = vld [vmem:[#allocation25 + $0x138] ss:$12 sps:$4 sm:$0xff]   ;;  %v7396_v62 = vrot.slane %v7387_v38, %v7395_v51 }
0x3eee   :  { %v7340_v49 = vsel %vm2817_vm5, %v7337_v5, 0.0  ;;  %7942 = vmatpush2.bf16.msra.mxu0 %v10406_v37  ;;  %v10448_v37 = vld [vmem:[#allocation25 + $0x200] ss:$12 sps:$4 sm:$0xff]  }
0x3eef   :  { %7341 = vadd.xlane.f32.xlu0 %v7340_v49  ;;  %10604 = vtanh.f32 %v2169_v61  ;;  %v10409_v49 = vld [vmem:[#allocation25 + $0x1e0] ss:$12 sps:$4 sm:$0xff]   ;;  %v7403_v61 = vrot.slane %v7389_v42, %v7395_v51  ;;  %v10480_v42 = vld [vmem:[#allocation26 + $0xb8] sm:$0xff]  }
0x3ef0   :  { %v10478_v38 = vld [vmem:[#allocation26 + $0x40] sm:$0xff]  }
0x3ef1   :  { %v10479_v51 = vld [vmem:[#allocation26] sm:$0xff]  }
0x3efc   :  { %v12108_v2 = vpop.eup %10604 }
0x3efd   :  { %v7370_v18 = vsel %vm2817_vm5, %v12108_v2, -inf  ;;  %v7363_v13 = vsel %vm2817_vm5, %v12108_v2, inf }
0x3efe   :  { %v7373_v6 = vmax.f32 %v7370_v18, %v7371_v46  ;;  %v7366_v52 = vmin.f32 %v7363_v13, %v7364_v8 }
0x3f78   :  { %v7342_v23 = vpop.xlane.xlu0 %7341 }
0x3f79   :  { %v7343_v25 = vmul.f32 0.0078125, %v7342_v23  ;;  %v10412_v23 = vld [vmem:[#allocation25 + $0x120] ss:$12 sps:$4 sm:$0xff]  }
0x3f7b   :  { %v7344_v26 = vsub.f32 %v7337_v5, %v7343_v25  ;;  %v10411_v5 = vld [vmem:[#allocation25 + $0x1e4] ss:$12 sps:$4 sm:$0xff]  }
0x3f7c   :  { %v10414_v25 = vld [vmem:[#allocation25 + $0x124] ss:$12 sps:$4 sm:$0xff]   ;;  %7968 = vmatprep.subr.bf16.mxu1 %v10411_v5  ;;  %v10450_v5 = vld [vmem:[#allocation25 + $0x68] ss:$12 sps:$4 sm:$0xff]  }
0x3f7d   :  { %v7345_v20 = vmul.f32 %v7344_v26, %v7344_v26  ;;  %7943 = vmatprep.subr.bf16.mxu0 %v10414_v25  ;;  %7969 = vmatpush1.bf16.msra.mxu1 %v10409_v49  ;;  %v10451_v49 = vld [vmem:[#allocation25 + $0x1e8] ss:$12 sps:$4 sm:$0xff]   ;;  %v10453_v25 = vld [vmem:[#allocation25 + $0x50] ss:$12 sps:$4 sm:$0xff]  }
0x3f7e   :  { %7944 = vmatpush2.bf16.msra.mxu0 %v10412_v23  ;;  %v10452_v23 = vld [vmem:[#allocation25 + $0x110] ss:$12 sps:$4 sm:$0xff]  }
0x3f7f   :  { %v7346_v14 = vsel %vm2817_vm5, %v7345_v20, 0.0  ;;  %v10415_v20 = vld [vmem:[#allocation25 + $0x1c8] ss:$12 sps:$4 sm:$0xff]  }
0x3f80   :  { %7347 = vadd.xlane.f32.xlu0 %v7346_v14  ;;  %v10420_v14 = vld [vmem:[#allocation25 + $0x10c] ss:$12 sps:$4 sm:$0xff]  }
0x3f81   :  { %7945 = vmatprep.subr.bf16.mxu0 %v10420_v14  ;;  %v10456_v14 = vld [vmem:[#allocation25 + $0x38] ss:$12 sps:$4 sm:$0xff]  }
0x3f82   :  { %7946 = vmatpush2.bf16.msra.mxu0 %v10418_v27  ;;  %v10457_v27 = vld [vmem:[#allocation25 + $0x1b8] ss:$12 sps:$4 sm:$0xff]  }
0x3f83   :  { %7947 = vmatprep.subr.bf16.mxu0 %v10426_v3  ;;  %v10459_v3 = vld [vmem:[#allocation25 + $0x20] ss:$12 sps:$4 sm:$0xff]  }
0x3f86   :  { %7948 = vmatpush2.bf16.msra.mxu0 %v10424_v47  ;;  %v10461_v47 = vld [vmem:[#allocation25 + $0xc8] ss:$12 sps:$4 sm:$0xff]  }
0x3f87   :  { %7949 = vmatprep.subr.bf16.mxu0 %v10432_v34  ;;  %v10463_v34 = vld [vmem:[#allocation25 + $0x188] ss:$12 sps:$4 sm:$0xff]  }
0x3f8a   :  { %7950 = vmatpush2.bf16.msra.mxu0 %v10430_v0  ;;  %v10465_v0 = vld [vmem:[#allocation26 + $0x38] sm:$0xff]  }
0x3f8b   :  { %7951 = vmatprep.subr.bf16.mxu0 %v10439_v45  ;;  %v10468_v45 = vld [vmem:[#allocation26 + $0x68] sm:$0xff]  }
0x3f8e   :  { %7952 = vmatpush2.bf16.msra.mxu0 %v10437_v21  ;;  %v10469_v21 = vld [vmem:[#allocation26 + $0x28] sm:$0xff]  }
0x3f8f   :  { %9915 = vmatprep.subr.bf16.mxu0 %v11020_v4 }
0x4009   :  { %v7348_v1 = vpop.xlane.xlu0 %7347 }
0x400a   :  { %v7349_v43 = vmul.f32 0.0078125, %v7348_v1 }
0x400c   :  { %v7350_v41 = vadd.f32 1e-05, %v7349_v43 }
0x400e   :  { %10606 = vrsqrt.f32 %v7350_v41 }
0x401b   :  { %v10607_v29 = vpop.eup %10606 }
0x401c   :  { %v7352_v50 = vmul.f32 %v10607_v29, %v7344_v26  ;;  %v10417_v26 = vld [vmem:[#allocation25 + $0x1cc] ss:$12 sps:$4 sm:$0xff]   ;;  %v7404_v29 = vcombine.high %v7396_v62, %v7396_v62 }
0x401d   :  { %7970 = vmatprep.subr.bf16.mxu1 %v10417_v26  ;;  %v10454_v26 = vld [vmem:[#allocation25 + $0x1d0] ss:$12 sps:$4 sm:$0xff]  }
0x401e   :  { %v7357_v56 = vmul.f32 %v8897_v11, %v7352_v50  ;;  %7971 = vmatpush1.bf16.msra.mxu1 %v10415_v20  ;;  %v10455_v20 = vld [vmem:[#allocation25 + $0xf8] ss:$12 sps:$4 sm:$0xff]  }
0x401f   :  { %7972 = vmatprep.subr.bf16.mxu1 %v10423_v30  ;;  %v10458_v30 = vld [vmem:[#allocation25 + $0xe0] ss:$12 sps:$4 sm:$0xff]  }
0x4020   :  { %v12120_v63 = vadd.f32 %v8898_v9, %v7357_v56 }
0x4022   :  { %v7372_v35 = vsel %vm2817_vm5, %v12120_v63, -inf  ;;  %v7365_v16 = vsel %vm2817_vm5, %v12120_v63, inf  ;;  %7973 = vmatpush1.bf16.msra.mxu1 %v10421_v31  ;;  %v10460_v31 = vld [vmem:[#allocation25 + $0x1a0] ss:$12 sps:$4 sm:$0xff]  }
0x4023   :  { %v7374_v53 = vmax.f32 %v7373_v6, %v7372_v35  ;;  %v7367_v17 = vmin.f32 %v7366_v52, %v7365_v16  ;;  %7974 = vmatprep.subr.bf16.mxu1 %v10429_v32  ;;  %v10441_v35 = vld [vmem:[#allocation25 + $0xb0] ss:$12 sps:$4 sm:$0xff]   ;;  %v10462_v32 = vld [vmem:[#allocation25 + $0x8] ss:$12 sps:$4 sm:$0xff]  }
0x4025   :  { %7375 = vmax.xlane.f32.xlu0 %v7374_v53  ;;  %7368 = vmin.xlane.f32.xlu1 %v7367_v17  ;;  %v10444_v17 = vld [vmem:[#allocation25 + $0x98] ss:$12 sps:$4 sm:$0xff]  }
0x4026   :  { %7975 = vmatpush1.bf16.msra.mxu1 %v10427_v15  ;;  %v10464_v15 = vld [vmem:[#allocation26 + $0x78] sm:$0xff]  }
0x4027   :  { %7976 = vmatprep.subr.bf16.mxu1 %v10435_v39  ;;  %v10466_v39 = vld [vmem:[#allocation26 + $0x70] sm:$0xff]  }
0x402a   :  { %7977 = vmatpush1.bf16.msra.mxu1 %v10433_v44  ;;  %v10467_v44 = vld [vmem:[#allocation26 + $0x30] sm:$0xff]  }
0x402b   :  { %9320 = vmatprep.subr.bf16.mxu1 %v10440_v48  ;;  %v10470_v48 = vld [vmem:[#allocation26 + $0x60] sm:$0xff]  }
0x4036   :  { %7414 = vperm.xlu1 %10009, %v7411_v19   ;;  %v10449_v19 = vld [vmem:[#allocation25 + $0x128] ss:$12 sps:$4 sm:$0xff]  }
0x40ae   :  { %v7376_v10 = vpop.xlane.xlu0 %7375  ;;  %v7369_v58 = vpop.xlane.xlu1 %7368 }
0x40af   :  { %v7377_v60 = vsub.f32 %v7376_v10, %v7369_v58  ;;  %v7381_v1 = vsub.f32 %v12108_v2, %v7369_v58  ;;  %v7382_v43 = vsub.f32 %v11523_v33, %v7369_v58  ;;  %v7383_v41 = vsub.f32 %v12120_v63, %v7369_v58  ;;  %v10442_v33 = vld [vmem:[#allocation25 + $0x230] ss:$12 sps:$4 sm:$0xff]   ;;  %v10443_v63 = vld [vmem:[#allocation25 + $0x158] ss:$12 sps:$4 sm:$0xff]  }
0x40b0   :  { %v10471_v10 = vld [vmem:[#allocation26 + $0x20] sm:$0xff]   ;;  %v10472_v58 = vld [vmem:[#allocation26 + $0x58] sm:$0xff]  }
0x40b1   :  { %vm7378_vm7 = vcmp.gt.f32.partialorder %v7377_v60, 0.0 }
0x40b2   :  { %v7379_v7 = vsel %vm7378_vm7, %v7377_v60, 1.0  ;;  %v7415_v18 = vpop.permute.xlu1 %7414  ;;  %v10473_v60 = vld [vmem:[#allocation26 + $0x18] sm:$0xff]  }
0x40b3   :  { %10608 = vrcp.f32 %v7379_v7  ;;  %v10476_v7 = vld [vmem:[#allocation26 + $0x48] sm:$0xff]  }
0x40c0   :  { %v10609_v11 = vpop.eup %10608 }
0x40c1   :  { %v7384_v50 = vmul.f32 %v10609_v11, %v7381_v1  ;;  %v7385_v9 = vmul.f32 %v10609_v11, %v7382_v43  ;;  %v7386_v56 = vmul.f32 %v10609_v11, %v7383_v41  ;;  %v10483_v1 = vld [vmem:[#allocation26 + $0xa0] sm:$0xff]   ;;  %v10484_v43 = vld [vmem:[#allocation26 + $0x98] sm:$0xff]   ;;  %v10485_v41 = vld [vmem:[#allocation26 + $0x90] sm:$0xff]  }
0x40c2   :  { %v10487_v11 = vld [vmem:[#allocation26 + $0x80] sm:$0xff]  }
0x40c3   :  { %v7408_v13 = vmul.f32 %v7396_v62, %v7384_v50  ;;  %v7409_v46 = vmul.f32 %v7404_v29, %v7385_v9  ;;  %v7410_v8 = vmul.f32 %v7403_v61, %v7386_v56  ;;  %v10481_v62 = vld [vmem:[#allocation26 + $0xb0] sm:$0xff]   ;;  %v10482_v61 = vld [vmem:[#allocation26 + $0xa8] sm:$0xff]  }
0x40c4   :  { %v10486_v29 = vld [vmem:[#allocation26 + $0x88] sm:$0xff]  }
0x40c5   :  { %v7417_v6 = vadd.f32 %v7415_v18, %v7408_v13  ;;  %v7418_v54 = vadd.f32 %v7415_v18, %v7409_v46  ;;  %v7419_v52 = vadd.f32 %v7415_v18, %v7410_v8  ;;  %v7517_v50 = vld [vmem:[#allocation28 + $0x7] ss:$8 sm:$0x7] }
0x40c6   :  { %v7525_v9 = vrot.slane %v7517_v50, %v11262_v55  ;;  %v7529_v18 = vrot.slane %v7517_v50, %v11265_v57 }
0x40c7   :  { %v12138_v16 = vpack.c.bf16 %v7417_v6, %v7417_v6  ;;  %v7519_v2 = vpack.c.bf16 %v7418_v54, %v7418_v54  ;;  %v12140_v53 = vpack.c.bf16 %v7419_v52, %v7419_v52 }
0x40c9   :  { %7953 = vmatprep.mubr.bf16.mxu0 %v7519_v2  ;;  %7995 = vmatmul.mubr.bf16.vlgmr.msra.gmra.mxu1 %v12140_v53 }
0x40ca   :  { %9321 = vmatpush3.bf16.msra.mxu1 %v10441_v35  ;;  %7954 = vmatmul.mubr.bf16.vlgmr.msra.gmra.mxu0 %v12138_v16 }
0x40cb   :  { %8035 = vmatprep.mubr.bf16.mxu1 %v7519_v2  ;;  %9916 = vmatpush3.bf16.msra.mxu0 %v10442_v33 }
0x40cc   :  { %9322 = vmatprep.subr.bf16.mxu1 %v10443_v63  ;;  %9917 = vmatprep.subr.bf16.mxu0 %v11020_v4 }
0x40cd   :  { %9931 = vmatprep.mubr.msk.bf16.mxu0 %vm11022_vm0, %v11020_v4 }
0x40ce   :  { %9323 = vmatpush3.bf16.msra.mxu1 %v10444_v17 }
0x40cf   :  { %9918 = vmatpush3.bf16.msra.mxu0 %v10445_v22  ;;  %9324 = vmatprep.subr.bf16.mxu1 %v10446_v28 }
0x40d0   :  { %9919 = vmatprep.subr.bf16.mxu0 %v11020_v4 }
0x40d2   :  { %9325 = vmatpush3.bf16.msra.mxu1 %v10447_v24  ;;  %v7533_v24 = vrot.slane %v7517_v50, %v11269_v59  ;;  %v10489_v59 = vld [vmem:[%s12223_s18 + $0x30] sm:$0xff]  }
0x40d3   :  { %9920 = vmatpush3.bf16.msra.mxu0 %v10448_v37  ;;  %9326 = vmatprep.subr.bf16.mxu1 %v10449_v19 }
0x40d4   :  { %9921 = vmatprep.subr.bf16.mxu0 %v11020_v4 }
0x40d6   :  { %9327 = vmatpush3.bf16.msra.mxu1 %v10450_v5 }
0x40d7   :  { %9922 = vmatpush3.bf16.msra.mxu0 %v10451_v49  ;;  %9328 = vmatprep.subr.bf16.mxu1 %v10452_v23 }
0x40d8   :  { %9923 = vmatprep.subr.bf16.mxu0 %v11020_v4 }
0x40da   :  { %9329 = vmatpush3.bf16.msra.mxu1 %v10453_v25 }
0x40db   :  { %9924 = vmatpush3.bf16.msra.mxu0 %v10454_v26  ;;  %9330 = vmatprep.subr.bf16.mxu1 %v10455_v20 }
0x40dc   :  { %9925 = vmatprep.subr.bf16.mxu0 %v11020_v4 }
0x40de   :  { %9331 = vmatpush3.bf16.msra.mxu1 %v10456_v14 }
0x40df   :  { %9926 = vmatpush3.bf16.msra.mxu0 %v10457_v27  ;;  %9332 = vmatprep.subr.bf16.mxu1 %v10458_v30 }
0x40e0   :  { %9927 = vmatprep.subr.bf16.mxu0 %v11020_v4 }
0x40e2   :  { %9333 = vmatpush3.bf16.msra.mxu1 %v10459_v3  ;;  %v10488_v3 = vld [vmem:[%s12223_s18 + $0x38] sm:$0xff]  }
0x40e3   :  { %9928 = vmatpush3.bf16.msra.mxu0 %v10460_v31  ;;  %9334 = vmatprep.subr.bf16.mxu1 %v10461_v47  ;;  %v10490_v31 = vld [vmem:[%s12223_s18 + $0x28] sm:$0xff]   ;;  %v10491_v47 = vld [vmem:[%s12223_s18 + $0x20] sm:$0xff]  }
0x40e4   :  { %9929 = vmatprep.subr.bf16.mxu0 %v11020_v4 }
0x40e6   :  { %9335 = vmatpush3.bf16.msra.mxu1 %v10462_v32  ;;  %v10492_v32 = vld [vmem:[%s12223_s18 + $0x18] sm:$0xff]  }
0x40e7   :  { %9930 = vmatpush3.bf16.msra.mxu0 %v10463_v34  ;;  %9351 = vmatprep.subr.bf16.mxu1 %v10464_v15  ;;  %v10493_v34 = vld [vmem:[%s12223_s18 + $0x10] sm:$0xff]   ;;  %v10494_v15 = vld [vmem:[%s12223_s18 + $0x8] sm:$0xff]  }
0x40e8   :  { %9935 = vmatprep.subr.bf16.mxu0 %v11020_v4 }
0x40e9   :  { %8036 = vmatmul.mubr.bf16.vlgmr.msra.gmra.mxu1 %v12138_v16 }
0x40ea   :  { %9932 = vmatmul.mubr.bf16.vlgmr.msra.gmra.mxu0 %v12140_v53  ;;  %9352 = vmatpush3.bf16.msra.mxu1 %v10465_v0  ;;  %v10495_v0 = vld [vmem:[%s12223_s18] sm:$0xff]   ;;  %s8477_s18 = sshll.u32 %s11026_s27, 4  ;;  %s8478_s18 = int_to_ptr.vmem [resolvable:$true] %s8477_s18 }
0x40eb   :  { %9353 = vmatprep.subr.bf16.mxu1 %v10466_v39  ;;  %9951 = vmatprep.mubr.msk.bf16.mxu0 %vm11022_vm0, %v11020_v4  ;;  %s10953_s13 = scalar_lea.vmem %s8478_s18, 32  ;;  %p10958_p2 = scmp.lt.s32.totalorder %s8478_s18, %s8478_s18 }
0x40ec   :  { %9936 = vmatpush3.bf16.msra.mxu0 %v10480_v42  ;;  %p10954_p1 = scmp.ne.s32.totalorder %s8478_s18, %s10953_s13  ;;  %p10959_p3 = scmp.lt.s32.totalorder %s10953_s13, %s10953_s13 }
0x40ed   :  { %9937 = vmatprep.subr.bf16.mxu0 %v11020_v4 }
0x40ee   :  { %9354 = vmatpush3.bf16.msra.mxu1 %v10467_v44  ;;  %p10960_p4 = por %p10959_p3, %p10958_p2 }
0x40ef   :  { %9355 = vmatprep.subr.bf16.mxu1 %v10468_v45 }
0x40f0   :  { %9938 = vmatpush3.bf16.msra.mxu0 %v10481_v62  ;;  %p10961_p5 = pnand %p10960_p4, %p10954_p1 }
0x40f1   :  { %9939 = vmatprep.subr.bf16.mxu0 %v11020_v4 }
0x40f2   :  { %9356 = vmatpush3.bf16.msra.mxu1 %v10469_v21 }
0x40f3   :  { %9357 = vmatprep.subr.bf16.mxu1 %v10470_v48 }
0x40f4   :  { %9940 = vmatpush3.bf16.msra.mxu0 %v10482_v61 }
0x40f5   :  { %9941 = vmatprep.subr.bf16.mxu0 %v11020_v4 }
0x40f6   :  { %9358 = vmatpush3.bf16.msra.mxu1 %v10471_v10  ;;  %v8134_v10 = vld [vmem:[#allocation28 + $0x30] ss:$0 sm:$0xff] }
0x40f7   :  { %9359 = vmatprep.subr.bf16.mxu1 %v10472_v58 }
0x40f8   :  { %9942 = vmatpush3.bf16.msra.mxu0 %v10483_v1 }
0x40f9   :  { %9943 = vmatprep.subr.bf16.mxu0 %v11020_v4 }
0x40fa   :  { %9360 = vmatpush3.bf16.msra.mxu1 %v10473_v60 }
0x40fb   :  { %9361 = vmatprep.subr.bf16.mxu1 %v10474_v36 }
0x40fc   :  { %9944 = vmatpush3.bf16.msra.mxu0 %v10484_v43 }
0x40fd   :  { %9945 = vmatprep.subr.bf16.mxu0 %v11020_v4 }
0x40fe   :  { %9362 = vmatpush3.bf16.msra.mxu1 %v10475_v40 }
0x40ff   :  { %9363 = vmatprep.subr.bf16.mxu1 %v10476_v7 }
0x4100   :  { %9946 = vmatpush3.bf16.msra.mxu0 %v10485_v41 }
0x4101   :  { %9947 = vmatprep.subr.bf16.mxu0 %v11020_v4 }
0x4102   :  { %9364 = vmatpush3.bf16.msra.mxu1 %v10477_v12 }
0x4103   :  { %9365 = vmatprep.subr.bf16.mxu1 %v10478_v38 }
0x4104   :  { %9948 = vmatpush3.bf16.msra.mxu0 %v10486_v29 }
0x4105   :  { %9949 = vmatprep.subr.bf16.mxu0 %v11020_v4 }
0x4106   :  { %9366 = vmatpush3.bf16.msra.mxu1 %v10479_v51  ;;  %v8379_v51 = vld [vmem:[#allocation28 + $0x31] ss:$0 sm:$0xff] }
0x4107   :  { %9955 = vmatprep.subr.bf16.mxu1 %v11020_v4 }
0x4108   :  { %9950 = vmatpush3.bf16.msra.mxu0 %v10487_v11 }
0x4189   :  { %v7996_v56 = vpop.f32.mrf.mxu1 }
0x418a   :  { %v7955_v13 = vpop.f32.mrf.mxu0 }
0x418b   :  { %v7956_v46 = vadd.f32 %v7955_v13, %v7525_v9  ;;  %v7998_v8 = vpop.f32.mrf.mxu1 }
0x418c   :  { %v7957_v6 = vpop.f32.mrf.mxu0 }
0x418d   :  { %v7997_v54 = vadd.f32 %v7996_v56, %v7956_v46  ;;  %v7958_v52 = vadd.f32 %v7957_v6, %v7529_v18  ;;  %v8000_v35 = vpop.f32.mrf.mxu1 }
0x418e   :  { %v7959_v16 = vpop.f32.mrf.mxu0 }
0x418f   :  { %v7999_v2 = vadd.f32 %v7998_v8, %v7958_v52  ;;  %v8001_v53 = vpop.f32.mrf.mxu1  ;;  %v8083_v33 = vmax.f32 %v7997_v54, 0.0 }
0x4190   :  { %v7960_v63 = vpop.f32.mrf.mxu0 }
0x4191   :  { %v8084_v17 = vmax.f32 %v7999_v2, 0.0  ;;  %v8135_v28 = vpack.c.bf16 %v8083_v33, %v8083_v33 }
0x4193   :  { %v8136_v22 = vpack.c.bf16 %v8084_v17, %v8084_v17 }
0x4195   :  { %8314 = vmatprep.mubr.bf16.mxu1 %v8136_v22 }
0x4196   :  { %8315 = vmatmul.mubr.bf16.vlgmr.msra.gmra.mxu1 %v8135_v28 }
0x4197   :  { %9971 = vmatprep.mubr.msk.bf16.mxu1 %vm11022_vm0, %v11020_v4  ;;  %9956 = vmatpush3.bf16.msra.mxu1 %v10488_v3 }
0x4198   :  { %9957 = vmatprep.subr.bf16.mxu1 %v11020_v4 }
0x419b   :  { %9958 = vmatpush3.bf16.msra.mxu1 %v10489_v59 }
0x419c   :  { %9959 = vmatprep.subr.bf16.mxu1 %v11020_v4 }
0x419f   :  { %9960 = vmatpush3.bf16.msra.mxu1 %v10490_v31 }
0x41a0   :  { %9961 = vmatprep.subr.bf16.mxu1 %v11020_v4 }
0x41a3   :  { %9962 = vmatpush3.bf16.msra.mxu1 %v10491_v47 }
0x41a4   :  { %9963 = vmatprep.subr.bf16.mxu1 %v11020_v4 }
0x41a7   :  { %9964 = vmatpush3.bf16.msra.mxu1 %v10492_v32 }
0x41a8   :  { %9965 = vmatprep.subr.bf16.mxu1 %v11020_v4 }
0x41a9   :  { %v9336_v55 = vpop.f32.mrf.mxu1 }
0x41aa   :  { %v8077_v57 = vpop.f32.mrf.mxu0 }
0x41ab   :  { %v9337_v37 = vpop.f32.mrf.mxu1  ;;  %9966 = vmatpush3.bf16.msra.mxu1 %v10493_v34 }
0x41ac   :  { %v9338_v19 = vadd.f32 %v9337_v37, %v9336_v55  ;;  %v9933_v5 = vpop.f32.mrf.mxu0  ;;  %9967 = vmatprep.subr.bf16.mxu1 %v11020_v4 }
0x41ad   :  { %v9339_v49 = vpop.f32.mrf.mxu1 }
0x41ae   :  { %v8038_v23 = vadd.f32 %v9338_v19, %v7533_v24  ;;  %v8080_v25 = vpop.f32.mrf.mxu0 }
0x41af   :  { %v9340_v26 = vpop.f32.mrf.mxu1  ;;  %9968 = vmatpush3.bf16.msra.mxu1 %v10494_v15 }
0x41b0   :  { %v8078_v20 = vadd.f32 %v8077_v57, %v8038_v23  ;;  %v9934_v14 = vpop.f32.mrf.mxu0  ;;  %9969 = vmatprep.subr.bf16.mxu1 %v11020_v4 }
0x41b2   :  { %v8085_v27 = vmax.f32 %v8078_v20, 0.0 }
0x41b3   :  { %9970 = vmatpush3.bf16.msra.mxu1 %v10495_v0 }
0x41b4   :  { %v8137_v30 = vpack.c.bf16 %v8085_v27, %v8085_v27 }
0x41b6   :  { %9952 = vmatmul.mubr.bf16.vlgmr.msra.gmra.mxu0 %v8137_v30 }
0x4256   :  { %v9367_v39 = vpop.f32.mrf.mxu1 }
0x4258   :  { %v9368_v44 = vpop.f32.mrf.mxu1 }
0x4259   :  { %v9369_v48 = vadd.f32 %v9368_v44, %v9367_v39 }
0x425a   :  { %v9370_v45 = vpop.f32.mrf.mxu1 }
0x425b   :  { %v8317_v58 = vadd.f32 %v9369_v48, %v8134_v10 }
0x425c   :  { %v9371_v21 = vpop.f32.mrf.mxu1 }
0x4276   :  { %v8356_v60 = vpop.f32.mrf.mxu0 }
0x4277   :  { %v8357_v36 = vadd.f32 %v8356_v60, %v8317_v58 }
0x4278   :  { %v9953_v40 = vpop.f32.mrf.mxu0 }
0x4279   :  { %10610 = vtanh.f32 %v8357_v36 }
0x427a   :  { %v8359_v7 = vpop.f32.mrf.mxu0 }
0x427c   :  { %v9954_v12 = vpop.f32.mrf.mxu0 }
0x4286   :  { %v10611_v38 = vpop.eup %10610 }
0x4287   :  { %v8380_v4 = vpack.c.bf16 %v10611_v38, %v10611_v38 }
0x4289   :  { %9972 = vmatmul.mubr.bf16.vlgmr.msra.gmra.mxu1 %v8380_v4 }
0x4349   :  { %v8463_v42 = vpop.f32.mrf.mxu1 }
0x434a   :  { %v8464_v62 = vadd.f32 %v8463_v42, %v8379_v51 }
0x434b   :  { %v9973_v61 = vpop.f32.mrf.mxu1 }
0x434c   :  { %8470 = vst.msk [vmem:[#allocation29] sm:$0x3] %vm8469_vm8, %v8464_v62 }
0x434d   :  { %v8466_v1 = vpop.f32.mrf.mxu1 }
0x434e   :  { %10964 = shalt.err (!%p10961_p5)
}
0x434f   :  { %8480 = dma.vmem_to_hbm [thread:$0]  %s8478_s18, 32, %s12226_s21, [#allocation4]   ;;  %v9974_v43 = vpop.f32.mrf.mxu1 }
0x4350   :  { %10991 = dma.done.wait [#allocation4], 32  }
0x4351   :  { %10992 = vsyncadd [#allocation4], 4294967264 }
0x4352   :  { %8484 = vsyncpa [#allocation3], 1 }
0x4353   :  { %8485 = vsyncpa [#allocation6], 1 }
0x4354   :  { %8486 = vsyncpa [#allocation9], 1 }
0x4355   :  { %8487 = vsyncpa [#allocation12], 1 }
0x4356   :  { %8488 = vsyncpa [#allocation15], 1 }
0x4357   :  { %8489 = vsyncpa [#allocation18], 1 }
0x4358   :  { %8490 = vsyncpa [#allocation21], 1 }
0x4359   :  { %8491 = vsyncpa [#allocation24], 1 }
0x435a   :  { %8492 = vsyncpa [#allocation27], 1 }
0x435b   :  { %8493 = vsyncpa [#allocation4], 1 }

</bundles_post_ra>
